<compile_context>
chip_gen: v6e
topology: v6e:2x2x1
jax: 0.10.0
libtpu: 0.0.40
codegen_flags: <defaults>
</compile_context>

<pallas_src>
import jax
import jax.numpy as jnp
import numpy as np
from jax.experimental import pallas as pl
from jax.experimental.pallas import tpu as pltpu

EPS = 1e-5
LANES = 128
VMEM_LIMIT = 32 * 1024 * 1024  # ample for these tiles; scale with Nt/H*W per generation


def _round_up(x, m):
    return (x + m - 1) // m * m


def _const_spec(shape):
    """BlockSpec for constant-index operands: single-buffered (never re-DMA'd)."""
    idx = lambda n: (0,) * len(shape)
    try:
        return pl.BlockSpec(shape, idx, pipeline_mode=pl.Buffered(1))
    except (TypeError, AttributeError):  # older JAX without pipeline_mode / Buffered
        return pl.BlockSpec(shape, idx)


def basic_block_forward(x_nchw, params):
    """BasicBlock forward (stride=1, identity shortcut). NCHW f32 -> NCHW f32."""
    w1, g1, b1, w2, g2, b2 = params
    N, C, H, W = x_nchw.shape
    CP = _round_up(C, LANES)            # channels padded to lane width
    Wpad = _round_up(W + 2, 16)         # padded row; 16 keeps bf16 slab slices tile-aligned
    Hp = H + 2
    R_in = Hp * Wpad                    # flat rows of a padded image
    R_out = H * Wpad                    # flat rows of a conv output (interior rows)
    f32, bf16 = jnp.float32, jnp.bfloat16

    # ---- batch tiling: Nt images per grid step (divisor of N, modest block size) ----
    img_bytes = R_in * CP * 4
    budget = 4 * 1024 * 1024
    cap = max(1, min(N // 2 if N >= 2 else 1, budget // img_bytes))
    Nt = max(d for d in range(1, cap + 1) if N % d == 0)
    G = N // Nt

    # ---- wrapper-side layout plumbing (NCHW -> flat lane-dense padded NHWC) ----
    x = jnp.transpose(x_nchw, (0, 2, 3, 1)).astype(f32)
    xp = jnp.pad(x, ((0, 0), (1, 1), (1, Wpad - W - 1), (0, CP - C)))
    x_flat = xp.reshape(N, R_in, CP)                       # (N, R_in, CP) f32

    def prep_w(w):  # (3,3,C,C) HWIO -> (9*CP, CP) bf16; K index = (kh*3+kw)*CP + cin
        wp = jnp.pad(w, ((0, 0), (0, 0), (0, CP - C), (0, CP - C)))
        return wp.reshape(9 * CP, CP).astype(bf16)

    w1m, w2m = prep_w(w1), prep_w(w2)
    g1p, b1p = jnp.pad(g1, (0, CP - C)), jnp.pad(b1, (0, CP - C))
    g2p, b2p = jnp.pad(g2, (0, CP - C)), jnp.pad(b2, (0, CP - C))

    count = float(N * H * W)

    def scale_shift(stats, gamma, beta):
        # stats: (N, 2, CP) per-image [sum, sum_sq] partials -> BN scale/shift.
        s = jnp.sum(stats, axis=0)
        mean = s[0] / count
        var = s[1] / count - mean * mean          # biased variance (BN training norm)
        a = gamma * jax.lax.rsqrt(var + EPS)
        c = beta - mean * a
        return a.reshape(1, CP).astype(f32), c.reshape(1, CP).astype(f32)

    # ------------------------------ in-kernel helpers ---------------------------
    def out_col_mask():
        # valid real columns of a conv output row-slab (R_out, 1)
        col = jax.lax.broadcasted_iota(jnp.int32, (R_out, 1), 0) % Wpad
        return (col >= 1) & (col <= W)

    def in_valid_mask():
        # interior rows AND real columns over the full padded image (R_in, 1)
        idx = jax.lax.broadcasted_iota(jnp.int32, (R_in, 1), 0)
        col = idx % Wpad
        return (col >= 1) & (col <= W) & (idx >= Wpad) & (idx < Wpad + R_out)

    def conv3x3(src_f32, w_flat):
        # src: (R_in, CP) f32 flat padded image; w_flat: (9*CP, CP) bf16.
        # kw taps via sublane rotations (XLU); cast the 3 rolled sources ONCE.
        left = pltpu.roll(src_f32, 1, axis=0).astype(bf16)           # src[i-1]
        mid = src_f32.astype(bf16)                                   # src[i]
        right = pltpu.roll(src_f32, R_in - 1, axis=0).astype(bf16)   # src[i+1]
        rolled = (left, mid, right)
        taps = [rolled[kw][kh * Wpad:kh * Wpad + R_out]              # aligned slabs
                for kh in range(3) for kw in range(3)]
        packed = jnp.concatenate(taps, axis=-1)                      # (R_out, 9*CP) bf16
        return jnp.dot(packed, w_flat, preferred_element_type=jnp.float32)

    def sum_sumsq(v):
        s = jnp.sum(v, axis=0, keepdims=True)
        sq = jnp.sum(v * v, axis=0, keepdims=True)
        return jnp.concatenate([s, sq], axis=0)          # (2, CP)

    # ------------------------------- kernels -----------------------------------
    def pass_a_kernel(x_ref, w_ref, y1_ref, st_ref):
        w_flat = w_ref[...]
        cmask = out_col_mask()
        halo = jnp.zeros((Wpad, CP), bf16)
        for t in range(Nt):
            y = jnp.where(cmask, conv3x3(x_ref[t], w_flat), 0.0)
            yb = y.astype(bf16)
            y1_ref[t, 0:Wpad, :] = halo                      # zero halo ring rows
            y1_ref[t, Wpad:Wpad + R_out, :] = yb
            y1_ref[t, Wpad + R_out:R_in, :] = halo
            st_ref[t] = sum_sumsq(yb.astype(f32))            # stats on stored (bf16) values

    def pass_b_kernel(y1_ref, w_ref, a_ref, c_ref, y2_ref, st_ref):
        w_flat = w_ref[...]
        a = a_ref[...]
        c = c_ref[...]
        vmask = in_valid_mask()
        cmask = out_col_mask()
        for t in range(Nt):
            h = jnp.maximum(y1_ref[t].astype(f32) * a + c, 0.0)   # bn1 + relu (f32)
            h = jnp.where(vmask, h, 0.0)                          # re-zero halo/pad positions
            y = jnp.where(cmask, conv3x3(h, w_flat), 0.0)
            yb = y.astype(bf16)
            y2_ref[t] = yb
            st_ref[t] = sum_sumsq(yb.astype(f32))

    def pass_c_kernel(y2_ref, x_ref, a_ref, c_ref, o_ref):
        a = a_ref[...]
        c = c_ref[...]
        for t in range(Nt):
            idn = x_ref[t, Wpad:Wpad + R_out, :]                  # identity (f32)
            o_ref[t] = jnp.maximum(y2_ref[t].astype(f32) * a + c + idn, 0.0)

    # ------------------------------ pallas_calls --------------------------------
    cparams = pltpu.CompilerParams(dimension_semantics=("parallel",),
                                   vmem_limit_bytes=VMEM_LIMIT)
    img_in = pl.BlockSpec((Nt, R_in, CP), lambda n: (n, 0, 0))
    img_out = pl.BlockSpec((Nt, R_out, CP), lambda n: (n, 0, 0))
    stats_spec = pl.BlockSpec((Nt, 2, CP), lambda n: (n, 0, 0))
    w_spec = _const_spec((9 * CP, CP))
    vec_spec = _const_spec((1, CP))

    # pass A: conv1 + per-image BN1 partial sums
    y1_flat, st1 = pl.pallas_call(
        pass_a_kernel,
        grid=(G,),
        in_specs=[img_in, w_spec],
        out_specs=[img_in, stats_spec],
        out_shape=[jax.ShapeDtypeStruct((N, R_in, CP), bf16),
                   jax.ShapeDtypeStruct((N, 2, CP), f32)],
        compiler_params=cparams,
    )(x_flat, w1m)

    a1, c1 = scale_shift(st1, g1p, b1p)

    # pass B: bn1 + relu + conv2 + per-image BN2 partial sums
    y2_flat, st2 = pl.pallas_call(
        pass_b_kernel,
        grid=(G,),
        in_specs=[img_in, w_spec, vec_spec, vec_spec],
        out_specs=[img_out, stats_spec],
        out_shape=[jax.ShapeDtypeStruct((N, R_out, CP), bf16),
                   jax.ShapeDtypeStruct((N, 2, CP), f32)],
        compiler_params=cparams,
    )(y1_flat, w2m, a1, c1)

    a2, c2 = scale_shift(st2, g2p, b2p)

    # pass C: bn2 + residual add + relu (elementwise, fully parallel)
    out_flat = pl.pallas_call(
        pass_c_kernel,
        grid=(G,),
        in_specs=[img_out, img_in, vec_spec, vec_spec],
        out_specs=img_out,
        out_shape=jax.ShapeDtypeStruct((N, R_out, CP), f32),
        compiler_params=cparams,
    )(y2_flat, x_flat, a2, c2)

    out = out_flat.reshape(N, H, Wpad, CP)[:, :, 1:W + 1, :C]
    return jnp.transpose(out, (0, 3, 1, 2))


def basic_block_reference(x_nchw, params):
    """Pure-JAX reference with matching precision (bf16 MXU inputs, bf16-stored
    conv outputs, f32 accumulation / BN math)."""
    w1, g1, b1, w2, g2, b2 = params
    x = jnp.transpose(x_nchw, (0, 2, 3, 1)).astype(jnp.float32)

    def conv(v, w):
        v = v.astype(jnp.bfloat16).astype(jnp.float32)  # mirror kernel's bf16 MXU inputs
        w = w.astype(jnp.bfloat16).astype(jnp.float32)
        out = jax.lax.conv_general_dilated(
            v, w, window_strides=(1, 1), padding="SAME",
            dimension_numbers=("NHWC", "HWIO", "NHWC"))
        return out.astype(jnp.bfloat16).astype(jnp.float32)  # mirror bf16 intermediate store

    def bn(v, g, b):
        mean = jnp.mean(v, axis=(0, 1, 2), keepdims=True)
        var = jnp.mean(jnp.square(v - mean), axis=(0, 1, 2), keepdims=True)
        return (v - mean) * jax.lax.rsqrt(var + EPS) * g + b

    h = jax.nn.relu(bn(conv(x, w1), g1, b1))
    out = jax.nn.relu(bn(conv(h, w2), g2, b2) + x)
    return jnp.transpose(out, (0, 3, 1, 2))


if __name__ == "__main__":
    key = jax.random.PRNGKey(0)
    N, C, H, W = 2, 4, 16, 16           # identity shortcut: in_ch == out_ch, stride 1
    k_x, k_w1, k_w2 = jax.random.split(key, 3)

    x = jax.random.normal(k_x, (N, C, H, W), jnp.float32)
    bound = 1.0 / np.sqrt(C * 3 * 3)    # PyTorch-style conv init; BN gamma=1, beta=0
    w1 = jax.random.uniform(k_w1, (3, 3, C, C), jnp.float32, -bound, bound)  # HWIO
    w2 = jax.random.uniform(k_w2, (3, 3, C, C), jnp.float32, -bound, bound)  # HWIO
    g1 = jnp.ones((C,), jnp.float32)
    b1 = jnp.zeros((C,), jnp.float32)
    g2 = jnp.ones((C,), jnp.float32)
    b2 = jnp.zeros((C,), jnp.float32)
    params = (w1, g1, b1, w2, g2, b2)

    out = jax.block_until_ready(jax.jit(basic_block_forward)(x, params))
    ref = jax.block_until_ready(basic_block_reference(x, params))
    assert out.shape == (N, C, H, W)
    assert bool(jnp.allclose(out, ref, atol=1e-2, rtol=1e-2)), \
        f"max abs diff = {float(jnp.max(jnp.abs(out - ref)))}"
    print("KERNEL_OK")
</pallas_src>

<mosaic_0001>
module attributes {stable_mosaic.version = 11 : i64} {
  func.func @pass_a_kernel(%arg0: i32, %arg1: memref<1x576x128xf32, #tpu.memory_space<vmem>>, %arg2: memref<1152x128xbf16, #tpu.memory_space<vmem>>, %arg3: memref<1x576x128xbf16, #tpu.memory_space<vmem>>, %arg4: memref<1x2x128xf32, #tpu.memory_space<vmem>>) attributes {dimension_semantics = [#tpu.dimension_semantics<parallel>], iteration_bounds = array<i64: 2>, scalar_prefetch = 0 : i64, scratch_operands = 0 : i64, tpu.core_type = #tpu.core_type<tc>, window_params = [{transform_indices = @transform_0, window_bounds = array<i64: 1, 576, 128>}, {pipeline_mode = #tpu.pipeline_mode<synchronous>, transform_indices = @transform_1, window_bounds = array<i64: 1152, 128>}, {transform_indices = @transform_2, window_bounds = array<i64: 1, 576, 128>}, {transform_indices = @transform_3, window_bounds = array<i64: 1, 2, 128>}]} {
    %c0 = arith.constant 0 : index
    %c0_0 = arith.constant 0 : index
    %0 = vector.load %arg2[%c0, %c0_0] : memref<1152x128xbf16, #tpu.memory_space<vmem>>, vector<1152x128xbf16>
    %1 = tpu.iota {dimensions = array<i32: 0>} : vector<512x1xi32>
    %c32_i32 = arith.constant 32 : i32
    %c0_i32 = arith.constant 0 : i32
    %2 = arith.cmpi eq, %c32_i32, %c0_i32 : i32
    %c1_i32 = arith.constant 1 : i32
    %3 = arith.select %2, %c1_i32, %c32_i32 : i32
    %4 = vector.broadcast %3 : i32 to vector<512x1xi32>
    %5 = arith.remsi %1, %4 : vector<512x1xi32>
    %c0_i32_1 = arith.constant 0 : i32
    %6 = vector.broadcast %c0_i32_1 : i32 to vector<512x1xi32>
    %7 = arith.cmpi ne, %5, %6 : vector<512x1xi32>
    %c0_i32_2 = arith.constant 0 : i32
    %8 = vector.broadcast %c0_i32_2 : i32 to vector<512x1xi32>
    %9 = arith.cmpi slt, %5, %8 : vector<512x1xi32>
    %c0_i32_3 = arith.constant 0 : i32
    %10 = arith.cmpi slt, %3, %c0_i32_3 : i32
    %11 = vector.broadcast %10 : i1 to vector<512x1xi1>
    %12 = vector.broadcast %11 : vector<512x1xi1> to vector<512x1xi1>
    %13 = arith.xori %9, %12 : vector<512x1xi1>
    %14 = arith.andi %13, %7 : vector<512x1xi1>
    %15 = vector.broadcast %3 : i32 to vector<512x1xi32>
    %16 = arith.addi %5, %15 : vector<512x1xi32>
    %17 = arith.select %14, %16, %5 : vector<512x1xi1>, vector<512x1xi32>
    %c1_i32_4 = arith.constant 1 : i32
    %18 = vector.broadcast %c1_i32_4 : i32 to vector<512x1xi32>
    %19 = arith.cmpi sge, %17, %18 : vector<512x1xi32>
    %c16_i32 = arith.constant 16 : i32
    %20 = vector.broadcast %c16_i32 : i32 to vector<512x1xi32>
    %21 = arith.cmpi sle, %17, %20 : vector<512x1xi32>
    %22 = arith.andi %19, %21 : vector<512x1xi1>
    %cst = arith.constant 0.000000e+00 : bf16
    %23 = vector.broadcast %cst : bf16 to vector<32x128xbf16>
    %c0_5 = arith.constant 0 : index
    %c0_6 = arith.constant 0 : index
    %c0_7 = arith.constant 0 : index
    %24 = vector.load %arg1[%c0_5, %c0_6, %c0_7] : memref<1x576x128xf32, #tpu.memory_space<vmem>>, vector<1x576x128xf32>
    %25 = vector.shape_cast %24 : vector<1x576x128xf32> to vector<576x128xf32>
    %c1_i32_8 = arith.constant 1 : i32
    %26 = tpu.dynamic_rotate %25 by %c1_i32_8 dim 0 : vector<576x128xf32>, i32 -> vector<576x128xf32>
    %27 = arith.truncf %26 : vector<576x128xf32> to vector<576x128xbf16>
    %28 = arith.truncf %25 : vector<576x128xf32> to vector<576x128xbf16>
    %c575_i32 = arith.constant 575 : i32
    %29 = tpu.dynamic_rotate %25 by %c575_i32 dim 0 : vector<576x128xf32>, i32 -> vector<576x128xf32>
    %30 = arith.truncf %29 : vector<576x128xf32> to vector<576x128xbf16>
    %31 = vector.extract_strided_slice %27 {offsets = [0, 0], sizes = [512, 128], strides = [1, 1]} : vector<576x128xbf16> to vector<512x128xbf16>
    %32 = vector.extract_strided_slice %28 {offsets = [0, 0], sizes = [512, 128], strides = [1, 1]} : vector<576x128xbf16> to vector<512x128xbf16>
    %33 = vector.extract_strided_slice %30 {offsets = [0, 0], sizes = [512, 128], strides = [1, 1]} : vector<576x128xbf16> to vector<512x128xbf16>
    %34 = vector.extract_strided_slice %27 {offsets = [32, 0], sizes = [512, 128], strides = [1, 1]} : vector<576x128xbf16> to vector<512x128xbf16>
    %35 = vector.extract_strided_slice %28 {offsets = [32, 0], sizes = [512, 128], strides = [1, 1]} : vector<576x128xbf16> to vector<512x128xbf16>
    %36 = vector.extract_strided_slice %30 {offsets = [32, 0], sizes = [512, 128], strides = [1, 1]} : vector<576x128xbf16> to vector<512x128xbf16>
    %37 = vector.extract_strided_slice %27 {offsets = [64, 0], sizes = [512, 128], strides = [1, 1]} : vector<576x128xbf16> to vector<512x128xbf16>
    %38 = vector.extract_strided_slice %28 {offsets = [64, 0], sizes = [512, 128], strides = [1, 1]} : vector<576x128xbf16> to vector<512x128xbf16>
    %39 = vector.extract_strided_slice %30 {offsets = [64, 0], sizes = [512, 128], strides = [1, 1]} : vector<576x128xbf16> to vector<512x128xbf16>
    %40 = tpu.concatenate %31, %32, %33, %34, %35, %36, %37, %38, %39 in 1 : vector<512x128xbf16>, vector<512x128xbf16>, vector<512x128xbf16>, vector<512x128xbf16>, vector<512x128xbf16>, vector<512x128xbf16>, vector<512x128xbf16>, vector<512x128xbf16>, vector<512x128xbf16> -> vector<512x1152xbf16>
    %cst_9 = arith.constant dense<0.000000e+00> : vector<512x128xf32>
    %41 = tpu.matmul %40, %0, %cst_9 {dimension_numbers = #tpu.dot_dimension_numbers<[1], [0], [0], [1], [0, 0, 1, 1], [], []>} : vector<512x1152xbf16>, vector<1152x128xbf16>, vector<512x128xf32> -> vector<512x128xf32>
    %cst_10 = arith.constant 0.000000e+00 : f32
    %42 = vector.shape_cast %22 : vector<512x1xi1> to vector<512x1xi1>
    %43 = vector.broadcast %42 : vector<512x1xi1> to vector<512x128xi1>
    %44 = vector.broadcast %cst_10 : f32 to vector<512x128xf32>
    %45 = arith.select %43, %41, %44 : vector<512x128xi1>, vector<512x128xf32>
    %46 = arith.truncf %45 : vector<512x128xf32> to vector<512x128xbf16>
    %c0_11 = arith.constant 0 : index
    %c0_12 = arith.constant 0 : index
    %c0_13 = arith.constant 0 : index
    %47 = vector.load %arg3[%c0_11, %c0_12, %c0_13] : memref<1x576x128xbf16, #tpu.memory_space<vmem>>, vector<1x32x128xbf16>
    %48 = vector.shape_cast %47 : vector<1x32x128xbf16> to vector<32x128xbf16>
    %49 = vector.shape_cast %23 : vector<32x128xbf16> to vector<1x32x128xbf16>
    tpu.vector_store %arg3[%c0_11, %c0_12, %c0_13], %49 {strides = array<i32>} : memref<1x576x128xbf16, #tpu.memory_space<vmem>>, vector<1x32x128xbf16>,
    %c0_14 = arith.constant 0 : index
    %c32 = arith.constant 32 : index
    %c0_15 = arith.constant 0 : index
    %50 = vector.load %arg3[%c0_14, %c32, %c0_15] : memref<1x576x128xbf16, #tpu.memory_space<vmem>>, vector<1x512x128xbf16>
    %51 = vector.shape_cast %50 : vector<1x512x128xbf16> to vector<512x128xbf16>
    %52 = vector.shape_cast %46 : vector<512x128xbf16> to vector<1x512x128xbf16>
    tpu.vector_store %arg3[%c0_14, %c32, %c0_15], %52 {strides = array<i32>} : memref<1x576x128xbf16, #tpu.memory_space<vmem>>, vector<1x512x128xbf16>,
    %c0_16 = arith.constant 0 : index
    %c544 = arith.constant 544 : index
    %c0_17 = arith.constant 0 : index
    %53 = vector.load %arg3[%c0_16, %c544, %c0_17] : memref<1x576x128xbf16, #tpu.memory_space<vmem>>, vector<1x32x128xbf16>
    %54 = vector.shape_cast %53 : vector<1x32x128xbf16> to vector<32x128xbf16>
    %55 = vector.shape_cast %23 : vector<32x128xbf16> to vector<1x32x128xbf16>
    tpu.vector_store %arg3[%c0_16, %c544, %c0_17], %55 {strides = array<i32>} : memref<1x576x128xbf16, #tpu.memory_space<vmem>>, vector<1x32x128xbf16>,
    %56 = arith.extf %46 : vector<512x128xbf16> to vector<512x128xf32>
    %cst_18 = arith.constant dense<0.000000e+00> : vector<128xf32>
    %57 = vector.multi_reduction <add>, %56, %cst_18 [0] : vector<512x128xf32> to vector<128xf32>
    %58 = vector.shape_cast %57 : vector<128xf32> to vector<1x128xf32>
    %59 = arith.mulf %56, %56 : vector<512x128xf32>
    %cst_19 = arith.constant dense<0.000000e+00> : vector<128xf32>
    %60 = vector.multi_reduction <add>, %59, %cst_19 [0] : vector<512x128xf32> to vector<128xf32>
    %61 = vector.shape_cast %60 : vector<128xf32> to vector<1x128xf32>
    %62 = tpu.concatenate %58, %61 in 0 : vector<1x128xf32>, vector<1x128xf32> -> vector<2x128xf32>
    %c0_20 = arith.constant 0 : index
    %c0_21 = arith.constant 0 : index
    %c0_22 = arith.constant 0 : index
    %63 = vector.load %arg4[%c0_20, %c0_21, %c0_22] : memref<1x2x128xf32, #tpu.memory_space<vmem>>, vector<1x2x128xf32>
    %64 = vector.shape_cast %63 : vector<1x2x128xf32> to vector<2x128xf32>
    %65 = vector.shape_cast %62 : vector<2x128xf32> to vector<1x2x128xf32>
    tpu.vector_store %arg4[%c0_20, %c0_21, %c0_22], %65 {strides = array<i32>} : memref<1x2x128xf32, #tpu.memory_space<vmem>>, vector<1x2x128xf32>,
    return
  }
  func.func @transform_0(%arg0: i32) -> (i32, i32, i32) {
    %c0_i32 = arith.constant 0 : i32
    %c0_i32_0 = arith.constant 0 : i32
    %c0_i32_1 = arith.constant 0 : i32
    return %arg0, %c0_i32, %c0_i32_0 : i32, i32, i32
  }
  func.func @transform_1(%arg0: i32) -> (i32, i32) {
    %c0_i32 = arith.constant 0 : i32
    %c0_i32_0 = arith.constant 0 : i32
    %c0_i32_1 = arith.constant 0 : i32
    return %c0_i32, %c0_i32_0 : i32, i32
  }
  func.func @transform_2(%arg0: i32) -> (i32, i32, i32) {
    %c0_i32 = arith.constant 0 : i32
    %c0_i32_0 = arith.constant 0 : i32
    %c0_i32_1 = arith.constant 0 : i32
    return %arg0, %c0_i32, %c0_i32_0 : i32, i32, i32
  }
  func.func @transform_3(%arg0: i32) -> (i32, i32, i32) {
    %c0_i32 = arith.constant 0 : i32
    %c0_i32_0 = arith.constant 0 : i32
    %c0_i32_1 = arith.constant 0 : i32
    return %arg0, %c0_i32, %c0_i32_0 : i32, i32, i32
  }
}

module attributes {stable_mosaic.version = 11 : i64} {
  func.func @pass_b_kernel(%arg0: i32, %arg1: memref<1x576x128xbf16, #tpu.memory_space<vmem>>, %arg2: memref<1152x128xbf16, #tpu.memory_space<vmem>>, %arg3: memref<1x128xf32, #tpu.memory_space<vmem>>, %arg4: memref<1x128xf32, #tpu.memory_space<vmem>>, %arg5: memref<1x512x128xbf16, #tpu.memory_space<vmem>>, %arg6: memref<1x2x128xf32, #tpu.memory_space<vmem>>) attributes {dimension_semantics = [#tpu.dimension_semantics<parallel>], iteration_bounds = array<i64: 2>, scalar_prefetch = 0 : i64, scratch_operands = 0 : i64, tpu.core_type = #tpu.core_type<tc>, window_params = [{transform_indices = @transform_0, window_bounds = array<i64: 1, 576, 128>}, {pipeline_mode = #tpu.pipeline_mode<synchronous>, transform_indices = @transform_1, window_bounds = array<i64: 1152, 128>}, {pipeline_mode = #tpu.pipeline_mode<synchronous>, transform_indices = @transform_2, window_bounds = array<i64: 1, 128>}, {pipeline_mode = #tpu.pipeline_mode<synchronous>, transform_indices = @transform_3, window_bounds = array<i64: 1, 128>}, {transform_indices = @transform_4, window_bounds = array<i64: 1, 512, 128>}, {transform_indices = @transform_5, window_bounds = array<i64: 1, 2, 128>}]} {
    %c0 = arith.constant 0 : index
    %c0_0 = arith.constant 0 : index
    %0 = vector.load %arg2[%c0, %c0_0] : memref<1152x128xbf16, #tpu.memory_space<vmem>>, vector<1152x128xbf16>
    %c0_1 = arith.constant 0 : index
    %c0_2 = arith.constant 0 : index
    %1 = vector.load %arg3[%c0_1, %c0_2] : memref<1x128xf32, #tpu.memory_space<vmem>>, vector<1x128xf32>
    %c0_3 = arith.constant 0 : index
    %c0_4 = arith.constant 0 : index
    %2 = vector.load %arg4[%c0_3, %c0_4] : memref<1x128xf32, #tpu.memory_space<vmem>>, vector<1x128xf32>
    %3 = tpu.iota {dimensions = array<i32: 0>} : vector<576x1xi32>
    %c32_i32 = arith.constant 32 : i32
    %c0_i32 = arith.constant 0 : i32
    %4 = arith.cmpi eq, %c32_i32, %c0_i32 : i32
    %c1_i32 = arith.constant 1 : i32
    %5 = arith.select %4, %c1_i32, %c32_i32 : i32
    %6 = vector.broadcast %5 : i32 to vector<576x1xi32>
    %7 = arith.remsi %3, %6 : vector<576x1xi32>
    %c0_i32_5 = arith.constant 0 : i32
    %8 = vector.broadcast %c0_i32_5 : i32 to vector<576x1xi32>
    %9 = arith.cmpi ne, %7, %8 : vector<576x1xi32>
    %c0_i32_6 = arith.constant 0 : i32
    %10 = vector.broadcast %c0_i32_6 : i32 to vector<576x1xi32>
    %11 = arith.cmpi slt, %7, %10 : vector<576x1xi32>
    %c0_i32_7 = arith.constant 0 : i32
    %12 = arith.cmpi slt, %5, %c0_i32_7 : i32
    %13 = vector.broadcast %12 : i1 to vector<576x1xi1>
    %14 = vector.broadcast %13 : vector<576x1xi1> to vector<576x1xi1>
    %15 = arith.xori %11, %14 : vector<576x1xi1>
    %16 = arith.andi %15, %9 : vector<576x1xi1>
    %17 = vector.broadcast %5 : i32 to vector<576x1xi32>
    %18 = arith.addi %7, %17 : vector<576x1xi32>
    %19 = arith.select %16, %18, %7 : vector<576x1xi1>, vector<576x1xi32>
    %c1_i32_8 = arith.constant 1 : i32
    %20 = vector.broadcast %c1_i32_8 : i32 to vector<576x1xi32>
    %21 = arith.cmpi sge, %19, %20 : vector<576x1xi32>
    %c16_i32 = arith.constant 16 : i32
    %22 = vector.broadcast %c16_i32 : i32 to vector<576x1xi32>
    %23 = arith.cmpi sle, %19, %22 : vector<576x1xi32>
    %24 = arith.andi %21, %23 : vector<576x1xi1>
    %c32_i32_9 = arith.constant 32 : i32
    %25 = vector.broadcast %c32_i32_9 : i32 to vector<576x1xi32>
    %26 = arith.cmpi sge, %3, %25 : vector<576x1xi32>
    %27 = arith.andi %24, %26 : vector<576x1xi1>
    %c544_i32 = arith.constant 544 : i32
    %28 = vector.broadcast %c544_i32 : i32 to vector<576x1xi32>
    %29 = arith.cmpi slt, %3, %28 : vector<576x1xi32>
    %30 = arith.andi %27, %29 : vector<576x1xi1>
    %31 = tpu.iota {dimensions = array<i32: 0>} : vector<512x1xi32>
    %c32_i32_10 = arith.constant 32 : i32
    %c0_i32_11 = arith.constant 0 : i32
    %32 = arith.cmpi eq, %c32_i32_10, %c0_i32_11 : i32
    %c1_i32_12 = arith.constant 1 : i32
    %33 = arith.select %32, %c1_i32_12, %c32_i32_10 : i32
    %34 = vector.broadcast %33 : i32 to vector<512x1xi32>
    %35 = arith.remsi %31, %34 : vector<512x1xi32>
    %c0_i32_13 = arith.constant 0 : i32
    %36 = vector.broadcast %c0_i32_13 : i32 to vector<512x1xi32>
    %37 = arith.cmpi ne, %35, %36 : vector<512x1xi32>
    %c0_i32_14 = arith.constant 0 : i32
    %38 = vector.broadcast %c0_i32_14 : i32 to vector<512x1xi32>
    %39 = arith.cmpi slt, %35, %38 : vector<512x1xi32>
    %c0_i32_15 = arith.constant 0 : i32
    %40 = arith.cmpi slt, %33, %c0_i32_15 : i32
    %41 = vector.broadcast %40 : i1 to vector<512x1xi1>
    %42 = vector.broadcast %41 : vector<512x1xi1> to vector<512x1xi1>
    %43 = arith.xori %39, %42 : vector<512x1xi1>
    %44 = arith.andi %43, %37 : vector<512x1xi1>
    %45 = vector.broadcast %33 : i32 to vector<512x1xi32>
    %46 = arith.addi %35, %45 : vector<512x1xi32>
    %47 = arith.select %44, %46, %35 : vector<512x1xi1>, vector<512x1xi32>
    %c1_i32_16 = arith.constant 1 : i32
    %48 = vector.broadcast %c1_i32_16 : i32 to vector<512x1xi32>
    %49 = arith.cmpi sge, %47, %48 : vector<512x1xi32>
    %c16_i32_17 = arith.constant 16 : i32
    %50 = vector.broadcast %c16_i32_17 : i32 to vector<512x1xi32>
    %51 = arith.cmpi sle, %47, %50 : vector<512x1xi32>
    %52 = arith.andi %49, %51 : vector<512x1xi1>
    %c0_18 = arith.constant 0 : index
    %c0_19 = arith.constant 0 : index
    %c0_20 = arith.constant 0 : index
    %53 = vector.load %arg1[%c0_18, %c0_19, %c0_20] : memref<1x576x128xbf16, #tpu.memory_space<vmem>>, vector<1x576x128xbf16>
    %54 = vector.shape_cast %53 : vector<1x576x128xbf16> to vector<576x128xbf16>
    %55 = arith.extf %54 : vector<576x128xbf16> to vector<576x128xf32>
    %56 = vector.broadcast %1 : vector<1x128xf32> to vector<576x128xf32>
    %57 = arith.mulf %55, %56 : vector<576x128xf32>
    %58 = vector.broadcast %2 : vector<1x128xf32> to vector<576x128xf32>
    %59 = arith.addf %57, %58 : vector<576x128xf32>
    %cst = arith.constant 0.000000e+00 : f32
    %60 = vector.broadcast %cst : f32 to vector<576x128xf32>
    %61 = arith.maximumf %59, %60 : vector<576x128xf32>
    %cst_21 = arith.constant 0.000000e+00 : f32
    %62 = vector.shape_cast %30 : vector<576x1xi1> to vector<576x1xi1>
    %63 = vector.broadcast %62 : vector<576x1xi1> to vector<576x128xi1>
    %64 = vector.broadcast %cst_21 : f32 to vector<576x128xf32>
    %65 = arith.select %63, %61, %64 : vector<576x128xi1>, vector<576x128xf32>
    %c1_i32_22 = arith.constant 1 : i32
    %66 = tpu.dynamic_rotate %65 by %c1_i32_22 dim 0 : vector<576x128xf32>, i32 -> vector<576x128xf32>
    %67 = arith.truncf %66 : vector<576x128xf32> to vector<576x128xbf16>
    %68 = arith.truncf %65 : vector<576x128xf32> to vector<576x128xbf16>
    %c575_i32 = arith.constant 575 : i32
    %69 = tpu.dynamic_rotate %65 by %c575_i32 dim 0 : vector<576x128xf32>, i32 -> vector<576x128xf32>
    %70 = arith.truncf %69 : vector<576x128xf32> to vector<576x128xbf16>
    %71 = vector.extract_strided_slice %67 {offsets = [0, 0], sizes = [512, 128], strides = [1, 1]} : vector<576x128xbf16> to vector<512x128xbf16>
    %72 = vector.extract_strided_slice %68 {offsets = [0, 0], sizes = [512, 128], strides = [1, 1]} : vector<576x128xbf16> to vector<512x128xbf16>
    %73 = vector.extract_strided_slice %70 {offsets = [0, 0], sizes = [512, 128], strides = [1, 1]} : vector<576x128xbf16> to vector<512x128xbf16>
    %74 = vector.extract_strided_slice %67 {offsets = [32, 0], sizes = [512, 128], strides = [1, 1]} : vector<576x128xbf16> to vector<512x128xbf16>
    %75 = vector.extract_strided_slice %68 {offsets = [32, 0], sizes = [512, 128], strides = [1, 1]} : vector<576x128xbf16> to vector<512x128xbf16>
    %76 = vector.extract_strided_slice %70 {offsets = [32, 0], sizes = [512, 128], strides = [1, 1]} : vector<576x128xbf16> to vector<512x128xbf16>
    %77 = vector.extract_strided_slice %67 {offsets = [64, 0], sizes = [512, 128], strides = [1, 1]} : vector<576x128xbf16> to vector<512x128xbf16>
    %78 = vector.extract_strided_slice %68 {offsets = [64, 0], sizes = [512, 128], strides = [1, 1]} : vector<576x128xbf16> to vector<512x128xbf16>
    %79 = vector.extract_strided_slice %70 {offsets = [64, 0], sizes = [512, 128], strides = [1, 1]} : vector<576x128xbf16> to vector<512x128xbf16>
    %80 = tpu.concatenate %71, %72, %73, %74, %75, %76, %77, %78, %79 in 1 : vector<512x128xbf16>, vector<512x128xbf16>, vector<512x128xbf16>, vector<512x128xbf16>, vector<512x128xbf16>, vector<512x128xbf16>, vector<512x128xbf16>, vector<512x128xbf16>, vector<512x128xbf16> -> vector<512x1152xbf16>
    %cst_23 = arith.constant dense<0.000000e+00> : vector<512x128xf32>
    %81 = tpu.matmul %80, %0, %cst_23 {dimension_numbers = #tpu.dot_dimension_numbers<[1], [0], [0], [1], [0, 0, 1, 1], [], []>} : vector<512x1152xbf16>, vector<1152x128xbf16>, vector<512x128xf32> -> vector<512x128xf32>
    %cst_24 = arith.constant 0.000000e+00 : f32
    %82 = vector.shape_cast %52 : vector<512x1xi1> to vector<512x1xi1>
    %83 = vector.broadcast %82 : vector<512x1xi1> to vector<512x128xi1>
    %84 = vector.broadcast %cst_24 : f32 to vector<512x128xf32>
    %85 = arith.select %83, %81, %84 : vector<512x128xi1>, vector<512x128xf32>
    %86 = arith.truncf %85 : vector<512x128xf32> to vector<512x128xbf16>
    %c0_25 = arith.constant 0 : index
    %c0_26 = arith.constant 0 : index
    %c0_27 = arith.constant 0 : index
    %87 = vector.load %arg5[%c0_25, %c0_26, %c0_27] : memref<1x512x128xbf16, #tpu.memory_space<vmem>>, vector<1x512x128xbf16>
    %88 = vector.shape_cast %87 : vector<1x512x128xbf16> to vector<512x128xbf16>
    %89 = vector.shape_cast %86 : vector<512x128xbf16> to vector<1x512x128xbf16>
    tpu.vector_store %arg5[%c0_25, %c0_26, %c0_27], %89 {strides = array<i32>} : memref<1x512x128xbf16, #tpu.memory_space<vmem>>, vector<1x512x128xbf16>,
    %90 = arith.extf %86 : vector<512x128xbf16> to vector<512x128xf32>
    %cst_28 = arith.constant dense<0.000000e+00> : vector<128xf32>
    %91 = vector.multi_reduction <add>, %90, %cst_28 [0] : vector<512x128xf32> to vector<128xf32>
    %92 = vector.shape_cast %91 : vector<128xf32> to vector<1x128xf32>
    %93 = arith.mulf %90, %90 : vector<512x128xf32>
    %cst_29 = arith.constant dense<0.000000e+00> : vector<128xf32>
    %94 = vector.multi_reduction <add>, %93, %cst_29 [0] : vector<512x128xf32> to vector<128xf32>
    %95 = vector.shape_cast %94 : vector<128xf32> to vector<1x128xf32>
    %96 = tpu.concatenate %92, %95 in 0 : vector<1x128xf32>, vector<1x128xf32> -> vector<2x128xf32>
    %c0_30 = arith.constant 0 : index
    %c0_31 = arith.constant 0 : index
    %c0_32 = arith.constant 0 : index
    %97 = vector.load %arg6[%c0_30, %c0_31, %c0_32] : memref<1x2x128xf32, #tpu.memory_space<vmem>>, vector<1x2x128xf32>
    %98 = vector.shape_cast %97 : vector<1x2x128xf32> to vector<2x128xf32>
    %99 = vector.shape_cast %96 : vector<2x128xf32> to vector<1x2x128xf32>
    tpu.vector_store %arg6[%c0_30, %c0_31, %c0_32], %99 {strides = array<i32>} : memref<1x2x128xf32, #tpu.memory_space<vmem>>, vector<1x2x128xf32>,
    return
  }
  func.func @transform_0(%arg0: i32) -> (i32, i32, i32) {
    %c0_i32 = arith.constant 0 : i32
    %c0_i32_0 = arith.constant 0 : i32
    %c0_i32_1 = arith.constant 0 : i32
    return %arg0, %c0_i32, %c0_i32_0 : i32, i32, i32
  }
  func.func @transform_1(%arg0: i32) -> (i32, i32) {
    %c0_i32 = arith.constant 0 : i32
    %c0_i32_0 = arith.constant 0 : i32
    %c0_i32_1 = arith.constant 0 : i32
    return %c0_i32, %c0_i32_0 : i32, i32
  }
  func.func @transform_2(%arg0: i32) -> (i32, i32) {
    %c0_i32 = arith.constant 0 : i32
    %c0_i32_0 = arith.constant 0 : i32
    %c0_i32_1 = arith.constant 0 : i32
    return %c0_i32, %c0_i32_0 : i32, i32
  }
  func.func @transform_3(%arg0: i32) -> (i32, i32) {
    %c0_i32 = arith.constant 0 : i32
    %c0_i32_0 = arith.constant 0 : i32
    %c0_i32_1 = arith.constant 0 : i32
    return %c0_i32, %c0_i32_0 : i32, i32
  }
  func.func @transform_4(%arg0: i32) -> (i32, i32, i32) {
    %c0_i32 = arith.constant 0 : i32
    %c0_i32_0 = arith.constant 0 : i32
    %c0_i32_1 = arith.constant 0 : i32
    return %arg0, %c0_i32, %c0_i32_0 : i32, i32, i32
  }
  func.func @transform_5(%arg0: i32) -> (i32, i32, i32) {
    %c0_i32 = arith.constant 0 : i32
    %c0_i32_0 = arith.constant 0 : i32
    %c0_i32_1 = arith.constant 0 : i32
    return %arg0, %c0_i32, %c0_i32_0 : i32, i32, i32
  }
}

module attributes {stable_mosaic.version = 11 : i64} {
  func.func @pass_c_kernel(%arg0: i32, %arg1: memref<1x512x128xbf16, #tpu.memory_space<vmem>>, %arg2: memref<1x576x128xf32, #tpu.memory_space<vmem>>, %arg3: memref<1x128xf32, #tpu.memory_space<vmem>>, %arg4: memref<1x128xf32, #tpu.memory_space<vmem>>, %arg5: memref<1x512x128xf32, #tpu.memory_space<vmem>>) attributes {dimension_semantics = [#tpu.dimension_semantics<parallel>], iteration_bounds = array<i64: 2>, scalar_prefetch = 0 : i64, scratch_operands = 0 : i64, tpu.core_type = #tpu.core_type<tc>, window_params = [{transform_indices = @transform_0, window_bounds = array<i64: 1, 512, 128>}, {transform_indices = @transform_1, window_bounds = array<i64: 1, 576, 128>}, {pipeline_mode = #tpu.pipeline_mode<synchronous>, transform_indices = @transform_2, window_bounds = array<i64: 1, 128>}, {pipeline_mode = #tpu.pipeline_mode<synchronous>, transform_indices = @transform_3, window_bounds = array<i64: 1, 128>}, {transform_indices = @transform_4, window_bounds = array<i64: 1, 512, 128>}]} {
    %c0 = arith.constant 0 : index
    %c0_0 = arith.constant 0 : index
    %0 = vector.load %arg3[%c0, %c0_0] : memref<1x128xf32, #tpu.memory_space<vmem>>, vector<1x128xf32>
    %c0_1 = arith.constant 0 : index
    %c0_2 = arith.constant 0 : index
    %1 = vector.load %arg4[%c0_1, %c0_2] : memref<1x128xf32, #tpu.memory_space<vmem>>, vector<1x128xf32>
    %c0_3 = arith.constant 0 : index
    %c32 = arith.constant 32 : index
    %c0_4 = arith.constant 0 : index
    %2 = vector.load %arg2[%c0_3, %c32, %c0_4] : memref<1x576x128xf32, #tpu.memory_space<vmem>>, vector<1x512x128xf32>
    %3 = vector.shape_cast %2 : vector<1x512x128xf32> to vector<512x128xf32>
    %c0_5 = arith.constant 0 : index
    %c0_6 = arith.constant 0 : index
    %c0_7 = arith.constant 0 : index
    %4 = vector.load %arg1[%c0_5, %c0_6, %c0_7] : memref<1x512x128xbf16, #tpu.memory_space<vmem>>, vector<1x512x128xbf16>
    %5 = vector.shape_cast %4 : vector<1x512x128xbf16> to vector<512x128xbf16>
    %6 = arith.extf %5 : vector<512x128xbf16> to vector<512x128xf32>
    %7 = vector.broadcast %0 : vector<1x128xf32> to vector<512x128xf32>
    %8 = arith.mulf %6, %7 : vector<512x128xf32>
    %9 = vector.broadcast %1 : vector<1x128xf32> to vector<512x128xf32>
    %10 = arith.addf %8, %9 : vector<512x128xf32>
    %11 = arith.addf %10, %3 : vector<512x128xf32>
    %cst = arith.constant 0.000000e+00 : f32
    %12 = vector.broadcast %cst : f32 to vector<512x128xf32>
    %13 = arith.maximumf %11, %12 : vector<512x128xf32>
    %c0_8 = arith.constant 0 : index
    %c0_9 = arith.constant 0 : index
    %c0_10 = arith.constant 0 : index
    %14 = vector.load %arg5[%c0_8, %c0_9, %c0_10] : memref<1x512x128xf32, #tpu.memory_space<vmem>>, vector<1x512x128xf32>
    %15 = vector.shape_cast %14 : vector<1x512x128xf32> to vector<512x128xf32>
    %16 = vector.shape_cast %13 : vector<512x128xf32> to vector<1x512x128xf32>
    tpu.vector_store %arg5[%c0_8, %c0_9, %c0_10], %16 {strides = array<i32>} : memref<1x512x128xf32, #tpu.memory_space<vmem>>, vector<1x512x128xf32>,
    return
  }
  func.func @transform_0(%arg0: i32) -> (i32, i32, i32) {
    %c0_i32 = arith.constant 0 : i32
    %c0_i32_0 = arith.constant 0 : i32
    %c0_i32_1 = arith.constant 0 : i32
    return %arg0, %c0_i32, %c0_i32_0 : i32, i32, i32
  }
  func.func @transform_1(%arg0: i32) -> (i32, i32, i32) {
    %c0_i32 = arith.constant 0 : i32
    %c0_i32_0 = arith.constant 0 : i32
    %c0_i32_1 = arith.constant 0 : i32
    return %arg0, %c0_i32, %c0_i32_0 : i32, i32, i32
  }
  func.func @transform_2(%arg0: i32) -> (i32, i32) {
    %c0_i32 = arith.constant 0 : i32
    %c0_i32_0 = arith.constant 0 : i32
    %c0_i32_1 = arith.constant 0 : i32
    return %c0_i32, %c0_i32_0 : i32, i32
  }
  func.func @transform_3(%arg0: i32) -> (i32, i32) {
    %c0_i32 = arith.constant 0 : i32
    %c0_i32_0 = arith.constant 0 : i32
    %c0_i32_1 = arith.constant 0 : i32
    return %c0_i32, %c0_i32_0 : i32, i32
  }
  func.func @transform_4(%arg0: i32) -> (i32, i32, i32) {
    %c0_i32 = arith.constant 0 : i32
    %c0_i32_0 = arith.constant 0 : i32
    %c0_i32_1 = arith.constant 0 : i32
    return %arg0, %c0_i32, %c0_i32_0 : i32, i32, i32
  }
}

</mosaic_0001>

<bundles_post_ra>
// kernel: basic_block_forward.5
= control target key start
LH: loop header
LB: loop body
LE: loop exit
PB: predicated region body
PF: predicated region fallthrough
CT: control target
= control target key end

     0   :  { %s1028_s15 = smov 0   ;;  %s1357_s0 = inlined_call_operand.vmem [shape: bf16[2,512,128], index: 0, kind: input, shape index: {}]   ;;  %s1358_s1 = inlined_call_operand.vmem [shape: f32[2,576,128], index: 1, kind: input, shape index: {}]   ;;  %s1359_s2 = inlined_call_operand.vmem [shape: f32[1,128], index: 2, kind: input, shape index: {}]   ;;  %s1360_s3 = inlined_call_operand.vmem [shape: f32[1,128], index: 3, kind: input, shape index: {}]   ;;  %s1361_s4 = inlined_call_operand.vmem [shape: f32[2,512,128], index: 4, kind: output, shape index: {}]  }
   0x1 LB: > { %s811_s16 = sadd.s32 4294967295, %s1001_s15   ;;  %p815_p0 = scmp.ge.s32.totalorder %s1001_s15, 1  ;;  %s1001_s15 = sphi %s1028_s15, %s14_s15  }
   0x2   : > { %p172_p1 = scmp.lt.s32.totalorder %s1001_s15, 3 }
   0x4   : > { %p173_p2 = pnand %p815_p0, %p172_p1 }
   0x5   : > { %p203_p3 = scmp.lt.s32.totalorder (!%p173_p2), %s811_s16, 1 }
   0x6   : > { %176 = sbr.rel (%p173_p2) target bundleno = 99 (0x63), region = 36 }
   0xb   : > { %s1363_s16 = smov (!%p203_p3, %s811_s16), 1  ;;  %v1048_v0 = vld [vmem:[%s1359_s2] ss:$0 sm:$0xff] }
   0xc   : > { %s825_s17 = sshll.u32 %s1363_s16, 8  ;;  %s986_s18 = smul.u32 576, %s1363_s16  ;;  %v1061_v8 = vld [vmem:[%s1360_s3] ss:$0 sm:$0xff] }
   0xd   : > { %s1043_s21 = scalar_lea.vmem %s1357_s0, %s825_s17  ;;  %s826_s29 = sshll.u32 %s1363_s16, 9 }
   0xe   : > { %s1053_s26 = scalar_lea.vmem %s1358_s1, %s986_s18  ;;  %v828_v1 = vld [vmem:[%s1043_s21] sm:$0xff]   ;;  %v955_v2 = vld [vmem:[%s1043_s21 + $0x8] sm:$0xff]   ;;  %v956_v3 = vld [vmem:[%s1043_s21 + $0x10] sm:$0xff]   ;;  %s1090_s6 = scalar_lea.vmem %s1361_s4, %s826_s29 }
   0xf   : > { %v829_v4 = vunpack.c.l.bf16 %v828_v1  ;;  %v830_v5 = vunpack.c.h.bf16 %v828_v1  ;;  %v833_v6 = vunpack.c.l.bf16 %v955_v2  ;;  %v834_v7 = vunpack.c.h.bf16 %v955_v2  ;;  %v220_v11 = vld [vmem:[%s1053_s26 + $0x20] sm:$0xff]  ;;  %v957_v16 = vld [vmem:[%s1043_s21 + $0x18] sm:$0xff]   ;;  %v221_v17 = vld [vmem:[%s1053_s26 + $0x28] sm:$0xff] }
  0x10   : > { %v837_v9 = vunpack.c.l.bf16 %v956_v3  ;;  %v838_v10 = vunpack.c.h.bf16 %v956_v3  ;;  %v222_v18 = vld [vmem:[%s1053_s26 + $0x30] sm:$0xff]  ;;  %v223_v19 = vld [vmem:[%s1053_s26 + $0x38] sm:$0xff]  ;;  %v841_v22 = vunpack.c.l.bf16 %v957_v16  ;;  %v842_v23 = vunpack.c.h.bf16 %v957_v16  ;;  %v224_v28 = vld [vmem:[%s1053_s26 + $0x40] sm:$0xff] }
  0x11   : > { %v418_v12 = vmul.f32 %v829_v4, %v1048_v0  ;;  %v419_v13 = vmul.f32 %v830_v5, %v1048_v0  ;;  %v420_v14 = vmul.f32 %v833_v6, %v1048_v0  ;;  %v421_v15 = vmul.f32 %v834_v7, %v1048_v0  ;;  %v225_v29 = vld [vmem:[%s1053_s26 + $0x48] sm:$0xff]  ;;  %v226_v38 = vld [vmem:[%s1053_s26 + $0x50] sm:$0xff]  ;;  %v227_v39 = vld [vmem:[%s1053_s26 + $0x58] sm:$0xff] }
  0x12   : > { %v422_v20 = vmul.f32 %v837_v9, %v1048_v0  ;;  %v423_v21 = vmul.f32 %v838_v10, %v1048_v0  ;;  %v424_v32 = vmul.f32 %v841_v22, %v1048_v0  ;;  %v425_v33 = vmul.f32 %v842_v23, %v1048_v0  ;;  %v958_v44 = vld [vmem:[%s1043_s21 + $0x20] sm:$0xff]   ;;  %v959_v45 = vld [vmem:[%s1043_s21 + $0x28] sm:$0xff]   ;;  %v960_v50 = vld [vmem:[%s1043_s21 + $0x30] sm:$0xff]  }
  0x13   : > { %v488_v24 = vadd.f32 %v1061_v8, %v418_v12  ;;  %v489_v25 = vadd.f32 %v1061_v8, %v419_v13  ;;  %v490_v26 = vadd.f32 %v1061_v8, %v420_v14  ;;  %v491_v27 = vadd.f32 %v1061_v8, %v421_v15  ;;  %v961_v59 = vld [vmem:[%s1043_s21 + $0x38] sm:$0xff]   ;;  %v228_v1 = vld [vmem:[%s1053_s26 + $0x60] sm:$0xff]  ;;  %v229_v6 = vld [vmem:[%s1053_s26 + $0x68] sm:$0xff] }
  0x14   : > { %v492_v30 = vadd.f32 %v1061_v8, %v422_v20  ;;  %v493_v31 = vadd.f32 %v1061_v8, %v423_v21  ;;  %v494_v42 = vadd.f32 %v1061_v8, %v424_v32  ;;  %v495_v43 = vadd.f32 %v1061_v8, %v425_v33  ;;  %v230_v7 = vld [vmem:[%s1053_s26 + $0x70] sm:$0xff]  ;;  %v231_v9 = vld [vmem:[%s1053_s26 + $0x78] sm:$0xff] }
  0x15   : > { %v552_v34 = vadd.f32 %v488_v24, %v220_v11  ;;  %v553_v35 = vadd.f32 %v489_v25, %v221_v17  ;;  %v554_v36 = vadd.f32 %v490_v26, %v222_v18  ;;  %v555_v37 = vadd.f32 %v491_v27, %v223_v19  ;;  %v232_v18 = vld [vmem:[%s1053_s26 + $0x80] sm:$0xff]  ;;  %v233_v19 = vld [vmem:[%s1053_s26 + $0x88] sm:$0xff] }
  0x16   : > { %v556_v40 = vadd.f32 %v492_v30, %v224_v28  ;;  %v557_v41 = vadd.f32 %v493_v31, %v225_v29  ;;  %v558_v53 = vadd.f32 %v494_v42, %v226_v38  ;;  %v559_v54 = vadd.f32 %v495_v43, %v227_v39  ;;  %v234_v28 = vld [vmem:[%s1053_s26 + $0x90] sm:$0xff]  ;;  %v235_v29 = vld [vmem:[%s1053_s26 + $0x98] sm:$0xff] }
  0x17   : > { %v616_v46 = vmax.f32 %v552_v34, 0.0  ;;  %v617_v47 = vmax.f32 %v553_v35, 0.0  ;;  %v618_v48 = vmax.f32 %v554_v36, 0.0  ;;  %v619_v49 = vmax.f32 %v555_v37, 0.0  ;;  %v962_v34 = vld [vmem:[%s1043_s21 + $0x40] sm:$0xff]   ;;  %v963_v35 = vld [vmem:[%s1043_s21 + $0x48] sm:$0xff]  }
  0x18   : > { %v620_v51 = vmax.f32 %v556_v40, 0.0  ;;  %v621_v52 = vmax.f32 %v557_v41, 0.0  ;;  %v845_v55 = vunpack.c.l.bf16 %v958_v44  ;;  %v846_v56 = vunpack.c.h.bf16 %v958_v44  ;;  %v964_v40 = vld [vmem:[%s1043_s21 + $0x50] sm:$0xff]  }
  0x19   : > { %680 = vst [vmem:[%s1090_s6] sm:$0xff] %v616_v46  ;;  %681 = vst [vmem:[%s1090_s6 + $0x8] sm:$0xff] %v617_v47  ;;  %v849_v57 = vunpack.c.l.bf16 %v959_v45  ;;  %v850_v58 = vunpack.c.h.bf16 %v959_v45  ;;  %v622_v60 = vmax.f32 %v558_v53, 0.0  ;;  %v623_v61 = vmax.f32 %v559_v54, 0.0  ;;  %v236_v54 = vld [vmem:[%s1053_s26 + $0xa0] sm:$0xff] }
  0x1a   : > { %682 = vst [vmem:[%s1090_s6 + $0x10] sm:$0xff] %v618_v48  ;;  %683 = vst [vmem:[%s1090_s6 + $0x18] sm:$0xff] %v619_v49  ;;  %v853_v62 = vunpack.c.l.bf16 %v960_v50  ;;  %v854_v63 = vunpack.c.h.bf16 %v960_v50  ;;  %v426_v2 = vmul.f32 %v845_v55, %v1048_v0  ;;  %v427_v3 = vmul.f32 %v846_v56, %v1048_v0  ;;  %v965_v49 = vld [vmem:[%s1043_s21 + $0x58] sm:$0xff]  }
  0x1b   : > { %684 = vst [vmem:[%s1090_s6 + $0x20] sm:$0xff] %v620_v51  ;;  %685 = vst [vmem:[%s1090_s6 + $0x28] sm:$0xff] %v621_v52  ;;  %v428_v4 = vmul.f32 %v849_v57, %v1048_v0  ;;  %v429_v5 = vmul.f32 %v850_v58, %v1048_v0  ;;  %v857_v12 = vunpack.c.l.bf16 %v961_v59  ;;  %v858_v13 = vunpack.c.h.bf16 %v961_v59  ;;  %v237_v59 = vld [vmem:[%s1053_s26 + $0xa8] sm:$0xff] }
  0x1c   : > { %686 = vst [vmem:[%s1090_s6 + $0x30] sm:$0xff] %v622_v60  ;;  %687 = vst [vmem:[%s1090_s6 + $0x38] sm:$0xff] %v623_v61  ;;  %v430_v10 = vmul.f32 %v853_v62, %v1048_v0  ;;  %v431_v11 = vmul.f32 %v854_v63, %v1048_v0  ;;  %v496_v14 = vadd.f32 %v1061_v8, %v426_v2  ;;  %v861_v45 = vunpack.c.l.bf16 %v962_v34  ;;  %v238_v60 = vld [vmem:[%s1053_s26 + $0xb0] sm:$0xff]  ;;  %v239_v61 = vld [vmem:[%s1053_s26 + $0xb8] sm:$0xff] }
  0x1d   : > { %v497_v15 = vadd.f32 %v1061_v8, %v427_v3  ;;  %v498_v16 = vadd.f32 %v1061_v8, %v428_v4  ;;  %v499_v17 = vadd.f32 %v1061_v8, %v429_v5  ;;  %v432_v22 = vmul.f32 %v857_v12, %v1048_v0 }
  0x1e   : > { %v500_v20 = vadd.f32 %v1061_v8, %v430_v10  ;;  %v501_v21 = vadd.f32 %v1061_v8, %v431_v11  ;;  %v433_v23 = vmul.f32 %v858_v13, %v1048_v0  ;;  %v560_v24 = vadd.f32 %v496_v14, %v228_v1 }
  0x1f   : > { %v561_v25 = vadd.f32 %v497_v15, %v229_v6  ;;  %v562_v26 = vadd.f32 %v498_v16, %v230_v7  ;;  %v563_v27 = vadd.f32 %v499_v17, %v231_v9  ;;  %v502_v32 = vadd.f32 %v1061_v8, %v432_v22  ;;  %v240_v7 = vld [vmem:[%s1053_s26 + $0xc0] sm:$0xff]  ;;  %v241_v9 = vld [vmem:[%s1053_s26 + $0xc8] sm:$0xff] }
  0x20   : > { %v564_v30 = vadd.f32 %v500_v20, %v232_v18  ;;  %v565_v31 = vadd.f32 %v501_v21, %v233_v19  ;;  %v503_v33 = vadd.f32 %v1061_v8, %v433_v23  ;;  %v624_v36 = vmax.f32 %v560_v24, 0.0  ;;  %v242_v18 = vld [vmem:[%s1053_s26 + $0xd0] sm:$0xff]  ;;  %v243_v19 = vld [vmem:[%s1053_s26 + $0xd8] sm:$0xff]  ;;  %v966_v24 = vld [vmem:[%s1043_s21 + $0x60] sm:$0xff]  }
  0x21   : > { %v625_v37 = vmax.f32 %v561_v25, 0.0  ;;  %v626_v38 = vmax.f32 %v562_v26, 0.0  ;;  %v627_v39 = vmax.f32 %v563_v27, 0.0  ;;  %v566_v43 = vadd.f32 %v502_v32, %v234_v28  ;;  %v967_v25 = vld [vmem:[%s1043_s21 + $0x68] sm:$0xff]  }
  0x22   : > { %v628_v41 = vmax.f32 %v564_v30, 0.0  ;;  %v629_v42 = vmax.f32 %v565_v31, 0.0  ;;  %v567_v44 = vadd.f32 %v503_v33, %v235_v29  ;;  %688 = vst [vmem:[%s1090_s6 + $0x40] sm:$0xff] %v624_v36  ;;  %v862_v46 = vunpack.c.h.bf16 %v962_v34  ;;  %v968_v30 = vld [vmem:[%s1043_s21 + $0x70] sm:$0xff]  }
  0x23   : > { %689 = vst [vmem:[%s1090_s6 + $0x48] sm:$0xff] %v625_v37  ;;  %690 = vst [vmem:[%s1090_s6 + $0x50] sm:$0xff] %v626_v38  ;;  %v865_v47 = vunpack.c.l.bf16 %v963_v35  ;;  %v866_v48 = vunpack.c.h.bf16 %v963_v35  ;;  %v630_v50 = vmax.f32 %v566_v43, 0.0  ;;  %v869_v52 = vunpack.c.l.bf16 %v964_v40 }
  0x24   : > { %691 = vst [vmem:[%s1090_s6 + $0x58] sm:$0xff] %v627_v39  ;;  %692 = vst [vmem:[%s1090_s6 + $0x60] sm:$0xff] %v628_v41  ;;  %v631_v51 = vmax.f32 %v567_v44, 0.0  ;;  %v870_v53 = vunpack.c.h.bf16 %v964_v40  ;;  %v434_v55 = vmul.f32 %v861_v45, %v1048_v0  ;;  %v435_v56 = vmul.f32 %v862_v46, %v1048_v0  ;;  %v969_v39 = vld [vmem:[%s1043_s21 + $0x78] sm:$0xff]   ;;  %v244_v44 = vld [vmem:[%s1053_s26 + $0xe0] sm:$0xff] }
  0x25   : > { %693 = vst [vmem:[%s1090_s6 + $0x68] sm:$0xff] %v629_v42  ;;  %v436_v57 = vmul.f32 %v865_v47, %v1048_v0  ;;  %v437_v58 = vmul.f32 %v866_v48, %v1048_v0  ;;  %694 = vst [vmem:[%s1090_s6 + $0x70] sm:$0xff] %v630_v50  ;;  %v438_v62 = vmul.f32 %v869_v52, %v1048_v0  ;;  %v873_v1 = vunpack.c.l.bf16 %v965_v49  ;;  %v246_v50 = vld [vmem:[%s1053_s26 + $0xf0] sm:$0xff] }
  0x26   : > { %695 = vst [vmem:[%s1090_s6 + $0x78] sm:$0xff] %v631_v51  ;;  %v439_v63 = vmul.f32 %v870_v53, %v1048_v0  ;;  %v874_v2 = vunpack.c.h.bf16 %v965_v49  ;;  %v504_v3 = vadd.f32 %v1061_v8, %v434_v55  ;;  %v505_v4 = vadd.f32 %v1061_v8, %v435_v56  ;;  %v245_v49 = vld [vmem:[%s1053_s26 + $0xe8] sm:$0xff]  ;;  %v247_v51 = vld [vmem:[%s1053_s26 + $0xf8] sm:$0xff] }
  0x27   : > { %v506_v5 = vadd.f32 %v1061_v8, %v436_v57  ;;  %v507_v6 = vadd.f32 %v1061_v8, %v437_v58  ;;  %v508_v10 = vadd.f32 %v1061_v8, %v438_v62  ;;  %v440_v12 = vmul.f32 %v873_v1, %v1048_v0 }
  0x28   : > { %v509_v11 = vadd.f32 %v1061_v8, %v439_v63  ;;  %v441_v13 = vmul.f32 %v874_v2, %v1048_v0  ;;  %v568_v14 = vadd.f32 %v504_v3, %v236_v54  ;;  %v569_v15 = vadd.f32 %v505_v4, %v237_v59 }
  0x29   : > { %v570_v16 = vadd.f32 %v506_v5, %v238_v60  ;;  %v571_v17 = vadd.f32 %v507_v6, %v239_v61  ;;  %v572_v20 = vadd.f32 %v508_v10, %v240_v7  ;;  %v510_v22 = vadd.f32 %v1061_v8, %v440_v12  ;;  %v248_v60 = vld [vmem:[%s1053_s26 + $0x100] sm:$0xff]  ;;  %v249_v61 = vld [vmem:[%s1053_s26 + $0x108] sm:$0xff]  ;;  %v250_v7 = vld [vmem:[%s1053_s26 + $0x110] sm:$0xff] }
  0x2a   : > { %v573_v21 = vadd.f32 %v509_v11, %v241_v9  ;;  %v511_v23 = vadd.f32 %v1061_v8, %v441_v13  ;;  %v632_v26 = vmax.f32 %v568_v14, 0.0  ;;  %v633_v27 = vmax.f32 %v569_v15, 0.0  ;;  %v251_v9 = vld [vmem:[%s1053_s26 + $0x118] sm:$0xff]  ;;  %v970_v14 = vld [vmem:[%s1043_s21 + $0x80] sm:$0xff]   ;;  %v971_v15 = vld [vmem:[%s1043_s21 + $0x88] sm:$0xff]  }
  0x2b   : > { %v634_v28 = vmax.f32 %v570_v16, 0.0  ;;  %v635_v29 = vmax.f32 %v571_v17, 0.0  ;;  %v636_v31 = vmax.f32 %v572_v20, 0.0  ;;  %v574_v33 = vadd.f32 %v510_v22, %v242_v18  ;;  %v972_v20 = vld [vmem:[%s1043_s21 + $0x90] sm:$0xff]  }
  0x2c   : > { %v637_v32 = vmax.f32 %v573_v21, 0.0  ;;  %v575_v34 = vadd.f32 %v511_v23, %v243_v19  ;;  %696 = vst [vmem:[%s1090_s6 + $0x80] sm:$0xff] %v632_v26  ;;  %697 = vst [vmem:[%s1090_s6 + $0x88] sm:$0xff] %v633_v27  ;;  %v877_v35 = vunpack.c.l.bf16 %v966_v24  ;;  %v878_v36 = vunpack.c.h.bf16 %v966_v24 }
  0x2d   : > { %698 = vst [vmem:[%s1090_s6 + $0x90] sm:$0xff] %v634_v28  ;;  %699 = vst [vmem:[%s1090_s6 + $0x98] sm:$0xff] %v635_v29  ;;  %v881_v37 = vunpack.c.l.bf16 %v967_v25  ;;  %v882_v38 = vunpack.c.h.bf16 %v967_v25  ;;  %v638_v40 = vmax.f32 %v574_v33, 0.0  ;;  %v885_v42 = vunpack.c.l.bf16 %v968_v30  ;;  %v973_v29 = vld [vmem:[%s1043_s21 + $0x98] sm:$0xff]  }
  0x2e   : > { %700 = vst [vmem:[%s1090_s6 + $0xa0] sm:$0xff] %v636_v31  ;;  %701 = vst [vmem:[%s1090_s6 + $0xa8] sm:$0xff] %v637_v32  ;;  %v639_v41 = vmax.f32 %v575_v34, 0.0  ;;  %v886_v43 = vunpack.c.h.bf16 %v968_v30  ;;  %v442_v45 = vmul.f32 %v877_v35, %v1048_v0  ;;  %v443_v46 = vmul.f32 %v878_v36, %v1048_v0  ;;  %v252_v34 = vld [vmem:[%s1053_s26 + $0x120] sm:$0xff] }
  0x2f   : > { %v444_v47 = vmul.f32 %v881_v37, %v1048_v0  ;;  %v445_v48 = vmul.f32 %v882_v38, %v1048_v0  ;;  %702 = vst [vmem:[%s1090_s6 + $0xb0] sm:$0xff] %v638_v40  ;;  %v446_v52 = vmul.f32 %v885_v42, %v1048_v0  ;;  %v889_v54 = vunpack.c.l.bf16 %v969_v39  ;;  %v254_v40 = vld [vmem:[%s1053_s26 + $0x130] sm:$0xff] }
  0x30   : > { %703 = vst [vmem:[%s1090_s6 + $0xb8] sm:$0xff] %v639_v41  ;;  %v447_v53 = vmul.f32 %v886_v43, %v1048_v0  ;;  %v890_v55 = vunpack.c.h.bf16 %v969_v39  ;;  %v512_v56 = vadd.f32 %v1061_v8, %v442_v45  ;;  %v513_v57 = vadd.f32 %v1061_v8, %v443_v46  ;;  %v253_v39 = vld [vmem:[%s1053_s26 + $0x128] sm:$0xff]  ;;  %v255_v41 = vld [vmem:[%s1053_s26 + $0x138] sm:$0xff] }
  0x31   : > { %v514_v58 = vadd.f32 %v1061_v8, %v444_v47  ;;  %v515_v59 = vadd.f32 %v1061_v8, %v445_v48  ;;  %v516_v62 = vadd.f32 %v1061_v8, %v446_v52  ;;  %v448_v1 = vmul.f32 %v889_v54, %v1048_v0 }
  0x32   : > { %v517_v63 = vadd.f32 %v1061_v8, %v447_v53  ;;  %v449_v2 = vmul.f32 %v890_v55, %v1048_v0  ;;  %v576_v3 = vadd.f32 %v512_v56, %v244_v44  ;;  %v577_v4 = vadd.f32 %v513_v57, %v245_v49 }
  0x33   : > { %v578_v5 = vadd.f32 %v514_v58, %v246_v50  ;;  %v579_v6 = vadd.f32 %v515_v59, %v247_v51  ;;  %v580_v10 = vadd.f32 %v516_v62, %v248_v60  ;;  %v518_v12 = vadd.f32 %v1061_v8, %v448_v1  ;;  %v256_v50 = vld [vmem:[%s1053_s26 + $0x140] sm:$0xff]  ;;  %v257_v51 = vld [vmem:[%s1053_s26 + $0x148] sm:$0xff]  ;;  %v258_v60 = vld [vmem:[%s1053_s26 + $0x150] sm:$0xff] }
  0x34   : > { %v581_v11 = vadd.f32 %v517_v63, %v249_v61  ;;  %v519_v13 = vadd.f32 %v1061_v8, %v449_v2  ;;  %v640_v16 = vmax.f32 %v576_v3, 0.0  ;;  %v641_v17 = vmax.f32 %v577_v4, 0.0  ;;  %v259_v61 = vld [vmem:[%s1053_s26 + $0x158] sm:$0xff]  ;;  %v974_v3 = vld [vmem:[%s1043_s21 + $0xa0] sm:$0xff]   ;;  %v975_v4 = vld [vmem:[%s1043_s21 + $0xa8] sm:$0xff]  }
  0x35   : > { %v642_v18 = vmax.f32 %v578_v5, 0.0  ;;  %v643_v19 = vmax.f32 %v579_v6, 0.0  ;;  %v644_v21 = vmax.f32 %v580_v10, 0.0  ;;  %v582_v23 = vadd.f32 %v518_v12, %v250_v7  ;;  %v976_v10 = vld [vmem:[%s1043_s21 + $0xb0] sm:$0xff]  }
  0x36   : > { %v645_v22 = vmax.f32 %v581_v11, 0.0  ;;  %v583_v24 = vadd.f32 %v519_v13, %v251_v9  ;;  %704 = vst [vmem:[%s1090_s6 + $0xc0] sm:$0xff] %v640_v16  ;;  %705 = vst [vmem:[%s1090_s6 + $0xc8] sm:$0xff] %v641_v17  ;;  %v893_v25 = vunpack.c.l.bf16 %v970_v14  ;;  %v894_v26 = vunpack.c.h.bf16 %v970_v14 }
  0x37   : > { %706 = vst [vmem:[%s1090_s6 + $0xd0] sm:$0xff] %v642_v18  ;;  %707 = vst [vmem:[%s1090_s6 + $0xd8] sm:$0xff] %v643_v19  ;;  %v897_v27 = vunpack.c.l.bf16 %v971_v15  ;;  %v898_v28 = vunpack.c.h.bf16 %v971_v15  ;;  %v646_v30 = vmax.f32 %v582_v23, 0.0  ;;  %v901_v32 = vunpack.c.l.bf16 %v972_v20  ;;  %v977_v19 = vld [vmem:[%s1043_s21 + $0xb8] sm:$0xff]  }
  0x38   : > { %708 = vst [vmem:[%s1090_s6 + $0xe0] sm:$0xff] %v644_v21  ;;  %709 = vst [vmem:[%s1090_s6 + $0xe8] sm:$0xff] %v645_v22  ;;  %v647_v31 = vmax.f32 %v583_v24, 0.0  ;;  %v902_v33 = vunpack.c.h.bf16 %v972_v20  ;;  %v450_v35 = vmul.f32 %v893_v25, %v1048_v0  ;;  %v451_v36 = vmul.f32 %v894_v26, %v1048_v0  ;;  %v260_v24 = vld [vmem:[%s1053_s26 + $0x160] sm:$0xff] }
  0x39   : > { %v452_v37 = vmul.f32 %v897_v27, %v1048_v0  ;;  %v453_v38 = vmul.f32 %v898_v28, %v1048_v0  ;;  %710 = vst [vmem:[%s1090_s6 + $0xf0] sm:$0xff] %v646_v30  ;;  %v454_v42 = vmul.f32 %v901_v32, %v1048_v0  ;;  %v905_v44 = vunpack.c.l.bf16 %v973_v29  ;;  %v262_v30 = vld [vmem:[%s1053_s26 + $0x170] sm:$0xff] }
  0x3a   : > { %711 = vst [vmem:[%s1090_s6 + $0xf8] sm:$0xff] %v647_v31  ;;  %v455_v43 = vmul.f32 %v902_v33, %v1048_v0  ;;  %v906_v45 = vunpack.c.h.bf16 %v973_v29  ;;  %v520_v46 = vadd.f32 %v1061_v8, %v450_v35  ;;  %v521_v47 = vadd.f32 %v1061_v8, %v451_v36  ;;  %v261_v29 = vld [vmem:[%s1053_s26 + $0x168] sm:$0xff]  ;;  %v263_v31 = vld [vmem:[%s1053_s26 + $0x178] sm:$0xff] }
  0x3b   : > { %v522_v48 = vadd.f32 %v1061_v8, %v452_v37  ;;  %v523_v49 = vadd.f32 %v1061_v8, %v453_v38  ;;  %v524_v52 = vadd.f32 %v1061_v8, %v454_v42  ;;  %v456_v54 = vmul.f32 %v905_v44, %v1048_v0 }
  0x3c   : > { %v525_v53 = vadd.f32 %v1061_v8, %v455_v43  ;;  %v457_v55 = vmul.f32 %v906_v45, %v1048_v0  ;;  %v584_v56 = vadd.f32 %v520_v46, %v252_v34  ;;  %v585_v57 = vadd.f32 %v521_v47, %v253_v39 }
  0x3d   : > { %v586_v58 = vadd.f32 %v522_v48, %v254_v40  ;;  %v587_v59 = vadd.f32 %v523_v49, %v255_v41  ;;  %v588_v62 = vadd.f32 %v524_v52, %v256_v50  ;;  %v526_v1 = vadd.f32 %v1061_v8, %v456_v54  ;;  %v264_v40 = vld [vmem:[%s1053_s26 + $0x180] sm:$0xff]  ;;  %v265_v41 = vld [vmem:[%s1053_s26 + $0x188] sm:$0xff]  ;;  %v266_v50 = vld [vmem:[%s1053_s26 + $0x190] sm:$0xff] }
  0x3e   : > { %v589_v63 = vadd.f32 %v525_v53, %v257_v51  ;;  %v527_v2 = vadd.f32 %v1061_v8, %v457_v55  ;;  %v648_v5 = vmax.f32 %v584_v56, 0.0  ;;  %v649_v6 = vmax.f32 %v585_v57, 0.0  ;;  %v267_v51 = vld [vmem:[%s1053_s26 + $0x198] sm:$0xff]  ;;  %v978_v56 = vld [vmem:[%s1043_s21 + $0xc0] sm:$0xff]   ;;  %v979_v57 = vld [vmem:[%s1043_s21 + $0xc8] sm:$0xff]  }
  0x3f   : > { %v650_v7 = vmax.f32 %v586_v58, 0.0  ;;  %v651_v9 = vmax.f32 %v587_v59, 0.0  ;;  %v652_v11 = vmax.f32 %v588_v62, 0.0  ;;  %v590_v13 = vadd.f32 %v526_v1, %v258_v60  ;;  %v980_v62 = vld [vmem:[%s1043_s21 + $0xd0] sm:$0xff]  }
  0x40   : > { %v653_v12 = vmax.f32 %v589_v63, 0.0  ;;  %v591_v14 = vadd.f32 %v527_v2, %v259_v61  ;;  %712 = vst [vmem:[%s1090_s6 + $0x100] sm:$0xff] %v648_v5  ;;  %713 = vst [vmem:[%s1090_s6 + $0x108] sm:$0xff] %v649_v6  ;;  %v909_v15 = vunpack.c.l.bf16 %v974_v3  ;;  %v910_v16 = vunpack.c.h.bf16 %v974_v3 }
  0x41   : > { %714 = vst [vmem:[%s1090_s6 + $0x110] sm:$0xff] %v650_v7  ;;  %715 = vst [vmem:[%s1090_s6 + $0x118] sm:$0xff] %v651_v9  ;;  %v913_v17 = vunpack.c.l.bf16 %v975_v4  ;;  %v914_v18 = vunpack.c.h.bf16 %v975_v4  ;;  %v654_v20 = vmax.f32 %v590_v13, 0.0  ;;  %v917_v22 = vunpack.c.l.bf16 %v976_v10  ;;  %v981_v9 = vld [vmem:[%s1043_s21 + $0xd8] sm:$0xff]  }
  0x42   : > { %716 = vst [vmem:[%s1090_s6 + $0x120] sm:$0xff] %v652_v11  ;;  %717 = vst [vmem:[%s1090_s6 + $0x128] sm:$0xff] %v653_v12  ;;  %v655_v21 = vmax.f32 %v591_v14, 0.0  ;;  %v918_v23 = vunpack.c.h.bf16 %v976_v10  ;;  %v458_v25 = vmul.f32 %v909_v15, %v1048_v0  ;;  %v459_v26 = vmul.f32 %v910_v16, %v1048_v0  ;;  %v268_v14 = vld [vmem:[%s1053_s26 + $0x1a0] sm:$0xff] }
  0x43   : > { %v460_v27 = vmul.f32 %v913_v17, %v1048_v0  ;;  %v461_v28 = vmul.f32 %v914_v18, %v1048_v0  ;;  %718 = vst [vmem:[%s1090_s6 + $0x130] sm:$0xff] %v654_v20  ;;  %v462_v32 = vmul.f32 %v917_v22, %v1048_v0  ;;  %v921_v34 = vunpack.c.l.bf16 %v977_v19  ;;  %v270_v20 = vld [vmem:[%s1053_s26 + $0x1b0] sm:$0xff] }
  0x44   : > { %719 = vst [vmem:[%s1090_s6 + $0x138] sm:$0xff] %v655_v21  ;;  %v463_v33 = vmul.f32 %v918_v23, %v1048_v0  ;;  %v922_v35 = vunpack.c.h.bf16 %v977_v19  ;;  %v528_v36 = vadd.f32 %v1061_v8, %v458_v25  ;;  %v529_v37 = vadd.f32 %v1061_v8, %v459_v26  ;;  %v269_v19 = vld [vmem:[%s1053_s26 + $0x1a8] sm:$0xff]  ;;  %v271_v21 = vld [vmem:[%s1053_s26 + $0x1b8] sm:$0xff] }
  0x45   : > { %v530_v38 = vadd.f32 %v1061_v8, %v460_v27  ;;  %v531_v39 = vadd.f32 %v1061_v8, %v461_v28  ;;  %v532_v42 = vadd.f32 %v1061_v8, %v462_v32  ;;  %v464_v44 = vmul.f32 %v921_v34, %v1048_v0 }
  0x46   : > { %v533_v43 = vadd.f32 %v1061_v8, %v463_v33  ;;  %v465_v45 = vmul.f32 %v922_v35, %v1048_v0  ;;  %v592_v46 = vadd.f32 %v528_v36, %v260_v24  ;;  %v593_v47 = vadd.f32 %v529_v37, %v261_v29 }
  0x47   : > { %v594_v48 = vadd.f32 %v530_v38, %v262_v30  ;;  %v595_v49 = vadd.f32 %v531_v39, %v263_v31  ;;  %v596_v52 = vadd.f32 %v532_v42, %v264_v40  ;;  %v534_v54 = vadd.f32 %v1061_v8, %v464_v44  ;;  %v272_v30 = vld [vmem:[%s1053_s26 + $0x1c0] sm:$0xff]  ;;  %v273_v31 = vld [vmem:[%s1053_s26 + $0x1c8] sm:$0xff]  ;;  %v274_v40 = vld [vmem:[%s1053_s26 + $0x1d0] sm:$0xff] }
  0x48   : > { %v597_v53 = vadd.f32 %v533_v43, %v265_v41  ;;  %v535_v55 = vadd.f32 %v1061_v8, %v465_v45  ;;  %v656_v58 = vmax.f32 %v592_v46, 0.0  ;;  %v657_v59 = vmax.f32 %v593_v47, 0.0  ;;  %v275_v41 = vld [vmem:[%s1053_s26 + $0x1d8] sm:$0xff]  ;;  %v982_v46 = vld [vmem:[%s1043_s21 + $0xe0] sm:$0xff]   ;;  %v983_v47 = vld [vmem:[%s1043_s21 + $0xe8] sm:$0xff]  }
  0x49   : > { %v658_v60 = vmax.f32 %v594_v48, 0.0  ;;  %v659_v61 = vmax.f32 %v595_v49, 0.0  ;;  %v660_v63 = vmax.f32 %v596_v52, 0.0  ;;  %v598_v2 = vadd.f32 %v534_v54, %v266_v50  ;;  %v984_v52 = vld [vmem:[%s1043_s21 + $0xf0] sm:$0xff]  }
  0x4a   : > { %v661_v1 = vmax.f32 %v597_v53, 0.0  ;;  %v599_v3 = vadd.f32 %v535_v55, %v267_v51  ;;  %720 = vst [vmem:[%s1090_s6 + $0x140] sm:$0xff] %v656_v58  ;;  %721 = vst [vmem:[%s1090_s6 + $0x148] sm:$0xff] %v657_v59  ;;  %v925_v4 = vunpack.c.l.bf16 %v978_v56  ;;  %v926_v5 = vunpack.c.h.bf16 %v978_v56 }
  0x4b   : > { %722 = vst [vmem:[%s1090_s6 + $0x150] sm:$0xff] %v658_v60  ;;  %723 = vst [vmem:[%s1090_s6 + $0x158] sm:$0xff] %v659_v61  ;;  %v929_v6 = vunpack.c.l.bf16 %v979_v57  ;;  %v930_v7 = vunpack.c.h.bf16 %v979_v57  ;;  %v662_v10 = vmax.f32 %v598_v2, 0.0  ;;  %v933_v12 = vunpack.c.l.bf16 %v980_v62  ;;  %v985_v61 = vld [vmem:[%s1043_s21 + $0xf8] sm:$0xff]  }
  0x4c   : > { %724 = vst [vmem:[%s1090_s6 + $0x160] sm:$0xff] %v660_v63  ;;  %725 = vst [vmem:[%s1090_s6 + $0x168] sm:$0xff] %v661_v1  ;;  %v663_v11 = vmax.f32 %v599_v3, 0.0  ;;  %v934_v13 = vunpack.c.h.bf16 %v980_v62  ;;  %v466_v15 = vmul.f32 %v925_v4, %v1048_v0  ;;  %v467_v16 = vmul.f32 %v926_v5, %v1048_v0  ;;  %v276_v3 = vld [vmem:[%s1053_s26 + $0x1e0] sm:$0xff] }
  0x4d   : > { %v468_v17 = vmul.f32 %v929_v6, %v1048_v0  ;;  %v469_v18 = vmul.f32 %v930_v7, %v1048_v0  ;;  %726 = vst [vmem:[%s1090_s6 + $0x170] sm:$0xff] %v662_v10  ;;  %v470_v22 = vmul.f32 %v933_v12, %v1048_v0  ;;  %v937_v24 = vunpack.c.l.bf16 %v981_v9  ;;  %v278_v10 = vld [vmem:[%s1053_s26 + $0x1f0] sm:$0xff] }
  0x4e   : > { %727 = vst [vmem:[%s1090_s6 + $0x178] sm:$0xff] %v663_v11  ;;  %v471_v23 = vmul.f32 %v934_v13, %v1048_v0  ;;  %v938_v25 = vunpack.c.h.bf16 %v981_v9  ;;  %v536_v26 = vadd.f32 %v1061_v8, %v466_v15  ;;  %v537_v27 = vadd.f32 %v1061_v8, %v467_v16  ;;  %v277_v9 = vld [vmem:[%s1053_s26 + $0x1e8] sm:$0xff]  ;;  %v279_v11 = vld [vmem:[%s1053_s26 + $0x1f8] sm:$0xff] }
  0x4f   : > { %v538_v28 = vadd.f32 %v1061_v8, %v468_v17  ;;  %v539_v29 = vadd.f32 %v1061_v8, %v469_v18  ;;  %v540_v32 = vadd.f32 %v1061_v8, %v470_v22  ;;  %v472_v34 = vmul.f32 %v937_v24, %v1048_v0 }
  0x50   : > { %v541_v33 = vadd.f32 %v1061_v8, %v471_v23  ;;  %v473_v35 = vmul.f32 %v938_v25, %v1048_v0  ;;  %v600_v36 = vadd.f32 %v536_v26, %v268_v14  ;;  %v601_v37 = vadd.f32 %v537_v27, %v269_v19 }
  0x51   : > { %v602_v38 = vadd.f32 %v538_v28, %v270_v20  ;;  %v603_v39 = vadd.f32 %v539_v29, %v271_v21  ;;  %v604_v42 = vadd.f32 %v540_v32, %v272_v30  ;;  %v542_v44 = vadd.f32 %v1061_v8, %v472_v34  ;;  %v280_v20 = vld [vmem:[%s1053_s26 + $0x200] sm:$0xff]  ;;  %v281_v21 = vld [vmem:[%s1053_s26 + $0x208] sm:$0xff]  ;;  %v282_v30 = vld [vmem:[%s1053_s26 + $0x210] sm:$0xff] }
  0x52   : > { %v605_v43 = vadd.f32 %v541_v33, %v273_v31  ;;  %v543_v45 = vadd.f32 %v1061_v8, %v473_v35  ;;  %v664_v48 = vmax.f32 %v600_v36, 0.0  ;;  %v665_v49 = vmax.f32 %v601_v37, 0.0  ;;  %v283_v31 = vld [vmem:[%s1053_s26 + $0x218] sm:$0xff] }
  0x53   : > { %v666_v50 = vmax.f32 %v602_v38, 0.0  ;;  %v667_v51 = vmax.f32 %v603_v39, 0.0  ;;  %v668_v53 = vmax.f32 %v604_v42, 0.0  ;;  %v606_v55 = vadd.f32 %v542_v44, %v274_v40 }
  0x54   : > { %v669_v54 = vmax.f32 %v605_v43, 0.0  ;;  %v607_v56 = vadd.f32 %v543_v45, %v275_v41  ;;  %728 = vst [vmem:[%s1090_s6 + $0x180] sm:$0xff] %v664_v48  ;;  %729 = vst [vmem:[%s1090_s6 + $0x188] sm:$0xff] %v665_v49  ;;  %v941_v57 = vunpack.c.l.bf16 %v982_v46  ;;  %v942_v58 = vunpack.c.h.bf16 %v982_v46 }
  0x55   : > { %730 = vst [vmem:[%s1090_s6 + $0x190] sm:$0xff] %v666_v50  ;;  %731 = vst [vmem:[%s1090_s6 + $0x198] sm:$0xff] %v667_v51  ;;  %v945_v59 = vunpack.c.l.bf16 %v983_v47  ;;  %v946_v60 = vunpack.c.h.bf16 %v983_v47  ;;  %v670_v62 = vmax.f32 %v606_v55, 0.0  ;;  %v949_v1 = vunpack.c.l.bf16 %v984_v52 }
  0x56   : > { %732 = vst [vmem:[%s1090_s6 + $0x1a0] sm:$0xff] %v668_v53  ;;  %733 = vst [vmem:[%s1090_s6 + $0x1a8] sm:$0xff] %v669_v54  ;;  %v671_v63 = vmax.f32 %v607_v56, 0.0  ;;  %v950_v2 = vunpack.c.h.bf16 %v984_v52  ;;  %v474_v4 = vmul.f32 %v941_v57, %v1048_v0  ;;  %v475_v5 = vmul.f32 %v942_v58, %v1048_v0 }
  0x57   : > { %v476_v6 = vmul.f32 %v945_v59, %v1048_v0  ;;  %v477_v7 = vmul.f32 %v946_v60, %v1048_v0  ;;  %734 = vst [vmem:[%s1090_s6 + $0x1b0] sm:$0xff] %v670_v62  ;;  %v478_v12 = vmul.f32 %v949_v1, %v1048_v0  ;;  %v953_v14 = vunpack.c.l.bf16 %v985_v61 }
  0x58   : > { %735 = vst [vmem:[%s1090_s6 + $0x1b8] sm:$0xff] %v671_v63  ;;  %v479_v13 = vmul.f32 %v950_v2, %v1048_v0  ;;  %v954_v15 = vunpack.c.h.bf16 %v985_v61  ;;  %v544_v16 = vadd.f32 %v1061_v8, %v474_v4  ;;  %v545_v17 = vadd.f32 %v1061_v8, %v475_v5 }
  0x59   : > { %v546_v18 = vadd.f32 %v1061_v8, %v476_v6  ;;  %v547_v19 = vadd.f32 %v1061_v8, %v477_v7  ;;  %v548_v22 = vadd.f32 %v1061_v8, %v478_v12  ;;  %v480_v24 = vmul.f32 %v953_v14, %v1048_v0 }
  0x5a   : > { %v549_v23 = vadd.f32 %v1061_v8, %v479_v13  ;;  %v481_v25 = vmul.f32 %v954_v15, %v1048_v0  ;;  %v608_v26 = vadd.f32 %v544_v16, %v276_v3  ;;  %v609_v27 = vadd.f32 %v545_v17, %v277_v9 }
  0x5b   : > { %v610_v28 = vadd.f32 %v546_v18, %v278_v10  ;;  %v611_v29 = vadd.f32 %v547_v19, %v279_v11  ;;  %v612_v32 = vadd.f32 %v548_v22, %v280_v20  ;;  %v550_v34 = vadd.f32 %v1061_v8, %v480_v24 }
  0x5c   : > { %v613_v33 = vadd.f32 %v549_v23, %v281_v21  ;;  %v551_v35 = vadd.f32 %v1061_v8, %v481_v25  ;;  %v672_v36 = vmax.f32 %v608_v26, 0.0  ;;  %v673_v0 = vmax.f32 %v609_v27, 0.0 }
  0x5d   : > { %v674_v37 = vmax.f32 %v610_v28, 0.0  ;;  %v675_v38 = vmax.f32 %v611_v29, 0.0  ;;  %v676_v39 = vmax.f32 %v612_v32, 0.0  ;;  %v614_v41 = vadd.f32 %v550_v34, %v282_v30 }
  0x5e   : > { %v677_v40 = vmax.f32 %v613_v33, 0.0  ;;  %v615_v42 = vadd.f32 %v551_v35, %v283_v31  ;;  %736 = vst [vmem:[%s1090_s6 + $0x1c0] sm:$0xff] %v672_v36  ;;  %737 = vst [vmem:[%s1090_s6 + $0x1c8] sm:$0xff] %v673_v0 }
  0x5f   : > { %738 = vst [vmem:[%s1090_s6 + $0x1d0] sm:$0xff] %v674_v37  ;;  %739 = vst [vmem:[%s1090_s6 + $0x1d8] sm:$0xff] %v675_v38  ;;  %v678_v43 = vmax.f32 %v614_v41, 0.0 }
  0x60   : > { %740 = vst [vmem:[%s1090_s6 + $0x1e0] sm:$0xff] %v676_v39  ;;  %741 = vst [vmem:[%s1090_s6 + $0x1e8] sm:$0xff] %v677_v40  ;;  %v679_v44 = vmax.f32 %v615_v42, 0.0 }
  0x61   : > { %742 = vst [vmem:[%s1090_s6 + $0x1f0] sm:$0xff] %v678_v43 }
  0x62   : > { %743 = vst [vmem:[%s1090_s6 + $0x1f8] sm:$0xff] %v679_v44 }
  0x63 PF: > { %s14_s15 = sadd.s32 1, %s1001_s15  }
  0x64   : > { %p11_p4 = scmp.ge.s32.totalorder %s14_s15, 4  }
  0x66   :  { %13 = sbr.rel (!%p11_p4) target bundleno = 1 (0x1), region = 69 }

// kernel: basic_block_forward.3
= control target key start
LH: loop header
LB: loop body
LE: loop exit
PB: predicated region body
PF: predicated region fallthrough
CT: control target
= control target key end

     0   :  { %s5230_s12 = smov 0   ;;  %s7606_s0 = inlined_call_operand.vmem [shape: f32[2,576,128], index: 0, kind: input, shape index: {}]   ;;  %s7607_s1 = inlined_call_operand.vmem [shape: bf16[1152,128], index: 1, kind: input, shape index: {}]   ;;  %s7608_s2 = inlined_call_operand.vmem [shape: bf16[2,576,128], index: 2, kind: output, shape index: {0}]   ;;  %s7609_s3 = inlined_call_operand.vmem [shape: f32[2,2,128], index: 3, kind: output, shape index: {1}]  }
   0x1 LB: > { %s4574_s13 = sadd.s32 4294967295, %s5206_s12   ;;  %p4578_p0 = scmp.ge.s32.totalorder %s5206_s12, 1  ;;  %s5206_s12 = sphi %s5230_s12, %s14_s12  }
   0x2   : > { %p140_p1 = scmp.lt.s32.totalorder %s5206_s12, 3 }
   0x4   : > { %p141_p2 = pnand %p4578_p0, %p140_p1 }
   0x6   : > { %144 = sbr.rel (%p141_p2) target bundleno = 871 (0x367), region = 28 }
   0xb   : > { %v5124_v0 = vld [vmem:[%s7607_s1 + $0x38] sm:$0xff]   ;;  %v7612_v1 = vmov 0   ;;  %p168_p3 = scmp.lt.s32.totalorder %s4574_s13, 1  ;;  %v5125_v2 = vld [vmem:[%s7607_s1 + $0x30] sm:$0xff]   ;;  %v5126_v3 = vld [vmem:[%s7607_s1 + $0x28] sm:$0xff]   ;;  %v327_v19 = vlaneseq }
   0xc   : > { %2254 = vmatprep.subr.bf16.mxu0 %v7612_v1  ;;  %5080 = vmatprep.subr.bf16.mxu1 %v7612_v1  ;;  %v5127_v4 = vld [vmem:[%s7607_s1 + $0x20] sm:$0xff]   ;;  %v5128_v5 = vld [vmem:[%s7607_s1 + $0x18] sm:$0xff]   ;;  %v5129_v11 = vld [vmem:[%s7607_s1 + $0x10] sm:$0xff]  }
   0xd   : > { %2255 = vmatpush1.bf16.msra.mxu0 %v5124_v0  ;;  %5096 = vmatpush1.bf16.msra.mxu1 %v5124_v0  ;;  %s8066_s13 = smov (!%p168_p3, %s4574_s13), 1  ;;  %v5130_v13 = vld [vmem:[%s7607_s1 + $0x8] sm:$0xff]   ;;  %v5131_v14 = vld [vmem:[%s7607_s1] sm:$0xff]   ;;  %v5132_v15 = vld [vmem:[%s7607_s1 + $0x78] sm:$0xff]   ;;  %v5330_v21 = vshrl.u32 %v327_v19, 7 }
   0xe   : > { %2256 = vmatprep.subr.bf16.mxu0 %v7612_v1  ;;  %5081 = vmatprep.subr.bf16.mxu1 %v7612_v1  ;;  %s5112_s20 = smul.u32 576, %s8066_s13  ;;  %v5133_v16 = vld [vmem:[%s7607_s1 + $0x70] sm:$0xff]   ;;  %v5134_v17 = vld [vmem:[%s7607_s1 + $0x68] sm:$0xff]   ;;  %v5135_v18 = vld [vmem:[%s7607_s1 + $0x60] sm:$0xff]  }
   0xf   : > { %v5136_v20 = vld [vmem:[%s7607_s1 + $0x58] sm:$0xff]   ;;  %v5137_v22 = vld [vmem:[%s7607_s1 + $0x50] sm:$0xff]   ;;  %v5138_v25 = vld [vmem:[%s7607_s1 + $0x48] sm:$0xff]   ;;  %vm1496_vm0 = vcmp.lt.s32.totalorder %v5330_v21, 1  ;;  %vm1713_vm1 = vcmp.lt.s32.totalorder %v5330_v21, 7  ;;  %s5113_s17 = smul.u32 288, %s8066_s13 }
  0x10   : > { %s5264_s25 = scalar_lea.vmem %s7606_s0, %s5112_s20  ;;  %v5139_v32 = vld [vmem:[%s7607_s1 + $0x40] sm:$0xff]   ;;  %v5140_v45 = vld [vmem:[%s7607_s1 + $0xb8] sm:$0xff]   ;;  %v5142_v50 = vld [vmem:[%s7607_s1 + $0xb0] sm:$0xff]  }
  0x11   : > { %2257 = vmatpush1.bf16.msra.mxu0 %v5125_v2  ;;  %5097 = vmatpush1.bf16.msra.mxu1 %v5125_v2  ;;  %v5272_v6 = vld [vmem:[%s5264_s25] sm:$0xff]  ;;  %v5275_v7 = vld [vmem:[%s5264_s25 + $0x8] sm:$0xff]  ;;  %v5338_v23 = vld [vmem:[%s5264_s25 + $0x238] sm:$0xff]  ;;  %s7026_s20 = scalar_lea.vmem %s7608_s2, %s5113_s17 }
  0x12   : > { %2258 = vmatprep.subr.bf16.mxu0 %v7612_v1  ;;  %5082 = vmatprep.subr.bf16.mxu1 %v7612_v1  ;;  %7744 = vst [vmem:[#allocation2_spill] sm:$0xff] %v5272_v6  ;;  %v1605_v8 = vpack.c.bf16 %v5275_v7, %v5272_v6  ;;  %v5280_v9 = vld [vmem:[%s5264_s25 + $0x180] sm:$0xff]  ;;  %v5283_v10 = vld [vmem:[%s5264_s25 + $0x188] sm:$0xff]  ;;  %7746 = vst [vmem:[#allocation4_spill] sm:$0xff] %v5338_v23  ;;  %v1424_v26 = vrot.slane %v5272_v6, 7  ;;  %v1425_v27 = vrot.slane %v5275_v7, 7 }
  0x13   : > { %v5290_v12 = vpack.c.bf16 %v5283_v10, %v5280_v9  ;;  %v5341_v24 = vld [vmem:[%s5264_s25 + $0x178] sm:$0xff]  ;;  %v1472_v28 = vrot.slane %v5280_v9, 7  ;;  %v1473_v29 = vrot.slane %v5283_v10, 7  ;;  %v7610_v30 = vrot.slane %v5338_v23, 7  ;;  %v5371_v37 = vld [vmem:[%s5264_s25 + $0x10] sm:$0xff]  ;;  %v5414_v54 = vld [vmem:[%s5264_s25 + $0x20] sm:$0xff] }
  0x14   : > { %2286 = vmatprep.mubr.bf16.mxu0 %v1605_v8  ;;  %v7611_v31 = vrot.slane %v5341_v24, 7  ;;  %v1567_v33 = vsel %vm1496_vm0, %v1424_v26, %v1425_v27  ;;  %v5374_v38 = vld [vmem:[%s5264_s25 + $0x18] sm:$0xff]  ;;  %v5379_v39 = vld [vmem:[%s5264_s25 + $0x190] sm:$0xff]  ;;  %v1426_v43 = vrot.slane %v5371_v37, 7  ;;  %v5423_v58 = vld [vmem:[%s5264_s25 + $0x28] sm:$0xff]  ;;  %v1428_v0 = vrot.slane %v5414_v54, 7 }
  0x15   : > { %2259 = vmatpush1.bf16.msra.mxu0 %v5126_v3  ;;  %5098 = vmatpush1.bf16.msra.mxu1 %v5126_v3  ;;  %7745 = vst [vmem:[#allocation3_spill] sm:$0xff] %v5290_v12  ;;  %v1568_v34 = vsel %vm1496_vm0, %v7610_v30, %v1424_v26  ;;  %v1519_v35 = vsel %vm1496_vm0, %v1472_v28, %v1473_v29  ;;  %v5382_v40 = vld [vmem:[%s5264_s25 + $0x198] sm:$0xff]  ;;  %v1427_v44 = vrot.slane %v5374_v38, 7  ;;  %v1474_v47 = vrot.slane %v5379_v39, 7  ;;  %v5145_v53 = vld [vmem:[%s7607_s1 + $0x130] sm:$0xff]   ;;  %v5427_v59 = vld [vmem:[%s5264_s25 + $0x1a0] sm:$0xff] }
  0x16   : > { %2260 = vmatprep.subr.bf16.mxu0 %v7612_v1  ;;  %5083 = vmatprep.subr.bf16.mxu1 %v7612_v1  ;;  %v1520_v36 = vsel %vm1496_vm0, %v7611_v31, %v1472_v28  ;;  %v1569_v41 = vpack.c.bf16 %v1567_v33, %v1568_v34  ;;  %v5141_v46 = vld [vmem:[%s7607_s1 + $0x138] sm:$0xff]   ;;  %v1475_v48 = vrot.slane %v5382_v40, 7  ;;  %v1606_v49 = vpack.c.bf16 %v5374_v38, %v5371_v37  ;;  %v5430_v60 = vld [vmem:[%s5264_s25 + $0x1a8] sm:$0xff]  ;;  %v5454_v9 = vld [vmem:[%s5264_s25 + $0x30] sm:$0xff] }
  0x17   : > { %2478 = vmatprep.mubr.bf16.mxu1 %v5290_v12  ;;  %v5384_v42 = vpack.c.bf16 %v1519_v35, %v1520_v36  ;;  %v5405_v51 = vpack.c.bf16 %v5382_v40, %v5379_v39  ;;  %v1565_v52 = vsel %vm1496_vm0, %v1426_v43, %v1427_v44  ;;  %v1566_v55 = vsel %vm1496_vm0, %v1425_v27, %v1426_v43  ;;  %v5143_v63 = vld [vmem:[%s7607_s1 + $0xa8] sm:$0xff]   ;;  %v5457_v10 = vld [vmem:[%s5264_s25 + $0x38] sm:$0xff]  ;;  %v5153_v27 = vld [vmem:[%s7607_s1 + $0x120] sm:$0xff]  }
  0x18   : > { %v1517_v56 = vsel %vm1496_vm0, %v1474_v47, %v1475_v48  ;;  %v1518_v57 = vsel %vm1496_vm0, %v1473_v29, %v1474_v47  ;;  %v1570_v61 = vpack.c.bf16 %v1565_v52, %v1566_v55  ;;  %v1429_v2 = vrot.slane %v5423_v58, 7  ;;  %v5479_v19 = vld [vmem:[%s5264_s25 + $0x1b8] sm:$0xff]  ;;  %v5498_v33 = vld [vmem:[%s5264_s25 + $0x40] sm:$0xff]  ;;  %v5501_v34 = vld [vmem:[%s5264_s25 + $0x48] sm:$0xff] }
  0x19   : > { %2261 = vmatpush1.bf16.msra.mxu0 %v5127_v4  ;;  %5099 = vmatpush1.bf16.msra.mxu1 %v5127_v4  ;;  %7747 = vst [vmem:[#allocation5_spill] sm:$0xff] %v5384_v42  ;;  %7748 = vst [vmem:[#allocation6_spill] sm:$0xff] %v5405_v51  ;;  %v5434_v62 = vpack.c.bf16 %v1517_v56, %v1518_v57  ;;  %v5443_v3 = vpack.c.bf16 %v5423_v58, %v5414_v54  ;;  %v1476_v4 = vrot.slane %v5427_v59, 7  ;;  %v5517_v43 = vld [vmem:[%s5264_s25 + $0x1c8] sm:$0xff]  ;;  %v5157_v47 = vld [vmem:[%s7607_s1 + $0x118] sm:$0xff]  }
  0x1a   : > { %2262 = vmatprep.subr.bf16.mxu0 %v7612_v1  ;;  %5084 = vmatprep.subr.bf16.mxu1 %v7612_v1  ;;  %v5450_v8 = vpack.c.bf16 %v5430_v60, %v5427_v59  ;;  %v5506_v35 = vpack.c.bf16 %v5457_v10, %v5454_v9  ;;  %v1433_v52 = vrot.slane %v5501_v34, 7  ;;  %v1481_v55 = vrot.slane %v5517_v43, 7  ;;  %v5148_v56 = vld [vmem:[%s7607_s1 + $0x88] sm:$0xff]   ;;  %v5686_v23 = vld [vmem:[%s5264_s25 + $0x70] sm:$0xff] }
  0x1b   : > { %7749 = vst [vmem:[#allocation7_spill] sm:$0xff] %v5434_v62 }
  0x1c   : > { %7750 = vst [vmem:[#allocation8_spill] sm:$0xff] %v5450_v8 }
  0x1d   : > { %2263 = vmatpush1.bf16.msra.mxu0 %v5128_v5  ;;  %5100 = vmatpush1.bf16.msra.mxu1 %v5128_v5  ;;  %v1477_v5 = vrot.slane %v5430_v60, 7 }
  0x1e   : > { %2264 = vmatprep.subr.bf16.mxu0 %v7612_v1  ;;  %5085 = vmatprep.subr.bf16.mxu1 %v7612_v1 }
  0x21   : > { %2265 = vmatpush1.bf16.msra.mxu0 %v5129_v11  ;;  %5101 = vmatpush1.bf16.msra.mxu1 %v5129_v11  ;;  %v5149_v11 = vld [vmem:[%s7607_s1 + $0x128] sm:$0xff]  }
  0x22   : > { %2266 = vmatprep.subr.bf16.mxu0 %v7612_v1  ;;  %5086 = vmatprep.subr.bf16.mxu1 %v7612_v1 }
  0x25   : > { %2267 = vmatpush1.bf16.msra.mxu0 %v5130_v13  ;;  %5102 = vmatpush1.bf16.msra.mxu1 %v5130_v13  ;;  %v1563_v13 = vsel %vm1496_vm0, %v1428_v0, %v1429_v2 }
  0x26   : > { %2268 = vmatprep.subr.bf16.mxu0 %v7612_v1  ;;  %5087 = vmatprep.subr.bf16.mxu1 %v7612_v1 }
  0x29   : > { %2269 = vmatpush1.bf16.msra.mxu0 %v5131_v14  ;;  %5103 = vmatpush1.bf16.msra.mxu1 %v5131_v14  ;;  %v5466_v14 = vld [vmem:[%s5264_s25 + $0x1b0] sm:$0xff] }
  0x2a   : > { %2270 = vmatprep.subr.bf16.mxu0 %v7612_v1  ;;  %5088 = vmatprep.subr.bf16.mxu1 %v7612_v1  ;;  %v1478_v26 = vrot.slane %v5466_v14, 7  ;;  %v5511_v36 = vpack.c.bf16 %v5479_v19, %v5466_v14 }
  0x2c   : > { %7752 = vst [vmem:[#allocation10_spill] sm:$0xff] %v5511_v36 }
  0x2d   : > { %2271 = vmatpush2.bf16.msra.mxu0 %v5132_v15  ;;  %5104 = vmatpush2.bf16.msra.mxu1 %v5132_v15  ;;  %v5144_v15 = vld [vmem:[%s7607_s1 + $0xa0] sm:$0xff]  }
  0x2e   : > { %2272 = vmatprep.subr.bf16.mxu0 %v7612_v1  ;;  %5089 = vmatprep.subr.bf16.mxu1 %v7612_v1 }
  0x31   : > { %2273 = vmatpush2.bf16.msra.mxu0 %v5133_v16  ;;  %5105 = vmatpush2.bf16.msra.mxu1 %v5133_v16  ;;  %v1564_v16 = vsel %vm1496_vm0, %v1427_v44, %v1428_v0  ;;  %v5147_v44 = vld [vmem:[%s7607_s1 + $0x90] sm:$0xff]   ;;  %v5554_v0 = vld [vmem:[%s5264_s25 + $0x58] sm:$0xff] }
  0x32   : > { %2274 = vmatprep.subr.bf16.mxu0 %v7612_v1  ;;  %5090 = vmatprep.subr.bf16.mxu1 %v7612_v1  ;;  %v5492_v28 = vpack.c.bf16 %v1563_v13, %v1564_v16 }
  0x35   : > { %2275 = vmatpush2.bf16.msra.mxu0 %v5134_v17  ;;  %5106 = vmatpush2.bf16.msra.mxu1 %v5134_v17  ;;  %v1515_v17 = vsel %vm1496_vm0, %v1476_v4, %v1477_v5 }
  0x36   : > { %2276 = vmatprep.subr.bf16.mxu0 %v7612_v1  ;;  %5091 = vmatprep.subr.bf16.mxu1 %v7612_v1 }
  0x39   : > { %2277 = vmatpush2.bf16.msra.mxu0 %v5135_v18  ;;  %5107 = vmatpush2.bf16.msra.mxu1 %v5135_v18  ;;  %v1516_v18 = vsel %vm1496_vm0, %v1475_v48, %v1476_v4  ;;  %v5561_v4 = vpack.c.bf16 %v5501_v34, %v5498_v33 }
  0x3a   : > { %2278 = vmatprep.subr.bf16.mxu0 %v7612_v1  ;;  %5092 = vmatprep.subr.bf16.mxu1 %v7612_v1  ;;  %v5494_v29 = vpack.c.bf16 %v1515_v17, %v1516_v18  ;;  %v5150_v18 = vld [vmem:[%s7607_s1 + $0x80] sm:$0xff]  }
  0x3c   : > { %7751 = vst [vmem:[#allocation9_spill] sm:$0xff] %v5494_v29 }
  0x3d   : > { %2279 = vmatpush2.bf16.msra.mxu0 %v5136_v20  ;;  %5108 = vmatpush2.bf16.msra.mxu1 %v5136_v20  ;;  %v1430_v20 = vrot.slane %v5454_v9, 7 }
  0x3e   : > { %2280 = vmatprep.subr.bf16.mxu0 %v7612_v1  ;;  %5093 = vmatprep.subr.bf16.mxu1 %v7612_v1 }
  0x41   : > { %2281 = vmatpush2.bf16.msra.mxu0 %v5137_v22  ;;  %5109 = vmatpush2.bf16.msra.mxu1 %v5137_v22  ;;  %v1431_v22 = vrot.slane %v5457_v10, 7 }
  0x42   : > { %2282 = vmatprep.subr.bf16.mxu0 %v7612_v1  ;;  %5094 = vmatprep.subr.bf16.mxu1 %v7612_v1 }
  0x45   : > { %2283 = vmatpush2.bf16.msra.mxu0 %v5138_v25  ;;  %5110 = vmatpush2.bf16.msra.mxu1 %v5138_v25  ;;  %v5146_v25 = vld [vmem:[%s7607_s1 + $0x98] sm:$0xff]  }
  0x46   : > { %2284 = vmatprep.subr.bf16.mxu0 %v7612_v1  ;;  %5095 = vmatprep.subr.bf16.mxu1 %v7612_v1 }
  0x49   : > { %2285 = vmatpush2.bf16.msra.mxu0 %v5139_v32  ;;  %5111 = vmatpush2.bf16.msra.mxu1 %v5139_v32  ;;  %v1479_v32 = vrot.slane %v5479_v19, 7 }
  0x4a   : > { %2543 = vmatprep.subr.bf16.mxu1 %v7612_v1  ;;  %2832 = vmatprep.subr.bf16.mxu0 %v7612_v1 }
  0x4b   : > { %v1513_v48 = vsel %vm1496_vm0, %v1478_v26, %v1479_v32 }
  0x4c   : > { %2287 = vmatmul.mubr.bf16.vlgmr.msra.gmra.mxu0 %v1569_v41  ;;  %2479 = vmatmul.mubr.bf16.vlgmr.msra.gmra.mxu1 %v5384_v42  ;;  %v5514_v41 = vld [vmem:[%s5264_s25 + $0x1c0] sm:$0xff] }
  0x4d   : > { %2544 = vmatpush1.bf16.msra.mxu1 %v5140_v45  ;;  %2833 = vmatpush1.bf16.msra.mxu0 %v5141_v46  ;;  %v1561_v45 = vsel %vm1496_vm0, %v1430_v20, %v1431_v22  ;;  %v1562_v46 = vsel %vm1496_vm0, %v1429_v2, %v1430_v20  ;;  %v5557_v2 = vld [vmem:[%s5264_s25 + $0x1d0] sm:$0xff]  ;;  %v5573_v13 = vpack.c.bf16 %v5517_v43, %v5514_v41 }
  0x4e   : > { %2545 = vmatprep.subr.bf16.mxu1 %v7612_v1  ;;  %2294 = vmatprep.mubr.bf16.mxu0 %v1606_v49  ;;  %v1514_v49 = vsel %vm1496_vm0, %v1477_v5, %v1478_v26  ;;  %v5546_v57 = vpack.c.bf16 %v1561_v45, %v1562_v46  ;;  %v5564_v5 = vld [vmem:[%s5264_s25 + $0x1d8] sm:$0xff]  ;;  %v1435_v26 = vrot.slane %v5554_v0, 7 }
  0x4f   : > { %2486 = vmatprep.mubr.bf16.mxu1 %v5405_v51  ;;  %2834 = vmatprep.subr.bf16.mxu0 %v7612_v1  ;;  %7754 = vst [vmem:[#allocation12_spill] sm:$0xff] %v5573_v13 }
  0x51   : > { %2546 = vmatpush1.bf16.msra.mxu1 %v5142_v50  ;;  %2835 = vmatpush1.bf16.msra.mxu0 %v5145_v53  ;;  %v1432_v50 = vrot.slane %v5498_v33, 7  ;;  %v1480_v53 = vrot.slane %v5514_v41, 7 }
  0x52   : > { %2547 = vmatprep.subr.bf16.mxu1 %v7612_v1  ;;  %2836 = vmatprep.subr.bf16.mxu0 %v7612_v1 }
  0x53   : > { %v1560_v16 = vsel %vm1496_vm0, %v1431_v22, %v1432_v50  ;;  %v1512_v17 = vsel %vm1496_vm0, %v1479_v32, %v1480_v53  ;;  %v1511_v20 = vsel %vm1496_vm0, %v1480_v53, %v1481_v55  ;;  %v1483_v22 = vrot.slane %v5564_v5, 7  ;;  %v5163_v32 = vld [vmem:[%s7607_s1 + $0x108] sm:$0xff]   ;;  %v5152_v53 = vld [vmem:[%s7607_s1 + $0xf0] sm:$0xff]  }
  0x54   : > { %2295 = vmatmul.mubr.bf16.gmra.mxu0 %v1570_v61  ;;  %2487 = vmatmul.mubr.bf16.gmra.mxu1 %v5434_v62  ;;  %v5548_v61 = vpack.c.bf16 %v1513_v48, %v1514_v49  ;;  %v5603_v46 = vpack.c.bf16 %v1511_v20, %v1512_v17  ;;  %v5613_v48 = vpack.c.bf16 %v5564_v5, %v5557_v2  ;;  %v5636_v17 = vld [vmem:[%s5264_s25 + $0x68] sm:$0xff] }
  0x55   : > { %2548 = vmatpush1.bf16.msra.mxu1 %v5143_v63  ;;  %2302 = vmatprep.mubr.bf16.mxu0 %v5443_v3  ;;  %v5551_v63 = vld [vmem:[%s5264_s25 + $0x50] sm:$0xff]  ;;  %v5644_v20 = vld [vmem:[%s5264_s25 + $0x1e8] sm:$0xff] }
  0x56   : > { %2549 = vmatprep.subr.bf16.mxu1 %v7612_v1  ;;  %2494 = vmatprep.mubr.bf16.mxu1 %v5450_v8  ;;  %7753 = vst [vmem:[#allocation11_spill] sm:$0xff] %v5548_v61  ;;  %7756 = vst [vmem:[#allocation14_spill] sm:$0xff] %v5603_v46 }
  0x57   : > { %2837 = vmatpush1.bf16.msra.mxu0 %v5149_v11  ;;  %v5161_v11 = vld [vmem:[%s7607_s1 + $0x110] sm:$0xff]   ;;  %7757 = vst [vmem:[#allocation15_spill] sm:$0xff] %v5613_v48 }
  0x58   : > { %2838 = vmatprep.subr.bf16.mxu0 %v7612_v1 }
  0x59   : > { %2550 = vmatpush1.bf16.msra.mxu1 %v5144_v15  ;;  %v1559_v15 = vsel %vm1496_vm0, %v1432_v50, %v1433_v52  ;;  %v5164_v50 = vld [vmem:[%s7607_s1 + $0x100] sm:$0xff]  }
  0x5a   : > { %2551 = vmatprep.subr.bf16.mxu1 %v7612_v1  ;;  %v5601_v45 = vpack.c.bf16 %v1559_v15, %v1560_v16  ;;  %v5633_v16 = vld [vmem:[%s5264_s25 + $0x60] sm:$0xff] }
  0x5b   : > { %2839 = vmatpush1.bf16.msra.mxu0 %v5153_v27  ;;  %v1482_v27 = vrot.slane %v5557_v2, 7 }
  0x5c   : > { %2303 = vmatmul.mubr.bf16.gmra.mxu0 %v5492_v28  ;;  %2495 = vmatmul.mubr.bf16.gmra.mxu1 %v5494_v29  ;;  %7755 = vst [vmem:[#allocation13_spill] sm:$0xff] %v5601_v45 }
  0x5d   : > { %2552 = vmatpush1.bf16.msra.mxu1 %v5146_v25  ;;  %2310 = vmatprep.mubr.bf16.mxu0 %v5506_v35  ;;  %v1434_v25 = vrot.slane %v5551_v63, 7  ;;  %v1510_v15 = vsel %vm1496_vm0, %v1481_v55, %v1482_v27  ;;  %v1436_v55 = vrot.slane %v5633_v16, 7 }
  0x5e   : > { %2553 = vmatprep.subr.bf16.mxu1 %v7612_v1  ;;  %2502 = vmatprep.mubr.bf16.mxu1 %v5511_v36  ;;  %v5697_v36 = vld [vmem:[%s5264_s25 + $0x1f8] sm:$0xff] }
  0x5f   : > { %2840 = vmatprep.subr.bf16.mxu0 %v7612_v1  ;;  %v1557_v49 = vsel %vm1496_vm0, %v1434_v25, %v1435_v26  ;;  %v1556_v30 = vsel %vm1496_vm0, %v1435_v26, %v1436_v55  ;;  %v5168_v26 = vld [vmem:[%s7607_s1 + $0x170] sm:$0xff]   ;;  %v7767_v51 = vrot.slane %v5697_v36, 7 }
  0x60   : > { %2841 = vmatpush1.bf16.msra.mxu0 %v5157_v47  ;;  %v5608_v47 = vpack.c.bf16 %v5554_v0, %v5551_v63 }
  0x61   : > { %2554 = vmatpush1.bf16.msra.mxu1 %v5147_v44  ;;  %2842 = vmatprep.subr.bf16.mxu0 %v7612_v1  ;;  %v5151_v44 = vld [vmem:[%s7607_s1 + $0xf8] sm:$0xff]  }
  0x62   : > { %2555 = vmatprep.subr.bf16.mxu1 %v7612_v1 }
  0x64   : > { %2311 = vmatmul.mubr.bf16.gmra.mxu0 %v5546_v57  ;;  %2503 = vmatmul.mubr.bf16.gmra.mxu1 %v5548_v61 }
  0x65   : > { %2556 = vmatpush1.bf16.msra.mxu1 %v5148_v56  ;;  %2318 = vmatprep.mubr.bf16.mxu0 %v5561_v4  ;;  %v1558_v56 = vsel %vm1496_vm0, %v1433_v52, %v1434_v25 }
  0x66   : > { %2557 = vmatprep.subr.bf16.mxu1 %v7612_v1  ;;  %2510 = vmatprep.mubr.bf16.mxu1 %v5573_v13  ;;  %v5647_v52 = vpack.c.bf16 %v1557_v49, %v1558_v56  ;;  %v1485_v56 = vrot.slane %v5644_v20, 7  ;;  %v5694_v13 = vld [vmem:[%s5264_s25 + $0x1f0] sm:$0xff] }
  0x67   : > { %2843 = vmatpush1.bf16.msra.mxu0 %v5161_v11  ;;  %v1509_v11 = vsel %vm1496_vm0, %v1482_v27, %v1483_v22  ;;  %v1437_v27 = vrot.slane %v5636_v17, 7 }
  0x68   : > { %2844 = vmatprep.subr.bf16.mxu0 %v7612_v1  ;;  %7758 = vst [vmem:[#allocation16_spill] sm:$0xff] %v5647_v52  ;;  %v5649_v25 = vpack.c.bf16 %v1509_v11, %v1510_v15  ;;  %v5155_v15 = vld [vmem:[%s7607_s1 + $0xe0] sm:$0xff]  }
  0x69   : > { %2558 = vmatpush1.bf16.msra.mxu1 %v5150_v18  ;;  %v5641_v18 = vld [vmem:[%s5264_s25 + $0x1e0] sm:$0xff]  ;;  %v1555_v11 = vsel %vm1496_vm0, %v1436_v55, %v1437_v27 }
  0x6a   : > { %2559 = vmatprep.subr.bf16.mxu1 %v7612_v1  ;;  %7759 = vst [vmem:[#allocation17_spill] sm:$0xff] %v5649_v25  ;;  %v1484_v49 = vrot.slane %v5641_v18, 7  ;;  %v5702_v55 = vpack.c.bf16 %v1555_v11, %v1556_v30  ;;  %v1486_v30 = vrot.slane %v5694_v13, 7 }
  0x6b   : > { %2845 = vmatpush1.bf16.msra.mxu0 %v5163_v32  ;;  %v5154_v32 = vld [vmem:[%s7607_s1 + $0xe8] sm:$0xff]  }
  0x6c   : > { %2319 = vmatmul.mubr.bf16.gmra.mxu0 %v5601_v45  ;;  %2511 = vmatmul.mubr.bf16.gmra.mxu1 %v5603_v46  ;;  %v1507_v31 = vsel %vm1496_vm0, %v1484_v49, %v1485_v56  ;;  %7763 = vst [vmem:[#allocation20_spill] sm:$0xff] %v5702_v55  ;;  %v1505_v12 = vsel %vm1496_vm0, %v1486_v30, %v7767_v51 }
  0x6d   : > { %2560 = vmatpush2.bf16.msra.mxu1 %v5151_v44  ;;  %2326 = vmatprep.mubr.bf16.mxu0 %v5608_v47  ;;  %v5658_v44 = vpack.c.bf16 %v5636_v17, %v5633_v16 }
  0x6e   : > { %2561 = vmatprep.subr.bf16.mxu1 %v7612_v1  ;;  %2518 = vmatprep.mubr.bf16.mxu1 %v5613_v48  ;;  %v5689_v48 = vld [vmem:[%s5264_s25 + $0x78] sm:$0xff] }
  0x6f   : > { %2846 = vmatprep.subr.bf16.mxu0 %v7612_v1  ;;  %7760 = vst [vmem:[#allocation18_spill] sm:$0xff] %v5658_v44  ;;  %v1439_v8 = vrot.slane %v5689_v48, 7 }
  0x70   : > { %2847 = vmatpush1.bf16.msra.mxu0 %v5164_v50  ;;  %v5666_v50 = vpack.c.bf16 %v5644_v20, %v5641_v18 }
  0x71   : > { %2562 = vmatpush2.bf16.msra.mxu1 %v5152_v53  ;;  %2848 = vmatprep.subr.bf16.mxu0 %v7612_v1  ;;  %v5166_v53 = vld [vmem:[%s7607_s1 + $0x178] sm:$0xff]  }
  0x72   : > { %2563 = vmatprep.subr.bf16.mxu1 %v7612_v1  ;;  %7761 = vst [vmem:[#allocation19_spill] sm:$0xff] %v5666_v50  ;;  %v1508_v1 = vsel %vm1496_vm0, %v1483_v22, %v1484_v49  ;;  %v1438_v49 = vrot.slane %v5686_v23, 7 }
  0x73   : > { %v5704_v22 = vpack.c.bf16 %v1507_v31, %v1508_v1  ;;  %v5721_v31 = vpack.c.bf16 %v5697_v36, %v5694_v13  ;;  %v5158_v1 = vld [vmem:[%s7607_s1 + $0xd0] sm:$0xff]  }
  0x74   : > { %2327 = vmatmul.mubr.bf16.gmra.mxu0 %v5647_v52  ;;  %2519 = vmatmul.mubr.bf16.gmra.mxu1 %v5649_v25  ;;  %v1553_v11 = vsel %vm1496_vm0, %v1438_v49, %v1439_v8  ;;  %v5748_v25 = vld [vmem:[%s5264_s25 + $0x88] sm:$0xff] }
  0x75   : > { %2564 = vmatpush2.bf16.msra.mxu1 %v5154_v32  ;;  %2334 = vmatprep.mubr.bf16.mxu0 %v5658_v44  ;;  %v7762_v32 = vmov 0   ;;  %7764 = vst [vmem:[#allocation21_spill] sm:$0xff] %v5704_v22  ;;  %7766 = vst [vmem:[#allocation23_spill] sm:$0xff] %v5721_v31  ;;  %v1441_v61 = vrot.slane %v5748_v25, 7  ;;  %v6101_v44 = vld [vmem:[%s5264_s25 + $0x118] sm:$0xff] }
  0x76   : > { %2565 = vmatprep.subr.bf16.mxu1 %v7762_v32  ;;  %2526 = vmatprep.mubr.bf16.mxu1 %v5666_v50  ;;  %v5156_v50 = vld [vmem:[%s7607_s1 + $0xd8] sm:$0xff]  }
  0x77   : > { %2849 = vmatpush2.bf16.msra.mxu0 %v5166_v53  ;;  %v5714_v53 = vpack.c.bf16 %v5689_v48, %v5686_v23 }
  0x78   : > { %2850 = vmatprep.subr.bf16.mxu0 %v7762_v32 }
  0x79   : > { %2566 = vmatpush2.bf16.msra.mxu1 %v5155_v15  ;;  %7765 = vst [vmem:[#allocation22_spill] sm:$0xff] %v5714_v53  ;;  %v5170_v15 = vld [vmem:[%s7607_s1 + $0x168] sm:$0xff]  }
  0x7a   : > { %2567 = vmatprep.subr.bf16.mxu1 %v7762_v32 }
  0x7b   : > { %2851 = vmatpush2.bf16.msra.mxu0 %v5168_v26  ;;  %v1554_v26 = vsel %vm1496_vm0, %v1437_v27, %v1438_v49  ;;  %v7639_v27 = vrot.slane %v5272_v6, 1  ;;  %v1642_v49 = vrot.slane %v5275_v7, 1  ;;  %v1644_v6 = vrot.slane %v5374_v38, 1  ;;  %v5162_v38 = vld [vmem:[%s7607_s1 + $0x1b8] sm:$0xff]  }
  0x7c   : > { %2335 = vmatmul.mubr.bf16.gmra.mxu0 %v5702_v55  ;;  %2527 = vmatmul.mubr.bf16.gmra.mxu1 %v5704_v22  ;;  %v1506_v22 = vsel %vm1496_vm0, %v1485_v56, %v1486_v30  ;;  %v5754_v51 = vpack.c.bf16 %v1553_v11, %v1554_v26  ;;  %v1643_v56 = vrot.slane %v5371_v37, 1  ;;  %v5159_v30 = vld [vmem:[%s7607_s1 + $0xc8] sm:$0xff]   ;;  %v5792_v26 = vld [vmem:[%s5264_s25 + $0x90] sm:$0xff] }
  0x7d   : > { %2568 = vmatpush2.bf16.msra.mxu1 %v5156_v50  ;;  %2342 = vmatprep.mubr.bf16.mxu0 %v5714_v53  ;;  %v5745_v50 = vld [vmem:[%s5264_s25 + $0x80] sm:$0xff]  ;;  %v5756_v46 = vpack.c.bf16 %v1505_v12, %v1506_v22  ;;  %v1784_v37 = vsel %vm1713_vm1, %v7639_v27, %v1642_v49  ;;  %v5173_v27 = vld [vmem:[%s7607_s1 + $0x158] sm:$0xff]   ;;  %v1659_v53 = vrot.slane %v5792_v26, 1 }
  0x7e   : > { %2569 = vmatprep.subr.bf16.mxu1 %v7762_v32  ;;  %2534 = vmatprep.mubr.bf16.mxu1 %v5721_v31  ;;  %7768 = vst [vmem:[#allocation24_spill] sm:$0xff] %v5754_v51  ;;  %v1440_v31 = vrot.slane %v5745_v50, 7  ;;  %v5766_v7 = vpack.c.bf16 %v5748_v25, %v5745_v50  ;;  %v5171_v12 = vld [vmem:[%s7607_s1 + $0x160] sm:$0xff]  }
  0x7f   : > { %2852 = vmatprep.subr.bf16.mxu0 %v7762_v32  ;;  %7769 = vst [vmem:[#allocation25_spill] sm:$0xff] %v5756_v46  ;;  %v5160_v22 = vld [vmem:[%s7607_s1 + $0xc0] sm:$0xff]  }
  0x80   : > { %2853 = vmatpush2.bf16.msra.mxu0 %v5170_v15  ;;  %7770 = vst [vmem:[#allocation26_spill] sm:$0xff] %v5766_v7  ;;  %v1552_v11 = vsel %vm1496_vm0, %v1439_v8, %v1440_v31  ;;  %v1783_v15 = vsel %vm1713_vm1, %v1642_v49, %v1643_v56  ;;  %v1645_v8 = vrot.slane %v5414_v54, 1  ;;  %v5175_v54 = vld [vmem:[%s7607_s1 + $0x150] sm:$0xff]  }
  0x81   : > { %2570 = vmatpush2.bf16.msra.mxu1 %v5158_v1  ;;  %2854 = vmatprep.subr.bf16.mxu0 %v7762_v32  ;;  %v1551_v1 = vsel %vm1496_vm0, %v1440_v31, %v1441_v61  ;;  %v1786_v49 = vpack.c.bf16 %v1783_v15, %v1784_v37  ;;  %v5833_v15 = vld [vmem:[%s5264_s25 + $0xa8] sm:$0xff] }
  0x82   : > { %2571 = vmatprep.subr.bf16.mxu1 %v7762_v32  ;;  %v5802_v31 = vpack.c.bf16 %v1551_v1, %v1552_v11  ;;  %v1781_v37 = vsel %vm1713_vm1, %v1644_v6, %v1645_v8  ;;  %v1782_v1 = vsel %vm1713_vm1, %v1643_v56, %v1644_v6  ;;  %v5830_v11 = vld [vmem:[%s5264_s25 + $0xa0] sm:$0xff]  ;;  %v1646_v6 = vrot.slane %v5423_v58, 1  ;;  %v5167_v58 = vld [vmem:[%s7607_s1 + $0x1a8] sm:$0xff]  }
  0x83   : > { %v1445_v29 = vrot.slane %v5833_v15, 7 }
  0x84   : > { %2343 = vmatmul.mubr.bf16.gmra.mxu0 %v5754_v51  ;;  %2535 = vmatmul.mubr.bf16.gmra.mxu1 %v5756_v46  ;;  %7771 = vst [vmem:[#allocation27_spill] sm:$0xff] %v5802_v31 }
  0x85   : > { %2572 = vmatpush2.bf16.msra.mxu1 %v5159_v30  ;;  %2350 = vmatprep.mubr.bf16.mxu0 %v5766_v7  ;;  %v5795_v30 = vld [vmem:[%s5264_s25 + $0x98] sm:$0xff] }
  0x86   : > { %2573 = vmatprep.subr.bf16.mxu1 %v7762_v32  ;;  %2575 = vmatprep.mubr.bf16.mxu1 %v5492_v28  ;;  %v1442_v28 = vrot.slane %v5792_v26, 7  ;;  %v1443_v46 = vrot.slane %v5795_v30, 7 }
  0x87   : > { %2855 = vmatpush2.bf16.msra.mxu0 %v5171_v12  ;;  %v5809_v12 = vpack.c.bf16 %v5795_v30, %v5792_v26  ;;  %v1691_v26 = vrot.slane %v5379_v39, 1 }
  0x88   : > { %2856 = vmatprep.subr.bf16.mxu0 %v7762_v32 }
  0x89   : > { %2574 = vmatpush2.bf16.msra.mxu1 %v5160_v22  ;;  %7772 = vst [vmem:[#allocation28_spill] sm:$0xff] %v5809_v12  ;;  %v1549_v22 = vsel %vm1496_vm0, %v1442_v28, %v1443_v46 }
  0x8a   : > { %3121 = vmatprep.subr.bf16.mxu1 %v7762_v32 }
  0x8b   : > { %2857 = vmatpush2.bf16.msra.mxu0 %v5173_v27  ;;  %v1550_v27 = vsel %vm1496_vm0, %v1441_v61, %v1442_v28  ;;  %v1647_v61 = vrot.slane %v5454_v9, 1  ;;  %v1787_v28 = vpack.c.bf16 %v1781_v37, %v1782_v1  ;;  %v5178_v9 = vld [vmem:[%s7607_s1 + $0x140] sm:$0xff]  }
  0x8c   : > { %2351 = vmatmul.mubr.bf16.gmra.mxu0 %v5802_v31  ;;  %2576 = vmatmul.mubr.bf16.vlgmr.msra.gmra.mxu1 %v1786_v49  ;;  %v5165_v49 = vld [vmem:[%s7607_s1 + $0x1b0] sm:$0xff]   ;;  %v5845_v56 = vpack.c.bf16 %v1549_v22, %v1550_v27  ;;  %v5867_v22 = vld [vmem:[%s7607_s1 + $0x238] sm:$0xff]  }
  0x8d   : > { %2358 = vmatprep.mubr.bf16.mxu0 %v5809_v12  ;;  %2583 = vmatprep.mubr.bf16.mxu1 %v5546_v57  ;;  %v5177_v57 = vld [vmem:[%s7607_s1 + $0x148] sm:$0xff]   ;;  %v1779_v37 = vsel %vm1713_vm1, %v1646_v6, %v1647_v61 }
  0x8e   : > { %3122 = vmatpush1.bf16.msra.mxu1 %v5162_v38  ;;  %2858 = vmatprep.subr.bf16.mxu0 %v7762_v32  ;;  %7773 = vst [vmem:[#allocation29_spill] sm:$0xff] %v5845_v56  ;;  %v1444_v38 = vrot.slane %v5830_v11, 7 }
  0x8f   : > { %3123 = vmatprep.subr.bf16.mxu1 %v7762_v32  ;;  %2859 = vmatpush2.bf16.msra.mxu0 %v5175_v54  ;;  %v5852_v54 = vpack.c.bf16 %v5833_v15, %v5830_v11 }
  0x90   : > { %2860 = vmatprep.subr.bf16.mxu0 %v7762_v32  ;;  %v1547_v27 = vsel %vm1496_vm0, %v1444_v38, %v1445_v29  ;;  %v1548_v1 = vsel %vm1496_vm0, %v1443_v46, %v1444_v38  ;;  %v1649_v46 = vrot.slane %v5498_v33, 1 }
  0x91   : > { %7774 = vst [vmem:[#allocation30_spill] sm:$0xff] %v5852_v54  ;;  %v5890_v38 = vpack.c.bf16 %v1547_v27, %v1548_v1  ;;  %v5918_v27 = vld [vmem:[%s5264_s25 + $0xc0] sm:$0xff]  ;;  %v5921_v1 = vld [vmem:[%s5264_s25 + $0xc8] sm:$0xff] }
  0x92   : > { %3124 = vmatpush1.bf16.msra.mxu1 %v5165_v49  ;;  %v1780_v49 = vsel %vm1713_vm1, %v1645_v8, %v1646_v6 }
  0x93   : > { %3125 = vmatprep.subr.bf16.mxu1 %v7762_v32  ;;  %2861 = vmatpush2.bf16.msra.mxu0 %v5177_v57  ;;  %v5878_v57 = vld [vmem:[%s5264_s25 + $0xb0] sm:$0xff]  ;;  %7775 = vst [vmem:[#allocation31_spill] sm:$0xff] %v5890_v38  ;;  %v5892_v8 = vpack.c.bf16 %v1779_v37, %v1780_v49 }
  0x94   : > { %2359 = vmatmul.mubr.bf16.gmra.mxu0 %v5845_v56  ;;  %2584 = vmatmul.mubr.bf16.gmra.mxu1 %v1787_v28  ;;  %v5881_v28 = vld [vmem:[%s5264_s25 + $0xb8] sm:$0xff]  ;;  %v1446_v6 = vrot.slane %v5878_v57, 7  ;;  %v5174_v49 = vld [vmem:[%s7607_s1 + $0x190] sm:$0xff]  }
  0x95   : > { %2366 = vmatprep.mubr.bf16.mxu0 %v5852_v54  ;;  %2591 = vmatprep.mubr.bf16.mxu1 %v5601_v45  ;;  %v5169_v54 = vld [vmem:[%s7607_s1 + $0x1a0] sm:$0xff]   ;;  %v1648_v45 = vrot.slane %v5457_v10, 1  ;;  %v5899_v12 = vpack.c.bf16 %v5881_v28, %v5878_v57  ;;  %v5172_v10 = vld [vmem:[%s7607_s1 + $0x198] sm:$0xff]  }
  0x96   : > { %3126 = vmatpush1.bf16.msra.mxu1 %v5167_v58  ;;  %2862 = vmatprep.subr.bf16.mxu0 %v7762_v32  ;;  %v1447_v58 = vrot.slane %v5881_v28, 7 }
  0x97   : > { %3127 = vmatprep.subr.bf16.mxu1 %v7762_v32  ;;  %2863 = vmatpush2.bf16.msra.mxu0 %v5178_v9  ;;  %7776 = vst [vmem:[#allocation32_spill] sm:$0xff] %v5899_v12  ;;  %v1777_v33 = vsel %vm1713_vm1, %v1648_v45, %v1649_v46  ;;  %v1546_v9 = vsel %vm1496_vm0, %v1445_v29, %v1446_v6 }
  0x98   : > { %5000 = vmatprep.subr.bf16.mxu0 %v5867_v22  ;;  %v1778_v37 = vsel %vm1713_vm1, %v1647_v61, %v1648_v45  ;;  %v1448_v45 = vrot.slane %v5918_v27, 7  ;;  %v1449_v61 = vrot.slane %v5921_v1, 7 }
  0x99   : > { %v5931_v29 = vpack.c.bf16 %v1777_v33, %v1778_v37  ;;  %v5959_v37 = vld [vmem:[%s5264_s25 + $0xd8] sm:$0xff] }
  0x9a   : > { %3128 = vmatpush1.bf16.msra.mxu1 %v5169_v54  ;;  %v1545_v54 = vsel %vm1496_vm0, %v1446_v6, %v1447_v58  ;;  %v5937_v6 = vpack.c.bf16 %v5921_v1, %v5918_v27  ;;  %v1544_v33 = vsel %vm1496_vm0, %v1447_v58, %v1448_v45 }
  0x9b   : > { %3129 = vmatprep.subr.bf16.mxu1 %v7762_v32  ;;  %v5929_v62 = vpack.c.bf16 %v1545_v54, %v1546_v9  ;;  %v5956_v9 = vld [vmem:[%s5264_s25 + $0xd0] sm:$0xff] }
  0x9c   : > { %2367 = vmatmul.mubr.bf16.gmra.mxu0 %v5890_v38  ;;  %2592 = vmatmul.mubr.bf16.gmra.mxu1 %v5892_v8  ;;  %7778 = vst [vmem:[#allocation34_spill] sm:$0xff] %v5937_v6 }
  0x9d   : > { %2374 = vmatprep.mubr.bf16.mxu0 %v5899_v12  ;;  %2599 = vmatprep.mubr.bf16.mxu1 %v5647_v52  ;;  %v1650_v52 = vrot.slane %v5501_v34, 1  ;;  %v1651_v12 = vrot.slane %v5551_v63, 1  ;;  %7777 = vst [vmem:[#allocation33_spill] sm:$0xff] %v5929_v62  ;;  %v5176_v34 = vld [vmem:[%s7607_s1 + $0x188] sm:$0xff]  }
  0x9e   : > { %3130 = vmatpush1.bf16.msra.mxu1 %v5172_v10  ;;  %v1543_v10 = vsel %vm1496_vm0, %v1448_v45, %v1449_v61  ;;  %v5975_v45 = vpack.c.bf16 %v5959_v37, %v5956_v9 }
  0x9f   : > { %3131 = vmatprep.subr.bf16.mxu1 %v7762_v32  ;;  %v1775_v63 = vsel %vm1713_vm1, %v1650_v52, %v1651_v12  ;;  %v1776_v54 = vsel %vm1713_vm1, %v1649_v46, %v1650_v52  ;;  %v5967_v7 = vpack.c.bf16 %v1543_v10, %v1544_v33  ;;  %v1450_v52 = vrot.slane %v5956_v9, 7  ;;  %v5994_v33 = vld [vmem:[%s5264_s25 + $0xe0] sm:$0xff] }
  0xa0   : > { %v5969_v58 = vpack.c.bf16 %v1775_v63, %v1776_v54  ;;  %v1451_v46 = vrot.slane %v5959_v37, 7  ;;  %7781 = vst [vmem:[#allocation37_spill] sm:$0xff] %v5975_v45  ;;  %v5997_v54 = vld [vmem:[%s5264_s25 + $0xe8] sm:$0xff] }
  0xa1   : > { %7779 = vst [vmem:[#allocation35_spill] sm:$0xff] %v5967_v7  ;;  %v1542_v63 = vsel %vm1496_vm0, %v1449_v61, %v1450_v52 }
  0xa2   : > { %3132 = vmatpush1.bf16.msra.mxu1 %v5174_v49  ;;  %v5179_v49 = vld [vmem:[%s7607_s1 + $0x180] sm:$0xff]   ;;  %7780 = vst [vmem:[#allocation36_spill] sm:$0xff] %v5969_v58 }
  0xa3   : > { %3133 = vmatprep.subr.bf16.mxu1 %v7762_v32 }
  0xa4   : > { %2375 = vmatmul.mubr.bf16.gmra.mxu0 %v5929_v62  ;;  %2600 = vmatmul.mubr.bf16.gmra.mxu1 %v5931_v29 }
  0xa5   : > { %2382 = vmatprep.mubr.bf16.mxu0 %v5937_v6  ;;  %2607 = vmatprep.mubr.bf16.mxu1 %v5702_v55  ;;  %v1652_v55 = vrot.slane %v5554_v0, 1  ;;  %v1653_v6 = vrot.slane %v5633_v16, 1  ;;  %v5181_v0 = vld [vmem:[%s7607_s1 + $0x1f8] sm:$0xff]  }
  0xa6   : > { %3134 = vmatpush1.bf16.msra.mxu1 %v5176_v34  ;;  %v1541_v34 = vsel %vm1496_vm0, %v1450_v52, %v1451_v46  ;;  %v6013_v52 = vpack.c.bf16 %v5997_v54, %v5994_v33 }
  0xa7   : > { %3135 = vmatprep.subr.bf16.mxu1 %v7762_v32  ;;  %v1773_v16 = vsel %vm1713_vm1, %v1652_v55, %v1653_v6  ;;  %v1774_v10 = vsel %vm1713_vm1, %v1651_v12, %v1652_v55  ;;  %v6005_v42 = vpack.c.bf16 %v1541_v34, %v1542_v63  ;;  %v1452_v55 = vrot.slane %v5994_v33, 7  ;;  %v6032_v63 = vld [vmem:[%s5264_s25 + $0xf0] sm:$0xff] }
  0xa8   : > { %v6007_v61 = vpack.c.bf16 %v1773_v16, %v1774_v10  ;;  %v1453_v12 = vrot.slane %v5997_v54, 7  ;;  %7784 = vst [vmem:[#allocation40_spill] sm:$0xff] %v6013_v52  ;;  %v6035_v10 = vld [vmem:[%s5264_s25 + $0xf8] sm:$0xff] }
  0xa9   : > { %7782 = vst [vmem:[#allocation38_spill] sm:$0xff] %v6005_v42  ;;  %v1540_v16 = vsel %vm1496_vm0, %v1451_v46, %v1452_v55  ;;  %v1656_v46 = vrot.slane %v5689_v48, 1 }
  0xaa   : > { %3136 = vmatpush1.bf16.msra.mxu1 %v5179_v49  ;;  %v5182_v49 = vld [vmem:[%s7607_s1 + $0x1f0] sm:$0xff]   ;;  %7783 = vst [vmem:[#allocation39_spill] sm:$0xff] %v6007_v61 }
  0xab   : > { %3137 = vmatprep.subr.bf16.mxu1 %v7762_v32 }
  0xac   : > { %2383 = vmatmul.mubr.bf16.gmra.mxu0 %v5967_v7  ;;  %2608 = vmatmul.mubr.bf16.gmra.mxu1 %v5969_v58 }
  0xad   : > { %2390 = vmatprep.mubr.bf16.mxu0 %v5975_v45  ;;  %2615 = vmatprep.mubr.bf16.mxu1 %v5754_v51  ;;  %v1654_v51 = vrot.slane %v5636_v17, 1  ;;  %v1655_v45 = vrot.slane %v5686_v23, 1  ;;  %v5184_v17 = vld [vmem:[%s7607_s1 + $0x1e8] sm:$0xff]  }
  0xae   : > { %3138 = vmatpush2.bf16.msra.mxu1 %v5181_v0  ;;  %v1539_v0 = vsel %vm1496_vm0, %v1452_v55, %v1453_v12  ;;  %v1657_v55 = vrot.slane %v5745_v50, 1 }
  0xaf   : > { %3139 = vmatprep.subr.bf16.mxu1 %v7762_v32  ;;  %v1771_v23 = vsel %vm1713_vm1, %v1654_v51, %v1655_v45  ;;  %v1772_v34 = vsel %vm1713_vm1, %v1653_v6, %v1654_v51  ;;  %v1455_v51 = vrot.slane %v6035_v10, 7  ;;  %v6048_v6 = vpack.c.bf16 %v6035_v10, %v6032_v63 }
  0xb0   : > { %v1769_v50 = vsel %vm1713_vm1, %v1656_v46, %v1657_v55 }
  0xb1   : > { %7787 = vst [vmem:[#allocation43_spill] sm:$0xff] %v6048_v6 }
  0xb2   : > { %3140 = vmatpush2.bf16.msra.mxu1 %v5182_v49  ;;  %v6038_v49 = vpack.c.bf16 %v1539_v0, %v1540_v16  ;;  %v6063_v0 = vld [vmem:[%s5264_s25 + $0x100] sm:$0xff]  ;;  %v6066_v16 = vld [vmem:[%s5264_s25 + $0x108] sm:$0xff] }
  0xb3   : > { %3141 = vmatprep.subr.bf16.mxu1 %v7762_v32 }
  0xb4   : > { %2391 = vmatmul.mubr.bf16.gmra.mxu0 %v6005_v42  ;;  %2616 = vmatmul.mubr.bf16.gmra.mxu1 %v6007_v61  ;;  %7785 = vst [vmem:[#allocation41_spill] sm:$0xff] %v6038_v49 }
  0xb5   : > { %2398 = vmatprep.mubr.bf16.mxu0 %v6013_v52  ;;  %2623 = vmatprep.mubr.bf16.mxu1 %v5802_v31  ;;  %v6040_v31 = vpack.c.bf16 %v1771_v23, %v1772_v34  ;;  %v1454_v52 = vrot.slane %v6032_v63, 7 }
  0xb6   : > { %3142 = vmatpush2.bf16.msra.mxu1 %v5184_v17  ;;  %v1770_v17 = vsel %vm1713_vm1, %v1655_v45, %v1656_v46  ;;  %v6078_v45 = vpack.c.bf16 %v6066_v16, %v6063_v0  ;;  %v5196_v46 = vld [vmem:[%s5264_s25 + $0x188] sm:$0xff] }
  0xb7   : > { %3143 = vmatprep.subr.bf16.mxu1 %v7762_v32  ;;  %7786 = vst [vmem:[#allocation42_spill] sm:$0xff] %v6040_v31  ;;  %v1538_v23 = vsel %vm1496_vm0, %v1453_v12, %v1454_v52  ;;  %v1537_v48 = vsel %vm1496_vm0, %v1454_v52, %v1455_v51  ;;  %v6070_v12 = vpack.c.bf16 %v1769_v50, %v1770_v17  ;;  %v1658_v52 = vrot.slane %v5748_v25, 1  ;;  %v5185_v25 = vld [vmem:[%s7607_s1 + $0x1e0] sm:$0xff]  }
  0xb8   : > { %v6068_v34 = vpack.c.bf16 %v1537_v48, %v1538_v23  ;;  %7790 = vst [vmem:[#allocation46_spill] sm:$0xff] %v6078_v45  ;;  %v1690_v23 = vrot.slane %v5196_v46, 1 }
  0xb9   : > { %7789 = vst [vmem:[#allocation45_spill] sm:$0xff] %v6070_v12  ;;  %v1767_v17 = vsel %vm1713_vm1, %v1658_v52, %v1659_v53  ;;  %v1768_v46 = vsel %vm1713_vm1, %v1657_v55, %v1658_v52  ;;  %v1459_v55 = vrot.slane %v6101_v44, 7  ;;  %v1661_v52 = vrot.slane %v5830_v11, 1 }
  0xba   : > { %7788 = vst [vmem:[#allocation44_spill] sm:$0xff] %v6068_v34  ;;  %3144 = vmatpush2.bf16.msra.mxu1 %v5185_v25 }
  0xbb   : > { %3145 = vmatprep.subr.bf16.mxu1 %v7762_v32 }
  0xbc   : > { %2399 = vmatmul.mubr.bf16.gmra.mxu0 %v6038_v49  ;;  %2624 = vmatmul.mubr.bf16.gmra.mxu1 %v6040_v31  ;;  %v6104_v31 = vld [vmem:[%s5264_s25 + $0x180] sm:$0xff] }
  0xbd   : > { %2406 = vmatprep.mubr.bf16.mxu0 %v6048_v6  ;;  %2631 = vmatprep.mubr.bf16.mxu1 %v5845_v56  ;;  %v1456_v6 = vrot.slane %v6063_v0, 7  ;;  %v1457_v56 = vrot.slane %v6066_v16, 7  ;;  %v7682_v39 = vrot.slane %v6104_v31, 1 }
  0xbf   : > { %v1535_v48 = vsel %vm1496_vm0, %v1456_v6, %v1457_v56  ;;  %v1536_v50 = vsel %vm1496_vm0, %v1455_v51, %v1456_v6  ;;  %v6111_v6 = vpack.c.bf16 %v1767_v17, %v1768_v46  ;;  %v1692_v17 = vrot.slane %v5382_v40, 1 }
  0xc0   : > { %v6109_v51 = vpack.c.bf16 %v1535_v48, %v1536_v50  ;;  %v1736_v48 = vsel %vm1713_vm1, %v7682_v39, %v1690_v23  ;;  %v1693_v46 = vrot.slane %v5427_v59, 1  ;;  %v6146_v39 = vld [vmem:[%s5264_s25 + $0x128] sm:$0xff]  ;;  %v1663_v59 = vrot.slane %v5878_v57, 1 }
  0xc1   : > { %7792 = vst [vmem:[#allocation48_spill] sm:$0xff] %v6111_v6 }
  0xc2   : > { %7791 = vst [vmem:[#allocation47_spill] sm:$0xff] %v6109_v51 }
  0xc4   : > { %2407 = vmatmul.mubr.bf16.gmra.mxu0 %v6068_v34  ;;  %2632 = vmatmul.mubr.bf16.gmra.mxu1 %v6070_v12  ;;  %v6098_v12 = vld [vmem:[%s5264_s25 + $0x110] sm:$0xff] }
  0xc5   : > { %2414 = vmatprep.mubr.bf16.mxu0 %v6078_v45  ;;  %2639 = vmatprep.mubr.bf16.mxu1 %v5890_v38  ;;  %v1660_v38 = vrot.slane %v5795_v30, 1  ;;  %v1458_v45 = vrot.slane %v6098_v12, 7  ;;  %v6118_v25 = vpack.c.bf16 %v6101_v44, %v6098_v12  ;;  %v1735_v30 = vsel %vm1713_vm1, %v1690_v23, %v1691_v26 }
  0xc6   : > { %v6126_v50 = vpack.c.bf16 %v1735_v30, %v1736_v48  ;;  %v6143_v48 = vld [vmem:[%s5264_s25 + $0x120] sm:$0xff] }
  0xc7   : > { %7793 = vst [vmem:[#allocation49_spill] sm:$0xff] %v6118_v25  ;;  %v1533_v11 = vsel %vm1496_vm0, %v1458_v45, %v1459_v55  ;;  %v1534_v23 = vsel %vm1496_vm0, %v1457_v56, %v1458_v45  ;;  %v1765_v30 = vsel %vm1713_vm1, %v1660_v38, %v1661_v52  ;;  %v1766_v40 = vsel %vm1713_vm1, %v1659_v53, %v1660_v38 }
  0xc8   : > { %7794 = vst [vmem:[#allocation50_spill] sm:$0xff] %v6126_v50  ;;  %v1662_v50 = vrot.slane %v5833_v15, 1  ;;  %v1460_v56 = vrot.slane %v6143_v48, 7  ;;  %v1461_v45 = vrot.slane %v6146_v39, 7  ;;  %v6158_v53 = vpack.c.bf16 %v6146_v39, %v6143_v48 }
  0xc9   : > { %v1733_v38 = vsel %vm1713_vm1, %v1692_v17, %v1693_v46  ;;  %v1734_v15 = vsel %vm1713_vm1, %v1691_v26, %v1692_v17 }
  0xca   : > { %7797 = vst [vmem:[#allocation53_spill] sm:$0xff] %v6158_v53  ;;  %v6164_v57 = vpack.c.bf16 %v1733_v38, %v1734_v15  ;;  %v1531_v26 = vsel %vm1496_vm0, %v1460_v56, %v1461_v45  ;;  %v1532_v17 = vsel %vm1496_vm0, %v1459_v55, %v1460_v56  ;;  %v6184_v38 = vld [vmem:[%s5264_s25 + $0x138] sm:$0xff]  ;;  %v1664_v15 = vrot.slane %v5881_v28, 1 }
  0xcb   : > { %v1463_v56 = vrot.slane %v6184_v38, 7 }
  0xcc   : > { %2415 = vmatmul.mubr.bf16.gmra.mxu0 %v6109_v51  ;;  %2640 = vmatmul.mubr.bf16.gmra.mxu1 %v6111_v6  ;;  %7798 = vst [vmem:[#allocation54_spill] sm:$0xff] %v6164_v57 }
  0xcd   : > { %2422 = vmatprep.mubr.bf16.mxu0 %v6118_v25  ;;  %2647 = vmatprep.mubr.bf16.mxu1 %v5929_v62  ;;  %v6150_v25 = vpack.c.bf16 %v1533_v11, %v1534_v23  ;;  %v6152_v62 = vpack.c.bf16 %v1765_v30, %v1766_v40  ;;  %v1694_v11 = vrot.slane %v5430_v60, 1  ;;  %v1763_v23 = vsel %vm1713_vm1, %v1662_v50, %v1663_v59  ;;  %v6181_v40 = vld [vmem:[%s5264_s25 + $0x130] sm:$0xff] }
  0xce   : > { %v1695_v30 = vrot.slane %v5466_v14, 1  ;;  %v1764_v60 = vsel %vm1713_vm1, %v1661_v52, %v1662_v50  ;;  %v5187_v14 = vld [vmem:[%s7607_s1 + $0x1d8] sm:$0xff]   ;;  %v1462_v55 = vrot.slane %v6181_v40, 7  ;;  %v1665_v52 = vrot.slane %v5918_v27, 1 }
  0xcf   : > { %7795 = vst [vmem:[#allocation51_spill] sm:$0xff] %v6150_v25  ;;  %7796 = vst [vmem:[#allocation52_spill] sm:$0xff] %v6152_v62  ;;  %3146 = vmatpush2.bf16.msra.mxu1 %v5187_v14  ;;  %v6200_v50 = vpack.c.bf16 %v6184_v38, %v6181_v40  ;;  %v6223_v14 = vld [vmem:[%s5264_s25 + $0x140] sm:$0xff] }
  0xd0   : > { %3147 = vmatprep.subr.bf16.mxu1 %v7762_v32  ;;  %v1731_v28 = vsel %vm1713_vm1, %v1694_v11, %v1695_v30  ;;  %v1529_v27 = vsel %vm1496_vm0, %v1462_v55, %v1463_v56 }
  0xd1   : > { %7801 = vst [vmem:[#allocation57_spill] sm:$0xff] %v6200_v50 }
  0xd4   : > { %2423 = vmatmul.mubr.bf16.gmra.mxu0 %v6150_v25  ;;  %2648 = vmatmul.mubr.bf16.gmra.mxu1 %v6152_v62 }
  0xd5   : > { %2430 = vmatprep.mubr.bf16.mxu0 %v6158_v53  ;;  %2655 = vmatprep.mubr.bf16.mxu1 %v5967_v7  ;;  %v6190_v7 = vpack.c.bf16 %v1531_v26, %v1532_v17  ;;  %v6192_v53 = vpack.c.bf16 %v1763_v23, %v1764_v60  ;;  %v1732_v23 = vsel %vm1713_vm1, %v1693_v46, %v1694_v11  ;;  %v1696_v17 = vrot.slane %v5479_v19, 1 }
  0xd6   : > { %v6206_v26 = vpack.c.bf16 %v1731_v28, %v1732_v23  ;;  %v1697_v60 = vrot.slane %v5514_v41, 1  ;;  %v1530_v46 = vsel %vm1496_vm0, %v1461_v45, %v1462_v55  ;;  %v1761_v11 = vsel %vm1713_vm1, %v1664_v15, %v1665_v52  ;;  %v6226_v28 = vld [vmem:[%s5264_s25 + $0x148] sm:$0xff] }
  0xd7   : > { %7799 = vst [vmem:[#allocation55_spill] sm:$0xff] %v6190_v7  ;;  %7800 = vst [vmem:[#allocation56_spill] sm:$0xff] %v6192_v53  ;;  %v1762_v19 = vsel %vm1713_vm1, %v1663_v59, %v1664_v15  ;;  %v1666_v23 = vrot.slane %v5921_v1, 1  ;;  %v1667_v41 = vrot.slane %v5956_v9, 1  ;;  %v1464_v45 = vrot.slane %v6223_v14, 7 }
  0xd8   : > { %v1465_v55 = vrot.slane %v6226_v28, 7  ;;  %v6238_v59 = vpack.c.bf16 %v6226_v28, %v6223_v14  ;;  %v1729_v15 = vsel %vm1713_vm1, %v1696_v17, %v1697_v60  ;;  %v1730_v1 = vsel %vm1713_vm1, %v1695_v30, %v1696_v17 }
  0xd9   : > { %v6244_v9 = vpack.c.bf16 %v1729_v15, %v1730_v1  ;;  %v1759_v17 = vsel %vm1713_vm1, %v1666_v23, %v1667_v41  ;;  %v6264_v15 = vld [vmem:[%s5264_s25 + $0x158] sm:$0xff] }
  0xda   : > { %7804 = vst [vmem:[#allocation60_spill] sm:$0xff] %v6238_v59  ;;  %v1527_v30 = vsel %vm1496_vm0, %v1464_v45, %v1465_v55 }
  0xdb   : > { %7805 = vst [vmem:[#allocation61_spill] sm:$0xff] %v6244_v9 }
  0xdc   : > { %2431 = vmatmul.mubr.bf16.gmra.mxu0 %v6190_v7  ;;  %2656 = vmatmul.mubr.bf16.gmra.mxu1 %v6192_v53 }
  0xdd   : > { %2438 = vmatprep.mubr.bf16.mxu0 %v6200_v50  ;;  %2663 = vmatprep.mubr.bf16.mxu1 %v6005_v42  ;;  %v6230_v50 = vpack.c.bf16 %v1529_v27, %v1530_v46  ;;  %v6232_v42 = vpack.c.bf16 %v1761_v11, %v1762_v19  ;;  %v1698_v27 = vrot.slane %v5517_v43, 1  ;;  %v1528_v46 = vsel %vm1496_vm0, %v1463_v56, %v1464_v45  ;;  %v6261_v19 = vld [vmem:[%s5264_s25 + $0x150] sm:$0xff] }
  0xde   : > { %v1699_v11 = vrot.slane %v5557_v2, 1  ;;  %v1760_v43 = vsel %vm1713_vm1, %v1665_v52, %v1666_v23  ;;  %v5188_v2 = vld [vmem:[%s7607_s1 + $0x1d0] sm:$0xff]   ;;  %v1668_v56 = vrot.slane %v5959_v37, 1  ;;  %v6270_v1 = vpack.c.bf16 %v1527_v30, %v1528_v46 }
  0xdf   : > { %7802 = vst [vmem:[#allocation58_spill] sm:$0xff] %v6230_v50  ;;  %7803 = vst [vmem:[#allocation59_spill] sm:$0xff] %v6232_v42  ;;  %3148 = vmatpush2.bf16.msra.mxu1 %v5188_v2  ;;  %v6272_v45 = vpack.c.bf16 %v1759_v17, %v1760_v43  ;;  %v1669_v52 = vrot.slane %v5994_v33, 1  ;;  %v6280_v23 = vpack.c.bf16 %v6264_v15, %v6261_v19  ;;  %v1700_v17 = vrot.slane %v5564_v5, 1  ;;  %v6303_v2 = vld [vmem:[%s5264_s25 + $0x160] sm:$0xff] }
  0xe0   : > { %7806 = vst [vmem:[#allocation62_spill] sm:$0xff] %v6270_v1  ;;  %3149 = vmatprep.subr.bf16.mxu1 %v7762_v32  ;;  %v1727_v37 = vsel %vm1713_vm1, %v1698_v27, %v1699_v11  ;;  %v1728_v46 = vsel %vm1713_vm1, %v1697_v60, %v1698_v27  ;;  %v1701_v43 = vrot.slane %v5641_v18, 1  ;;  %v1758_v5 = vsel %vm1713_vm1, %v1667_v41, %v1668_v56 }
  0xe1   : > { %7807 = vst [vmem:[#allocation63_spill] sm:$0xff] %v6272_v45  ;;  %7808 = vst [vmem:[#allocation64_spill] sm:$0xff] %v6280_v23  ;;  %v6286_v30 = vpack.c.bf16 %v1727_v37, %v1728_v46  ;;  %v1757_v27 = vsel %vm1713_vm1, %v1668_v56, %v1669_v52  ;;  %v6306_v37 = vld [vmem:[%s5264_s25 + $0x168] sm:$0xff]  ;;  %v1670_v46 = vrot.slane %v5997_v54, 1  ;;  %v1671_v18 = vrot.slane %v6032_v63, 1 }
  0xe2   : > { %v6318_v41 = vpack.c.bf16 %v6306_v37, %v6303_v2  ;;  %v1725_v56 = vsel %vm1713_vm1, %v1700_v17, %v1701_v43  ;;  %v1726_v54 = vsel %vm1713_vm1, %v1699_v11, %v1700_v17 }
  0xe3   : > { %7809 = vst [vmem:[#allocation65_spill] sm:$0xff] %v6286_v30  ;;  %v6324_v63 = vpack.c.bf16 %v1725_v56, %v1726_v54  ;;  %v1756_v17 = vsel %vm1713_vm1, %v1669_v52, %v1670_v46  ;;  %v1673_v52 = vrot.slane %v6063_v0, 1  ;;  %v7816_v0 = vrot.slane %v5341_v24, 7 }
  0xe4   : > { %2439 = vmatmul.mubr.bf16.gmra.mxu0 %v6230_v50  ;;  %2664 = vmatmul.mubr.bf16.gmra.mxu1 %v6232_v42 }
  0xe5   : > { %2446 = vmatprep.mubr.bf16.mxu0 %v6238_v59  ;;  %2671 = vmatprep.mubr.bf16.mxu1 %v6038_v49  ;;  %v1466_v49 = vrot.slane %v6261_v19, 7  ;;  %v1467_v59 = vrot.slane %v6264_v15, 7  ;;  %7812 = vst [vmem:[#allocation68_spill] sm:$0xff] %v6324_v63 }
  0xe7   : > { %v1525_v33 = vsel %vm1496_vm0, %v1466_v49, %v1467_v59  ;;  %v1526_v60 = vsel %vm1496_vm0, %v1465_v55, %v1466_v49  ;;  %v1468_v49 = vrot.slane %v6303_v2, 7  ;;  %v1469_v55 = vrot.slane %v6306_v37, 7 }
  0xe9   : > { %v1523_v11 = vsel %vm1496_vm0, %v1468_v49, %v1469_v55 }
  0xec   : > { %2447 = vmatmul.mubr.bf16.gmra.mxu0 %v6270_v1  ;;  %2672 = vmatmul.mubr.bf16.gmra.mxu1 %v6272_v45 }
  0xed   : > { %2454 = vmatprep.mubr.bf16.mxu0 %v6280_v23  ;;  %2679 = vmatprep.mubr.bf16.mxu1 %v6068_v34  ;;  %v6310_v23 = vpack.c.bf16 %v1525_v33, %v1526_v60  ;;  %v6312_v34 = vpack.c.bf16 %v1757_v27, %v1758_v5  ;;  %v1702_v33 = vrot.slane %v5644_v20, 1  ;;  %v1524_v60 = vsel %vm1496_vm0, %v1467_v59, %v1468_v49  ;;  %v6341_v5 = vld [vmem:[%s5264_s25 + $0x170] sm:$0xff]  ;;  %v5190_v59 = vld [vmem:[%s7607_s1 + $0x1c8] sm:$0xff]  }
  0xee   : > { %v1703_v27 = vrot.slane %v5694_v13, 1  ;;  %v1755_v20 = vsel %vm1713_vm1, %v1670_v46, %v1671_v18  ;;  %3150 = vmatpush2.bf16.msra.mxu1 %v5190_v59  ;;  %v1672_v13 = vrot.slane %v6035_v10, 1  ;;  %v6347_v56 = vpack.c.bf16 %v1523_v11, %v1524_v60  ;;  %v6355_v46 = vld [vmem:[%s5264_s25 + $0x178] sm:$0xff] }
  0xef   : > { %7810 = vst [vmem:[#allocation66_spill] sm:$0xff] %v6310_v23  ;;  %7811 = vst [vmem:[#allocation67_spill] sm:$0xff] %v6312_v34  ;;  %v6349_v54 = vpack.c.bf16 %v1755_v20, %v1756_v17  ;;  %v1470_v49 = vrot.slane %v6341_v5, 7  ;;  %3151 = vmatprep.subr.bf16.mxu1 %v7762_v32  ;;  %v1724_v60 = vsel %vm1713_vm1, %v1701_v43, %v1702_v33  ;;  %v1704_v17 = vrot.slane %v5697_v36, 1 }
  0xf0   : > { %7813 = vst [vmem:[#allocation69_spill] sm:$0xff] %v6347_v56  ;;  %v1723_v10 = vsel %vm1713_vm1, %v1702_v33, %v1703_v27  ;;  %v1753_v33 = vsel %vm1713_vm1, %v1672_v13, %v1673_v52  ;;  %v1754_v59 = vsel %vm1713_vm1, %v1671_v18, %v1672_v13  ;;  %v1674_v32 = vrot.slane %v6066_v16, 1 }
  0xf1   : > { %7814 = vst [vmem:[#allocation70_spill] sm:$0xff] %v6349_v54  ;;  %v6365_v11 = vpack.c.bf16 %v1723_v10, %v1724_v60  ;;  %v1521_v20 = vsel %vm1496_vm0, %v1470_v49, %v7816_v0  ;;  %v1522_v43 = vsel %vm1496_vm0, %v1469_v55, %v1470_v49  ;;  %v6383_v10 = vld [vmem:[%s5264_s25 + $0x200] sm:$0xff]  ;;  %v6388_v0 = vpack.c.bf16 %v1753_v33, %v1754_v59  ;;  %v5186_v59 = vld [vmem:[%s7607_s1 + $0x228] sm:$0xff]  }
  0xf2   : > { %7817 = vst [vmem:[#allocation72_spill] sm:$0xff] %v6383_v10  ;;  %v7702_v24 = vrot.slane %v6383_v10, 1  ;;  %v6386_v60 = vpack.c.bf16 %v1521_v20, %v1522_v43  ;;  %v1722_v18 = vsel %vm1713_vm1, %v1703_v27, %v1704_v17  ;;  %v5191_v27 = vld [vmem:[%s7607_s1 + $0x1c0] sm:$0xff]   ;;  %v1676_v20 = vrot.slane %v6101_v44, 1 }
  0xf3   : > { %7815 = vst [vmem:[#allocation71_spill] sm:$0xff] %v6365_v11  ;;  %7819 = vst [vmem:[#allocation74_spill] sm:$0xff] %v6388_v0  ;;  %3152 = vmatpush2.bf16.msra.mxu1 %v5191_v27 }
  0xf4   : > { %2455 = vmatmul.mubr.bf16.gmra.mxu0 %v6310_v23  ;;  %2680 = vmatmul.mubr.bf16.gmra.mxu1 %v6312_v34  ;;  %7818 = vst [vmem:[#allocation73_spill] sm:$0xff] %v6386_v60  ;;  %v1721_v55 = vsel %vm1713_vm1, %v1704_v17, %v7702_v24  ;;  %v1677_v17 = vrot.slane %v6143_v48, 1 }
  0xf5   : > { %2462 = vmatprep.mubr.bf16.mxu0 %v6318_v41  ;;  %2687 = vmatprep.mubr.bf16.mxu1 %v6109_v51  ;;  %v6359_v51 = vpack.c.bf16 %v6355_v46, %v6341_v5  ;;  %v6398_v13 = vpack.c.bf16 %v1721_v55, %v1722_v18  ;;  %v1678_v18 = vrot.slane %v6146_v39, 1 }
  0xf6   : > { %v1749_v44 = vsel %vm1713_vm1, %v1676_v20, %v1677_v17 }
  0xf7   : > { %7820 = vst [vmem:[#allocation75_spill] sm:$0xff] %v6398_v13 }
  0xfc   : > { %2463 = vmatmul.mubr.bf16.gmra.mxu0 %v6347_v56  ;;  %2688 = vmatmul.mubr.bf16.gmra.mxu1 %v6349_v54 }
  0xfd   : > { %2470 = vmatprep.mubr.bf16.mxu0 %v6359_v51  ;;  %2695 = vmatprep.mubr.bf16.mxu1 %v6150_v25  ;;  %v1675_v25 = vrot.slane %v6098_v12, 1  ;;  %v1752_v12 = vsel %vm1713_vm1, %v1673_v52, %v1674_v32 }
  0xff   : > { %v1751_v16 = vsel %vm1713_vm1, %v1674_v32, %v1675_v25  ;;  %v1750_v32 = vsel %vm1713_vm1, %v1675_v25, %v1676_v20 }
 0x100   : > { %v6411_v49 = vpack.c.bf16 %v1751_v16, %v1752_v12  ;;  %v6438_v55 = vpack.c.bf16 %v1749_v44, %v1750_v32  ;;  %v1679_v16 = vrot.slane %v6181_v40, 1  ;;  %v1748_v40 = vsel %vm1713_vm1, %v1677_v17, %v1678_v18  ;;  %v5192_v32 = vld [vmem:[%s7607_s1 + $0x218] sm:$0xff]  }
 0x102   : > { %7821 = vst [vmem:[#allocation76_spill] sm:$0xff] %v6411_v49  ;;  %7824 = vst [vmem:[#allocation79_spill] sm:$0xff] %v6438_v55  ;;  %v1747_v39 = vsel %vm1713_vm1, %v1678_v18, %v1679_v16 }
 0x104   : > { %2471 = vmatmul.mubr.bf16.gmra.mxu0 %v6386_v60  ;;  %2696 = vmatmul.mubr.bf16.gmra.mxu1 %v6388_v0 }
 0x105   : > { %2703 = vmatprep.mubr.bf16.mxu1 %v6190_v7  ;;  %2864 = vmatprep.mubr.bf16.mxu0 %v5892_v8  ;;  %v5183_v8 = vld [vmem:[%s7607_s1 + $0x230] sm:$0xff]  }
 0x10c   : > { %v6418_v43 = vpop.f32.mrf.mxu0  ;;  %v6420_v33 = vpop.f32.mrf.mxu1  ;;  %2704 = vmatmul.mubr.bf16.gmra.mxu1 %v6411_v49  ;;  %2865 = vmatmul.mubr.bf16.vlgmr.msra.gmra.mxu0 %v5443_v3 }
 0x10d   : > { %7822 = vst [vmem:[#allocation77_spill] sm:$0xff] %v6420_v33  ;;  %5001 = vmatpush3.bf16.msra.mxu0 %v5867_v22  ;;  %2711 = vmatprep.mubr.bf16.mxu1 %v6230_v50  ;;  %v7834_v33 = vld [vmem:[#allocation18_spill] sm:$0xff] }
 0x10e   : > { %v2290_v48 = vpop.f32.mrf.mxu0  ;;  %v2482_v52 = vpop.f32.mrf.mxu1  ;;  %2872 = vmatprep.mubr.bf16.mxu0 %v5931_v29  ;;  %5002 = vmatprep.subr.bf16.mxu0 %v5183_v8  ;;  %v5189_v29 = vld [vmem:[%s7607_s1 + $0x220] sm:$0xff]  }
 0x10f   : > { %v6460_v52 = vpack.c.bf16 %v1747_v39, %v1748_v40  ;;  %v1682_v40 = vrot.slane %v6226_v28, 1 }
 0x110   : > { %v6434_v3 = vpop.f32.mrf.mxu0  ;;  %v6436_v22 = vpop.f32.mrf.mxu1 }
 0x111   : > { %7823 = vst [vmem:[#allocation78_spill] sm:$0xff] %v6436_v22  ;;  %5003 = vmatpush3.bf16.msra.mxu0 %v5183_v8  ;;  %7826 = vst [vmem:[#allocation81_spill] sm:$0xff] %v6460_v52 }
 0x112   : > { %v2293_v25 = vpop.f32.mrf.mxu0  ;;  %v2485_v12 = vpop.f32.mrf.mxu1  ;;  %5004 = vmatprep.subr.bf16.mxu0 %v5186_v59 }
 0x113   : > { %v1680_v25 = vrot.slane %v6184_v38, 1  ;;  %v1681_v12 = vrot.slane %v6223_v14, 1 }
 0x114   : > { %v6445_v27 = vpop.f32.mrf.mxu0  ;;  %v6447_v20 = vpop.f32.mrf.mxu1  ;;  %2712 = vmatmul.mubr.bf16.gmra.mxu1 %v6438_v55  ;;  %2873 = vmatmul.mubr.bf16.gmra.mxu0 %v5506_v35 }
 0x115   : > { %7825 = vst [vmem:[#allocation80_spill] sm:$0xff] %v6447_v20  ;;  %2719 = vmatprep.mubr.bf16.mxu1 %v6270_v1  ;;  %2880 = vmatprep.mubr.bf16.mxu0 %v5969_v58  ;;  %v1745_v38 = vsel %vm1713_vm1, %v1680_v25, %v1681_v12  ;;  %v1746_v14 = vsel %vm1713_vm1, %v1679_v16, %v1680_v25  ;;  %v7831_v16 = vld [vmem:[#allocation42_spill] sm:$0xff]  ;;  %v1488_v58 = vrot.slane %v6383_v10, 7 }
 0x116   : > { %v2298_v8 = vpop.f32.mrf.mxu0  ;;  %v2490_v44 = vpop.f32.mrf.mxu1  ;;  %5005 = vmatpush3.bf16.msra.mxu0 %v5186_v59  ;;  %v6480_v39 = vpack.c.bf16 %v1745_v38, %v1746_v14  ;;  %v1744_v28 = vsel %vm1713_vm1, %v1681_v12, %v1682_v40  ;;  %v7835_v12 = vld [vmem:[#allocation45_spill] sm:$0xff] }
 0x117   : > { %5006 = vmatprep.subr.bf16.mxu0 %v5189_v29  ;;  %v1683_v8 = vrot.slane %v6261_v19, 1 }
 0x118   : > { %v2299_v48 = vpop.f32.mrf.mxu0  ;;  %v2491_v35 = vpop.f32.mrf.mxu1  ;;  %7829 = vst [vmem:[#allocation84_spill] sm:$0xff] %v6480_v39 }
 0x11a   : > { %v2301_v24 = vpop.f32.mrf.mxu0  ;;  %v2493_v20 = vpop.f32.mrf.mxu1  ;;  %5007 = vmatpush3.bf16.msra.mxu0 %v5189_v29 }
 0x11b   : > { %5008 = vmatprep.subr.bf16.mxu0 %v5192_v32 }
 0x11c   : > { %v6464_v17 = vpop.f32.mrf.mxu0  ;;  %v6466_v59 = vpop.f32.mrf.mxu1  ;;  %2720 = vmatmul.mubr.bf16.gmra.mxu1 %v6460_v52  ;;  %2881 = vmatmul.mubr.bf16.gmra.mxu0 %v5561_v4 }
 0x11d   : > { %7827 = vst [vmem:[#allocation82_spill] sm:$0xff] %v6466_v59  ;;  %2727 = vmatprep.mubr.bf16.mxu1 %v6310_v23  ;;  %2888 = vmatprep.mubr.bf16.mxu0 %v6007_v61  ;;  %v7856_v61 = vld [vmem:[#allocation34_spill] sm:$0xff] }
 0x11e   : > { %v2306_v24 = vpop.f32.mrf.mxu0  ;;  %v2498_v18 = vpop.f32.mrf.mxu1  ;;  %5009 = vmatpush3.bf16.msra.mxu0 %v5192_v32  ;;  %v1743_v32 = vsel %vm1713_vm1, %v1682_v40, %v1683_v8 }
 0x11f   : > { %v6496_v24 = vpack.c.bf16 %v1743_v32, %v1744_v28  ;;  %v1684_v18 = vrot.slane %v6264_v15, 1 }
 0x120   : > { %v6476_v29 = vpop.f32.mrf.mxu0  ;;  %v6478_v20 = vpop.f32.mrf.mxu1 }
 0x121   : > { %7828 = vst [vmem:[#allocation83_spill] sm:$0xff] %v6478_v20  ;;  %7832 = vst [vmem:[#allocation86_spill] sm:$0xff] %v6496_v24  ;;  %v1742_v15 = vsel %vm1713_vm1, %v1683_v8, %v1684_v18 }
 0x122   : > { %v2309_v44 = vpop.f32.mrf.mxu0  ;;  %v2501_v48 = vpop.f32.mrf.mxu1 }
 0x123   : > { %v1685_v44 = vrot.slane %v6303_v2, 1  ;;  %v5193_v2 = vld [vmem:[%s7607_s1 + $0x210] sm:$0xff]  }
 0x124   : > { %v6484_v35 = vpop.f32.mrf.mxu0  ;;  %v6486_v59 = vpop.f32.mrf.mxu1  ;;  %2728 = vmatmul.mubr.bf16.gmra.mxu1 %v6480_v39  ;;  %2889 = vmatmul.mubr.bf16.gmra.mxu0 %v5608_v47 }
 0x125   : > { %7830 = vst [vmem:[#allocation85_spill] sm:$0xff] %v6486_v59  ;;  %2735 = vmatprep.mubr.bf16.mxu1 %v6347_v56  ;;  %2896 = vmatprep.mubr.bf16.mxu0 %v7831_v16  ;;  %v1741_v40 = vsel %vm1713_vm1, %v1684_v18, %v1685_v44 }
 0x126   : > { %v2314_v19 = vpop.f32.mrf.mxu0  ;;  %v2506_v25 = vpop.f32.mrf.mxu1  ;;  %5010 = vmatprep.subr.bf16.mxu0 %v5193_v2 }
 0x127   : > { %v6519_v25 = vpack.c.bf16 %v1741_v40, %v1742_v15  ;;  %5011 = vmatpush3.bf16.msra.mxu0 %v5193_v2 }
 0x128   : > { %v2315_v38 = vpop.f32.mrf.mxu0  ;;  %v2507_v14 = vpop.f32.mrf.mxu1 }
 0x129   : > { %7837 = vst [vmem:[#allocation88_spill] sm:$0xff] %v6519_v25  ;;  %v1686_v38 = vrot.slane %v6306_v37, 1  ;;  %v1687_v14 = vrot.slane %v6341_v5, 1 }
 0x12a   : > { %v2317_v48 = vpop.f32.mrf.mxu0  ;;  %v2509_v59 = vpop.f32.mrf.mxu1 }
 0x12b   : > { %v1739_v40 = vsel %vm1713_vm1, %v1686_v38, %v1687_v14  ;;  %v1740_v37 = vsel %vm1713_vm1, %v1685_v44, %v1686_v38  ;;  %v7845_v44 = vrot.slane %v6104_v31, 1  ;;  %v7849_v31 = vld [vmem:[#allocation28_spill] sm:$0xff] }
 0x12c   : > { %v6500_v20 = vpop.f32.mrf.mxu0  ;;  %v6502_v22 = vpop.f32.mrf.mxu1  ;;  %2736 = vmatmul.mubr.bf16.gmra.mxu1 %v6496_v24  ;;  %2897 = vmatmul.mubr.bf16.gmra.mxu0 %v7834_v33 }
 0x12d   : > { %7833 = vst [vmem:[#allocation87_spill] sm:$0xff] %v6502_v22  ;;  %2743 = vmatprep.mubr.bf16.mxu1 %v6386_v60  ;;  %2904 = vmatprep.mubr.bf16.mxu0 %v7835_v12  ;;  %v7844_v12 = vld [vmem:[#allocation7_spill] sm:$0xff] }
 0x12e   : > { %v2322_v59 = vpop.f32.mrf.mxu0  ;;  %v2514_v32 = vpop.f32.mrf.mxu1 }
 0x12f   : > { %v7839_v59 = vld [vmem:[#allocation22_spill] sm:$0xff]  ;;  %v7840_v32 = vld [vmem:[#allocation5_spill] sm:$0xff] }
 0x130   : > { %v6515_v28 = vpop.f32.mrf.mxu0  ;;  %v6517_v19 = vpop.f32.mrf.mxu1 }
 0x131   : > { %7836 = vst [vmem:[#allocation18_spill] sm:$0xff] %v6517_v19 }
 0x132   : > { %v2325_v48 = vpop.f32.mrf.mxu0  ;;  %v2517_v8 = vpop.f32.mrf.mxu1 }
 0x133   : > { %v6535_v8 = vpack.c.bf16 %v1739_v40, %v1740_v37 }
 0x134   : > { %v6523_v18 = vpop.f32.mrf.mxu0  ;;  %v6525_v22 = vpop.f32.mrf.mxu1  ;;  %2744 = vmatmul.mubr.bf16.gmra.mxu1 %v6519_v25  ;;  %2905 = vmatmul.mubr.bf16.gmra.mxu0 %v7839_v59 }
 0x135   : > { %7838 = vst [vmem:[#allocation89_spill] sm:$0xff] %v6525_v22  ;;  %2751 = vmatprep.mubr.bf16.mxu1 %v7840_v32  ;;  %2912 = vmatprep.mubr.bf16.mxu0 %v6111_v6  ;;  %7841 = vst [vmem:[#allocation22_spill] sm:$0xff] %v6535_v8  ;;  %v1688_v22 = vrot.slane %v6355_v46, 1  ;;  %v7843_v6 = vld [vmem:[#allocation26_spill] sm:$0xff] }
 0x136   : > { %v2330_v5 = vpop.f32.mrf.mxu0  ;;  %v2522_v15 = vpop.f32.mrf.mxu1 }
 0x137   : > { %v1737_v38 = vsel %vm1713_vm1, %v1688_v22, %v7845_v44  ;;  %v1738_v46 = vsel %vm1713_vm1, %v1687_v14, %v1688_v22  ;;  %v7850_v44 = vld [vmem:[#allocation9_spill] sm:$0xff] }
 0x138   : > { %v2331_v2 = vpop.f32.mrf.mxu0  ;;  %v2523_v48 = vpop.f32.mrf.mxu1  ;;  %v6556_v5 = vpack.c.bf16 %v1737_v38, %v1738_v46 }
 0x13a   : > { %v2333_v19 = vpop.f32.mrf.mxu0  ;;  %v2525_v60 = vpop.f32.mrf.mxu1  ;;  %7847 = vst [vmem:[#allocation91_spill] sm:$0xff] %v6556_v5 }
 0x13c   : > { %v6538_v56 = vpop.f32.mrf.mxu0  ;;  %v6540_v32 = vpop.f32.mrf.mxu1  ;;  %2752 = vmatmul.mubr.bf16.gmra.mxu1 %v6535_v8  ;;  %2913 = vmatmul.mubr.bf16.gmra.mxu0 %v7843_v6 }
 0x13d   : > { %7842 = vst [vmem:[#allocation90_spill] sm:$0xff] %v6540_v32  ;;  %2759 = vmatprep.mubr.bf16.mxu1 %v7844_v12  ;;  %2920 = vmatprep.mubr.bf16.mxu0 %v6152_v62  ;;  %v7853_v62 = vld [vmem:[#allocation11_spill] sm:$0xff] }
 0x13e   : > { %v2338_v60 = vpop.f32.mrf.mxu0  ;;  %v2530_v19 = vpop.f32.mrf.mxu1 }
 0x140   : > { %v6552_v40 = vpop.f32.mrf.mxu0  ;;  %v6554_v37 = vpop.f32.mrf.mxu1 }
 0x141   : > { %7846 = vst [vmem:[#allocation26_spill] sm:$0xff] %v6554_v37  ;;  %v7851_v37 = vld [vmem:[#allocation50_spill] sm:$0xff] }
 0x142   : > { %v2341_v15 = vpop.f32.mrf.mxu0  ;;  %v2533_v2 = vpop.f32.mrf.mxu1 }
 0x144   : > { %v6558_v48 = vpop.f32.mrf.mxu0  ;;  %v6560_v32 = vpop.f32.mrf.mxu1  ;;  %2760 = vmatmul.mubr.bf16.gmra.mxu1 %v6556_v5  ;;  %2921 = vmatmul.mubr.bf16.gmra.mxu0 %v7849_v31 }
 0x145   : > { %7848 = vst [vmem:[#allocation92_spill] sm:$0xff] %v6560_v32  ;;  %2767 = vmatprep.mubr.bf16.mxu1 %v7850_v44  ;;  %2928 = vmatprep.mubr.bf16.mxu0 %v6192_v53  ;;  %v7852_v32 = vld [vmem:[#allocation30_spill] sm:$0xff] }
 0x146   : > { %v2346_v22 = vpop.f32.mrf.mxu0  ;;  %v2538_v14 = vpop.f32.mrf.mxu1 }
 0x147   : > { %v5194_v22 = vld [vmem:[%s7607_s1 + $0x208] sm:$0xff]  }
 0x148   : > { %v2347_v60 = vpop.f32.mrf.mxu0  ;;  %v2539_v19 = vpop.f32.mrf.mxu1  ;;  %5012 = vmatprep.subr.bf16.mxu0 %v5194_v22 }
 0x149   : > { %5013 = vmatpush3.bf16.msra.mxu0 %v5194_v22 }
 0x14a   : > { %v2349_v38 = vpop.f32.mrf.mxu0  ;;  %v2541_v46 = vpop.f32.mrf.mxu1 }
 0x14c   : > { %v6566_v15 = vpop.f32.mrf.mxu0  ;;  %v2577_v2 = vpop.f32.mrf.mxu1  ;;  %2768 = vmatmul.mubr.bf16.gmra.mxu1 %v7851_v37  ;;  %2929 = vmatmul.mubr.bf16.gmra.mxu0 %v7852_v32 }
 0x14d   : > { %v6571_v12 = vadd.f32 %v2577_v2, %v6418_v43  ;;  %2775 = vmatprep.mubr.bf16.mxu1 %v7853_v62  ;;  %2936 = vmatprep.mubr.bf16.mxu0 %v6232_v42  ;;  %v7854_v42 = vld [vmem:[#allocation32_spill] sm:$0xff] }
 0x14e   : > { %v2354_v14 = vpop.f32.mrf.mxu0  ;;  %v2579_v60 = vpop.f32.mrf.mxu1 }
 0x14f   : > { %v7855_v60 = vld [vmem:[#allocation14_spill] sm:$0xff] }
 0x150   : > { %v6578_v19 = vpop.f32.mrf.mxu0  ;;  %v2580_v38 = vpop.f32.mrf.mxu1 }
 0x151   : > { %v6581_v46 = vadd.f32 %v2580_v38, %v6434_v3 }
 0x152   : > { %v2357_v43 = vpop.f32.mrf.mxu0  ;;  %v2582_v2 = vpop.f32.mrf.mxu1 }
 0x154   : > { %v6583_v44 = vpop.f32.mrf.mxu0  ;;  %v2585_v62 = vpop.f32.mrf.mxu1  ;;  %2776 = vmatmul.mubr.bf16.gmra.mxu1 %v6164_v57  ;;  %2937 = vmatmul.mubr.bf16.gmra.mxu0 %v7854_v42 }
 0x155   : > { %v6588_v14 = vadd.f32 %v2585_v62, %v6445_v27  ;;  %2783 = vmatprep.mubr.bf16.mxu1 %v7855_v60  ;;  %2944 = vmatprep.mubr.bf16.mxu0 %v6272_v45  ;;  %v7857_v27 = vld [vmem:[#allocation17_spill] sm:$0xff] }
 0x156   : > { %v2362_v22 = vpop.f32.mrf.mxu0  ;;  %v2587_v53 = vpop.f32.mrf.mxu1 }
 0x158   : > { %v2363_v3 = vpop.f32.mrf.mxu0  ;;  %v2588_v38 = vpop.f32.mrf.mxu1 }
 0x15a   : > { %v2365_v43 = vpop.f32.mrf.mxu0  ;;  %v2590_v2 = vpop.f32.mrf.mxu1 }
 0x15c   : > { %v6592_v23 = vpop.f32.mrf.mxu0  ;;  %v2593_v16 = vpop.f32.mrf.mxu1  ;;  %2784 = vmatmul.mubr.bf16.gmra.mxu1 %v6206_v26  ;;  %2945 = vmatmul.mubr.bf16.gmra.mxu0 %v7856_v61 }
 0x15d   : > { %v6597_v62 = vadd.f32 %v2593_v16, %v6464_v17  ;;  %2791 = vmatprep.mubr.bf16.mxu1 %v7857_v27  ;;  %2952 = vmatprep.mubr.bf16.mxu0 %v6312_v34  ;;  %v7858_v17 = vld [vmem:[#allocation37_spill] sm:$0xff] }
 0x15e   : > { %v2370_v22 = vpop.f32.mrf.mxu0  ;;  %v2595_v53 = vpop.f32.mrf.mxu1 }
 0x15f   : > { %v7860_v22 = vld [vmem:[#allocation21_spill] sm:$0xff] }
 0x160   : > { %v6601_v3 = vpop.f32.mrf.mxu0  ;;  %v2596_v38 = vpop.f32.mrf.mxu1 }
 0x161   : > { %v6604_v43 = vadd.f32 %v2596_v38, %v6476_v29  ;;  %v6616_v29 = vld [vmem:[%s5264_s25 + $0x208] sm:$0xff] }
 0x162   : > { %v2373_v2 = vpop.f32.mrf.mxu0  ;;  %v2598_v60 = vpop.f32.mrf.mxu1  ;;  %7861 = vst [vmem:[#allocation30_spill] sm:$0xff] %v6616_v29  ;;  %v1489_v50 = vrot.slane %v6616_v29, 7 }
 0x164   : > { %v6606_v45 = vpop.f32.mrf.mxu0  ;;  %v2601_v1 = vpop.f32.mrf.mxu1  ;;  %2792 = vmatmul.mubr.bf16.gmra.mxu1 %v6244_v9  ;;  %2953 = vmatmul.mubr.bf16.gmra.mxu0 %v7858_v17 }
 0x165   : > { %v6611_v16 = vadd.f32 %v2601_v1, %v6484_v35  ;;  %2799 = vmatprep.mubr.bf16.mxu1 %v7860_v22  ;;  %2960 = vmatprep.mubr.bf16.mxu0 %v6349_v54  ;;  %v7862_v22 = vld [vmem:[#allocation40_spill] sm:$0xff]  ;;  %v7865_v54 = vrot.slane %v5697_v36, 7 }
 0x166   : > { %v2378_v53 = vpop.f32.mrf.mxu0  ;;  %v2603_v27 = vpop.f32.mrf.mxu1 }
 0x167   : > { %7859 = vst [vmem:[#allocation28_spill] sm:$0xff] %v6611_v16  ;;  %v7864_v53 = vld [vmem:[#allocation25_spill] sm:$0xff]  ;;  %v1504_v7 = vsel %vm1496_vm0, %v7865_v54, %v1488_v58  ;;  %v7868_v16 = vld [vmem:[#allocation43_spill] sm:$0xff] }
 0x168   : > { %v2379_v38 = vpop.f32.mrf.mxu0  ;;  %v2604_v60 = vpop.f32.mrf.mxu1 }
 0x16a   : > { %v2381_v2 = vpop.f32.mrf.mxu0  ;;  %v2606_v34 = vpop.f32.mrf.mxu1 }
 0x16b   : > { %v5195_v34 = vld [vmem:[%s7607_s1 + $0x200] sm:$0xff]   ;;  %v1503_v2 = vsel %vm1496_vm0, %v1488_v58, %v1489_v50 }
 0x16c   : > { %v6620_v1 = vpop.f32.mrf.mxu0  ;;  %v2609_v35 = vpop.f32.mrf.mxu1  ;;  %2800 = vmatmul.mubr.bf16.gmra.mxu1 %v6286_v30  ;;  %2961 = vmatmul.mubr.bf16.gmra.mxu0 %v7862_v22 }
 0x16d   : > { %v6625_v27 = vadd.f32 %v2609_v35, %v6500_v20  ;;  %2807 = vmatprep.mubr.bf16.mxu1 %v7864_v53  ;;  %2968 = vmatprep.mubr.bf16.mxu0 %v6388_v0  ;;  %v6639_v20 = vld [vmem:[%s5264_s25 + $0x210] sm:$0xff]  ;;  %v6642_v35 = vld [vmem:[%s5264_s25 + $0x218] sm:$0xff] }
 0x16e   : > { %v2386_v38 = vpop.f32.mrf.mxu0  ;;  %v2611_v60 = vpop.f32.mrf.mxu1  ;;  %5014 = vmatprep.subr.bf16.mxu0 %v5195_v34  ;;  %v1490_v36 = vrot.slane %v6639_v20, 7  ;;  %v7724_v58 = vrot.slane %v6642_v35, 7 }
 0x16f   : > { %7863 = vst [vmem:[#allocation32_spill] sm:$0xff] %v6625_v27  ;;  %5015 = vmatpush3.bf16.msra.mxu0 %v5195_v34  ;;  %v6649_v60 = vpack.c.bf16 %v1503_v2, %v1504_v7 }
 0x170   : > { %v6644_v53 = vpop.f32.mrf.mxu0  ;;  %v2612_v0 = vpop.f32.mrf.mxu1 }
 0x171   : > { %v6647_v38 = vadd.f32 %v2612_v0, %v6515_v28  ;;  %7867 = vst [vmem:[#allocation37_spill] sm:$0xff] %v6649_v60  ;;  %v1501_v0 = vsel %vm1496_vm0, %v1490_v36, %v7724_v58  ;;  %v1502_v28 = vsel %vm1496_vm0, %v1489_v50, %v1490_v36 }
 0x172   : > { %v2389_v10 = vpop.f32.mrf.mxu0  ;;  %v2614_v27 = vpop.f32.mrf.mxu1 }
 0x173   : > { %7866 = vst [vmem:[#allocation34_spill] sm:$0xff] %v6647_v38  ;;  %v6668_v38 = vpack.c.bf16 %v1501_v0, %v1502_v28 }
 0x174   : > { %v6653_v54 = vpop.f32.mrf.mxu0  ;;  %v2617_v29 = vpop.f32.mrf.mxu1  ;;  %2808 = vmatmul.mubr.bf16.gmra.mxu1 %v6324_v63  ;;  %2969 = vmatmul.mubr.bf16.gmra.mxu0 %v7868_v16 }
 0x175   : > { %v6658_v34 = vadd.f32 %v2617_v29, %v6523_v18  ;;  %2815 = vmatprep.mubr.bf16.mxu1 %v6649_v60  ;;  %2976 = vmatprep.mubr.bf16.mxu0 %v6411_v49  ;;  %7870 = vst [vmem:[#allocation43_spill] sm:$0xff] %v6668_v38  ;;  %v7874_v49 = vld [vmem:[#allocation53_spill] sm:$0xff] }
 0x176   : > { %v2394_v7 = vpop.f32.mrf.mxu0  ;;  %v2619_v10 = vpop.f32.mrf.mxu1 }
 0x177   : > { %7869 = vst [vmem:[#allocation40_spill] sm:$0xff] %v6658_v34  ;;  %v7871_v7 = vld [vmem:[#allocation46_spill] sm:$0xff] }
 0x178   : > { %v2395_v27 = vpop.f32.mrf.mxu0  ;;  %v2620_v2 = vpop.f32.mrf.mxu1 }
 0x17a   : > { %v2397_v18 = vpop.f32.mrf.mxu0  ;;  %v2622_v29 = vpop.f32.mrf.mxu1 }
 0x17c   : > { %v6670_v34 = vpop.f32.mrf.mxu0  ;;  %v2625_v60 = vpop.f32.mrf.mxu1  ;;  %2816 = vmatmul.mubr.bf16.gmra.mxu1 %v6365_v11  ;;  %2977 = vmatmul.mubr.bf16.gmra.mxu0 %v7871_v7 }
 0x17d   : > { %v6675_v10 = vadd.f32 %v2625_v60, %v6538_v56  ;;  %2823 = vmatprep.mubr.bf16.mxu1 %v6668_v38  ;;  %2984 = vmatprep.mubr.bf16.mxu0 %v6438_v55  ;;  %v7873_v56 = vld [vmem:[#allocation49_spill] sm:$0xff] }
 0x17e   : > { %v2402_v50 = vpop.f32.mrf.mxu0  ;;  %v2627_v36 = vpop.f32.mrf.mxu1 }
 0x180   : > { %v6679_v0 = vpop.f32.mrf.mxu0  ;;  %v2628_v28 = vpop.f32.mrf.mxu1 }
 0x181   : > { %v6682_v27 = vadd.f32 %v2628_v28, %v6552_v40 }
 0x182   : > { %v2405_v2 = vpop.f32.mrf.mxu0  ;;  %v2630_v18 = vpop.f32.mrf.mxu1 }
 0x183   : > { %7872 = vst [vmem:[#allocation46_spill] sm:$0xff] %v6682_v27  ;;  %v7875_v27 = vld [vmem:[#allocation13_spill] sm:$0xff] }
 0x184   : > { %v6684_v29 = vpop.f32.mrf.mxu0  ;;  %v2633_v58 = vpop.f32.mrf.mxu1  ;;  %2824 = vmatmul.mubr.bf16.gmra.mxu1 %v6398_v13  ;;  %2985 = vmatmul.mubr.bf16.gmra.mxu0 %v7873_v56 }
 0x185   : > { %v6689_v60 = vadd.f32 %v2633_v58, %v6558_v48  ;;  %2992 = vmatprep.mubr.bf16.mxu0 %v6460_v52  ;;  %3153 = vmatprep.mubr.bf16.mxu1 %v5561_v4  ;;  %v7878_v52 = vld [vmem:[#allocation57_spill] sm:$0xff] }
 0x186   : > { %v2410_v50 = vpop.f32.mrf.mxu0  ;;  %v2635_v36 = vpop.f32.mrf.mxu1 }
 0x188   : > { %v2411_v40 = vpop.f32.mrf.mxu0  ;;  %v2636_v28 = vpop.f32.mrf.mxu1 }
 0x18a   : > { %v2413_v2 = vpop.f32.mrf.mxu0  ;;  %v2638_v18 = vpop.f32.mrf.mxu1 }
 0x18c   : > { %v6693_v38 = vpop.f32.mrf.mxu0  ;;  %v2641_v55 = vpop.f32.mrf.mxu1  ;;  %2993 = vmatmul.mubr.bf16.gmra.mxu0 %v7874_v49  ;;  %3154 = vmatmul.mubr.bf16.vlgmr.msra.gmra.mxu1 %v7875_v27 }
 0x18d   : > { %v6698_v48 = vadd.f32 %v2641_v55, %v6566_v15  ;;  %3000 = vmatprep.mubr.bf16.mxu0 %v6480_v39  ;;  %3161 = vmatprep.mubr.bf16.mxu1 %v5608_v47  ;;  %v7879_v55 = vld [vmem:[#allocation16_spill] sm:$0xff] }
 0x18e   : > { %v2418_v4 = vpop.f32.mrf.mxu0  ;;  %v2643_v58 = vpop.f32.mrf.mxu1 }
 0x18f   : > { %7876 = vst [vmem:[#allocation49_spill] sm:$0xff] %v6698_v48  ;;  %v7881_v48 = vld [vmem:[#allocation20_spill] sm:$0xff] }
 0x190   : > { %v6702_v50 = vpop.f32.mrf.mxu0  ;;  %v2644_v36 = vpop.f32.mrf.mxu1 }
 0x191   : > { %v6705_v40 = vadd.f32 %v2644_v36, %v6578_v19 }
 0x192   : > { %v2421_v28 = vpop.f32.mrf.mxu0  ;;  %v2646_v2 = vpop.f32.mrf.mxu1 }
 0x193   : > { %7877 = vst [vmem:[#allocation53_spill] sm:$0xff] %v6705_v40  ;;  %v7880_v40 = vld [vmem:[#allocation60_spill] sm:$0xff] }
 0x194   : > { %v6707_v18 = vpop.f32.mrf.mxu0  ;;  %v2649_v27 = vpop.f32.mrf.mxu1  ;;  %3001 = vmatmul.mubr.bf16.gmra.mxu0 %v7878_v52  ;;  %3162 = vmatmul.mubr.bf16.gmra.mxu1 %v7879_v55 }
 0x195   : > { %v6712_v15 = vadd.f32 %v2649_v27, %v6583_v44  ;;  %3008 = vmatprep.mubr.bf16.mxu0 %v6496_v24  ;;  %3169 = vmatprep.mubr.bf16.mxu1 %v7834_v33  ;;  %v7884_v24 = vld [vmem:[#allocation27_spill] sm:$0xff] }
 0x196   : > { %v2426_v47 = vpop.f32.mrf.mxu0  ;;  %v2651_v4 = vpop.f32.mrf.mxu1 }
 0x198   : > { %v2427_v19 = vpop.f32.mrf.mxu0  ;;  %v2652_v58 = vpop.f32.mrf.mxu1 }
 0x19a   : > { %v2429_v36 = vpop.f32.mrf.mxu0  ;;  %v2654_v28 = vpop.f32.mrf.mxu1 }
 0x19b   : > { %v7882_v28 = vld [vmem:[#allocation64_spill] sm:$0xff] }
 0x19c   : > { %v6716_v2 = vpop.f32.mrf.mxu0  ;;  %v2657_v39 = vpop.f32.mrf.mxu1  ;;  %3009 = vmatmul.mubr.bf16.gmra.mxu0 %v7880_v40  ;;  %3170 = vmatmul.mubr.bf16.gmra.mxu1 %v7881_v48 }
 0x19d   : > { %v6721_v44 = vadd.f32 %v2657_v39, %v6592_v23  ;;  %3016 = vmatprep.mubr.bf16.mxu0 %v6519_v25  ;;  %3177 = vmatprep.mubr.bf16.mxu1 %v7839_v59  ;;  %v7883_v23 = vld [vmem:[#allocation24_spill] sm:$0xff] }
 0x19e   : > { %v2434_v33 = vpop.f32.mrf.mxu0  ;;  %v2659_v27 = vpop.f32.mrf.mxu1 }
 0x1a0   : > { %v6725_v55 = vpop.f32.mrf.mxu0  ;;  %v2660_v47 = vpop.f32.mrf.mxu1 }
 0x1a1   : > { %v6728_v4 = vadd.f32 %v2660_v47, %v6601_v3 }
 0x1a2   : > { %v2437_v19 = vpop.f32.mrf.mxu0  ;;  %v2662_v58 = vpop.f32.mrf.mxu1 }
 0x1a4   : > { %v6730_v36 = vpop.f32.mrf.mxu0  ;;  %v2665_v48 = vpop.f32.mrf.mxu1  ;;  %3017 = vmatmul.mubr.bf16.gmra.mxu0 %v7882_v28  ;;  %3178 = vmatmul.mubr.bf16.gmra.mxu1 %v7883_v23 }
 0x1a5   : > { %v6735_v39 = vadd.f32 %v2665_v48, %v6606_v45  ;;  %3024 = vmatprep.mubr.bf16.mxu0 %v6535_v8  ;;  %3185 = vmatprep.mubr.bf16.mxu1 %v7843_v6  ;;  %v7887_v8 = vld [vmem:[#allocation31_spill] sm:$0xff] }
 0x1a6   : > { %v2442_v59 = vpop.f32.mrf.mxu0  ;;  %v2667_v33 = vpop.f32.mrf.mxu1 }
 0x1a8   : > { %v2443_v3 = vpop.f32.mrf.mxu0  ;;  %v2668_v27 = vpop.f32.mrf.mxu1 }
 0x1aa   : > { %v2445_v47 = vpop.f32.mrf.mxu0  ;;  %v2670_v19 = vpop.f32.mrf.mxu1 }
 0x1ac   : > { %v6739_v58 = vpop.f32.mrf.mxu0  ;;  %v2673_v25 = vpop.f32.mrf.mxu1  ;;  %3025 = vmatmul.mubr.bf16.gmra.mxu0 %v6318_v41  ;;  %3186 = vmatmul.mubr.bf16.gmra.mxu1 %v7884_v24 }
 0x1ad   : > { %v6744_v45 = vadd.f32 %v2673_v25, %v6620_v1  ;;  %3032 = vmatprep.mubr.bf16.mxu0 %v6556_v5  ;;  %3193 = vmatprep.mubr.bf16.mxu1 %v7849_v31  ;;  %v7885_v25 = vld [vmem:[#allocation29_spill] sm:$0xff]  ;;  %v7886_v5 = vld [vmem:[#allocation3_spill] sm:$0xff] }
 0x1ae   : > { %v2450_v6 = vpop.f32.mrf.mxu0  ;;  %v2675_v48 = vpop.f32.mrf.mxu1 }
 0x1b0   : > { %v6748_v23 = vpop.f32.mrf.mxu0  ;;  %v2676_v59 = vpop.f32.mrf.mxu1 }
 0x1b1   : > { %v6751_v33 = vadd.f32 %v2676_v59, %v6644_v53 }
 0x1b2   : > { %v2453_v3 = vpop.f32.mrf.mxu0  ;;  %v2678_v27 = vpop.f32.mrf.mxu1 }
 0x1b4   : > { %v6753_v47 = vpop.f32.mrf.mxu0  ;;  %v2681_v24 = vpop.f32.mrf.mxu1  ;;  %3033 = vmatmul.mubr.bf16.gmra.mxu0 %v6359_v51  ;;  %3194 = vmatmul.mubr.bf16.gmra.mxu1 %v7885_v25 }
 0x1b5   : > { %v6758_v1 = vadd.f32 %v2681_v24, %v6653_v54  ;;  %3040 = vmatprep.mubr.bf16.mxu0 %v7851_v37  ;;  %3201 = vmatprep.mubr.bf16.mxu1 %v7852_v32  ;;  %v7891_v37 = vld [vmem:[#allocation8_spill] sm:$0xff] }
 0x1b6   : > { %v2458_v31 = vpop.f32.mrf.mxu0  ;;  %v2683_v19 = vpop.f32.mrf.mxu1 }
 0x1b8   : > { %v2459_v53 = vpop.f32.mrf.mxu0  ;;  %v2684_v6 = vpop.f32.mrf.mxu1 }
 0x1ba   : > { %v2461_v48 = vpop.f32.mrf.mxu0  ;;  %v2686_v59 = vpop.f32.mrf.mxu1 }
 0x1bb   : > { %v7889_v59 = vld [vmem:[#allocation6_spill] sm:$0xff] }
 0x1bc   : > { %v6762_v3 = vpop.f32.mrf.mxu0  ;;  %v2689_v27 = vpop.f32.mrf.mxu1  ;;  %3041 = vmatmul.mubr.bf16.gmra.mxu0 %v7886_v5  ;;  %3202 = vmatmul.mubr.bf16.gmra.mxu1 %v7887_v8 }
 0x1bd   : > { %v6767_v54 = vadd.f32 %v2689_v27, %v6670_v34  ;;  %3048 = vmatprep.mubr.bf16.mxu0 %v6164_v57  ;;  %3209 = vmatprep.mubr.bf16.mxu1 %v7854_v42  ;;  %v7890_v34 = vld [vmem:[#allocation33_spill] sm:$0xff] }
 0x1be   : > { %v2466_v32 = vpop.f32.mrf.mxu0  ;;  %v2691_v24 = vpop.f32.mrf.mxu1 }
 0x1c0   : > { %v6771_v25 = vpop.f32.mrf.mxu0  ;;  %v2692_v31 = vpop.f32.mrf.mxu1 }
 0x1c1   : > { %v6774_v19 = vadd.f32 %v2692_v31, %v6679_v0 }
 0x1c2   : > { %v2469_v53 = vpop.f32.mrf.mxu0  ;;  %v2694_v6 = vpop.f32.mrf.mxu1 }
 0x1c3   : > { %7888 = vst [vmem:[#allocation13_spill] sm:$0xff] %v6774_v19  ;;  %v7892_v19 = vld [vmem:[#allocation35_spill] sm:$0xff] }
 0x1c4   : > { %v6776_v48 = vpop.f32.mrf.mxu0  ;;  %v2697_v8 = vpop.f32.mrf.mxu1  ;;  %3049 = vmatmul.mubr.bf16.gmra.mxu0 %v7889_v59  ;;  %3210 = vmatmul.mubr.bf16.gmra.mxu1 %v7890_v34 }
 0x1c5   : > { %v6781_v27 = vadd.f32 %v2697_v8, %v6684_v29  ;;  %3056 = vmatprep.mubr.bf16.mxu0 %v6206_v26  ;;  %3217 = vmatprep.mubr.bf16.mxu1 %v7856_v61 }
 0x1c6   : > { %v2474_v42 = vpop.f32.mrf.mxu0  ;;  %v2699_v32 = vpop.f32.mrf.mxu1 }
 0x1c8   : > { %v2475_v0 = vpop.f32.mrf.mxu0  ;;  %v2700_v24 = vpop.f32.mrf.mxu1 }
 0x1ca   : > { %v2477_v31 = vpop.f32.mrf.mxu0  ;;  %v2702_v53 = vpop.f32.mrf.mxu1 }
 0x1cc   : > { %v2705_v6 = vpop.f32.mrf.mxu1  ;;  %v2866_v57 = vpop.f32.mrf.mxu0  ;;  %3057 = vmatmul.mubr.bf16.gmra.mxu0 %v7891_v37  ;;  %3218 = vmatmul.mubr.bf16.gmra.mxu1 %v7892_v19 }
 0x1cd   : > { %v6788_v34 = vadd.f32 %v2705_v6, %v6693_v38  ;;  %v6791_v29 = vadd.f32 %v2866_v57, %v6571_v12  ;;  %3064 = vmatprep.mubr.bf16.mxu0 %v6244_v9  ;;  %3225 = vmatprep.mubr.bf16.mxu1 %v7858_v17  ;;  %v7893_v57 = vld [vmem:[#allocation10_spill] sm:$0xff]  ;;  %v7895_v9 = vld [vmem:[#allocation12_spill] sm:$0xff] }
 0x1ce   : > { %v2707_v61 = vpop.f32.mrf.mxu1  ;;  %v2868_v8 = vpop.f32.mrf.mxu0  ;;  %v7894_v12 = vld [vmem:[#allocation38_spill] sm:$0xff] }
 0x1d0   : > { %v2708_v42 = vpop.f32.mrf.mxu1  ;;  %v2869_v32 = vpop.f32.mrf.mxu0 }
 0x1d1   : > { %v6796_v0 = vadd.f32 %v2708_v42, %v6702_v50  ;;  %v6799_v24 = vadd.f32 %v2869_v32, %v6581_v46 }
 0x1d2   : > { %v2710_v19 = vpop.f32.mrf.mxu1  ;;  %v2871_v38 = vpop.f32.mrf.mxu0 }
 0x1d4   : > { %v2713_v31 = vpop.f32.mrf.mxu1  ;;  %v2874_v53 = vpop.f32.mrf.mxu0  ;;  %3065 = vmatmul.mubr.bf16.gmra.mxu0 %v7893_v57  ;;  %3226 = vmatmul.mubr.bf16.gmra.mxu1 %v7894_v12  ;;  %v7896_v12 = vld [vmem:[#allocation41_spill] sm:$0xff] }
 0x1d5   : > { %v6804_v17 = vadd.f32 %v2713_v31, %v6707_v18  ;;  %v6807_v6 = vadd.f32 %v2874_v53, %v6588_v14  ;;  %3072 = vmatprep.mubr.bf16.mxu0 %v6286_v30  ;;  %3233 = vmatprep.mubr.bf16.mxu1 %v7862_v22 }
 0x1d6   : > { %v2715_v46 = vpop.f32.mrf.mxu1  ;;  %v2876_v50 = vpop.f32.mrf.mxu0 }
 0x1d8   : > { %v2716_v61 = vpop.f32.mrf.mxu1  ;;  %v2877_v8 = vpop.f32.mrf.mxu0 }
 0x1da   : > { %v2718_v42 = vpop.f32.mrf.mxu1  ;;  %v2879_v32 = vpop.f32.mrf.mxu0 }
 0x1dc   : > { %v2721_v19 = vpop.f32.mrf.mxu1  ;;  %v2882_v38 = vpop.f32.mrf.mxu0  ;;  %3073 = vmatmul.mubr.bf16.gmra.mxu0 %v7895_v9  ;;  %3234 = vmatmul.mubr.bf16.gmra.mxu1 %v7896_v12 }
 0x1dd   : > { %v6814_v18 = vadd.f32 %v2721_v19, %v6716_v2  ;;  %v6817_v14 = vadd.f32 %v2882_v38, %v6597_v62  ;;  %3080 = vmatprep.mubr.bf16.mxu0 %v6324_v63  ;;  %3241 = vmatprep.mubr.bf16.mxu1 %v7868_v16  ;;  %v7897_v62 = vld [vmem:[#allocation15_spill] sm:$0xff]  ;;  %v7898_v19 = vld [vmem:[#allocation44_spill] sm:$0xff] }
 0x1de   : > { %v2723_v22 = vpop.f32.mrf.mxu1  ;;  %v2884_v31 = vpop.f32.mrf.mxu0  ;;  %v7899_v38 = vld [vmem:[#allocation28_spill] sm:$0xff]  ;;  %v7902_v63 = vld [vmem:[#allocation19_spill] sm:$0xff] }
 0x1e0   : > { %v2724_v53 = vpop.f32.mrf.mxu1  ;;  %v2885_v46 = vpop.f32.mrf.mxu0 }
 0x1e1   : > { %v6822_v50 = vadd.f32 %v2724_v53, %v6725_v55  ;;  %v6825_v61 = vadd.f32 %v2885_v46, %v6604_v43 }
 0x1e2   : > { %v2726_v8 = vpop.f32.mrf.mxu1  ;;  %v2887_v2 = vpop.f32.mrf.mxu0 }
 0x1e3   : > { %v7901_v8 = vld [vmem:[#allocation30_spill] sm:$0xff] }
 0x1e4   : > { %v2729_v42 = vpop.f32.mrf.mxu1  ;;  %v2890_v32 = vpop.f32.mrf.mxu0  ;;  %3081 = vmatmul.mubr.bf16.gmra.mxu0 %v7897_v62  ;;  %3242 = vmatmul.mubr.bf16.gmra.mxu1 %v7898_v19  ;;  %v1706_v2 = vrot.slane %v7901_v8, 1  ;;  %v1707_v19 = vrot.slane %v6639_v20, 1 }
 0x1e5   : > { %v6830_v16 = vadd.f32 %v2729_v42, %v6730_v36  ;;  %v6833_v12 = vadd.f32 %v2890_v32, %v7899_v38  ;;  %3088 = vmatprep.mubr.bf16.mxu0 %v6365_v11  ;;  %3249 = vmatprep.mubr.bf16.mxu1 %v7871_v7  ;;  %v7903_v32 = vld [vmem:[#allocation47_spill] sm:$0xff]  ;;  %v7905_v7 = vld [vmem:[#allocation32_spill] sm:$0xff]  ;;  %v6856_v11 = vld [vmem:[%s5264_s25 + $0x220] sm:$0xff] }
 0x1e6   : > { %v2731_v43 = vpop.f32.mrf.mxu1  ;;  %v2892_v55 = vpop.f32.mrf.mxu0 }
 0x1e7   : > { %7900 = vst [vmem:[#allocation57_spill] sm:$0xff] %v6833_v12  ;;  %v7911_v12 = vld [vmem:[#allocation51_spill] sm:$0xff] }
 0x1e8   : > { %v2732_v22 = vpop.f32.mrf.mxu1  ;;  %v2893_v31 = vpop.f32.mrf.mxu0 }
 0x1e9   : > { %v1719_v31 = vsel %vm1713_vm1, %v1706_v2, %v1707_v19 }
 0x1ea   : > { %v2734_v53 = vpop.f32.mrf.mxu1  ;;  %v2895_v46 = vpop.f32.mrf.mxu0 }
 0x1eb   : > { %v7907_v53 = vld [vmem:[#allocation72_spill] sm:$0xff] }
 0x1ec   : > { %v2737_v36 = vpop.f32.mrf.mxu1  ;;  %v2898_v42 = vpop.f32.mrf.mxu0  ;;  %3089 = vmatmul.mubr.bf16.gmra.mxu0 %v7902_v63  ;;  %3250 = vmatmul.mubr.bf16.gmra.mxu1 %v7903_v32  ;;  %v7908_v46 = vrot.slane %v7907_v53, 1 }
 0x1ed   : > { %v6842_v38 = vadd.f32 %v2737_v36, %v6739_v58  ;;  %v6845_v43 = vadd.f32 %v2898_v42, %v7905_v7  ;;  %3096 = vmatprep.mubr.bf16.mxu0 %v6398_v13  ;;  %3257 = vmatprep.mubr.bf16.mxu1 %v7873_v56  ;;  %v7909_v7 = vld [vmem:[#allocation34_spill] sm:$0xff] }
 0x1ee   : > { %v2739_v55 = vpop.f32.mrf.mxu1  ;;  %v2900_v22 = vpop.f32.mrf.mxu0  ;;  %v1720_v32 = vsel %vm1713_vm1, %v7908_v46, %v1706_v2  ;;  %v7910_v46 = vld [vmem:[#allocation23_spill] sm:$0xff] }
 0x1ef   : > { %7904 = vst [vmem:[#allocation16_spill] sm:$0xff] %v6842_v38  ;;  %7906 = vst [vmem:[#allocation60_spill] sm:$0xff] %v6845_v43  ;;  %v6864_v56 = vpack.c.bf16 %v1719_v31, %v1720_v32  ;;  %v1708_v43 = vrot.slane %v6642_v35, 1  ;;  %v7741_v38 = vrot.slane %v6856_v11, 1 }
 0x1f0   : > { %v2740_v58 = vpop.f32.mrf.mxu1  ;;  %v2901_v36 = vpop.f32.mrf.mxu0 }
 0x1f1   : > { %v6859_v42 = vadd.f32 %v2740_v58, %v6748_v23  ;;  %v6862_v13 = vadd.f32 %v2901_v36, %v7909_v7  ;;  %v7912_v58 = vld [vmem:[#allocation40_spill] sm:$0xff]  ;;  %v1717_v7 = vsel %vm1713_vm1, %v1708_v43, %v7741_v38 }
 0x1f2   : > { %v2742_v55 = vpop.f32.mrf.mxu1  ;;  %v2903_v22 = vpop.f32.mrf.mxu0 }
 0x1f4   : > { %v2745_v30 = vpop.f32.mrf.mxu1  ;;  %v2906_v2 = vpop.f32.mrf.mxu0  ;;  %3097 = vmatmul.mubr.bf16.gmra.mxu0 %v7910_v46  ;;  %3258 = vmatmul.mubr.bf16.gmra.mxu1 %v7911_v12  ;;  %v1718_v12 = vsel %vm1713_vm1, %v1707_v19, %v1708_v43 }
 0x1f5   : > { %v6871_v23 = vadd.f32 %v2745_v30, %v6753_v47  ;;  %v6874_v36 = vadd.f32 %v2906_v2, %v7912_v58  ;;  %3104 = vmatprep.mubr.bf16.mxu0 %v6864_v56  ;;  %3265 = vmatprep.mubr.bf16.mxu1 %v7874_v49  ;;  %v6886_v47 = vpack.c.bf16 %v7901_v8, %v7907_v53 }
 0x1f6   : > { %v2747_v31 = vpop.f32.mrf.mxu1  ;;  %v2908_v32 = vpop.f32.mrf.mxu0  ;;  %v6888_v22 = vpack.c.bf16 %v1717_v7, %v1718_v12  ;;  %v6902_v12 = vpack.c.bf16 %v6642_v35, %v6639_v20 }
 0x1f7   : > { %v7913_v32 = vld [vmem:[#allocation55_spill] sm:$0xff] }
 0x1f8   : > { %v2748_v55 = vpop.f32.mrf.mxu1  ;;  %v2909_v30 = vpop.f32.mrf.mxu0 }
 0x1fa   : > { %v2750_v2 = vpop.f32.mrf.mxu1  ;;  %v2911_v49 = vpop.f32.mrf.mxu0 }
 0x1fc   : > { %v2753_v58 = vpop.f32.mrf.mxu1  ;;  %v2914_v31 = vpop.f32.mrf.mxu0  ;;  %3105 = vmatmul.mubr.bf16.gmra.mxu0 %v6886_v47  ;;  %3266 = vmatmul.mubr.bf16.gmra.mxu1 %v7913_v32 }
 0x1fd   : > { %v6893_v38 = vadd.f32 %v2753_v58, %v6762_v3  ;;  %v6896_v19 = vadd.f32 %v2914_v31, %v6675_v10  ;;  %3112 = vmatprep.mubr.bf16.mxu0 %v6888_v22  ;;  %3273 = vmatprep.mubr.bf16.mxu1 %v7878_v52  ;;  %v7914_v3 = vld [vmem:[#allocation46_spill] sm:$0xff] }
 0x1fe   : > { %v2755_v8 = vpop.f32.mrf.mxu1  ;;  %v2916_v43 = vpop.f32.mrf.mxu0  ;;  %v7915_v52 = vld [vmem:[#allocation58_spill] sm:$0xff] }
 0x200   : > { %v2756_v53 = vpop.f32.mrf.mxu1  ;;  %v2917_v7 = vpop.f32.mrf.mxu0 }
 0x201   : > { %v6905_v55 = vadd.f32 %v2756_v53, %v6771_v25  ;;  %v6908_v30 = vadd.f32 %v2917_v7, %v7914_v3  ;;  %v7916_v25 = vld [vmem:[#allocation36_spill] sm:$0xff] }
 0x202   : > { %v2758_v10 = vpop.f32.mrf.mxu1  ;;  %v2919_v2 = vpop.f32.mrf.mxu0 }
 0x204   : > { %v2761_v49 = vpop.f32.mrf.mxu1  ;;  %v2922_v58 = vpop.f32.mrf.mxu0  ;;  %3113 = vmatmul.mubr.bf16.gmra.mxu0 %v6902_v12  ;;  %3274 = vmatmul.mubr.bf16.gmra.mxu1 %v7915_v52  ;;  %v7918_v52 = vld [vmem:[#allocation62_spill] sm:$0xff] }
 0x205   : > { %v6913_v31 = vadd.f32 %v2761_v49, %v6776_v48  ;;  %v6916_v20 = vadd.f32 %v2922_v58, %v6689_v60  ;;  %3281 = vmatprep.mubr.bf16.mxu1 %v7880_v40  ;;  %5016 = vmatprep.mubr.bf16.mxu0 %v7916_v25  ;;  %v7919_v48 = vld [vmem:[#allocation39_spill] sm:$0xff]  ;;  %v7920_v49 = vld [vmem:[#allocation49_spill] sm:$0xff]  ;;  %v7921_v40 = vld [vmem:[#allocation42_spill] sm:$0xff] }
 0x206   : > { %v2763_v32 = vpop.f32.mrf.mxu1  ;;  %v2924_v8 = vpop.f32.mrf.mxu0 }
 0x208   : > { %v2764_v43 = vpop.f32.mrf.mxu1  ;;  %v2925_v53 = vpop.f32.mrf.mxu0 }
 0x209   : > { %v7922_v43 = vld [vmem:[#allocation53_spill] sm:$0xff] }
 0x20a   : > { %v2766_v7 = vpop.f32.mrf.mxu1  ;;  %v2927_v3 = vpop.f32.mrf.mxu0 }
 0x20c   : > { %v6920_v10 = vpop.f32.mrf.mxu1  ;;  %v2930_v2 = vpop.f32.mrf.mxu0  ;;  %3282 = vmatmul.mubr.bf16.gmra.mxu1 %v7918_v52  ;;  %5017 = vmatmul.mubr.bf16.vlgmr.msra.gmra.mxu0 %v7919_v48 }
 0x20d   : > { %7917 = vst [vmem:[#allocation20_spill] sm:$0xff] %v6920_v10  ;;  %v6925_v60 = vadd.f32 %v2930_v2, %v7920_v49  ;;  %3289 = vmatprep.mubr.bf16.mxu1 %v7882_v28  ;;  %5020 = vmatprep.mubr.bf16.mxu0 %v7921_v40  ;;  %v7925_v10 = vld [vmem:[#allocation66_spill] sm:$0xff]  ;;  %v7926_v2 = vld [vmem:[#allocation45_spill] sm:$0xff]  ;;  %v7927_v49 = vld [vmem:[#allocation48_spill] sm:$0xff] }
 0x20e   : > { %v2771_v58 = vpop.f32.mrf.mxu1  ;;  %v2932_v25 = vpop.f32.mrf.mxu0 }
 0x210   : > { %v6929_v32 = vpop.f32.mrf.mxu1  ;;  %v2933_v8 = vpop.f32.mrf.mxu0 }
 0x211   : > { %v6932_v53 = vadd.f32 %v2933_v8, %v7922_v43 }
 0x212   : > { %v2774_v7 = vpop.f32.mrf.mxu1  ;;  %v2935_v3 = vpop.f32.mrf.mxu0 }
 0x213   : > { %7923 = vst [vmem:[#allocation64_spill] sm:$0xff] %v6932_v53  ;;  %v7928_v53 = vld [vmem:[#allocation69_spill] sm:$0xff] }
 0x214   : > { %v6934_v52 = vpop.f32.mrf.mxu1  ;;  %v2938_v48 = vpop.f32.mrf.mxu0  ;;  %3290 = vmatmul.mubr.bf16.gmra.mxu1 %v7925_v10  ;;  %5021 = vmatmul.mubr.bf16.gmra.mxu0 %v7926_v2  ;;  %v7929_v10 = vld [vmem:[#allocation52_spill] sm:$0xff] }
 0x215   : > { %7924 = vst [vmem:[#allocation24_spill] sm:$0xff] %v6934_v52  ;;  %v6939_v28 = vadd.f32 %v2938_v48, %v6712_v15  ;;  %3297 = vmatprep.mubr.bf16.mxu1 %v6318_v41  ;;  %5024 = vmatprep.mubr.bf16.mxu0 %v7927_v49  ;;  %v7930_v41 = vld [vmem:[#allocation56_spill] sm:$0xff] }
 0x216   : > { %v2779_v40 = vpop.f32.mrf.mxu1  ;;  %v2940_v58 = vpop.f32.mrf.mxu0 }
 0x218   : > { %v2780_v25 = vpop.f32.mrf.mxu1  ;;  %v2941_v8 = vpop.f32.mrf.mxu0 }
 0x21a   : > { %v2782_v43 = vpop.f32.mrf.mxu1  ;;  %v2943_v7 = vpop.f32.mrf.mxu0 }
 0x21b   : > { %v7932_v7 = vld [vmem:[#allocation73_spill] sm:$0xff] }
 0x21c   : > { %v6943_v3 = vpop.f32.mrf.mxu1  ;;  %v2946_v52 = vpop.f32.mrf.mxu0  ;;  %3298 = vmatmul.mubr.bf16.gmra.mxu1 %v7928_v53  ;;  %5025 = vmatmul.mubr.bf16.gmra.mxu0 %v7929_v10 }
 0x21d   : > { %v6948_v15 = vadd.f32 %v2946_v52, %v6721_v44  ;;  %3305 = vmatprep.mubr.bf16.mxu1 %v6359_v51  ;;  %5028 = vmatprep.mubr.bf16.mxu0 %v7930_v41  ;;  %v7933_v44 = vld [vmem:[#allocation59_spill] sm:$0xff] }
 0x21e   : > { %v2787_v48 = vpop.f32.mrf.mxu1  ;;  %v2948_v2 = vpop.f32.mrf.mxu0  ;;  %v7934_v52 = vld [vmem:[#allocation63_spill] sm:$0xff] }
 0x220   : > { %v6952_v49 = vpop.f32.mrf.mxu1  ;;  %v2949_v40 = vpop.f32.mrf.mxu0 }
 0x221   : > { %v6955_v58 = vadd.f32 %v2949_v40, %v6728_v4 }
 0x222   : > { %v2790_v25 = vpop.f32.mrf.mxu1  ;;  %v2951_v8 = vpop.f32.mrf.mxu0 }
 0x224   : > { %v6957_v53 = vpop.f32.mrf.mxu1  ;;  %v2954_v43 = vpop.f32.mrf.mxu0  ;;  %3306 = vmatmul.mubr.bf16.gmra.mxu1 %v7932_v7  ;;  %5029 = vmatmul.mubr.bf16.gmra.mxu0 %v7933_v44  ;;  %v7936_v7 = vld [vmem:[#allocation67_spill] sm:$0xff] }
 0x225   : > { %7931 = vst [vmem:[#allocation27_spill] sm:$0xff] %v6957_v53  ;;  %v6962_v51 = vadd.f32 %v2954_v43, %v6735_v39  ;;  %3313 = vmatprep.mubr.bf16.mxu1 %v7886_v5  ;;  %5032 = vmatprep.mubr.bf16.mxu0 %v7934_v52  ;;  %v7935_v53 = vld [vmem:[#allocation5_spill] sm:$0xff]  ;;  %v7937_v5 = vld [vmem:[#allocation70_spill] sm:$0xff] }
 0x226   : > { %v2795_v10 = vpop.f32.mrf.mxu1  ;;  %v2956_v41 = vpop.f32.mrf.mxu0 }
 0x228   : > { %v2796_v4 = vpop.f32.mrf.mxu1  ;;  %v2957_v48 = vpop.f32.mrf.mxu0 }
 0x22a   : > { %v2798_v2 = vpop.f32.mrf.mxu1  ;;  %v2959_v40 = vpop.f32.mrf.mxu0 }
 0x22b   : > { %v7939_v40 = vld [vmem:[#allocation7_spill] sm:$0xff] }
 0x22c   : > { %v6966_v25 = vpop.f32.mrf.mxu1  ;;  %v2962_v8 = vpop.f32.mrf.mxu0  ;;  %3314 = vmatmul.mubr.bf16.gmra.mxu1 %v7935_v53  ;;  %5033 = vmatmul.mubr.bf16.gmra.mxu0 %v7936_v7 }
 0x22d   : > { %v6971_v39 = vadd.f32 %v2962_v8, %v6744_v45  ;;  %3321 = vmatprep.mubr.bf16.mxu1 %v7889_v59  ;;  %5036 = vmatprep.mubr.bf16.mxu0 %v7937_v5  ;;  %v7940_v45 = vld [vmem:[#allocation74_spill] sm:$0xff]  ;;  %v7941_v8 = vld [vmem:[#allocation76_spill] sm:$0xff] }
 0x22e   : > { %v2803_v43 = vpop.f32.mrf.mxu1  ;;  %v2964_v44 = vpop.f32.mrf.mxu0 }
 0x230   : > { %v6975_v52 = vpop.f32.mrf.mxu1  ;;  %v2965_v10 = vpop.f32.mrf.mxu0 }
 0x231   : > { %v6978_v41 = vadd.f32 %v2965_v10, %v6751_v33 }
 0x232   : > { %v2806_v4 = vpop.f32.mrf.mxu1  ;;  %v2967_v48 = vpop.f32.mrf.mxu0 }
 0x234   : > { %v6980_v53 = vpop.f32.mrf.mxu1  ;;  %v2970_v2 = vpop.f32.mrf.mxu0  ;;  %3322 = vmatmul.mubr.bf16.gmra.mxu1 %v7939_v40  ;;  %5037 = vmatmul.mubr.bf16.gmra.mxu0 %v7940_v45  ;;  %v7943_v40 = vld [vmem:[#allocation79_spill] sm:$0xff] }
 0x235   : > { %7938 = vst [vmem:[#allocation29_spill] sm:$0xff] %v6980_v53  ;;  %v6985_v59 = vadd.f32 %v2970_v2, %v6758_v1  ;;  %3329 = vmatprep.mubr.bf16.mxu1 %v7891_v37  ;;  %5040 = vmatprep.mubr.bf16.mxu0 %v7941_v8  ;;  %v7942_v53 = vld [vmem:[#allocation9_spill] sm:$0xff] }
 0x236   : > { %v2811_v7 = vpop.f32.mrf.mxu1  ;;  %v2972_v5 = vpop.f32.mrf.mxu0  ;;  %v7944_v37 = vld [vmem:[#allocation81_spill] sm:$0xff] }
 0x237   : > { %v7945_v5 = vld [vmem:[#allocation13_spill] sm:$0xff] }
 0x238   : > { %v2812_v33 = vpop.f32.mrf.mxu1  ;;  %v2973_v43 = vpop.f32.mrf.mxu0 }
 0x23a   : > { %v2814_v44 = vpop.f32.mrf.mxu1  ;;  %v2975_v10 = vpop.f32.mrf.mxu0 }
 0x23c   : > { %v6989_v4 = vpop.f32.mrf.mxu1  ;;  %v2978_v48 = vpop.f32.mrf.mxu0  ;;  %3330 = vmatmul.mubr.bf16.gmra.mxu1 %v7942_v53  ;;  %5041 = vmatmul.mubr.bf16.gmra.mxu0 %v7943_v40  ;;  %v7948_v40 = vld [vmem:[#allocation11_spill] sm:$0xff] }
 0x23d   : > { %v6994_v1 = vadd.f32 %v2978_v48, %v6767_v54  ;;  %3337 = vmatprep.mubr.bf16.mxu1 %v7893_v57  ;;  %5044 = vmatprep.mubr.bf16.mxu0 %v7944_v37  ;;  %v7949_v54 = vld [vmem:[#allocation84_spill] sm:$0xff]  ;;  %v7950_v48 = vld [vmem:[#allocation86_spill] sm:$0xff] }
 0x23e   : > { %v2819_v2 = vpop.f32.mrf.mxu1  ;;  %v2980_v45 = vpop.f32.mrf.mxu0 }
 0x240   : > { %v6998_v8 = vpop.f32.mrf.mxu1  ;;  %v2981_v7 = vpop.f32.mrf.mxu0 }
 0x241   : > { %v7001_v33 = vadd.f32 %v2981_v7, %v7945_v5 }
 0x242   : > { %v2822_v43 = vpop.f32.mrf.mxu1  ;;  %v2983_v44 = vpop.f32.mrf.mxu0 }
 0x243   : > { %7946 = vst [vmem:[#allocation3_spill] sm:$0xff] %v7001_v33  ;;  %v7951_v33 = vld [vmem:[#allocation14_spill] sm:$0xff] }
 0x244   : > { %v7003_v53 = vpop.f32.mrf.mxu1  ;;  %v2986_v10 = vpop.f32.mrf.mxu0  ;;  %3338 = vmatmul.mubr.bf16.gmra.mxu1 %v7948_v40  ;;  %5045 = vmatmul.mubr.bf16.gmra.mxu0 %v7949_v54  ;;  %v7952_v40 = vld [vmem:[#allocation88_spill] sm:$0xff] }
 0x245   : > { %7947 = vst [vmem:[#allocation31_spill] sm:$0xff] %v7003_v53  ;;  %v7008_v57 = vadd.f32 %v2986_v10, %v6781_v27  ;;  %3345 = vmatprep.mubr.bf16.mxu1 %v7895_v9  ;;  %5048 = vmatprep.mubr.bf16.mxu0 %v7950_v48  ;;  %v7953_v10 = vld [vmem:[#allocation22_spill] sm:$0xff] }
 0x246   : > { %v2827_v37 = vpop.f32.mrf.mxu1  ;;  %v2988_v2 = vpop.f32.mrf.mxu0 }
 0x248   : > { %v2828_v45 = vpop.f32.mrf.mxu1  ;;  %v2989_v7 = vpop.f32.mrf.mxu0 }
 0x24a   : > { %v2830_v5 = vpop.f32.mrf.mxu1  ;;  %v2991_v43 = vpop.f32.mrf.mxu0 }
 0x24b   : > { %v7955_v5 = vld [vmem:[#allocation17_spill] sm:$0xff]  ;;  %v7956_v43 = vld [vmem:[#allocation91_spill] sm:$0xff] }
 0x24c   : > { %v2994_v44 = vpop.f32.mrf.mxu0  ;;  %v3155_v53 = vpop.f32.mrf.mxu1  ;;  %3346 = vmatmul.mubr.bf16.gmra.mxu1 %v7951_v33  ;;  %5049 = vmatmul.mubr.bf16.gmra.mxu0 %v7952_v40 }
 0x24d   : > { %v7015_v27 = vadd.f32 %v2994_v44, %v6788_v34  ;;  %v7018_v9 = vadd.f32 %v3155_v53, %v6791_v29  ;;  %3353 = vmatprep.mubr.bf16.mxu1 %v7897_v62  ;;  %5052 = vmatprep.mubr.bf16.mxu0 %v7953_v10  ;;  %v7954_v62 = vmov 0  }
 0x24e   : > { %v2996_v54 = vpop.f32.mrf.mxu0  ;;  %v3157_v48 = vpop.f32.mrf.mxu1  ;;  %3923 = vst [vmem:[%s7026_s20] sm:$0xf] %v7954_v62  ;;  %3924 = vst [vmem:[%s7026_s20 + $0x4] sm:$0xf] %v7954_v62 }
 0x24f   : > { %3925 = vst [vmem:[%s7026_s20 + $0x8] sm:$0xf] %v7954_v62  ;;  %3926 = vst [vmem:[%s7026_s20 + $0xc] sm:$0xf] %v7954_v62 }
 0x250   : > { %v2997_v34 = vpop.f32.mrf.mxu0  ;;  %v3158_v29 = vpop.f32.mrf.mxu1  ;;  %4215 = vst [vmem:[%s7026_s20 + $0x110] sm:$0xf] %v7954_v62  ;;  %4216 = vst [vmem:[%s7026_s20 + $0x114] sm:$0xf] %v7954_v62 }
 0x251   : > { %4217 = vst [vmem:[%s7026_s20 + $0x118] sm:$0xf] %v7954_v62  ;;  %4218 = vst [vmem:[%s7026_s20 + $0x11c] sm:$0xf] %v7954_v62  ;;  %v7045_v33 = vadd.f32 %v2997_v34, %v6796_v0  ;;  %v7048_v53 = vadd.f32 %v3158_v29, %v6799_v24  ;;  %v7957_v0 = vld [vmem:[#allocation50_spill] sm:$0xff] }
 0x252   : > { %v2999_v37 = vpop.f32.mrf.mxu0  ;;  %v3160_v2 = vpop.f32.mrf.mxu1 }
 0x253   : > { %v7958_v2 = vld [vmem:[#allocation21_spill] sm:$0xff] }
 0x254   : > { %v3002_v45 = vpop.f32.mrf.mxu0  ;;  %v3163_v7 = vpop.f32.mrf.mxu1  ;;  %3354 = vmatmul.mubr.bf16.gmra.mxu1 %v7955_v5  ;;  %5053 = vmatmul.mubr.bf16.gmra.mxu0 %v7956_v43  ;;  %v7959_v5 = vld [vmem:[#allocation54_spill] sm:$0xff] }
 0x255   : > { %v7053_v44 = vadd.f32 %v3002_v45, %v6804_v17  ;;  %v7056_v40 = vadd.f32 %v3163_v7, %v6807_v6  ;;  %3361 = vmatprep.mubr.bf16.mxu1 %v7902_v63  ;;  %5056 = vmatprep.mubr.bf16.mxu0 %v7957_v0 }
 0x256   : > { %v3004_v24 = vpop.f32.mrf.mxu0  ;;  %v3165_v10 = vpop.f32.mrf.mxu1 }
 0x258   : > { %v3005_v54 = vpop.f32.mrf.mxu0  ;;  %v3166_v48 = vpop.f32.mrf.mxu1 }
 0x25a   : > { %v3007_v34 = vpop.f32.mrf.mxu0  ;;  %v3168_v29 = vpop.f32.mrf.mxu1 }
 0x25b   : > { %v7961_v34 = vld [vmem:[#allocation61_spill] sm:$0xff] }
 0x25c   : > { %v3010_v62 = vpop.f32.mrf.mxu0  ;;  %v3171_v37 = vpop.f32.mrf.mxu1  ;;  %3362 = vmatmul.mubr.bf16.gmra.mxu1 %v7958_v2  ;;  %5057 = vmatmul.mubr.bf16.gmra.mxu0 %v7959_v5 }
 0x25d   : > { %v7063_v17 = vadd.f32 %v3010_v62, %v6814_v18  ;;  %v7066_v6 = vadd.f32 %v3171_v37, %v6817_v14  ;;  %3369 = vmatprep.mubr.bf16.mxu1 %v7910_v46  ;;  %5060 = vmatprep.mubr.bf16.mxu0 %v6206_v26  ;;  %v7960_v14 = vld [vmem:[#allocation25_spill] sm:$0xff] }
 0x25e   : > { %v3012_v63 = vpop.f32.mrf.mxu0  ;;  %v3173_v45 = vpop.f32.mrf.mxu1  ;;  %v7962_v46 = vld [vmem:[#allocation57_spill] sm:$0xff] }
 0x260   : > { %v3013_v7 = vpop.f32.mrf.mxu0  ;;  %v3174_v43 = vpop.f32.mrf.mxu1 }
 0x261   : > { %v7071_v0 = vadd.f32 %v3013_v7, %v6822_v50  ;;  %v7074_v24 = vadd.f32 %v3174_v43, %v6825_v61  ;;  %v7963_v50 = vld [vmem:[#allocation65_spill] sm:$0xff] }
 0x262   : > { %v3015_v10 = vpop.f32.mrf.mxu0  ;;  %v3176_v18 = vpop.f32.mrf.mxu1  ;;  %v7964_v43 = vld [vmem:[#allocation37_spill] sm:$0xff] }
 0x263   : > { %v7966_v10 = vld [vmem:[#allocation16_spill] sm:$0xff] }
 0x264   : > { %v3018_v54 = vpop.f32.mrf.mxu0  ;;  %v3179_v48 = vpop.f32.mrf.mxu1  ;;  %3370 = vmatmul.mubr.bf16.gmra.mxu1 %v7960_v14  ;;  %5061 = vmatmul.mubr.bf16.gmra.mxu0 %v7961_v34  ;;  %v1421_v14 = vld [vmem:[%s5264_s25 + $0x228] sm:$0xff] }
 0x265   : > { %v7079_v26 = vadd.f32 %v3018_v54, %v6830_v16  ;;  %v7082_v29 = vadd.f32 %v3179_v48, %v7962_v46  ;;  %3377 = vmatprep.mubr.bf16.mxu1 %v6886_v47  ;;  %5064 = vmatprep.mubr.bf16.mxu0 %v7963_v50  ;;  %v7965_v16 = vld [vmem:[#allocation68_spill] sm:$0xff]  ;;  %v7969_v48 = vld [vmem:[#allocation71_spill] sm:$0xff] }
 0x266   : > { %v3020_v61 = vpop.f32.mrf.mxu0  ;;  %v3181_v62 = vpop.f32.mrf.mxu1  ;;  %v7968_v47 = vld [vmem:[#allocation60_spill] sm:$0xff] }
 0x267   : > { %v1422_v50 = vld [vmem:[%s5264_s25 + $0x230] sm:$0xff] }
 0x268   : > { %v3021_v37 = vpop.f32.mrf.mxu0  ;;  %v3182_v2 = vpop.f32.mrf.mxu1 }
 0x269   : > { %v1493_v37 = vrot.slane %v1421_v14, 7  ;;  %v1492_v2 = vrot.slane %v6856_v11, 7 }
 0x26a   : > { %v3023_v5 = vpop.f32.mrf.mxu0  ;;  %v3184_v63 = vpop.f32.mrf.mxu1 }
 0x26c   : > { %v3026_v45 = vpop.f32.mrf.mxu0  ;;  %v3187_v7 = vpop.f32.mrf.mxu1  ;;  %3378 = vmatmul.mubr.bf16.gmra.mxu1 %v7964_v43  ;;  %5065 = vmatmul.mubr.bf16.gmra.mxu0 %v7965_v16  ;;  %v1710_v43 = vrot.slane %v1421_v14, 1  ;;  %v1711_v16 = vrot.slane %v1422_v50, 1 }
 0x26d   : > { %v7089_v18 = vadd.f32 %v3026_v45, %v7966_v10  ;;  %v7092_v54 = vadd.f32 %v3187_v7, %v7968_v47  ;;  %3385 = vmatprep.mubr.bf16.mxu1 %v6902_v12  ;;  %5068 = vmatprep.mubr.bf16.mxu0 %v7969_v48  ;;  %v1639_v45 = vpack.c.bf16 %v1421_v14, %v6856_v11  ;;  %v7971_v48 = vld [vmem:[#allocation43_spill] sm:$0xff]  ;;  %v7973_v14 = vrot.slane %v6642_v35, 7 }
 0x26e   : > { %v3028_v34 = vpop.f32.mrf.mxu0  ;;  %v3189_v46 = vpop.f32.mrf.mxu1 }
 0x26f   : > { %7967 = vst [vmem:[#allocation6_spill] sm:$0xff] %v7089_v18  ;;  %v7972_v34 = vld [vmem:[#allocation75_spill] sm:$0xff] }
 0x270   : > { %v3029_v61 = vpop.f32.mrf.mxu0  ;;  %v3190_v62 = vpop.f32.mrf.mxu1 }
 0x271   : > { %v7100_v5 = vadd.f32 %v3029_v61, %v6859_v42  ;;  %v7103_v63 = vadd.f32 %v3190_v62, %v6862_v13  ;;  %v1499_v42 = vsel %vm1496_vm0, %v1492_v2, %v1493_v37  ;;  %v1500_v61 = vsel %vm1496_vm0, %v7973_v14, %v1492_v2 }
 0x272   : > { %v3031_v12 = vpop.f32.mrf.mxu0  ;;  %v3192_v7 = vpop.f32.mrf.mxu1 }
 0x273   : > { %7970 = vst [vmem:[#allocation33_spill] sm:$0xff] %v7100_v5  ;;  %v1715_v7 = vsel %vm1713_vm1, %v1710_v43, %v1711_v16 }
 0x274   : > { %v3034_v10 = vpop.f32.mrf.mxu0  ;;  %v3195_v47 = vpop.f32.mrf.mxu1  ;;  %3386 = vmatmul.mubr.bf16.gmra.mxu1 %v7971_v48  ;;  %5069 = vmatmul.mubr.bf16.gmra.mxu0 %v7972_v34  ;;  %v7974_v48 = vrot.slane %v6856_v11, 1 }
 0x275   : > { %v7111_v46 = vadd.f32 %v3034_v10, %v6871_v23  ;;  %v7114_v13 = vadd.f32 %v3195_v47, %v6874_v36  ;;  %3393 = vmatprep.mubr.bf16.mxu1 %v1639_v45  ;;  %5072 = vmatprep.mubr.bf16.mxu0 %v6864_v56  ;;  %v1603_v45 = vpack.c.bf16 %v1499_v42, %v1500_v61  ;;  %v1494_v47 = vrot.slane %v1422_v50, 7  ;;  %v5199_v56 = vld [vmem:[%s5264_s25 + $0x238] sm:$0xff]  ;;  %s4581_s25 = sshll.u32 %s8066_s13, 1 }
 0x276   : > { %v3036_v62 = vpop.f32.mrf.mxu0  ;;  %v3197_v12 = vpop.f32.mrf.mxu1  ;;  %v1716_v23 = vsel %vm1713_vm1, %v7974_v48, %v1710_v43  ;;  %v1712_v34 = vrot.slane %v5199_v56, 1  ;;  %v1640_v35 = vpack.c.bf16 %v5199_v56, %v1422_v50  ;;  %s181_s23 = scalar_lea.vmem %s7609_s3, %s4581_s25 }
 0x277   : > { %v1820_v5 = vpack.c.bf16 %v1715_v7, %v1716_v23  ;;  %v7975_v12 = vld [vmem:[#allocation4_spill] sm:$0xff]  ;;  %v1498_v42 = vsel %vm1496_vm0, %v1493_v37, %v1494_v47 }
 0x278   : > { %v3037_v36 = vpop.f32.mrf.mxu0  ;;  %v3198_v10 = vpop.f32.mrf.mxu1  ;;  %v7976_v11 = vrot.slane %v7975_v12, 7  ;;  %v1714_v61 = vsel %vm1713_vm1, %v1711_v16, %v1712_v34 }
 0x27a   : > { %v3039_v18 = vpop.f32.mrf.mxu0  ;;  %v3200_v2 = vpop.f32.mrf.mxu1  ;;  %v1497_v43 = vsel %vm1496_vm0, %v1494_v47, %v7976_v11 }
 0x27c   : > { %v3042_v14 = vpop.f32.mrf.mxu0  ;;  %v3203_v62 = vpop.f32.mrf.mxu1  ;;  %3394 = vmatmul.mubr.bf16.gmra.mxu1 %v1603_v45  ;;  %5073 = vmatmul.mubr.bf16.gmra.mxu0 %v6888_v22  ;;  %v7977_v22 = vld [vmem:[#allocation2_spill] sm:$0xff]  ;;  %v1604_v45 = vpack.c.bf16 %v1497_v43, %v1498_v42  ;;  %v7980_v42 = vld [vmem:[#allocation20_spill] sm:$0xff] }
 0x27d   : > { %v7138_v50 = vadd.f32 %v3042_v14, %v6893_v38  ;;  %v7141_v18 = vadd.f32 %v3203_v62, %v6896_v19  ;;  %3401 = vmatprep.mubr.bf16.mxu1 %v1640_v35  ;;  %5076 = vmatprep.mubr.bf16.mxu0 %v1820_v5  ;;  %v7978_v7 = vrot.slane %v7977_v22, 1 }
 0x27e   : > { %v3044_v23 = vpop.f32.mrf.mxu0  ;;  %v3205_v36 = vpop.f32.mrf.mxu1 }
 0x27f   : > { %v1785_v48 = vsel %vm1713_vm1, %v1712_v34, %v7978_v7 }
 0x280   : > { %v3045_v10 = vpop.f32.mrf.mxu0  ;;  %v3206_v37 = vpop.f32.mrf.mxu1  ;;  %v1821_v47 = vpack.c.bf16 %v1785_v48, %v1714_v61 }
 0x281   : > { %v7148_v16 = vadd.f32 %v3045_v10, %v6905_v55  ;;  %v7151_v38 = vadd.f32 %v3206_v37, %v6908_v30  ;;  %v7979_v30 = vld [vmem:[#allocation77_spill] sm:$0xff] }
 0x282   : > { %v3047_v19 = vpop.f32.mrf.mxu0  ;;  %v3208_v56 = vpop.f32.mrf.mxu1  ;;  %v2770_v61 = vadd.f32 %v7980_v42, %v7979_v30 }
 0x283   : > { %v7982_v19 = vld [vmem:[#allocation64_spill] sm:$0xff] }
 0x284   : > { %v3050_v5 = vpop.f32.mrf.mxu0  ;;  %v3211_v35 = vpop.f32.mrf.mxu1  ;;  %3402 = vmatmul.mubr.bf16.gmra.mxu1 %v1604_v45  ;;  %5077 = vmatmul.mubr.bf16.gmra.mxu0 %v1821_v47 }
 0x285   : > { %v7154_v34 = vadd.f32 %v3050_v5, %v6913_v31  ;;  %v7157_v2 = vadd.f32 %v3211_v35, %v6916_v20  ;;  %v7981_v20 = vld [vmem:[#allocation78_spill] sm:$0xff] }
 0x286   : > { %v3052_v14 = vpop.f32.mrf.mxu0  ;;  %v3213_v62 = vpop.f32.mrf.mxu1  ;;  %v2773_v10 = vadd.f32 %v6929_v32, %v7981_v20 }
 0x287   : > { %v7983_v14 = vld [vmem:[#allocation80_spill] sm:$0xff] }
 0x288   : > { %v3053_v12 = vpop.f32.mrf.mxu0  ;;  %v3214_v55 = vpop.f32.mrf.mxu1  ;;  %v7984_v62 = vld [vmem:[#allocation24_spill] sm:$0xff] }
 0x289   : > { %v2778_v12 = vadd.f32 %v7984_v62, %v7983_v14 }
 0x28a   : > { %v3055_v11 = vpop.f32.mrf.mxu0  ;;  %v3216_v43 = vpop.f32.mrf.mxu1 }
 0x28c   : > { %v3058_v22 = vpop.f32.mrf.mxu0  ;;  %v3219_v7 = vpop.f32.mrf.mxu1 }
 0x28d   : > { %v7161_v48 = vadd.f32 %v3058_v22, %v2770_v61  ;;  %v7164_v23 = vadd.f32 %v3219_v7, %v6925_v60 }
 0x28e   : > { %v3060_v31 = vpop.f32.mrf.mxu0  ;;  %v3221_v36 = vpop.f32.mrf.mxu1 }
 0x28f   : > { %v7985_v31 = vld [vmem:[#allocation82_spill] sm:$0xff] }
 0x290   : > { %v3061_v37 = vpop.f32.mrf.mxu0  ;;  %v3222_v45 = vpop.f32.mrf.mxu1  ;;  %v2786_v36 = vadd.f32 %v6943_v3, %v7985_v31 }
 0x291   : > { %v7168_v47 = vadd.f32 %v3061_v37, %v2773_v10  ;;  %v7171_v56 = vadd.f32 %v3222_v45, %v7982_v19 }
 0x292   : > { %v3063_v5 = vpop.f32.mrf.mxu0  ;;  %v3224_v35 = vpop.f32.mrf.mxu1 }
 0x294   : > { %v3066_v55 = vpop.f32.mrf.mxu0  ;;  %v3227_v60 = vpop.f32.mrf.mxu1 }
 0x295   : > { %v7175_v11 = vadd.f32 %v3066_v55, %v2778_v12  ;;  %v7178_v43 = vadd.f32 %v3227_v60, %v6939_v28  ;;  %v7986_v28 = vld [vmem:[#allocation83_spill] sm:$0xff] }
 0x296   : > { %v3068_v32 = vpop.f32.mrf.mxu0  ;;  %v3229_v30 = vpop.f32.mrf.mxu1  ;;  %v2789_v35 = vadd.f32 %v6952_v49, %v7986_v28 }
 0x297   : > { %v7987_v32 = vld [vmem:[#allocation85_spill] sm:$0xff]  ;;  %v7988_v30 = vld [vmem:[#allocation27_spill] sm:$0xff] }
 0x298   : > { %v3069_v42 = vpop.f32.mrf.mxu0  ;;  %v3230_v61 = vpop.f32.mrf.mxu1 }
 0x299   : > { %v2794_v42 = vadd.f32 %v7988_v30, %v7987_v32 }
 0x29a   : > { %v3071_v22 = vpop.f32.mrf.mxu0  ;;  %v3232_v7 = vpop.f32.mrf.mxu1 }
 0x29c   : > { %v3074_v20 = vpop.f32.mrf.mxu0  ;;  %v3235_v10 = vpop.f32.mrf.mxu1 }
 0x29d   : > { %v7182_v37 = vadd.f32 %v3074_v20, %v2786_v36  ;;  %v7185_v45 = vadd.f32 %v3235_v10, %v6948_v15 }
 0x29e   : > { %v3076_v19 = vpop.f32.mrf.mxu0  ;;  %v3237_v5 = vpop.f32.mrf.mxu1 }
 0x2a0   : > { %v3077_v14 = vpop.f32.mrf.mxu0  ;;  %v3238_v62 = vpop.f32.mrf.mxu1 }
 0x2a1   : > { %v7189_v12 = vadd.f32 %v3077_v14, %v2789_v35  ;;  %v7192_v55 = vadd.f32 %v3238_v62, %v6955_v58  ;;  %v7989_v58 = vld [vmem:[#allocation87_spill] sm:$0xff] }
 0x2a2   : > { %v3079_v3 = vpop.f32.mrf.mxu0  ;;  %v3240_v60 = vpop.f32.mrf.mxu1  ;;  %v2802_v5 = vadd.f32 %v6966_v25, %v7989_v58 }
 0x2a4   : > { %v3082_v61 = vpop.f32.mrf.mxu0  ;;  %v3243_v15 = vpop.f32.mrf.mxu1 }
 0x2a5   : > { %v7196_v22 = vadd.f32 %v3082_v61, %v2794_v42  ;;  %v7199_v7 = vadd.f32 %v3243_v15, %v6962_v51  ;;  %v7990_v51 = vld [vmem:[#allocation18_spill] sm:$0xff] }
 0x2a6   : > { %v3084_v49 = vpop.f32.mrf.mxu0  ;;  %v3245_v31 = vpop.f32.mrf.mxu1  ;;  %v2805_v32 = vadd.f32 %v6975_v52, %v7990_v51 }
 0x2a7   : > { %v7992_v31 = vld [vmem:[#allocation89_spill] sm:$0xff] }
 0x2a8   : > { %v3085_v36 = vpop.f32.mrf.mxu0  ;;  %v3246_v20 = vpop.f32.mrf.mxu1 }
 0x2a9   : > { %v7993_v36 = vld [vmem:[#allocation29_spill] sm:$0xff] }
 0x2aa   : > { %v3087_v10 = vpop.f32.mrf.mxu0  ;;  %v3248_v19 = vpop.f32.mrf.mxu1  ;;  %v2810_v20 = vadd.f32 %v7993_v36, %v7992_v31 }
 0x2ac   : > { %v3090_v28 = vpop.f32.mrf.mxu0  ;;  %v3251_v35 = vpop.f32.mrf.mxu1 }
 0x2ad   : > { %v7203_v14 = vadd.f32 %v3090_v28, %v2802_v5  ;;  %v7206_v62 = vadd.f32 %v3251_v35, %v6971_v39 }
 0x2ae   : > { %v3092_v3 = vpop.f32.mrf.mxu0  ;;  %v3253_v60 = vpop.f32.mrf.mxu1 }
 0x2b0   : > { %v3093_v30 = vpop.f32.mrf.mxu0  ;;  %v3254_v42 = vpop.f32.mrf.mxu1 }
 0x2b1   : > { %v7210_v61 = vadd.f32 %v3093_v30, %v2805_v32  ;;  %v7213_v15 = vadd.f32 %v3254_v42, %v6978_v41  ;;  %v7994_v41 = vld [vmem:[#allocation90_spill] sm:$0xff] }
 0x2b2   : > { %v3095_v25 = vpop.f32.mrf.mxu0  ;;  %v3256_v49 = vpop.f32.mrf.mxu1  ;;  %v2818_v51 = vadd.f32 %v6989_v4, %v7994_v41 }
 0x2b3   : > { %7991 = vst [vmem:[#allocation8_spill] sm:$0xff] %v7210_v61 }
 0x2b4   : > { %v3098_v10 = vpop.f32.mrf.mxu0  ;;  %v3259_v39 = vpop.f32.mrf.mxu1 }
 0x2b5   : > { %v7217_v19 = vadd.f32 %v3098_v10, %v2810_v20  ;;  %v7220_v58 = vadd.f32 %v3259_v39, %v6985_v59  ;;  %v7996_v59 = vld [vmem:[#allocation26_spill] sm:$0xff] }
 0x2b6   : > { %v3100_v52 = vpop.f32.mrf.mxu0  ;;  %v3261_v5 = vpop.f32.mrf.mxu1  ;;  %v2821_v36 = vadd.f32 %v6998_v8, %v7996_v59 }
 0x2b7   : > { %v7998_v52 = vld [vmem:[#allocation3_spill] sm:$0xff] }
 0x2b8   : > { %v3101_v28 = vpop.f32.mrf.mxu0  ;;  %v3262_v35 = vpop.f32.mrf.mxu1 }
 0x2b9   : > { %v7999_v35 = vld [vmem:[#allocation92_spill] sm:$0xff] }
 0x2ba   : > { %v3103_v3 = vpop.f32.mrf.mxu0  ;;  %v3264_v60 = vpop.f32.mrf.mxu1 }
 0x2bb   : > { %v8000_v3 = vld [vmem:[#allocation31_spill] sm:$0xff] }
 0x2bc   : > { %v3106_v32 = vpop.f32.mrf.mxu0  ;;  %v3267_v30 = vpop.f32.mrf.mxu1  ;;  %v2826_v60 = vadd.f32 %v8000_v3, %v7999_v35  ;;  %v396_v3 = vand.u32 31, %v5330_v21 }
 0x2bd   : > { %v7224_v42 = vadd.f32 %v3106_v32, %v2818_v51  ;;  %v7227_v25 = vadd.f32 %v3267_v30, %v6994_v1  ;;  %v330_v51 = vadd.s32 16, %v5330_v21 }
 0x2be   : > { %v3108_v49 = vpop.f32.mrf.mxu0  ;;  %v3269_v31 = vpop.f32.mrf.mxu1  ;;  %vm1160_vm3 = vcmp.ge.s32.totalorder %v396_v3, 1 }
 0x2bf   : > { %7995 = vst [vmem:[#allocation35_spill] sm:$0xff] %v7224_v42  ;;  %v410_v59 = vand.u32 31, %v330_v51 }
 0x2c0   : > { %v3109_v20 = vpop.f32.mrf.mxu0  ;;  %v3270_v10 = vpop.f32.mrf.mxu1 }
 0x2c1   : > { %v7231_v39 = vadd.f32 %v3109_v20, %v2821_v36  ;;  %v7234_v5 = vadd.f32 %v3270_v10, %v7998_v52  ;;  %vm1226_vm2 = vcmp.le.s32.totalorder %v410_v59, 16 }
 0x2c2   : > { %v3111_v4 = vpop.f32.mrf.mxu0  ;;  %v3272_v28 = vpop.f32.mrf.mxu1 }
 0x2c3   : > { %7997 = vst [vmem:[#allocation10_spill] sm:$0xff] %v7231_v39  ;;  %v334_v4 = vadd.s32 48, %v5330_v21 }
 0x2c4   : > { %v3114_v41 = vpop.f32.mrf.mxu0  ;;  %v7238_v1 = vpop.f32.mrf.mxu1 }
 0x2c5   : > { %v7241_v32 = vadd.f32 %v3114_v41, %v2826_v60 }
 0x2c6   : > { %v3116_v8 = vpop.f32.mrf.mxu0  ;;  %v3277_v30 = vpop.f32.mrf.mxu1 }
 0x2c7   : > { %8001 = vst [vmem:[#allocation38_spill] sm:$0xff] %v7241_v32  ;;  %v7742_v30 = vmov 0.0  }
 0x2c8   : > { %v3117_v49 = vpop.f32.mrf.mxu0  ;;  %v3278_v31 = vpop.f32.mrf.mxu1 }
 0x2ca   : > { %v3119_v36 = vpop.f32.mrf.mxu0  ;;  %v3280_v20 = vpop.f32.mrf.mxu1 }
 0x2cb   : > { %v438_v36 = vand.u32 31, %v334_v4  ;;  %v332_v20 = vadd.s32 32, %v5330_v21  ;;  %v338_v4 = vadd.s32 80, %v5330_v21 }
 0x2cc   : > { %v3283_v10 = vpop.f32.mrf.mxu1  ;;  %v5018_v52 = vpop.f32.mrf.mxu0 }
 0x2cd   : > { %v7245_v28 = vadd.f32 %v3283_v10, %v7015_v27  ;;  %v3453_v35 = vadd.f32 %v5018_v52, %v7056_v40  ;;  %vm1230_vm4 = vcmp.le.s32.totalorder %v438_v36, 16 }
 0x2ce   : > { %v3285_v60 = vpop.f32.mrf.mxu1  ;;  %v3444_v41 = vpop.f32.mrf.mxu0 }
 0x2cf   : > { %v3829_v8 = vsel %vm1226_vm2, %v3453_v35, 0.0  ;;  %v3445_v49 = vadd.f32 %v3444_v41, %v7018_v9  ;;  %v424_v41 = vand.u32 31, %v332_v20 }
 0x2d0   : > { %v3892_v51 = vpack.c.bf16 %v7742_v30, %v3829_v8  ;;  %v3286_v31 = vpop.f32.mrf.mxu1  ;;  %v5019_v59 = vpop.f32.mrf.mxu0 }
 0x2d1   : > { %v7253_v27 = vadd.f32 %v3286_v31, %v7045_v33  ;;  %v3827_v35 = vsel %vm1160_vm3, %v3445_v49, 0.0  ;;  %vm7263_vm5 = vcmp.ge.s32.totalorder %v424_v41, 1 }
 0x2d2   : > { %4929 = vst [vmem:[%s7026_s20 + $0x18] sm:$0xff] %v3892_v51   ;;  %v3288_v40 = vpop.f32.mrf.mxu1  ;;  %v3447_v10 = vpop.f32.mrf.mxu0  ;;  %v4221_v31 = vunpack.c.l.bf16 %v3892_v51  ;;  %v336_v51 = vadd.s32 64, %v5330_v21 }
 0x2d3   : > { %v3448_v52 = vadd.f32 %v3447_v10, %v7048_v53  ;;  %v8002_v53 = vmov 0.0  }
 0x2d4   : > { %v7257_v60 = vpop.f32.mrf.mxu1  ;;  %v5022_v9 = vpop.f32.mrf.mxu0 }
 0x2d5   : > { %v3891_v8 = vpack.c.bf16 %v3448_v52, %v3827_v35  ;;  %v3469_v3 = vadd.f32 %v5022_v9, %v7082_v29  ;;  %v466_v35 = vand.u32 31, %v338_v4 }
 0x2d6   : > { %v3293_v59 = vpop.f32.mrf.mxu1  ;;  %v3460_v33 = vpop.f32.mrf.mxu0 }
 0x2d7   : > { %4928 = vst [vmem:[%s7026_s20 + $0x10] sm:$0xff] %v3891_v8   ;;  %v4219_v40 = vunpack.c.l.bf16 %v3891_v8  ;;  %v4220_v30 = vunpack.c.h.bf16 %v3891_v8  ;;  %v3833_v39 = vsel %vm1230_vm4, %v3469_v3, 0.0  ;;  %v3461_v36 = vadd.f32 %v3460_v33, %v7066_v6 }
 0x2d8   : > { %v3894_v49 = vpack.c.bf16 %v8002_v53, %v3833_v39  ;;  %v3294_v20 = vpop.f32.mrf.mxu1  ;;  %v5023_v52 = vpop.f32.mrf.mxu0  ;;  %v4354_v3 = vmul.f32 %v4221_v31, %v4221_v31  ;;  %vm1234_vm6 = vcmp.le.s32.totalorder %v466_v35, 16 }
 0x2d9   : > { %v4283_v29 = vadd.f32 %v4220_v30, %v4219_v40  ;;  %v4352_v9 = vmul.f32 %v4219_v40, %v4219_v40  ;;  %v4353_v59 = vmul.f32 %v4220_v30, %v4220_v30  ;;  %v3831_v6 = vsel %vm7263_vm5, %v3461_v36, 0.0 }
 0x2da   : > { %4931 = vst [vmem:[%s7026_s20 + $0x28] sm:$0xff] %v3894_v49   ;;  %v3296_v32 = vpop.f32.mrf.mxu1  ;;  %v3463_v8 = vpop.f32.mrf.mxu0  ;;  %v342_v30 = vadd.s32 112, %v5330_v21  ;;  %v452_v52 = vand.u32 31, %v336_v51 }
 0x2db   : > { %v4416_v39 = vadd.f32 %v4353_v59, %v4352_v9  ;;  %v3464_v41 = vadd.f32 %v3463_v8, %v7074_v24  ;;  %v4284_v42 = vadd.f32 %v4283_v29, %v4221_v31 }
 0x2dc   : > { %v7273_v33 = vpop.f32.mrf.mxu1  ;;  %v5026_v4 = vpop.f32.mrf.mxu0  ;;  %v494_v8 = vand.u32 31, %v342_v30  ;;  %vm7283_vm7 = vcmp.ge.s32.totalorder %v452_v52, 1 }
 0x2dd   : > { %v3893_v40 = vpack.c.bf16 %v3464_v41, %v3831_v6  ;;  %v4417_v20 = vadd.f32 %v4416_v39, %v4354_v3  ;;  %v3485_v32 = vadd.f32 %v5026_v4, %v7114_v13  ;;  %v340_v3 = vadd.s32 96, %v5330_v21 }
 0x2de   : > { %v3301_v61 = vpop.f32.mrf.mxu1  ;;  %v3476_v9 = vpop.f32.mrf.mxu0  ;;  %v4225_v39 = vunpack.c.l.bf16 %v3894_v49  ;;  %vm7293_vm8 = vcmp.le.s32.totalorder %v494_v8, 16 }
 0x2df   : > { %4930 = vst [vmem:[%s7026_s20 + $0x20] sm:$0xff] %v3893_v40   ;;  %v4223_v24 = vunpack.c.l.bf16 %v3893_v40  ;;  %v4224_v31 = vunpack.c.h.bf16 %v3893_v40  ;;  %v3837_v29 = vsel %vm1234_vm6, %v3485_v32, 0.0  ;;  %v3477_v36 = vadd.f32 %v3476_v9, %v7092_v54 }
 0x2e0   : > { %v3896_v10 = vpack.c.bf16 %v8002_v53, %v3837_v29  ;;  %v7280_v35 = vpop.f32.mrf.mxu1  ;;  %v5027_v59 = vpop.f32.mrf.mxu0  ;;  %v480_v52 = vand.u32 31, %v340_v3  ;;  %v4358_v29 = vmul.f32 %v4225_v39, %v4225_v39 }
 0x2e1   : > { %v4286_v13 = vadd.f32 %v4284_v42, %v4223_v24  ;;  %v4356_v51 = vmul.f32 %v4223_v24, %v4223_v24  ;;  %v4357_v40 = vmul.f32 %v4224_v31, %v4224_v31  ;;  %v3835_v30 = vsel %vm7283_vm7, %v3477_v36, 0.0 }
 0x2e2   : > { %4933 = vst [vmem:[%s7026_s20 + $0x38] sm:$0xff] %v3896_v10   ;;  %v3304_v41 = vpop.f32.mrf.mxu1  ;;  %v3479_v6 = vpop.f32.mrf.mxu0  ;;  %v346_v24 = vadd.s32 144, %v5330_v21  ;;  %v344_v36 = vadd.s32 128, %v5330_v21  ;;  %vm7303_vm9 = vcmp.ge.s32.totalorder %v480_v52, 1 }
 0x2e3   : > { %v4287_v4 = vadd.f32 %v4286_v13, %v4224_v31  ;;  %v4419_v32 = vadd.f32 %v4417_v20, %v4356_v51  ;;  %v3480_v54 = vadd.f32 %v3479_v6, %v7103_v63 }
 0x2e4   : > { %v7291_v9 = vpop.f32.mrf.mxu1  ;;  %v5030_v49 = vpop.f32.mrf.mxu0 }
 0x2e5   : > { %v4420_v59 = vadd.f32 %v4419_v32, %v4357_v40  ;;  %v3895_v31 = vpack.c.bf16 %v3480_v54, %v3835_v30  ;;  %v4288_v20 = vadd.f32 %v4287_v4, %v4225_v39  ;;  %v3501_v13 = vadd.f32 %v5030_v49, %v7157_v2 }
 0x2e6   : > { %v3309_v63 = vpop.f32.mrf.mxu1  ;;  %v3492_v51 = vpop.f32.mrf.mxu0  ;;  %v522_v40 = vand.u32 31, %v346_v24  ;;  %v4229_v32 = vunpack.c.l.bf16 %v3896_v10 }
 0x2e7   : > { %4932 = vst [vmem:[%s7026_s20 + $0x30] sm:$0xff] %v3895_v31   ;;  %v4227_v61 = vunpack.c.l.bf16 %v3895_v31  ;;  %v4228_v8 = vunpack.c.h.bf16 %v3895_v31  ;;  %v4421_v41 = vadd.f32 %v4420_v59, %v4358_v29  ;;  %v3841_v6 = vsel %vm7293_vm8, %v3501_v13, 0.0 }
 0x2e8   : > { %v3493_v39 = vadd.f32 %v3492_v51, %v7141_v18  ;;  %v3310_v4 = vpop.f32.mrf.mxu1  ;;  %v5031_v2 = vpop.f32.mrf.mxu0  ;;  %v3898_v49 = vpack.c.bf16 %v8002_v53, %v3841_v6  ;;  %v508_v59 = vand.u32 31, %v344_v36  ;;  %vm7315_vm10 = vcmp.le.s32.totalorder %v522_v40, 16 }
 0x2e9   : > { %v4290_v54 = vadd.f32 %v4288_v20, %v4227_v61  ;;  %v4360_v30 = vmul.f32 %v4227_v61, %v4227_v61  ;;  %v4361_v13 = vmul.f32 %v4228_v8, %v4228_v8  ;;  %v350_v20 = vadd.s32 176, %v5330_v21 }
 0x2ea   : > { %v3312_v31 = vpop.f32.mrf.mxu1  ;;  %v3495_v29 = vpop.f32.mrf.mxu0  ;;  %4935 = vst [vmem:[%s7026_s20 + $0x48] sm:$0xff] %v3898_v49   ;;  %v3839_v18 = vsel %vm7303_vm9, %v3493_v39, 0.0  ;;  %v4362_v36 = vmul.f32 %v4229_v32, %v4229_v32  ;;  %vm7322_vm11 = vcmp.ge.s32.totalorder %v508_v59, 1  ;;  %v352_v40 = vadd.s32 192, %v5330_v21 }
 0x2eb   : > { %v4291_v42 = vadd.f32 %v4290_v54, %v4228_v8  ;;  %v4423_v52 = vadd.f32 %v4421_v41, %v4360_v30  ;;  %v3496_v63 = vadd.f32 %v3495_v29, %v7151_v38  ;;  %v348_v29 = vadd.s32 160, %v5330_v21 }
 0x2ec   : > { %v7313_v51 = vpop.f32.mrf.mxu1  ;;  %v5034_v24 = vpop.f32.mrf.mxu0 }
 0x2ed   : > { %v4424_v61 = vadd.f32 %v4423_v52, %v4361_v13  ;;  %v3897_v8 = vpack.c.bf16 %v3496_v63, %v3839_v18  ;;  %v4292_v6 = vadd.f32 %v4291_v42, %v4229_v32  ;;  %v3517_v41 = vadd.f32 %v5034_v24, %v7178_v43 }
 0x2ee   : > { %v3317_v4 = vpop.f32.mrf.mxu1  ;;  %v3508_v38 = vpop.f32.mrf.mxu0  ;;  %v550_v43 = vand.u32 31, %v350_v20  ;;  %v4233_v42 = vunpack.c.l.bf16 %v3898_v49 }
 0x2ef   : > { %4934 = vst [vmem:[%s7026_s20 + $0x40] sm:$0xff] %v3897_v8   ;;  %v4231_v3 = vunpack.c.l.bf16 %v3897_v8  ;;  %v4232_v39 = vunpack.c.h.bf16 %v3897_v8  ;;  %v4425_v2 = vadd.f32 %v4424_v61, %v4362_v36  ;;  %v3845_v54 = vsel %vm7315_vm10, %v3517_v41, 0.0 }
 0x2f0   : > { %v3509_v30 = vadd.f32 %v3508_v38, %v7164_v23  ;;  %v7329_v31 = vpop.f32.mrf.mxu1  ;;  %v5035_v32 = vpop.f32.mrf.mxu0  ;;  %v3900_v59 = vpack.c.bf16 %v8002_v53, %v3845_v54  ;;  %vm7339_vm12 = vcmp.le.s32.totalorder %v550_v43, 16  ;;  %v354_v41 = vadd.s32 208, %v5330_v21 }
 0x2f1   : > { %v4294_v13 = vadd.f32 %v4292_v6, %v4231_v3  ;;  %v4364_v52 = vmul.f32 %v4231_v3, %v4231_v3  ;;  %v4365_v36 = vmul.f32 %v4232_v39, %v4232_v39  ;;  %v536_v6 = vand.u32 31, %v348_v29 }
 0x2f2   : > { %v3320_v63 = vpop.f32.mrf.mxu1  ;;  %v3511_v18 = vpop.f32.mrf.mxu0  ;;  %4937 = vst [vmem:[%s7026_s20 + $0x58] sm:$0xff] %v3900_v59   ;;  %v3843_v61 = vsel %vm7322_vm11, %v3509_v30, 0.0  ;;  %v4366_v4 = vmul.f32 %v4233_v42, %v4233_v42 }
 0x2f3   : > { %v4295_v24 = vadd.f32 %v4294_v13, %v4232_v39  ;;  %v4427_v10 = vadd.f32 %v4425_v2, %v4364_v52  ;;  %v3512_v23 = vadd.f32 %v3511_v18, %v7171_v56  ;;  %vm7349_vm13 = vcmp.ge.s32.totalorder %v536_v6, 1 }
 0x2f4   : > { %v7337_v20 = vpop.f32.mrf.mxu1  ;;  %v5038_v8 = vpop.f32.mrf.mxu0  ;;  %v578_v63 = vand.u32 31, %v354_v41  ;;  %v4237_v18 = vunpack.c.l.bf16 %v3900_v59 }
 0x2f5   : > { %v4428_v38 = vadd.f32 %v4427_v10, %v4365_v36  ;;  %v3899_v3 = vpack.c.bf16 %v3512_v23, %v3843_v61  ;;  %v4296_v39 = vadd.f32 %v4295_v24, %v4233_v42  ;;  %v3533_v2 = vadd.f32 %v5038_v8, %v7199_v7 }
 0x2f6   : > { %v3325_v56 = vpop.f32.mrf.mxu1  ;;  %v3524_v54 = vpop.f32.mrf.mxu0  ;;  %v564_v8 = vand.u32 31, %v352_v40  ;;  %vm7361_vm14 = vcmp.le.s32.totalorder %v578_v63, 16 }
 0x2f7   : > { %4936 = vst [vmem:[%s7026_s20 + $0x50] sm:$0xff] %v3899_v3   ;;  %v4235_v30 = vunpack.c.l.bf16 %v3899_v3  ;;  %v4236_v32 = vunpack.c.h.bf16 %v3899_v3  ;;  %v4429_v43 = vadd.f32 %v4428_v38, %v4366_v4  ;;  %v3849_v13 = vsel %vm7339_vm12, %v3533_v2, 0.0 }
 0x2f8   : > { %v3525_v42 = vadd.f32 %v3524_v54, %v7185_v45  ;;  %v3326_v52 = vpop.f32.mrf.mxu1  ;;  %v5039_v7 = vpop.f32.mrf.mxu0  ;;  %v3902_v10 = vpack.c.bf16 %v8002_v53, %v3849_v13  ;;  %v4370_v2 = vmul.f32 %v4237_v18, %v4237_v18  ;;  %vm7368_vm15 = vcmp.ge.s32.totalorder %v564_v8, 1 }
 0x2f9   : > { %v4298_v24 = vadd.f32 %v4296_v39, %v4235_v30  ;;  %v4368_v36 = vmul.f32 %v4235_v30, %v4235_v30  ;;  %v4369_v4 = vmul.f32 %v4236_v32, %v4236_v32  ;;  %v358_v39 = vadd.s32 240, %v5330_v21 }
 0x2fa   : > { %v3328_v23 = vpop.f32.mrf.mxu1  ;;  %v3527_v61 = vpop.f32.mrf.mxu0  ;;  %4939 = vst [vmem:[%s7026_s20 + $0x68] sm:$0xff] %v3902_v10   ;;  %v3847_v45 = vsel %vm7349_vm13, %v3525_v42, 0.0 }
 0x2fb   : > { %v4299_v49 = vadd.f32 %v4298_v24, %v4236_v32  ;;  %v4431_v6 = vadd.f32 %v4429_v43, %v4368_v36  ;;  %v3528_v38 = vadd.f32 %v3527_v61, %v7192_v55  ;;  %v356_v24 = vadd.s32 224, %v5330_v21 }
 0x2fc   : > { %v7359_v3 = vpop.f32.mrf.mxu1  ;;  %v5042_v41 = vpop.f32.mrf.mxu0  ;;  %v4241_v36 = vunpack.c.l.bf16 %v3902_v10 }
 0x2fd   : > { %v4432_v56 = vadd.f32 %v4431_v6, %v4369_v4  ;;  %v3901_v54 = vpack.c.bf16 %v3528_v38, %v3847_v45  ;;  %v4300_v40 = vadd.f32 %v4299_v49, %v4237_v18  ;;  %v3549_v30 = vadd.f32 %v5042_v41, %v7220_v58 }
 0x2fe   : > { %v3333_v32 = vpop.f32.mrf.mxu1  ;;  %v3540_v55 = vpop.f32.mrf.mxu0  ;;  %v606_v58 = vand.u32 31, %v358_v39  ;;  %v362_v6 = vadd.s32 272, %v5330_v21  ;;  %v3276_v41 = vadd.f32 %v7238_v1, %v7008_v57 }
 0x2ff   : > { %4938 = vst [vmem:[%s7026_s20 + $0x60] sm:$0xff] %v3901_v54   ;;  %v4239_v43 = vunpack.c.l.bf16 %v3901_v54  ;;  %v4240_v13 = vunpack.c.h.bf16 %v3901_v54  ;;  %v4433_v29 = vadd.f32 %v4432_v56, %v4370_v2  ;;  %v3853_v52 = vsel %vm7361_vm14, %v3549_v30, 0.0 }
 0x300   : > { %v3541_v7 = vadd.f32 %v3540_v55, %v7206_v62  ;;  %v7375_v63 = vpop.f32.mrf.mxu1  ;;  %v5043_v18 = vpop.f32.mrf.mxu0  ;;  %v3904_v8 = vpack.c.bf16 %v8002_v53, %v3853_v52  ;;  %vm7388_vm0 = vcmp.le.s32.totalorder %v606_v58, 16  ;;  %v592_v54 = vand.u32 31, %v356_v24 }
 0x301   : > { %v4302_v23 = vadd.f32 %v4300_v40, %v4239_v43  ;;  %v4372_v61 = vmul.f32 %v4239_v43, %v4239_v43  ;;  %v4373_v45 = vmul.f32 %v4240_v13, %v4240_v13  ;;  %v4374_v40 = vmul.f32 %v4241_v36, %v4241_v36 }
 0x302   : > { %v3336_v49 = vpop.f32.mrf.mxu1  ;;  %v3543_v4 = vpop.f32.mrf.mxu0  ;;  %4941 = vst [vmem:[%s7026_s20 + $0x78] sm:$0xff] %v3904_v8   ;;  %v3851_v10 = vsel %vm7368_vm15, %v3541_v7, 0.0  ;;  %vm7395_vm1 = vcmp.ge.s32.totalorder %v592_v54, 1 }
 0x303   : > { %v4303_v38 = vadd.f32 %v4302_v23, %v4240_v13  ;;  %v4435_v59 = vadd.f32 %v4433_v29, %v4372_v61  ;;  %v3544_v62 = vadd.f32 %v3543_v4, %v7213_v15  ;;  %v634_v29 = vand.u32 31, %v362_v6 }
 0x304   : > { %v7386_v39 = vpop.f32.mrf.mxu1  ;;  %v5046_v56 = vpop.f32.mrf.mxu0  ;;  %v4245_v23 = vunpack.c.l.bf16 %v3904_v8  ;;  %v3292_v8 = vadd.f32 %v7257_v60, %v7053_v44 }
 0x305   : > { %v4436_v30 = vadd.f32 %v4435_v59, %v4373_v45  ;;  %v3903_v32 = vpack.c.bf16 %v3544_v62, %v3851_v10  ;;  %v4304_v55 = vadd.f32 %v4303_v38, %v4241_v36  ;;  %v3565_v43 = vadd.f32 %v5046_v56, %v3276_v41 }
 0x306   : > { %v3341_v15 = vpop.f32.mrf.mxu1  ;;  %v3556_v13 = vpop.f32.mrf.mxu0  ;;  %v360_v36 = vadd.s32 256, %v5330_v21  ;;  %vm7402_vm2 = vcmp.le.s32.totalorder %v634_v29, 16 }
 0x307   : > { %4940 = vst [vmem:[%s7026_s20 + $0x70] sm:$0xff] %v3903_v32   ;;  %v4243_v57 = vunpack.c.l.bf16 %v3903_v32  ;;  %v4244_v1 = vunpack.c.h.bf16 %v3903_v32  ;;  %v4437_v42 = vadd.f32 %v4436_v30, %v4374_v40  ;;  %v3857_v52 = vsel %vm7388_vm0, %v3565_v43, 0.0 }
 0x308   : > { %v3557_v18 = vadd.f32 %v3556_v13, %v7227_v25  ;;  %v3342_v58 = vpop.f32.mrf.mxu1  ;;  %v5047_v24 = vpop.f32.mrf.mxu0  ;;  %v3906_v4 = vpack.c.bf16 %v8002_v53, %v3857_v52  ;;  %v620_v54 = vand.u32 31, %v360_v36  ;;  %v366_v40 = vadd.s32 304, %v5330_v21 }
 0x309   : > { %v4306_v61 = vadd.f32 %v4304_v55, %v4243_v57  ;;  %v4376_v49 = vmul.f32 %v4243_v57, %v4243_v57  ;;  %v4377_v62 = vmul.f32 %v4244_v1, %v4244_v1  ;;  %v4378_v30 = vmul.f32 %v4245_v23, %v4245_v23 }
 0x30a   : > { %v3344_v6 = vpop.f32.mrf.mxu1  ;;  %v3559_v38 = vpop.f32.mrf.mxu0  ;;  %4943 = vst [vmem:[%s7026_s20 + $0x88] sm:$0xff] %v3906_v4   ;;  %v3855_v10 = vsel %vm7395_vm1, %v3557_v18, 0.0  ;;  %vm7419_vm3 = vcmp.ge.s32.totalorder %v620_v54, 1  ;;  %v662_v58 = vand.u32 31, %v366_v40  ;;  %v4249_v24 = vunpack.c.l.bf16 %v3906_v4 }
 0x30b   : > { %v4307_v59 = vadd.f32 %v4306_v61, %v4244_v1  ;;  %v4439_v41 = vadd.f32 %v4437_v42, %v4376_v49  ;;  %v3560_v25 = vadd.f32 %v3559_v38, %v7234_v5  ;;  %v364_v5 = vadd.s32 288, %v5330_v21 }
 0x30c   : > { %v7412_v2 = vpop.f32.mrf.mxu1  ;;  %v5050_v56 = vpop.f32.mrf.mxu0  ;;  %vm7435_vm4 = vcmp.le.s32.totalorder %v662_v58, 16  ;;  %v4382_v54 = vmul.f32 %v4249_v24, %v4249_v24 }
 0x30d   : > { %v4440_v32 = vadd.f32 %v4439_v41, %v4377_v62  ;;  %v3905_v55 = vpack.c.bf16 %v3560_v25, %v3855_v10  ;;  %v4308_v43 = vadd.f32 %v4307_v59, %v4245_v23  ;;  %v3581_v15 = vadd.f32 %v5050_v56, %v3292_v8 }
 0x30e   : > { %v3349_v13 = vpop.f32.mrf.mxu1  ;;  %v3572_v29 = vpop.f32.mrf.mxu0  ;;  %v648_v38 = vand.u32 31, %v364_v5  ;;  %v370_v56 = vadd.s32 336, %v5330_v21 }
 0x30f   : > { %4942 = vst [vmem:[%s7026_s20 + $0x80] sm:$0xff] %v3905_v55   ;;  %v4247_v44 = vunpack.c.l.bf16 %v3905_v55  ;;  %v4248_v60 = vunpack.c.h.bf16 %v3905_v55  ;;  %v4441_v57 = vadd.f32 %v4440_v32, %v4378_v30  ;;  %v3861_v1 = vsel %vm7402_vm2, %v3581_v15, 0.0 }
 0x310   : > { %v3573_v52 = vadd.f32 %v3572_v29, %v7245_v28  ;;  %v7424_v7 = vpop.f32.mrf.mxu1  ;;  %v5051_v18 = vpop.f32.mrf.mxu0  ;;  %v3908_v61 = vpack.c.bf16 %v8002_v53, %v3861_v1  ;;  %v3308_v28 = vadd.f32 %v7291_v9, %v7079_v26  ;;  %v3300_v32 = vadd.f32 %v7273_v33, %v7063_v17 }
 0x311   : > { %v4310_v36 = vadd.f32 %v4308_v43, %v4247_v44  ;;  %v4380_v23 = vmul.f32 %v4247_v44, %v4247_v44  ;;  %v4381_v59 = vmul.f32 %v4248_v60, %v4248_v60  ;;  %v368_v43 = vadd.s32 320, %v5330_v21 }
 0x312   : > { %v3352_v49 = vpop.f32.mrf.mxu1  ;;  %v3575_v6 = vpop.f32.mrf.mxu0  ;;  %4945 = vst [vmem:[%s7026_s20 + $0x98] sm:$0xff] %v3908_v61   ;;  %v3859_v4 = vsel %vm7419_vm3, %v3573_v52, 0.0  ;;  %vm7444_vm5 = vcmp.ge.s32.totalorder %v648_v38, 1  ;;  %v3303_v44 = vadd.f32 %v7280_v35, %v7071_v0  ;;  %v690_v1 = vand.u32 31, %v370_v56  ;;  %v8037_v56 = vld [vmem:[#allocation6_spill] sm:$0xff] }
 0x313   : > { %v4311_v45 = vadd.f32 %v4310_v36, %v4248_v60  ;;  %v4443_v62 = vadd.f32 %v4441_v57, %v4380_v23  ;;  %v3576_v41 = vadd.f32 %v3575_v6, %v7253_v27  ;;  %v4253_v42 = vunpack.c.l.bf16 %v3908_v61 }
 0x314   : > { %v7433_v25 = vpop.f32.mrf.mxu1  ;;  %v5054_v10 = vpop.f32.mrf.mxu0  ;;  %v676_v23 = vand.u32 31, %v368_v43  ;;  %v3324_v35 = vadd.f32 %v7337_v20, %v7111_v46  ;;  %vm7460_vm6 = vcmp.le.s32.totalorder %v690_v1, 16  ;;  %vm4485_vm2 = vcmask 1040384  }
 0x315   : > { %v4444_v40 = vadd.f32 %v4443_v62, %v4381_v59  ;;  %v3907_v30 = vpack.c.bf16 %v3576_v41, %v3859_v4  ;;  %v4312_v27 = vadd.f32 %v4311_v45, %v4249_v24  ;;  %v3597_v26 = vadd.f32 %v5054_v10, %v3308_v28 }
 0x316   : > { %v3357_v9 = vpop.f32.mrf.mxu1  ;;  %v3588_v55 = vpop.f32.mrf.mxu0  ;;  %v374_v41 = vadd.s32 368, %v5330_v21  ;;  %v4386_v28 = vmul.f32 %v4253_v42, %v4253_v42  ;;  %vm7469_vm7 = vcmp.ge.s32.totalorder %v676_v23, 1 }
 0x317   : > { %4944 = vst [vmem:[%s7026_s20 + $0x90] sm:$0xff] %v3907_v30   ;;  %v4251_v15 = vunpack.c.l.bf16 %v3907_v30  ;;  %v4252_v13 = vunpack.c.h.bf16 %v3907_v30  ;;  %v4445_v29 = vadd.f32 %v4444_v40, %v4382_v54  ;;  %v3865_v17 = vsel %vm7435_vm4, %v3597_v26, 0.0 }
 0x318   : > { %v3589_v33 = vadd.f32 %v3588_v55, %v3300_v32  ;;  %v3358_v60 = vpop.f32.mrf.mxu1  ;;  %v5055_v57 = vpop.f32.mrf.mxu0  ;;  %v3910_v58 = vpack.c.bf16 %v8002_v53, %v3865_v17  ;;  %v3316_v54 = vadd.f32 %v7313_v51, %v8037_v56  ;;  %v372_v30 = vadd.s32 352, %v5330_v21  ;;  %v8040_v55 = vld [vmem:[#allocation33_spill] sm:$0xff] }
 0x319   : > { %v4314_v52 = vadd.f32 %v4312_v27, %v4251_v15  ;;  %v4384_v18 = vmul.f32 %v4251_v15, %v4251_v15  ;;  %v4385_v6 = vmul.f32 %v4252_v13, %v4252_v13  ;;  %v3319_v43 = vadd.f32 %v7329_v31, %v8040_v55 }
 0x31a   : > { %v3360_v24 = vpop.f32.mrf.mxu1  ;;  %v3591_v36 = vpop.f32.mrf.mxu0  ;;  %4947 = vst [vmem:[%s7026_s20 + $0xa8] sm:$0xff] %v3910_v58   ;;  %v3863_v45 = vsel %vm7444_vm5, %v3589_v33, 0.0  ;;  %v718_v5 = vand.u32 31, %v374_v41 }
 0x31b   : > { %v4315_v49 = vadd.f32 %v4314_v52, %v4252_v13  ;;  %v4447_v38 = vadd.f32 %v4445_v29, %v4384_v18  ;;  %v3592_v0 = vadd.f32 %v3591_v36, %v3303_v44  ;;  %v4257_v44 = vunpack.c.l.bf16 %v3910_v58 }
 0x31c   : > { %v7458_v61 = vpop.f32.mrf.mxu1  ;;  %v5058_v62 = vpop.f32.mrf.mxu0  ;;  %v3340_v36 = vadd.f32 %v7386_v39, %v7154_v34  ;;  %vm7487_vm8 = vcmp.le.s32.totalorder %v718_v5, 16 }
 0x31d   : > { %v4448_v4 = vadd.f32 %v4447_v38, %v4385_v6  ;;  %v3909_v8 = vpack.c.bf16 %v3592_v0, %v3863_v45  ;;  %v4316_v10 = vadd.f32 %v4315_v49, %v4253_v42  ;;  %v3613_v46 = vadd.f32 %v5058_v62, %v3324_v35 }
 0x31e   : > { %v3365_v20 = vpop.f32.mrf.mxu1  ;;  %v3604_v40 = vpop.f32.mrf.mxu0  ;;  %v704_v42 = vand.u32 31, %v372_v30  ;;  %v378_v38 = vadd.s32 400, %v5330_v21  ;;  %v4390_v0 = vmul.f32 %v4257_v44, %v4257_v44  ;;  %v3332_v62 = vadd.f32 %v7359_v3, %v7138_v50 }
 0x31f   : > { %4946 = vst [vmem:[%s7026_s20 + $0xa0] sm:$0xff] %v3909_v8   ;;  %v4255_v27 = vunpack.c.l.bf16 %v3909_v8  ;;  %v4256_v32 = vunpack.c.h.bf16 %v3909_v8  ;;  %v4449_v26 = vadd.f32 %v4448_v4, %v4386_v28  ;;  %v3869_v51 = vsel %vm7460_vm6, %v3613_v46, 0.0 }
 0x320   : > { %v3605_v15 = vadd.f32 %v3604_v40, %v3316_v54  ;;  %v7477_v13 = vpop.f32.mrf.mxu1  ;;  %v5059_v29 = vpop.f32.mrf.mxu0  ;;  %v3912_v60 = vpack.c.bf16 %v8002_v53, %v3869_v51  ;;  %v376_v28 = vadd.s32 384, %v5330_v21  ;;  %vm7496_vm9 = vcmp.ge.s32.totalorder %v704_v42, 1 }
 0x321   : > { %v4318_v17 = vadd.f32 %v4316_v10, %v4255_v27  ;;  %v4388_v33 = vmul.f32 %v4255_v27, %v4255_v27  ;;  %v4389_v18 = vmul.f32 %v4256_v32, %v4256_v32  ;;  %v3335_v54 = vadd.f32 %v7375_v63, %v7148_v16 }
 0x322   : > { %v3368_v57 = vpop.f32.mrf.mxu1  ;;  %v3607_v1 = vpop.f32.mrf.mxu0  ;;  %4949 = vst [vmem:[%s7026_s20 + $0xb8] sm:$0xff] %v3912_v60   ;;  %v3867_v23 = vsel %vm7469_vm7, %v3605_v15, 0.0  ;;  %v746_v40 = vand.u32 31, %v378_v38  ;;  %v4261_v30 = vunpack.c.l.bf16 %v3912_v60  ;;  %v3356_v63 = vadd.f32 %v7433_v25, %v7175_v11 }
 0x323   : > { %v4319_v52 = vadd.f32 %v4318_v17, %v4256_v32  ;;  %v4451_v31 = vadd.f32 %v4449_v26, %v4388_v33  ;;  %v3608_v24 = vadd.f32 %v3607_v1, %v3319_v43  ;;  %v732_v43 = vand.u32 31, %v376_v28 }
 0x324   : > { %v7485_v58 = vpop.f32.mrf.mxu1  ;;  %v5062_v6 = vpop.f32.mrf.mxu0  ;;  %vm7512_vm10 = vcmp.le.s32.totalorder %v746_v40, 16  ;;  %v382_v60 = vadd.s32 432, %v5330_v21  ;;  %v4394_v57 = vmul.f32 %v4261_v30, %v4261_v30  ;;  %v3351_v38 = vadd.f32 %v7424_v7, %v7168_v47 }
 0x325   : > { %v4452_v35 = vadd.f32 %v4451_v31, %v4389_v18  ;;  %v3911_v45 = vpack.c.bf16 %v3608_v24, %v3867_v23  ;;  %v4320_v59 = vadd.f32 %v4319_v52, %v4257_v44  ;;  %v3629_v34 = vadd.f32 %v5062_v6, %v3340_v36 }
 0x326   : > { %v3373_v39 = vpop.f32.mrf.mxu1  ;;  %v3620_v41 = vpop.f32.mrf.mxu0  ;;  %v3348_v18 = vadd.f32 %v7412_v2, %v7161_v48  ;;  %v380_v24 = vadd.s32 416, %v5330_v21  ;;  %vm7521_vm11 = vcmp.ge.s32.totalorder %v732_v43, 1  ;;  %v3372_v56 = vadd.f32 %v7485_v58, %v7196_v22 }
 0x327   : > { %4948 = vst [vmem:[%s7026_s20 + $0xb0] sm:$0xff] %v3911_v45   ;;  %v4259_v4 = vunpack.c.l.bf16 %v3911_v45  ;;  %v4260_v8 = vunpack.c.h.bf16 %v3911_v45  ;;  %v4453_v10 = vadd.f32 %v4452_v35, %v4390_v0  ;;  %v3873_v50 = vsel %vm7487_vm8, %v3629_v34, 0.0 }
 0x328   : > { %v3621_v3 = vadd.f32 %v3620_v41, %v3332_v62  ;;  %v3374_v46 = vpop.f32.mrf.mxu1  ;;  %v5063_v20 = vpop.f32.mrf.mxu0  ;;  %v3914_v26 = vpack.c.bf16 %v8002_v53, %v3873_v50  ;;  %v774_v45 = vand.u32 31, %v382_v60 }
 0x329   : > { %v4322_v27 = vadd.f32 %v4320_v59, %v4259_v4  ;;  %v4392_v32 = vmul.f32 %v4259_v4, %v4259_v4  ;;  %v4393_v15 = vmul.f32 %v4260_v8, %v4260_v8  ;;  %v760_v4 = vand.u32 31, %v380_v24 }
 0x32a   : > { %v3376_v9 = vpop.f32.mrf.mxu1  ;;  %v3623_v55 = vpop.f32.mrf.mxu0  ;;  %4951 = vst [vmem:[%s7026_s20 + $0xc8] sm:$0xff] %v3914_v26   ;;  %v3871_v5 = vsel %vm7496_vm9, %v3621_v3, 0.0  ;;  %v4265_v59 = vunpack.c.l.bf16 %v3914_v26  ;;  %vm7537_vm12 = vcmp.le.s32.totalorder %v774_v45, 16  ;;  %v386_v20 = vadd.s32 464, %v5330_v21 }
 0x32b   : > { %v4323_v51 = vadd.f32 %v4322_v27, %v4260_v8  ;;  %v4455_v29 = vadd.f32 %v4453_v10, %v4392_v32  ;;  %v3624_v16 = vadd.f32 %v3623_v55, %v3335_v54  ;;  %v3364_v26 = vadd.f32 %v7458_v61, %v7182_v37 }
 0x32c   : > { %v7510_v44 = vpop.f32.mrf.mxu1  ;;  %v5066_v33 = vpop.f32.mrf.mxu0  ;;  %v4398_v40 = vmul.f32 %v4265_v59, %v4265_v59  ;;  %v384_v55 = vadd.s32 448, %v5330_v21  ;;  %vm7546_vm13 = vcmp.ge.s32.totalorder %v760_v4, 1  ;;  %v802_v17 = vand.u32 31, %v386_v20  ;;  %v8057_v4 = vld [vmem:[#allocation8_spill] sm:$0xff] }
 0x32d   : > { %v4456_v1 = vadd.f32 %v4455_v29, %v4393_v15  ;;  %v3913_v42 = vpack.c.bf16 %v3624_v16, %v3871_v5  ;;  %v4324_v52 = vadd.f32 %v4323_v51, %v4261_v30  ;;  %v3645_v11 = vadd.f32 %v5066_v33, %v3356_v63 }
 0x32e   : > { %v3381_v25 = vpop.f32.mrf.mxu1  ;;  %v3636_v31 = vpop.f32.mrf.mxu0  ;;  %v3367_v16 = vadd.f32 %v7477_v13, %v7189_v12  ;;  %vm7559_vm14 = vcmp.le.s32.totalorder %v802_v17, 16 }
 0x32f   : > { %4950 = vst [vmem:[%s7026_s20 + $0xc0] sm:$0xff] %v3913_v42   ;;  %v4263_v36 = vunpack.c.l.bf16 %v3913_v42  ;;  %v4264_v23 = vunpack.c.h.bf16 %v3913_v42  ;;  %v4457_v49 = vadd.f32 %v4456_v1, %v4394_v57  ;;  %v3877_v48 = vsel %vm7512_vm10, %v3645_v11, 0.0 }
 0x330   : > { %v3637_v2 = vadd.f32 %v3636_v31, %v3348_v18  ;;  %v7529_v0 = vpop.f32.mrf.mxu1  ;;  %v5067_v35 = vpop.f32.mrf.mxu0  ;;  %v3916_v39 = vpack.c.bf16 %v8002_v53, %v3877_v48  ;;  %v788_v18 = vand.u32 31, %v384_v55 }
 0x331   : > { %v4326_v62 = vadd.f32 %v4324_v52, %v4263_v36  ;;  %v4396_v34 = vmul.f32 %v4263_v36, %v4263_v36  ;;  %v4397_v10 = vmul.f32 %v4264_v23, %v4264_v23  ;;  %v3380_v35 = vadd.f32 %v7510_v44, %v7203_v14 }
 0x332   : > { %v3384_v41 = vpop.f32.mrf.mxu1  ;;  %v3639_v28 = vpop.f32.mrf.mxu0  ;;  %4953 = vst [vmem:[%s7026_s20 + $0xd8] sm:$0xff] %v3916_v39   ;;  %v3875_v54 = vsel %vm7521_vm11, %v3637_v2, 0.0  ;;  %v4269_v33 = vunpack.c.l.bf16 %v3916_v39  ;;  %vm7567_vm15 = vcmp.ge.s32.totalorder %v788_v18, 1 }
 0x333   : > { %v4327_v8 = vadd.f32 %v4326_v62, %v4264_v23  ;;  %v4459_v47 = vadd.f32 %v4457_v49, %v4396_v34  ;;  %v3640_v7 = vadd.f32 %v3639_v28, %v3351_v38 }
 0x334   : > { %v3387_v50 = vpop.f32.mrf.mxu1  ;;  %v5070_v46 = vpop.f32.mrf.mxu0  ;;  %v4402_v6 = vmul.f32 %v4269_v33, %v4269_v33 }
 0x335   : > { %v4460_v30 = vadd.f32 %v4459_v47, %v4397_v10  ;;  %v3915_v27 = vpack.c.bf16 %v3640_v7, %v3875_v54  ;;  %v4328_v32 = vadd.f32 %v4327_v8, %v4265_v59  ;;  %v3661_v9 = vadd.f32 %v5070_v46, %v3372_v56 }
 0x336   : > { %v3389_v22 = vpop.f32.mrf.mxu1  ;;  %v3652_v58 = vpop.f32.mrf.mxu0  ;;  %v3388_v13 = vadd.f32 %v3387_v50, %v7217_v19  ;;  %v390_v19 = vadd.s32 496, %v5330_v21  ;;  %v3383_v8 = vadd.f32 %v7529_v0, %v8057_v4  ;;  %v388_v7 = vadd.s32 480, %v5330_v21 }
 0x337   : > { %4952 = vst [vmem:[%s7026_s20 + $0xd0] sm:$0xff] %v3915_v27   ;;  %v4267_v43 = vunpack.c.l.bf16 %v3915_v27  ;;  %v4268_v51 = vunpack.c.h.bf16 %v3915_v27  ;;  %v4461_v15 = vadd.f32 %v4460_v30, %v4398_v40  ;;  %v3881_v37 = vsel %vm7537_vm12, %v3661_v9, 0.0 }
 0x338   : > { %v3653_v61 = vadd.f32 %v3652_v58, %v3364_v26  ;;  %v3390_v63 = vpop.f32.mrf.mxu1  ;;  %v5071_v5 = vpop.f32.mrf.mxu0  ;;  %v3918_v1 = vpack.c.bf16 %v8002_v53, %v3881_v37  ;;  %v830_v40 = vand.u32 31, %v390_v19  ;;  %v816_v21 = vand.u32 31, %v388_v7 }
 0x339   : > { %v4330_v60 = vadd.f32 %v4328_v32, %v4267_v43  ;;  %v4400_v57 = vmul.f32 %v4267_v43, %v4267_v43  ;;  %v4401_v25 = vmul.f32 %v4268_v51, %v4268_v51 }
 0x33a   : > { %v3392_v42 = vpop.f32.mrf.mxu1  ;;  %v3655_v52 = vpop.f32.mrf.mxu0  ;;  %4955 = vst [vmem:[%s7026_s20 + $0xe8] sm:$0xff] %v3918_v1   ;;  %v3879_v24 = vsel %vm7546_vm13, %v3653_v61, 0.0  ;;  %v4273_v56 = vunpack.c.l.bf16 %v3918_v1  ;;  %vm7583_vm0 = vcmp.le.s32.totalorder %v830_v40, 16  ;;  %vm7587_vm1 = vcmp.ge.s32.totalorder %v816_v21, 1 }
 0x33b   : > { %v4331_v11 = vadd.f32 %v4330_v60, %v4268_v51  ;;  %v4463_v31 = vadd.f32 %v4461_v15, %v4400_v57  ;;  %v3656_v12 = vadd.f32 %v3655_v52, %v3367_v16  ;;  %v8058_v15 = vld [vmem:[#allocation35_spill] sm:$0xff]  ;;  %v8059_v16 = vld [vmem:[#allocation38_spill] sm:$0xff] }
 0x33c   : > { %v3395_v36 = vpop.f32.mrf.mxu1  ;;  %v5074_v49 = vpop.f32.mrf.mxu0  ;;  %v4406_v58 = vmul.f32 %v4273_v56, %v4273_v56 }
 0x33d   : > { %v4464_v38 = vadd.f32 %v4463_v31, %v4401_v25  ;;  %v3917_v48 = vpack.c.bf16 %v3656_v12, %v3879_v24  ;;  %v4332_v2 = vadd.f32 %v4331_v11, %v4269_v33  ;;  %v3677_v45 = vadd.f32 %v5074_v49, %v3388_v13  ;;  %v8064_v25 = vld [vmem:[#allocation10_spill] sm:$0xff] }
 0x33e   : > { %v3397_v59 = vpop.f32.mrf.mxu1  ;;  %v3668_v62 = vpop.f32.mrf.mxu0  ;;  %v3396_v29 = vadd.f32 %v3395_v36, %v8058_v15 }
 0x33f   : > { %4954 = vst [vmem:[%s7026_s20 + $0xe0] sm:$0xff] %v3917_v48   ;;  %v4271_v34 = vunpack.c.l.bf16 %v3917_v48  ;;  %v4272_v39 = vunpack.c.h.bf16 %v3917_v48  ;;  %v4465_v41 = vadd.f32 %v4464_v38, %v4402_v6  ;;  %v3885_v14 = vsel %vm7559_vm14, %v3677_v45, 0.0 }
 0x340   : > { %v3669_v44 = vadd.f32 %v3668_v62, %v3380_v35  ;;  %v3398_v10 = vpop.f32.mrf.mxu1  ;;  %v5075_v47 = vpop.f32.mrf.mxu0  ;;  %v3920_v3 = vpack.c.bf16 %v8002_v53, %v3885_v14 }
 0x341   : > { %v4334_v54 = vadd.f32 %v4332_v2, %v4271_v34  ;;  %v4404_v50 = vmul.f32 %v4271_v34, %v4271_v34  ;;  %v4405_v27 = vmul.f32 %v4272_v39, %v4272_v39  ;;  %v3399_v31 = vadd.f32 %v3398_v10, %v8064_v25 }
 0x342   : > { %v3400_v46 = vpop.f32.mrf.mxu1  ;;  %v3671_v20 = vpop.f32.mrf.mxu0  ;;  %4957 = vst [vmem:[%s7026_s20 + $0xf8] sm:$0xff] %v3920_v3   ;;  %v3883_v26 = vsel %vm7567_vm15, %v3669_v44, 0.0  ;;  %v4277_v11 = vunpack.c.l.bf16 %v3920_v3 }
 0x343   : > { %v4335_v30 = vadd.f32 %v4334_v54, %v4272_v39  ;;  %v4467_v0 = vadd.f32 %v4465_v41, %v4404_v50  ;;  %v3672_v32 = vadd.f32 %v3671_v20, %v3383_v8 }
 0x344   : > { %v3403_v9 = vpop.f32.mrf.mxu1  ;;  %v5078_v22 = vpop.f32.mrf.mxu0  ;;  %v4410_v45 = vmul.f32 %v4277_v11, %v4277_v11 }
 0x345   : > { %v4468_v55 = vadd.f32 %v4467_v0, %v4405_v27  ;;  %v3919_v43 = vpack.c.bf16 %v3672_v32, %v3883_v26  ;;  %v4336_v51 = vadd.f32 %v4335_v30, %v4273_v56  ;;  %v3404_v37 = vadd.f32 %v3403_v9, %v8059_v16 }
 0x346   : > { %v3684_v61 = vpop.f32.mrf.mxu0  ;;  %v3405_v63 = vpop.f32.mrf.mxu1 }
 0x347   : > { %4956 = vst [vmem:[%s7026_s20 + $0xf0] sm:$0xff] %v3919_v43   ;;  %v4275_v5 = vunpack.c.l.bf16 %v3919_v43  ;;  %v4276_v17 = vunpack.c.h.bf16 %v3919_v43  ;;  %v4469_v33 = vadd.f32 %v4468_v55, %v4406_v58  ;;  %v3693_v57 = vadd.f32 %v5078_v22, %v3404_v37 }
 0x348   : > { %v3685_v42 = vadd.f32 %v3684_v61, %v3396_v29  ;;  %v5079_v52 = vpop.f32.mrf.mxu0  ;;  %v3406_v18 = vpop.f32.mrf.mxu1 }
 0x349   : > { %v4338_v12 = vadd.f32 %v4336_v51, %v4275_v5  ;;  %v4408_v13 = vmul.f32 %v4275_v5, %v4275_v5  ;;  %v4409_v24 = vmul.f32 %v4276_v17, %v4276_v17  ;;  %v3889_v36 = vsel %vm7583_vm0, %v3693_v57, 0.0 }
 0x34a   : > { %v3687_v23 = vpop.f32.mrf.mxu0  ;;  %v3408_v49 = vpop.f32.mrf.mxu1  ;;  %v3922_v48 = vpack.c.bf16 %v8002_v53, %v3889_v36  ;;  %v3887_v35 = vsel %vm7587_vm1, %v3685_v42, 0.0 }
 0x34b   : > { %v4339_v6 = vadd.f32 %v4338_v12, %v4276_v17  ;;  %v4471_v38 = vadd.f32 %v4469_v33, %v4408_v13  ;;  %v3688_v2 = vadd.f32 %v3687_v23, %v3399_v31 }
 0x34c   : > { %4959 = vst [vmem:[%s7026_s20 + $0x108] sm:$0xff] %v3922_v48   ;;  %v4281_v28 = vunpack.c.l.bf16 %v3922_v48 }
 0x34d   : > { %v4472_v59 = vadd.f32 %v4471_v38, %v4409_v24  ;;  %v3921_v62 = vpack.c.bf16 %v3688_v2, %v3887_v35  ;;  %v4340_v19 = vadd.f32 %v4339_v6, %v4277_v11 }
 0x34e   : > { %v4414_v10 = vmul.f32 %v4281_v28, %v4281_v28 }
 0x34f   : > { %4958 = vst [vmem:[%s7026_s20 + $0x100] sm:$0xff] %v3921_v62   ;;  %v4279_v34 = vunpack.c.l.bf16 %v3921_v62  ;;  %v4280_v39 = vunpack.c.h.bf16 %v3921_v62  ;;  %v4473_v41 = vadd.f32 %v4472_v59, %v4410_v45 }
 0x351   : > { %v4342_v4 = vadd.f32 %v4340_v19, %v4279_v34  ;;  %v4412_v8 = vmul.f32 %v4279_v34, %v4279_v34  ;;  %v4413_v44 = vmul.f32 %v4280_v39, %v4280_v39 }
 0x353   : > { %v4343_v14 = vadd.f32 %v4342_v4, %v4280_v39  ;;  %v4475_v53 = vadd.f32 %v4473_v41, %v4412_v8 }
 0x355   : > { %v4344_v47 = vadd.f32 %v4343_v14, %v4281_v28  ;;  %v4476_v7 = vadd.f32 %v4475_v53, %v4413_v44 }
 0x357   : > { %v4346_v56 = vrot.slane %v4344_v47, 4  ;;  %v4477_v54 = vadd.f32 %v4476_v7, %v4414_v10 }
 0x359   : > { %v4347_v50 = vadd.f32 %v4346_v56, %v4344_v47  ;;  %v4479_v3 = vrot.slane %v4477_v54, 4 }
 0x35b   : > { %v4348_v46 = vrot.slane %v4347_v50, 2  ;;  %v4480_v20 = vadd.f32 %v4479_v3, %v4477_v54 }
 0x35d   : > { %v4349_v40 = vadd.f32 %v4348_v46, %v4347_v50  ;;  %v4481_v30 = vrot.slane %v4480_v20, 2 }
 0x35f   : > { %v4350_v27 = vrot.slane %v4349_v40, 1  ;;  %v4482_v0 = vadd.f32 %v4481_v30, %v4480_v20 }
 0x361   : > { %v4483_v32 = vrot.slane %v4482_v0, 1  ;;  %v4351_v26 = vadd.f32 %v4350_v27, %v4349_v40 }
 0x363   : > { %v4484_v9 = vadd.f32 %v4483_v32, %v4482_v0 }
 0x365   : > { %v4486_v22 = vsel %vm4485_vm2, %v4351_v26, %v4484_v9 }
 0x366   : > { %4487 = vst [vmem:[%s181_s23] sm:$0x3] %v4486_v22 }
 0x367 PF: > { %s14_s12 = sadd.s32 1, %s5206_s12  }
 0x368   : > { %p11_p4 = scmp.ge.s32.totalorder %s14_s12, 4  }
 0x36a   :  { %13 = sbr.rel (!%p11_p4) target bundleno = 1 (0x1), region = 70 }

// kernel: basic_block_forward.4
= control target key start
LH: loop header
LB: loop body
LE: loop exit
PB: predicated region body
PF: predicated region fallthrough
CT: control target
= control target key end

     0   :  { %s6582_s18 = smov 0   ;;  %s9514_s0 = inlined_call_operand.vmem [shape: bf16[2,576,128], index: 0, kind: input, shape index: {}]   ;;  %s9515_s1 = inlined_call_operand.vmem [shape: bf16[1152,128], index: 1, kind: input, shape index: {}]   ;;  %s9516_s2 = inlined_call_operand.vmem [shape: f32[1,128], index: 2, kind: input, shape index: {}]   ;;  %s9517_s3 = inlined_call_operand.vmem [shape: f32[1,128], index: 3, kind: input, shape index: {}]   ;;  %s9518_s4 = inlined_call_operand.vmem [shape: bf16[2,512,128], index: 4, kind: output, shape index: {0}]   ;;  %s9519_s5 = inlined_call_operand.vmem [shape: f32[2,2,128], index: 5, kind: output, shape index: {1}]  }
   0x1 LB: > { %s5554_s19 = sadd.s32 4294967295, %s6546_s18   ;;  %p5558_p0 = scmp.ge.s32.totalorder %s6546_s18, 1  ;;  %s6546_s18 = sphi %s6582_s18, %s16_s18  }
   0x2   : > { %p190_p1 = scmp.lt.s32.totalorder %s6546_s18, 3 }
   0x4   : > { %p191_p2 = pnand %p5558_p0, %p190_p1 }
   0x6   : > { %194 = sbr.rel (%p191_p2) target bundleno = 871 (0x367), region = 36 }
   0xb   : > { %v6464_v0 = vld [vmem:[%s9515_s1 + $0x38] sm:$0xff]   ;;  %v9537_v1 = vmov 0   ;;  %v6465_v2 = vld [vmem:[%s9515_s1 + $0x30] sm:$0xff]   ;;  %p222_p3 = scmp.lt.s32.totalorder %s5554_s19, 1  ;;  %v9520_v3 = vmov 0.0|0.0   ;;  %v6466_v4 = vld [vmem:[%s9515_s1 + $0x28] sm:$0xff]   ;;  %v383_v5 = vlaneseq }
   0xc   : > { %3242 = vmatprep.subr.bf16.mxu0 %v9537_v1  ;;  %6419 = vmatprep.subr.bf16.mxu1 %v9537_v1  ;;  %v6467_v6 = vld [vmem:[%s9515_s1 + $0x20] sm:$0xff]   ;;  %v6468_v8 = vld [vmem:[%s9515_s1 + $0x18] sm:$0xff]   ;;  %v6469_v12 = vld [vmem:[%s9515_s1 + $0x10] sm:$0xff]   ;;  %v9831_v24 = vmov 0  ;;  %vm9522_vm1 = vmmov 1   ;;  %v9834_v25 = vmov 0 }
   0xd   : > { %3243 = vmatpush1.bf16.msra.mxu0 %v6464_v0  ;;  %6435 = vmatpush1.bf16.msra.mxu1 %v6464_v0  ;;  %s10551_s19 = smov (!%p222_p3, %s5554_s19), 1  ;;  %v6614_v7 = vshrl.u32 %v383_v5, 7  ;;  %v6629_v9 = vld [vmem:[%s9516_s2] ss:$0 sm:$0xff]  ;;  %v6470_v21 = vld [vmem:[%s9515_s1 + $0x8] sm:$0xff]   ;;  %v6472_v28 = vld [vmem:[%s9515_s1 + $0x78] sm:$0xff]  }
   0xe   : > { %3244 = vmatprep.subr.bf16.mxu0 %v9537_v1  ;;  %6420 = vmatprep.subr.bf16.mxu1 %v9537_v1  ;;  %s6451_s26 = smul.u32 288, %s10551_s19  ;;  %v6639_v15 = vld [vmem:[%s9517_s3] ss:$0 sm:$0xff]  ;;  %v6473_v29 = vld [vmem:[%s9515_s1 + $0x70] sm:$0xff]   ;;  %v6474_v30 = vld [vmem:[%s9515_s1 + $0x68] sm:$0xff]   ;;  %v9524_v47 = vmov 0.0  }
   0xf   : > { %3274 = vmatprep.mubr.bf16.mxu0 %v9520_v3  ;;  %9830 = vst [vmem:[#allocation2_spill] sm:$0xff] %v6614_v7  ;;  %v432_v10 = vadd.s32 384, %v6614_v7  ;;  %v6471_v27 = vld [vmem:[%s9515_s1] sm:$0xff]   ;;  %v6476_v34 = vld [vmem:[%s9515_s1 + $0x58] sm:$0xff]   ;;  %v434_v38 = vadd.s32 400, %v6614_v7  ;;  %v388_v39 = vadd.s32 32, %v6614_v7 }
  0x10   : > { %s6619_s6 = scalar_lea.vmem %s9514_s0, %s6451_s26  ;;  %v6475_v32 = vld [vmem:[%s9515_s1 + $0x60] sm:$0xff]   ;;  %v6477_v41 = vld [vmem:[%s9515_s1 + $0x50] sm:$0xff]   ;;  %v6720_v48 = vrot.slane %v9524_v47, 7  ;;  %v436_v51 = vadd.s32 416, %v6614_v7  ;;  %v390_v55 = vadd.s32 48, %v6614_v7  ;;  %v6478_v56 = vld [vmem:[%s9515_s1 + $0x48] sm:$0xff]  }
  0x11   : > { %3245 = vmatpush1.bf16.msra.mxu0 %v6465_v2  ;;  %6436 = vmatpush1.bf16.msra.mxu1 %v6465_v2  ;;  %v6263_v11 = vld [vmem:[%s6619_s6 + $0xc0] sm:$0xff]   ;;  %v796_v18 = vand.u32 31, %v432_v10  ;;  %v1874_v31 = vld [vmem:[%s6619_s6 + $0x18] ss:$176 sps:$4 sm:$0xff]   ;;  %v6252_v35 = vld [vmem:[%s6619_s6 + $0x10] sm:$0xff]   ;;  %v810_v49 = vand.u32 31, %v434_v38 }
  0x12   : > { %3246 = vmatprep.subr.bf16.mxu0 %v9537_v1  ;;  %6421 = vmatprep.subr.bf16.mxu1 %v9537_v1  ;;  %v6090_v13 = vunpack.c.l.bf16 %v6263_v11  ;;  %v6091_v14 = vunpack.c.h.bf16 %v6263_v11  ;;  %v1946_v33 = vunpack.c.h.bf16 %v1874_v31  ;;  %v6264_v37 = vld [vmem:[%s6619_s6 + $0xd0] sm:$0xff]   ;;  %v6046_v40 = vunpack.c.l.bf16 %v6252_v35  ;;  %v6746_v0 = vld [vmem:[%s6619_s6 + $0x28] ss:$176 sps:$4 sm:$0xff]   ;;  %s5979_s24 = sshll.u32 %s10551_s19, 8  ;;  %s5562_s28 = sshll.u32 %s10551_s19, 1 }
  0x13   : > { %vm6654_vm0 = vcmp.ge.s32.totalorder %v796_v18, 1  ;;  %v6094_v43 = vunpack.c.l.bf16 %v6264_v37  ;;  %v6047_v45 = vunpack.c.h.bf16 %v6252_v35  ;;  %v1902_v46 = vunpack.c.l.bf16 %v1874_v31  ;;  %v6253_v31 = vld [vmem:[%s6619_s6 + $0x20] sm:$0xff]   ;;  %s9298_s27 = scalar_lea.vmem %s9518_s4, %s5979_s24  ;;  %s235_s7 = scalar_lea.vmem %s9519_s5, %s5562_s28 }
  0x14   : > { %v2022_v16 = vmul.f32 %v6090_v13, %v6629_v9  ;;  %v2023_v17 = vmul.f32 %v6091_v14, %v6629_v9  ;;  %v9832_v24 = vsel %vm6654_vm0, 4294967295, %v9831_v24  ;;  %vm6661_vm2 = vmpackc.low %vm9522_vm1, %vm6654_vm0  ;;  %v2024_v36 = vmul.f32 %v6629_v9, %v1946_v33 }
  0x15   : > { %3247 = vmatpush1.bf16.msra.mxu0 %v6466_v4  ;;  %6437 = vmatpush1.bf16.msra.mxu1 %v6466_v4  ;;  %9833 = vst [vmem:[#allocation3_spill] sm:$0xff] %v9832_v24  ;;  %v9835_v25 = vsel %vm6661_vm2, 4294967295, %v9834_v25  ;;  %v488_v50 = vand.u32 31, %v388_v39  ;;  %v1978_v54 = vmul.f32 %v6046_v40, %v6629_v9  ;;  %vm9531_vm3 = vcmp.lt.s32.totalorder %v6614_v7, 1 }
  0x16   : > { %3248 = vmatprep.subr.bf16.mxu0 %v9537_v1  ;;  %6422 = vmatprep.subr.bf16.mxu1 %v9537_v1  ;;  %v2100_v19 = vadd.f32 %v6639_v15, %v2022_v16  ;;  %v2101_v20 = vadd.f32 %v6639_v15, %v2023_v17  ;;  %9836 = vst [vmem:[#allocation4_spill] sm:$0xff] %v9835_v25  ;;  %v6095_v57 = vunpack.c.h.bf16 %v6264_v37  ;;  %vm6737_vm4 = vcmp.le.s32.totalorder %v810_v49, 16  ;;  %v6482_v49 = vld [vmem:[%s9515_s1 + $0xb0] sm:$0xff]  }
  0x17   : > { %v6717_v44 = vadd.f32 %v6639_v15, %v2024_v36  ;;  %v2026_v58 = vmul.f32 %v6094_v43, %v6629_v9  ;;  %v1979_v60 = vmul.f32 %v6047_v45, %v6629_v9  ;;  %v1980_v61 = vmul.f32 %v6629_v9, %v1902_v46  ;;  %v6265_v36 = vld [vmem:[%s6619_s6 + $0xe0] sm:$0xff]   ;;  %vm6820_vm8 = vmpackc.low %vm9522_vm1, %vm6737_vm4 }
  0x18   : > { %v2172_v22 = vmax.f32 %v2100_v19, 0.0  ;;  %v6652_v23 = vmax.f32 %v2101_v20, 0.0  ;;  %v9839_v62 = vmov 0  ;;  %vm6741_vm5 = vcmp.ge.s32.totalorder %v488_v50, 1  ;;  %v6480_v20 = vld [vmem:[%s9515_s1 + $0xb8] sm:$0xff]  }
  0x19   : > { %3249 = vmatpush1.bf16.msra.mxu0 %v6467_v6  ;;  %6438 = vmatpush1.bf16.msra.mxu1 %v6467_v6  ;;  %v2174_v59 = vmax.f32 %v6717_v44, 0.0  ;;  %v9840_v62 = vsel %vm6737_vm4, 4294967295, %v9839_v62  ;;  %v9842_v63 = vmov 0  ;;  %v6753_v4 = vadd.f32 %v6639_v15, %v1978_v54  ;;  %vm6880_vm10 = vmpackc.low %vm9522_vm1, %vm6741_vm5 }
  0x1a   : > { %3250 = vmatprep.subr.bf16.mxu0 %v9537_v1  ;;  %6423 = vmatprep.subr.bf16.mxu1 %v9537_v1  ;;  %v6666_v26 = vpack.c.bf16 %v6652_v23, %v2172_v22  ;;  %v6712_v42 = vsel %vm6654_vm0, %v2172_v22, 0.0  ;;  %v2461_v53 = vrot.slane %v6652_v23, 7  ;;  %9841 = vst [vmem:[#allocation7_spill] sm:$0xff] %v9840_v62  ;;  %v9843_v63 = vsel %vm6741_vm5, 4294967295, %v9842_v63  ;;  %v6488_v62 = vld [vmem:[%s9515_s1 + $0x88] sm:$0xff]  }
  0x1b   : > { %9838 = vst [vmem:[#allocation6_spill] sm:$0xff] %v6712_v42  ;;  %v2460_v52 = vrot.slane %v6712_v42, 7  ;;  %9844 = vst [vmem:[#allocation8_spill] sm:$0xff] %v9843_v63  ;;  %v824_v5 = vand.u32 31, %v436_v51  ;;  %v502_v6 = vand.u32 31, %v390_v55  ;;  %v2027_v11 = vmul.f32 %v6095_v57, %v6629_v9 }
  0x1c   : > { %9837 = vst [vmem:[#allocation5_spill] sm:$0xff] %v6666_v26  ;;  %5705 = vmatprep.mubr.msk.bf16.mxu1 %vm6661_vm2, %v6666_v26  ;;  %v438_v13 = vadd.s32 432, %v6614_v7  ;;  %v6770_v14 = vsel %vm6737_vm4, %v2174_v59, 0.0  ;;  %v2057_v16 = vadd.f32 %v6639_v15, %v1979_v60  ;;  %v6774_v17 = vadd.f32 %v6639_v15, %v1980_v61 }
  0x1d   : > { %3251 = vmatpush1.bf16.msra.mxu0 %v6468_v8  ;;  %6439 = vmatpush1.bf16.msra.mxu1 %v6468_v8  ;;  %v2507_v2 = vsel %vm9531_vm3, %v2460_v52, %v2461_v53  ;;  %v6479_v8 = vld [vmem:[%s9515_s1 + $0x40] sm:$0xff]   ;;  %v2508_v10 = vsel %vm9531_vm3, %v6720_v48, %v2460_v52  ;;  %v1950_v18 = vunpack.c.h.bf16 %v6746_v0  ;;  %v6779_v19 = vpack.c.bf16 %v6720_v48, %v6720_v48  ;;  %v6485_v52 = vld [vmem:[%s9515_s1 + $0x130] sm:$0xff]  }
  0x1e   : > { %3252 = vmatprep.subr.bf16.mxu0 %v9537_v1  ;;  %6424 = vmatprep.subr.bf16.mxu1 %v9537_v1  ;;  %v6788_v22 = vadd.s32 64, %v6614_v7  ;;  %vm6793_vm6 = vcmp.ge.s32.totalorder %v824_v5, 1  ;;  %vm6797_vm7 = vcmp.le.s32.totalorder %v502_v6, 16  ;;  %v2105_v33 = vadd.f32 %v6639_v15, %v2027_v11 }
  0x1f   : > { %9845 = vst [vmem:[#allocation9_spill] sm:$0xff] %v6779_v19  ;;  %v838_v35 = vand.u32 31, %v438_v13  ;;  %v6808_v37 = vmax.f32 %v2057_v16, 0.0  ;;  %v2130_v38 = vmax.f32 %v6774_v17, 0.0  ;;  %v2028_v39 = vmul.f32 %v6629_v9, %v1950_v18  ;;  %v6489_v13 = vld [vmem:[%s9515_s1 + $0x128] sm:$0xff]   ;;  %vm6896_vm11 = vmpackc.low %vm9522_vm1, %vm6793_vm6 }
  0x20   : > { %v6813_v40 = vpack.c.bf16 %v9524_v47, %v2174_v59  ;;  %v9854_v43 = vmov 0  ;;  %v516_v45 = vand.u32 31, %v6788_v22  ;;  %v6098_v46 = vunpack.c.l.bf16 %v6265_v36  ;;  %vm6987_vm14 = vmpackc.low %vm9522_vm1, %vm6797_vm7 }
  0x21   : > { %3253 = vmatpush1.bf16.msra.mxu0 %v6469_v12  ;;  %6440 = vmatpush1.bf16.msra.mxu1 %v6469_v12  ;;  %v6763_v12 = vadd.f32 %v6639_v15, %v2026_v58  ;;  %v9855_v43 = vsel %vm6820_vm8, 4294967295, %v9854_v43  ;;  %v6842_v54 = vmax.f32 %v2105_v33, 0.0  ;;  %vm6856_vm9 = vcmp.le.s32.totalorder %v838_v35, 16  ;;  %v6915_v33 = vld [vmem:[%s6619_s6 + $0x38] ss:$176 sps:$4 sm:$0xff]  }
  0x22   : > { %3254 = vmatprep.subr.bf16.mxu0 %v9537_v1  ;;  %6425 = vmatprep.subr.bf16.mxu1 %v9537_v1  ;;  %9853 = vst [vmem:[#allocation13_spill] sm:$0xff] %v6813_v40  ;;  %9856 = vst [vmem:[#allocation14_spill] sm:$0xff] %v9855_v43  ;;  %v6861_v57 = vadd.f32 %v6639_v15, %v2028_v39  ;;  %v6051_v58 = vunpack.c.h.bf16 %v6253_v31  ;;  %v2417_v60 = vrot.slane %v6808_v37, 7  ;;  %v6099_v6 = vunpack.c.h.bf16 %v6265_v36  ;;  %v6492_v43 = vld [vmem:[%s9515_s1 + $0xf0] sm:$0xff]  }
  0x23   : > { %v440_v16 = vadd.s32 448, %v6614_v7  ;;  %v9863_v18 = vmov 0  ;;  %v394_v39 = vadd.s32 80, %v6614_v7  ;;  %vm6952_vm12 = vcmp.ge.s32.totalorder %v516_v45, 1  ;;  %vm7000_vm15 = vmpackc.low %vm9522_vm1, %vm6856_vm9 }
  0x24   : > { %v9864_v18 = vsel %vm6896_vm11, 4294967295, %v9863_v18  ;;  %v2178_v22 = vmax.f32 %v6861_v57, 0.0  ;;  %v2031_v35 = vmul.f32 %v6099_v6, %v6629_v9  ;;  %v6965_v6 = vld [vmem:[%s6619_s6 + $0x30] sm:$0xff]  }
  0x25   : > { %3255 = vmatpush1.bf16.msra.mxu0 %v6470_v21  ;;  %6441 = vmatpush1.bf16.msra.mxu1 %v6470_v21  ;;  %v6481_v21 = vld [vmem:[%s9515_s1 + $0x138] sm:$0xff]   ;;  %9865 = vst [vmem:[#allocation17_spill] sm:$0xff] %v9864_v18 }
  0x26   : > { %3256 = vmatprep.subr.bf16.mxu0 %v9537_v1  ;;  %6426 = vmatprep.subr.bf16.mxu1 %v9537_v1  ;;  %v6950_v57 = vsel %vm6856_vm9, %v2178_v22, 0.0  ;;  %v2109_v45 = vadd.f32 %v6639_v15, %v2031_v35  ;;  %v9875_v35 = vmov 0  ;;  %v6992_v17 = vpack.c.bf16 %v9524_v47, %v2178_v22 }
  0x27   : > { %v9876_v35 = vsel %vm6987_vm14, 4294967295, %v9875_v35  ;;  %v442_v22 = vadd.s32 464, %v6614_v7 }
  0x28   : > { %9877 = vst [vmem:[#allocation23_spill] sm:$0xff] %v9876_v35  ;;  %9878 = vst [vmem:[#allocation24_spill] sm:$0xff] %v6992_v17 }
  0x29   : > { %3257 = vmatpush1.bf16.msra.mxu0 %v6471_v27  ;;  %6442 = vmatpush1.bf16.msra.mxu1 %v6471_v27  ;;  %v6790_v27 = vpack.c.bf16 %v2507_v2, %v2508_v10  ;;  %v6526_v10 = vld [vmem:[%s9515_s1 + $0x228] sm:$0xff]  }
  0x2a   : > { %3258 = vmatprep.subr.bf16.mxu0 %v9537_v1  ;;  %6427 = vmatprep.subr.bf16.mxu1 %v9537_v1 }
  0x2b   : > { %9846 = vst [vmem:[#allocation10_spill] sm:$0xff] %v6790_v27 }
  0x2d   : > { %3259 = vmatpush2.bf16.msra.mxu0 %v6472_v28  ;;  %6443 = vmatpush2.bf16.msra.mxu1 %v6472_v28  ;;  %v2128_v28 = vmax.f32 %v6753_v4, 0.0  ;;  %v6483_v4 = vld [vmem:[%s9515_s1 + $0xa8] sm:$0xff]  }
  0x2e   : > { %3260 = vmatprep.subr.bf16.mxu0 %v9537_v1  ;;  %6428 = vmatprep.subr.bf16.mxu1 %v9537_v1 }
  0x2f   : > { %v6826_v44 = vsel %vm6741_vm5, %v2128_v28, 0.0  ;;  %v6885_v11 = vpack.c.bf16 %v6808_v37, %v2128_v28  ;;  %v1983_v28 = vmul.f32 %v6051_v58, %v6629_v9  ;;  %v9867_v58 = vmov 0 }
  0x30   : > { %v2416_v59 = vrot.slane %v6826_v44, 7  ;;  %v9868_v58 = vsel %vm6952_vm12, 4294967295, %v9867_v58  ;;  %vm9920_vm5 = vcmp.lt.s32.totalorder %v6614_v7, 1 }
  0x31   : > { %3261 = vmatpush2.bf16.msra.mxu0 %v6473_v29  ;;  %6444 = vmatpush2.bf16.msra.mxu1 %v6473_v29  ;;  %v9847_v29 = vmov 0  ;;  %9869 = vst [vmem:[#allocation19_spill] sm:$0xff] %v9868_v58 }
  0x32   : > { %3262 = vmatprep.subr.bf16.mxu0 %v9537_v1  ;;  %6429 = vmatprep.subr.bf16.mxu1 %v9537_v1  ;;  %v9848_v29 = vsel %vm6793_vm6, 4294967295, %v9847_v29 }
  0x33   : > { %9849 = vst [vmem:[#allocation11_spill] sm:$0xff] %v9848_v29 }
  0x35   : > { %3263 = vmatpush2.bf16.msra.mxu0 %v6474_v30  ;;  %6445 = vmatpush2.bf16.msra.mxu1 %v6474_v30  ;;  %v9850_v30 = vmov 0 }
  0x36   : > { %3264 = vmatprep.subr.bf16.mxu0 %v9537_v1  ;;  %6430 = vmatprep.subr.bf16.mxu1 %v9537_v1  ;;  %v9851_v30 = vsel %vm6797_vm7, 4294967295, %v9850_v30 }
  0x37   : > { %9852 = vst [vmem:[#allocation12_spill] sm:$0xff] %v9851_v30 }
  0x39   : > { %3265 = vmatpush2.bf16.msra.mxu0 %v6475_v32  ;;  %6446 = vmatpush2.bf16.msra.mxu1 %v6475_v32  ;;  %v2462_v32 = vrot.slane %v6770_v14, 7 }
  0x3a   : > { %3266 = vmatprep.subr.bf16.mxu0 %v9537_v1  ;;  %6431 = vmatprep.subr.bf16.mxu1 %v9537_v1 }
  0x3b   : > { %v2505_v50 = vsel %vm9531_vm3, %v2462_v32, %v6720_v48  ;;  %v2506_v51 = vsel %vm9531_vm3, %v2461_v53, %v2462_v32  ;;  %v9857_v53 = vmov 0 }
  0x3c   : > { %v9858_v53 = vsel %vm6856_vm9, 4294967295, %v9857_v53  ;;  %v6870_v2 = vpack.c.bf16 %v2505_v50, %v2506_v51  ;;  %v852_v50 = vand.u32 31, %v440_v16  ;;  %v6493_v51 = vld [vmem:[%s9515_s1 + $0x120] sm:$0xff]   ;;  %vm9893_vm9 = vcmp.lt.s32.totalorder %v6614_v7, 1 }
  0x3d   : > { %3267 = vmatpush2.bf16.msra.mxu0 %v6476_v34  ;;  %6447 = vmatpush2.bf16.msra.mxu1 %v6476_v34  ;;  %v2176_v34 = vmax.f32 %v6763_v12, 0.0  ;;  %9859 = vst [vmem:[#allocation15_spill] sm:$0xff] %v9858_v53  ;;  %v2465_v12 = vrot.slane %v6842_v54, 7  ;;  %vm9897_vm4 = vmmov %vm9893_vm9 }
  0x3e   : > { %3268 = vmatprep.subr.bf16.mxu0 %v9537_v1  ;;  %6432 = vmatprep.subr.bf16.mxu1 %v9537_v1  ;;  %9860 = vst [vmem:[#allocation16_spill] sm:$0xff] %v6870_v2  ;;  %vm6978_vm13 = vcmp.ge.s32.totalorder %v852_v50, 1 }
  0x3f   : > { %v6846_v55 = vsel %vm6793_vm6, %v2176_v34, 0.0 }
  0x40   : > { %v2464_v5 = vrot.slane %v6846_v55, 7 }
  0x41   : > { %3269 = vmatpush2.bf16.msra.mxu0 %v6477_v41  ;;  %6448 = vmatpush2.bf16.msra.mxu1 %v6477_v41  ;;  %v6050_v41 = vunpack.c.l.bf16 %v6253_v31  ;;  %v2551_v31 = vsel %vm9531_vm3, %v2416_v59, %v2417_v60 }
  0x42   : > { %3270 = vmatprep.subr.bf16.mxu0 %v9537_v1  ;;  %6433 = vmatprep.subr.bf16.mxu1 %v9537_v1 }
  0x43   : > { %v1982_v61 = vmul.f32 %v6050_v41, %v6629_v9  ;;  %v6484_v41 = vld [vmem:[%s9515_s1 + $0xa0] sm:$0xff]  }
  0x45   : > { %3271 = vmatpush2.bf16.msra.mxu0 %v6478_v56  ;;  %6449 = vmatpush2.bf16.msra.mxu1 %v6478_v56  ;;  %v6854_v56 = vsel %vm6797_vm7, %v2130_v38, 0.0  ;;  %v6912_v32 = vadd.f32 %v6639_v15, %v1982_v61  ;;  %v1954_v61 = vunpack.c.h.bf16 %v6915_v33 }
  0x46   : > { %3272 = vmatprep.subr.bf16.mxu0 %v9537_v1  ;;  %6434 = vmatprep.subr.bf16.mxu1 %v9537_v1 }
  0x49   : > { %3273 = vmatpush2.bf16.msra.mxu0 %v6479_v8  ;;  %6450 = vmatpush2.bf16.msra.mxu1 %v6479_v8  ;;  %v2030_v8 = vmul.f32 %v6098_v46, %v6629_v9  ;;  %v2503_v46 = vsel %vm9531_vm3, %v2464_v5, %v2465_v12 }
  0x4a   : > { %3531 = vmatprep.subr.bf16.mxu1 %v9537_v1  ;;  %3820 = vmatprep.subr.bf16.mxu0 %v9537_v1 }
  0x4b   : > { %v6924_v36 = vadd.f32 %v6639_v15, %v2030_v8 }
  0x4c   : > { %3275 = vmatmul.mubr.bf16.vlgmr.msra.gmra.mxu0 %v6779_v19  ;;  %3467 = vmatmul.mubr.bf16.vlgmr.msra.gmra.mxu1 %v6790_v27 }
  0x4d   : > { %3532 = vmatpush1.bf16.msra.mxu1 %v6480_v20  ;;  %3821 = vmatpush1.bf16.msra.mxu0 %v6481_v21  ;;  %v6901_v20 = vpack.c.bf16 %v6842_v54, %v2176_v34  ;;  %v2418_v21 = vrot.slane %v6854_v56, 7  ;;  %v2552_v34 = vsel %vm9531_vm3, %v6720_v48, %v2416_v59  ;;  %v2061_v59 = vadd.f32 %v6639_v15, %v1983_v28 }
  0x4e   : > { %3533 = vmatprep.subr.bf16.mxu1 %v9537_v1  ;;  %3282 = vmatprep.mubr.bf16.mxu0 %v9520_v3  ;;  %v2180_v16 = vmax.f32 %v6924_v36, 0.0  ;;  %v530_v28 = vand.u32 31, %v394_v39  ;;  %v2032_v36 = vmul.f32 %v6629_v9, %v1954_v61  ;;  %v9879_v39 = vmov 0  ;;  %v6497_v61 = vld [vmem:[%s9515_s1 + $0x118] sm:$0xff]   ;;  %v6487_v3 = vld [vmem:[%s9515_s1 + $0x90] sm:$0xff]  }
  0x4f   : > { %5708 = vmatprep.mubr.msk.bf16.mxu1 %vm6820_vm8, %v6813_v40  ;;  %3822 = vmatprep.subr.bf16.mxu0 %v9537_v1  ;;  %9866 = vst [vmem:[#allocation18_spill] sm:$0xff] %v6901_v20  ;;  %v9880_v39 = vsel %vm7000_vm15, 4294967295, %v9879_v39  ;;  %v2550_v50 = vsel %vm9531_vm3, %v2417_v60, %v2418_v21 }
  0x50   : > { %9881 = vst [vmem:[#allocation25_spill] sm:$0xff] %v9880_v39  ;;  %vm7042_vm1 = vcmp.le.s32.totalorder %v530_v28, 16  ;;  %v7054_v53 = vadd.f32 %v6639_v15, %v2032_v36  ;;  %v6055_v36 = vunpack.c.h.bf16 %v6965_v6 }
  0x51   : > { %3534 = vmatpush1.bf16.msra.mxu1 %v6482_v49  ;;  %3823 = vmatpush1.bf16.msra.mxu0 %v6485_v52  ;;  %v2504_v49 = vsel %vm9531_vm3, %v6720_v48, %v2464_v5  ;;  %v1906_v52 = vunpack.c.l.bf16 %v6746_v0  ;;  %v6486_v0 = vld [vmem:[%s9515_s1 + $0x98] sm:$0xff]   ;;  %v2132_v5 = vmax.f32 %v6912_v32, 0.0  ;;  %v9872_v32 = vmov 0 }
  0x52   : > { %3535 = vmatprep.subr.bf16.mxu1 %v9537_v1  ;;  %3824 = vmatprep.subr.bf16.mxu0 %v9537_v1  ;;  %v6967_v8 = vpack.c.bf16 %v2503_v46, %v2504_v49  ;;  %v9873_v32 = vsel %vm6978_vm13, 4294967295, %v9872_v32  ;;  %v6266_v49 = vld [vmem:[%s6619_s6 + $0xf0] sm:$0xff]  }
  0x53   : > { %9874 = vst [vmem:[#allocation22_spill] sm:$0xff] %v9873_v32  ;;  %v7009_v46 = vsel %vm6952_vm12, %v2132_v5, 0.0  ;;  %v1987_v32 = vmul.f32 %v6055_v36, %v6629_v9 }
  0x54   : > { %3283 = vmatmul.mubr.bf16.gmra.mxu0 %v6779_v19  ;;  %3475 = vmatmul.mubr.bf16.gmra.mxu1 %v6870_v2  ;;  %9870 = vst [vmem:[#allocation20_spill] sm:$0xff] %v6967_v8 }
  0x55   : > { %3536 = vmatpush1.bf16.msra.mxu1 %v6483_v4  ;;  %5639 = vmatprep.mubr.msk.bf16.mxu0 %vm6880_vm10, %v6885_v11  ;;  %v6958_v4 = vpack.c.bf16 %v2551_v31, %v2552_v34  ;;  %v6975_v31 = vpack.c.bf16 %v9524_v47, %v2130_v38  ;;  %v1984_v34 = vmul.f32 %v6629_v9, %v1906_v52  ;;  %v6994_v38 = vmax.f32 %v2061_v59, 0.0 }
  0x56   : > { %3537 = vmatprep.subr.bf16.mxu1 %v9537_v1  ;;  %5711 = vmatprep.mubr.msk.bf16.mxu1 %vm6896_vm11, %v6901_v20  ;;  %v7019_v52 = vmax.f32 %v2109_v45, 0.0  ;;  %v7023_v59 = vsel %vm6978_vm13, %v2180_v16, 0.0  ;;  %v9882_v45 = vmov 0  ;;  %v2420_v47 = vrot.slane %v7009_v46, 7 }
  0x57   : > { %3825 = vmatpush1.bf16.msra.mxu0 %v6489_v13  ;;  %9871 = vst [vmem:[#allocation21_spill] sm:$0xff] %v6975_v31  ;;  %v2466_v13 = vrot.slane %v6950_v57, 7  ;;  %v9883_v45 = vsel %vm7042_vm1, 4294967295, %v9882_v45  ;;  %vm9995_vm11 = vcmp.lt.s32.totalorder %v6614_v7, 1 }
  0x58   : > { %3826 = vmatprep.subr.bf16.mxu0 %v9537_v1  ;;  %9884 = vst [vmem:[#allocation26_spill] sm:$0xff] %v9883_v45  ;;  %v9548_v29 = vrot.slane %v7019_v52, 7 }
  0x59   : > { %3538 = vmatpush1.bf16.msra.mxu1 %v6484_v41  ;;  %v2549_v41 = vsel %vm9531_vm3, %v2418_v21, %v6720_v48  ;;  %v2501_v60 = vsel %vm9531_vm3, %v2466_v13, %v6720_v48  ;;  %v2502_v21 = vsel %vm9531_vm3, %v2465_v12, %v2466_v13  ;;  %v6102_v12 = vunpack.c.l.bf16 %v6266_v49 }
  0x5a   : > { %3539 = vmatprep.subr.bf16.mxu1 %v9537_v1  ;;  %v7056_v28 = vpack.c.bf16 %v2549_v41, %v2550_v50  ;;  %v2468_v13 = vrot.slane %v7023_v59, 7  ;;  %v7060_v24 = vpack.c.bf16 %v2501_v60, %v2502_v21  ;;  %v7069_v41 = vpack.c.bf16 %v6994_v38, %v2132_v5  ;;  %v7073_v21 = vld [vmem:[%s6619_s6 + $0x48] ss:$176 sps:$4 sm:$0xff]  }
  0x5b   : > { %3827 = vmatpush1.bf16.msra.mxu0 %v6493_v51  ;;  %v6054_v51 = vunpack.c.l.bf16 %v6965_v6  ;;  %v396_v50 = vadd.s32 96, %v6614_v7  ;;  %v6103_v60 = vunpack.c.h.bf16 %v6266_v49  ;;  %vm9887_vm3 = vmmov 1  }
  0x5c   : > { %3291 = vmatmul.mubr.bf16.gmra.mxu0 %v6958_v4  ;;  %3483 = vmatmul.mubr.bf16.gmra.mxu1 %v6967_v8  ;;  %9885 = vst [vmem:[#allocation27_spill] sm:$0xff] %v7060_v24  ;;  %9886 = vst [vmem:[#allocation28_spill] sm:$0xff] %v7069_v41  ;;  %v9888_v6 = vmov 0  ;;  %v9892_v5 = vrot.slane %v6994_v38, 7  ;;  %v1958_v36 = vunpack.c.h.bf16 %v7073_v21 }
  0x5d   : > { %3540 = vmatpush1.bf16.msra.mxu1 %v6486_v0  ;;  %5642 = vmatprep.mubr.msk.bf16.mxu0 %vm6987_vm14, %v6975_v31  ;;  %v2062_v0 = vadd.f32 %v6639_v15, %v1984_v34  ;;  %v866_v34 = vand.u32 31, %v442_v22  ;;  %v1986_v63 = vmul.f32 %v6054_v51, %v6629_v9  ;;  %vm7080_vm6 = vmpackc.low %vm9887_vm3, %vm6952_vm12  ;;  %v2182_v51 = vmax.f32 %v7054_v53, 0.0 }
  0x5e   : > { %3541 = vmatprep.subr.bf16.mxu1 %v9537_v1  ;;  %5714 = vmatprep.mubr.msk.bf16.mxu1 %vm7000_vm15, %v6992_v17  ;;  %v9889_v6 = vsel %vm7080_vm6, 4294967295, %v9888_v6  ;;  %v2547_v49 = vsel %vm9893_vm9, %v2420_v47, %v9892_v5  ;;  %vm7096_vm0 = vmpackc.low %vm9887_vm3, %vm6978_vm13  ;;  %v9899_v5 = vmov 0  ;;  %v444_v53 = vadd.s32 480, %v6614_v7 }
  0x5f   : > { %3828 = vmatprep.subr.bf16.mxu0 %v9537_v1  ;;  %v2134_v22 = vmax.f32 %v2062_v0, 0.0  ;;  %9890 = vst [vmem:[#allocation29_spill] sm:$0xff] %v9889_v6  ;;  %v9894_v0 = vmov 0  ;;  %vm9898_vm12 = vmmov %vm9897_vm4  ;;  %vm7106_vm9 = vcmp.le.s32.totalorder %v866_v34, 16  ;;  %v2499_v34 = vsel %vm9897_vm4, %v2468_v13, %v9548_v29  ;;  %v6503_v29 = vld [vmem:[%s9515_s1 + $0x108] sm:$0xff]  }
  0x60   : > { %3829 = vmatpush1.bf16.msra.mxu0 %v6497_v61  ;;  %v2034_v61 = vmul.f32 %v6102_v12, %v6629_v9  ;;  %v9895_v0 = vsel %vm7096_vm0, 4294967295, %v9894_v0  ;;  %v9900_v5 = vsel %vm7106_vm9, 4294967295, %v9899_v5  ;;  %v6501_v12 = vld [vmem:[%s9515_s1 + $0x110] sm:$0xff]   ;;  %v7125_v58 = vadd.f32 %v6639_v15, %v1986_v63  ;;  %vm7189_vm13 = vmpackc.low %vm9887_vm3, %vm7106_vm9 }
  0x61   : > { %3542 = vmatpush1.bf16.msra.mxu1 %v6487_v3  ;;  %3830 = vmatprep.subr.bf16.mxu0 %v9537_v1  ;;  %v7085_v3 = vpack.c.bf16 %v7019_v52, %v2180_v16  ;;  %9896 = vst [vmem:[#allocation31_spill] sm:$0xff] %v9895_v0  ;;  %v2548_v16 = vsel %vm9897_vm4, %v6720_v48, %v2420_v47  ;;  %9901 = vst [vmem:[#allocation32_spill] sm:$0xff] %v9900_v5  ;;  %v6490_v47 = vld [vmem:[%s9515_s1 + $0x80] sm:$0xff]   ;;  %v7132_v30 = vsel %vm7042_vm1, %v2134_v22, 0.0 }
  0x62   : > { %3543 = vmatprep.subr.bf16.mxu1 %v9537_v1  ;;  %v2500_v1 = vsel %vm9898_vm12, %v6720_v48, %v2468_v13  ;;  %v544_v19 = vand.u32 31, %v396_v50  ;;  %v2035_v39 = vmul.f32 %v6103_v60, %v6629_v9  ;;  %v1910_v17 = vunpack.c.l.bf16 %v6915_v33  ;;  %vm7176_vm4 = vmpackc.low %vm9887_vm3, %vm7042_vm1 }
  0x63   : > { %9891 = vst [vmem:[#allocation30_spill] sm:$0xff] %v7085_v3  ;;  %v9902_v13 = vmov 0   ;;  %v7145_v63 = vadd.f32 %v6639_v15, %v2034_v61  ;;  %v7148_v50 = vpack.c.bf16 %v2547_v49, %v2548_v16  ;;  %v7150_v60 = vpack.c.bf16 %v2499_v34, %v2500_v1  ;;  %v6491_v1 = vld [vmem:[%s9515_s1 + $0xf8] sm:$0xff]   ;;  %v6255_v34 = vld [vmem:[%s6619_s6 + $0x40] sm:$0xff]  }
  0x64   : > { %3299 = vmatmul.mubr.bf16.gmra.mxu0 %v7056_v28  ;;  %3491 = vmatmul.mubr.bf16.gmra.mxu1 %v7060_v24  ;;  %v880_v33 = vand.u32 31, %v444_v53  ;;  %v2422_v0 = vrot.slane %v7132_v30, 7  ;;  %v2065_v61 = vadd.f32 %v6639_v15, %v1987_v32  ;;  %v2136_v20 = vmax.f32 %v7125_v58, 0.0 }
  0x65   : > { %3544 = vmatpush1.bf16.msra.mxu1 %v6488_v62  ;;  %5645 = vmatprep.mubr.msk.bf16.mxu0 %vm7080_vm6, %v7069_v41  ;;  %v7142_v62 = vsel %vm7106_vm9, %v2182_v51, 0.0  ;;  %9903 = vst [vmem:[#allocation33_spill] sm:$0xff] %v7148_v50  ;;  %9904 = vst [vmem:[#allocation34_spill] sm:$0xff] %v7150_v60  ;;  %vm7166_vm12 = vcmp.ge.s32.totalorder %v544_v19, 1  ;;  %v9907_v16 = vmov 0  ;;  %v1988_v32 = vmul.f32 %v6629_v9, %v1910_v17 }
  0x66   : > { %3545 = vmatprep.subr.bf16.mxu1 %v9902_v13  ;;  %5717 = vmatprep.mubr.msk.bf16.mxu1 %vm7096_vm0, %v7085_v3  ;;  %v9905_v3 = vmov 0.0   ;;  %v2470_v49 = vrot.slane %v7142_v62, 7  ;;  %v9908_v16 = vsel %vm7166_vm12, 4294967295, %v9907_v16  ;;  %v9910_v58 = vmov 0  ;;  %vm9922_vm9 = vmmov %vm9920_vm5 }
  0x67   : > { %3831 = vmatpush1.bf16.msra.mxu0 %v6501_v12  ;;  %v7157_v18 = vpack.c.bf16 %v9905_v3, %v2134_v22  ;;  %9909 = vst [vmem:[#allocation36_spill] sm:$0xff] %v9908_v16  ;;  %v2113_v22 = vadd.f32 %v6639_v15, %v2035_v39  ;;  %v9911_v58 = vsel %vm7176_vm4, 4294967295, %v9910_v58  ;;  %v7181_v53 = vpack.c.bf16 %v9905_v3, %v2182_v51 }
  0x68   : > { %3832 = vmatprep.subr.bf16.mxu0 %v9902_v13  ;;  %9912 = vst [vmem:[#allocation37_spill] sm:$0xff] %v9911_v58  ;;  %v2184_v19 = vmax.f32 %v7145_v63, 0.0  ;;  %v398_v12 = vadd.s32 112, %v6614_v7  ;;  %v2036_v39 = vmul.f32 %v6629_v9, %v1958_v36  ;;  %v9914_v17 = vmov 0 }
  0x69   : > { %9906 = vst [vmem:[#allocation35_spill] sm:$0xff] %v7157_v18  ;;  %3546 = vmatpush1.bf16.msra.mxu1 %v6490_v47  ;;  %9913 = vst [vmem:[#allocation38_spill] sm:$0xff] %v7181_v53  ;;  %v9915_v17 = vsel %vm7189_vm13, 4294967295, %v9914_v17  ;;  %vm7193_vm1 = vcmp.ge.s32.totalorder %v880_v33, 1  ;;  %v9917_v47 = vmov 0  ;;  %v446_v51 = vadd.s32 496, %v6614_v7 }
  0x6a   : > { %3547 = vmatprep.subr.bf16.mxu1 %v9902_v13  ;;  %9916 = vst [vmem:[#allocation39_spill] sm:$0xff] %v9915_v17  ;;  %v9918_v47 = vsel %vm7193_vm1, 4294967295, %v9917_v47  ;;  %v2545_v63 = vsel %vm9920_vm5, %v2422_v0, %v6720_v48  ;;  %v9921_v36 = vrot.slane %v6994_v38, 7  ;;  %v7208_v5 = vmax.f32 %v2065_v61, 0.0  ;;  %vm7277_vm7 = vmpackc.low %vm9887_vm3, %vm7193_vm1 }
  0x6b   : > { %9919 = vst [vmem:[#allocation40_spill] sm:$0xff] %v9918_v47  ;;  %3833 = vmatpush1.bf16.msra.mxu0 %v6503_v29  ;;  %v7212_v45 = vsel %vm7166_vm12, %v2136_v20, 0.0  ;;  %v6504_v29 = vld [vmem:[%s9515_s1 + $0x100] sm:$0xff]   ;;  %v9923_v61 = vrot.slane %v7019_v52, 7  ;;  %v7230_v40 = vmax.f32 %v2113_v22, 0.0  ;;  %v7239_v25 = vsel %vm7193_vm1, %v2184_v19, 0.0 }
  0x6c   : > { %3307 = vmatmul.mubr.bf16.gmra.mxu0 %v7148_v50  ;;  %3499 = vmatmul.mubr.bf16.gmra.mxu1 %v7150_v60  ;;  %v2546_v33 = vsel %vm9922_vm9, %v9921_v36, %v2422_v0  ;;  %v2497_v0 = vsel %vm9920_vm5, %v2470_v49, %v6720_v48  ;;  %vm9924_vm9 = vmmov %vm9920_vm5  ;;  %v558_v26 = vand.u32 31, %v398_v12  ;;  %v2114_v60 = vadd.f32 %v6639_v15, %v2036_v39  ;;  %v6494_v12 = vld [vmem:[%s9515_s1 + $0xe8] sm:$0xff]  }
  0x6d   : > { %3548 = vmatpush2.bf16.msra.mxu1 %v6491_v1  ;;  %5648 = vmatprep.mubr.msk.bf16.mxu0 %vm7176_vm4, %v7157_v18  ;;  %v2498_v36 = vsel %vm9924_vm9, %v9923_v61, %v2470_v49  ;;  %v2066_v1 = vadd.f32 %v6639_v15, %v1988_v32  ;;  %v6058_v24 = vunpack.c.l.bf16 %v6255_v34  ;;  %v7242_v8 = vpack.c.bf16 %v2545_v63, %v2546_v33  ;;  %vm7262_vm5 = vmpackc.low %vm9887_vm3, %vm7166_vm12 }
  0x6e   : > { %3549 = vmatprep.subr.bf16.mxu1 %v9902_v13  ;;  %5720 = vmatprep.mubr.msk.bf16.mxu1 %vm7189_vm13, %v7181_v53  ;;  %v894_v49 = vand.u32 31, %v446_v51  ;;  %v7245_v22 = vpack.c.bf16 %v2497_v0, %v2498_v36  ;;  %v2424_v32 = vrot.slane %v7212_v45, 7  ;;  %v7249_v61 = vpack.c.bf16 %v7208_v5, %v2136_v20 }
  0x6f   : > { %9925 = vst [vmem:[#allocation41_spill] sm:$0xff] %v7242_v8  ;;  %3834 = vmatprep.subr.bf16.mxu0 %v9902_v13  ;;  %v9587_v17 = vrot.slane %v7208_v5, 7  ;;  %v2472_v39 = vrot.slane %v7239_v25, 7  ;;  %v9589_v51 = vrot.slane %v7230_v40, 7  ;;  %v2138_v63 = vmax.f32 %v2066_v1, 0.0 }
  0x70   : > { %9926 = vst [vmem:[#allocation42_spill] sm:$0xff] %v7245_v22  ;;  %9927 = vst [vmem:[#allocation43_spill] sm:$0xff] %v7249_v61  ;;  %3835 = vmatpush1.bf16.msra.mxu0 %v6504_v29  ;;  %v6059_v33 = vunpack.c.h.bf16 %v6255_v34  ;;  %v9928_v20 = vmov 0  ;;  %vm7269_vm9 = vcmp.le.s32.totalorder %v558_v26, 16  ;;  %v9932_v29 = vmov 0  ;;  %v6506_v26 = vld [vmem:[%s9515_s1 + $0x178] sm:$0xff]  }
  0x71   : > { %3550 = vmatpush2.bf16.msra.mxu1 %v6492_v43  ;;  %3836 = vmatprep.subr.bf16.mxu0 %v9902_v13  ;;  %v9929_v20 = vsel %vm7262_vm5, 4294967295, %v9928_v20  ;;  %v7267_v43 = vpack.c.bf16 %v7230_v40, %v2184_v19  ;;  %v9933_v29 = vsel %vm7269_vm9, 4294967295, %v9932_v29  ;;  %v2186_v0 = vmax.f32 %v2114_v60, 0.0 }
  0x72   : > { %3551 = vmatprep.subr.bf16.mxu1 %v9902_v13  ;;  %9930 = vst [vmem:[#allocation44_spill] sm:$0xff] %v9929_v20  ;;  %9934 = vst [vmem:[#allocation46_spill] sm:$0xff] %v9933_v29  ;;  %v1990_v34 = vmul.f32 %v6058_v24, %v6629_v9  ;;  %v9935_v36 = vmov 0  ;;  %vm7281_vm12 = vcmp.le.s32.totalorder %v894_v49, 16  ;;  %v9938_v1 = vmov 0  ;;  %v6495_v49 = vld [vmem:[%s9515_s1 + $0xe0] sm:$0xff]  }
  0x73   : > { %9931 = vst [vmem:[#allocation45_spill] sm:$0xff] %v7267_v43  ;;  %v9936_v36 = vsel %vm7277_vm7, 4294967295, %v9935_v36  ;;  %v9939_v1 = vsel %vm7281_vm12, 4294967295, %v9938_v1  ;;  %v400_v19 = vadd.s32 128, %v6614_v7  ;;  %vm9941_vm1 = vcmp.lt.s32.totalorder %v6614_v7, 1  ;;  %v6515_v20 = vld [vmem:[%s9515_s1 + $0x150] sm:$0xff]  }
  0x74   : > { %9937 = vst [vmem:[#allocation47_spill] sm:$0xff] %v9936_v36  ;;  %9940 = vst [vmem:[#allocation48_spill] sm:$0xff] %v9939_v1  ;;  %3315 = vmatmul.mubr.bf16.gmra.mxu0 %v7242_v8  ;;  %3507 = vmatmul.mubr.bf16.gmra.mxu1 %v7245_v22  ;;  %v2543_v24 = vsel %vm9941_vm1, %v2424_v32, %v9587_v17  ;;  %v7322_v16 = vsel %vm7281_vm12, %v2186_v0, 0.0  ;;  %vm9984_vm15 = vcmp.lt.s32.totalorder %v6614_v7, 7 }
  0x75   : > { %vm9942_vm13 = vmmov %vm9941_vm1  ;;  %3552 = vmatpush2.bf16.msra.mxu1 %v6494_v12  ;;  %5651 = vmatprep.mubr.msk.bf16.mxu0 %vm7262_vm5, %v7249_v61  ;;  %v1991_v12 = vmul.f32 %v6059_v33, %v6629_v9  ;;  %v572_v53 = vand.u32 31, %v400_v19  ;;  %v6508_v9 = vld [vmem:[%s9515_s1 + $0x170] sm:$0xff]   ;;  %v2474_v19 = vrot.slane %v7322_v16, 7  ;;  %v2634_v61 = vrot.slane %v6808_v37, 1 }
  0x76   : > { %v2544_v60 = vsel %vm9942_vm13, %v6720_v48, %v2424_v32  ;;  %vm9943_vm0 = vmmov %vm9941_vm1  ;;  %v7313_v32 = vsel %vm7269_vm9, %v2138_v63, 0.0  ;;  %3553 = vmatprep.subr.bf16.mxu1 %v9902_v13  ;;  %5723 = vmatprep.mubr.msk.bf16.mxu1 %vm7277_vm7, %v7267_v43  ;;  %v9961_v43 = vrot.slane %v7230_v40, 7 }
  0x77   : > { %v2495_v47 = vsel %vm9943_vm0, %v2472_v39, %v9589_v51  ;;  %vm9944_vm1 = vmmov %vm9943_vm0  ;;  %v2068_v51 = vadd.f32 %v6639_v15, %v1990_v34  ;;  %3837 = vmatpush2.bf16.msra.mxu0 %v6506_v26  ;;  %v7329_v33 = vpack.c.bf16 %v2543_v24, %v2544_v60  ;;  %v2426_v36 = vrot.slane %v7313_v32, 7 }
  0x78   : > { %v2496_v17 = vsel %vm9944_vm1, %v6720_v48, %v2472_v39  ;;  %v1914_v39 = vunpack.c.l.bf16 %v7073_v21  ;;  %3838 = vmatprep.subr.bf16.mxu0 %v9902_v13  ;;  %v6496_v21 = vld [vmem:[%s9515_s1 + $0xd8] sm:$0xff]   ;;  %v7339_v34 = vpack.c.bf16 %v9905_v3, %v2138_v63  ;;  %v2069_v26 = vadd.f32 %v6639_v15, %v1991_v12  ;;  %vm7347_vm0 = vmpackc.low %vm9887_vm3, %vm7269_vm9  ;;  %v7357_v63 = vld [vmem:[%s9516_s2] ss:$0 sm:$0xff] }
  0x79   : > { %9945 = vst [vmem:[#allocation49_spill] sm:$0xff] %v7329_v33  ;;  %v7331_v22 = vpack.c.bf16 %v2495_v47, %v2496_v17  ;;  %3554 = vmatpush2.bf16.msra.mxu1 %v6495_v49  ;;  %v9948_v17 = vmov 0  ;;  %v7352_v47 = vpack.c.bf16 %v9905_v3, %v2186_v0  ;;  %v2140_v24 = vmax.f32 %v2068_v51, 0.0  ;;  %vm7363_vm13 = vmpackc.low %vm9887_vm3, %vm7281_vm12  ;;  %v6256_v0 = vld [vmem:[%s6619_s6 + $0x50] sm:$0xff]  }
  0x7a   : > { %9947 = vst [vmem:[#allocation51_spill] sm:$0xff] %v7339_v34  ;;  %3555 = vmatprep.subr.bf16.mxu1 %v9902_v13  ;;  %v9949_v17 = vsel %vm7347_vm0, 4294967295, %v9948_v17  ;;  %v1992_v15 = vmul.f32 %v7357_v63, %v1914_v39  ;;  %v9952_v60 = vmov 0  ;;  %vm7367_vm1 = vcmp.ge.s32.totalorder %v572_v53, 1  ;;  %v6510_v39 = vld [vmem:[%s9515_s1 + $0x168] sm:$0xff]   ;;  %v6498_v53 = vld [vmem:[%s9515_s1 + $0xd0] sm:$0xff]  }
  0x7b   : > { %9946 = vst [vmem:[#allocation50_spill] sm:$0xff] %v7331_v22  ;;  %9950 = vst [vmem:[#allocation52_spill] sm:$0xff] %v9949_v17  ;;  %v9953_v60 = vsel %vm7363_vm13, 4294967295, %v9952_v60  ;;  %v9955_v49 = vmov 0  ;;  %v402_v51 = vadd.s32 144, %v6614_v7  ;;  %3839 = vmatpush2.bf16.msra.mxu0 %v6508_v9  ;;  %vm9958_vm9 = vcmp.lt.s32.totalorder %v6614_v7, 1 }
  0x7c   : > { %9951 = vst [vmem:[#allocation53_spill] sm:$0xff] %v7352_v47  ;;  %9954 = vst [vmem:[#allocation54_spill] sm:$0xff] %v9953_v60  ;;  %v9956_v49 = vsel %vm7367_vm1, 4294967295, %v9955_v49  ;;  %3323 = vmatmul.mubr.bf16.gmra.mxu0 %v7329_v33  ;;  %3515 = vmatmul.mubr.bf16.gmra.mxu1 %v7331_v22  ;;  %v2541_v12 = vsel %vm9958_vm9, %v2426_v36, %v6720_v48  ;;  %v9959_v9 = vrot.slane %v7208_v5, 7  ;;  %v7398_v22 = vmax.f32 %v2069_v26, 0.0 }
  0x7d   : > { %9957 = vst [vmem:[#allocation55_spill] sm:$0xff] %v9956_v49  ;;  %3556 = vmatpush2.bf16.msra.mxu1 %v6496_v21  ;;  %5654 = vmatprep.mubr.msk.bf16.mxu0 %vm7347_vm0, %v7339_v34  ;;  %vm9960_vm12 = vmmov %vm9958_vm9  ;;  %v2493_v29 = vsel %vm9958_vm9, %v2474_v19, %v6720_v48 }
  0x7e   : > { %v2542_v1 = vsel %vm9960_vm12, %v9959_v9, %v2426_v36  ;;  %vm9962_vm7 = vmmov %vm9958_vm9  ;;  %3557 = vmatprep.subr.bf16.mxu1 %v9902_v13  ;;  %5726 = vmatprep.mubr.msk.bf16.mxu1 %vm7363_vm13, %v7352_v47  ;;  %v7406_v36 = vsel %vm7367_vm1, %v2140_v24, 0.0  ;;  %v7411_v9 = vld [vmem:[%s9517_s3] ss:$0 sm:$0xff]  ;;  %v6499_v47 = vld [vmem:[%s9515_s1 + $0xc8] sm:$0xff]   ;;  %v7424_v17 = vpack.c.bf16 %v7398_v22, %v2140_v24  ;;  %v9969_v24 = vmov 0 }
  0x7f   : > { %v2494_v21 = vsel %vm9962_vm7, %v9961_v43, %v2474_v19  ;;  %v2070_v2 = vadd.f32 %v7411_v9, %v1992_v15  ;;  %v6062_v43 = vunpack.c.l.bf16 %v6256_v0  ;;  %v586_v19 = vand.u32 31, %v402_v51  ;;  %3840 = vmatprep.subr.bf16.mxu0 %v9902_v13  ;;  %vm7432_vm7 = vmpackc.low %vm9887_vm3, %vm7367_vm1 }
  0x80   : > { %v7415_v26 = vpack.c.bf16 %v2541_v12, %v2542_v1  ;;  %v7417_v60 = vpack.c.bf16 %v2493_v29, %v2494_v21  ;;  %3841 = vmatpush2.bf16.msra.mxu0 %v6510_v39  ;;  %v2428_v27 = vrot.slane %v7406_v36, 7  ;;  %9965 = vst [vmem:[#allocation58_spill] sm:$0xff] %v7424_v17  ;;  %v2429_v15 = vrot.slane %v7398_v22, 7  ;;  %v7443_v39 = vld [vmem:[%s6619_s6 + $0x58] ss:$16 sps:$4 sm:$0xff]   ;;  %v6500_v21 = vld [vmem:[%s9515_s1 + $0xc0] sm:$0xff]   ;;  %vm9973_vm1 = vmmov %vm9958_vm9 }
  0x81   : > { %3558 = vmatpush2.bf16.msra.mxu1 %v6498_v53  ;;  %v6063_v51 = vunpack.c.h.bf16 %v6256_v0  ;;  %3842 = vmatprep.subr.bf16.mxu0 %v9902_v13  ;;  %v9966_v29 = vmov 0  ;;  %v2142_v1 = vmax.f32 %v2070_v2, 0.0  ;;  %v1994_v12 = vmul.f32 %v7357_v63, %v6062_v43  ;;  %v6511_v53 = vld [vmem:[%s9515_s1 + $0x160] sm:$0xff]  }
  0x82   : > { %9963 = vst [vmem:[#allocation56_spill] sm:$0xff] %v7415_v26  ;;  %9964 = vst [vmem:[#allocation57_spill] sm:$0xff] %v7417_v60  ;;  %3559 = vmatprep.subr.bf16.mxu1 %v9902_v13  ;;  %v9967_v29 = vsel %vm7432_vm7, 4294967295, %v9966_v29  ;;  %vm7437_vm12 = vcmp.le.s32.totalorder %v586_v19, 16  ;;  %v404_v0 = vadd.s32 160, %v6614_v7  ;;  %v7451_v2 = vrot.slane %v9905_v3, 1 }
  0x83   : > { %9968 = vst [vmem:[#allocation59_spill] sm:$0xff] %v9967_v29  ;;  %v9970_v24 = vsel %vm7437_vm12, 4294967295, %v9969_v24  ;;  %v2539_v43 = vsel %vm9958_vm9, %v2428_v27, %v2429_v15  ;;  %v2540_v19 = vsel %vm9973_vm1, %v6720_v48, %v2428_v27  ;;  %v1995_v49 = vmul.f32 %v7357_v63, %v6063_v51  ;;  %v6513_v27 = vld [vmem:[%s9515_s1 + $0x158] sm:$0xff]   ;;  %vm7492_vm1 = vmpackc.low %vm9887_vm3, %vm7437_vm12 }
  0x84   : > { %9971 = vst [vmem:[#allocation60_spill] sm:$0xff] %v9970_v24  ;;  %3331 = vmatmul.mubr.bf16.gmra.mxu0 %v7415_v26  ;;  %3523 = vmatmul.mubr.bf16.gmra.mxu1 %v7417_v60  ;;  %9972 = vst [vmem:[#allocation61_spill] sm:$0xff] %v7451_v2  ;;  %v2072_v60 = vadd.f32 %v7411_v9, %v1994_v12  ;;  %v1918_v29 = vunpack.c.l.bf16 %v7443_v39  ;;  %v7476_v34 = vpack.c.bf16 %v2539_v43, %v2540_v19  ;;  %v9977_v43 = vmov 0  ;;  %v6257_v24 = vld [vmem:[%s6619_s6 + $0x60] sm:$0xff]  }
  0x85   : > { %3560 = vmatpush2.bf16.msra.mxu1 %v6499_v47  ;;  %5657 = vmatprep.mubr.msk.bf16.mxu0 %vm7432_vm7, %v7424_v17  ;;  %v7469_v47 = vsel %vm7437_vm12, %v2142_v1, 0.0  ;;  %v600_v17 = vand.u32 31, %v404_v0  ;;  %v2633_v51 = vrot.slane %v6826_v44, 1  ;;  %v7486_v0 = vpack.c.bf16 %v9905_v3, %v2142_v1  ;;  %v6502_v44 = vld [vmem:[%s9515_s1 + $0x1b8] sm:$0xff]   ;;  %vm9983_vm12 = vmmov %vm9958_vm9 }
  0x86   : > { %3561 = vmatprep.subr.bf16.mxu1 %v9902_v13  ;;  %3563 = vmatprep.mubr.bf16.mxu1 %v6958_v4  ;;  %9974 = vst [vmem:[#allocation62_spill] sm:$0xff] %v7476_v34  ;;  %v7480_v4 = vpack.c.bf16 %v7451_v2, %v7451_v2  ;;  %v2430_v12 = vrot.slane %v7469_v47, 7  ;;  %v9978_v43 = vsel %vm7492_vm1, 4294967295, %v9977_v43  ;;  %v1996_v1 = vmul.f32 %v7357_v63, %v1918_v29 }
  0x87   : > { %3843 = vmatpush2.bf16.msra.mxu0 %v6511_v53  ;;  %9976 = vst [vmem:[#allocation64_spill] sm:$0xff] %v7486_v0  ;;  %v2073_v53 = vadd.f32 %v7411_v9, %v1995_v49  ;;  %9979 = vst [vmem:[#allocation65_spill] sm:$0xff] %v9978_v43  ;;  %vm7502_vm13 = vcmp.ge.s32.totalorder %v600_v17, 1  ;;  %v9980_v49 = vmov 0  ;;  %v406_v19 = vadd.s32 176, %v6614_v7  ;;  %v6505_v43 = vld [vmem:[%s9515_s1 + $0x1b0] sm:$0xff]  }
  0x88   : > { %9975 = vst [vmem:[#allocation63_spill] sm:$0xff] %v7480_v4  ;;  %3844 = vmatprep.subr.bf16.mxu0 %v9902_v13  ;;  %v9981_v49 = vsel %vm7502_vm13, 4294967295, %v9980_v49  ;;  %v2537_v17 = vsel %vm9958_vm9, %v2430_v12, %v6720_v48  ;;  %v2769_v29 = vsel %vm9984_vm15, %v7451_v2, %v2633_v51  ;;  %v6067_v18 = vunpack.c.h.bf16 %v6257_v24  ;;  %vm7554_vm15 = vmpackc.low %vm9887_vm3, %vm7502_vm13 }
  0x89   : > { %3562 = vmatpush2.bf16.msra.mxu1 %v6500_v21  ;;  %v2144_v21 = vmax.f32 %v2072_v60, 0.0  ;;  %9982 = vst [vmem:[#allocation66_spill] sm:$0xff] %v9981_v49  ;;  %v2538_v60 = vsel %vm9983_vm12, %v2429_v15, %v2430_v12  ;;  %v614_v15 = vand.u32 31, %v406_v19  ;;  %v6517_v12 = vld [vmem:[%s9515_s1 + $0x148] sm:$0xff]   ;;  %vm9993_vm9 = vcmp.lt.s32.totalorder %v6614_v7, 7 }
  0x8a   : > { %4109 = vmatprep.subr.bf16.mxu1 %v9902_v13  ;;  %v1922_v49 = vunpack.c.h.bf16 %v7443_v39 }
  0x8b   : > { %3845 = vmatpush2.bf16.msra.mxu0 %v6513_v27  ;;  %v7525_v27 = vmax.f32 %v2073_v53, 0.0  ;;  %v2635_v53 = vrot.slane %v6854_v56, 1  ;;  %v9987_v56 = vmov 0  ;;  %vm7562_vm12 = vcmp.le.s32.totalorder %v614_v15, 16 }
  0x8c   : > { %3339 = vmatmul.mubr.bf16.gmra.mxu0 %v7476_v34  ;;  %3564 = vmatmul.mubr.bf16.vlgmr.msra.gmra.mxu1 %v7480_v4  ;;  %v7529_v4 = vsel %vm7502_vm13, %v2144_v21, 0.0  ;;  %v9988_v56 = vsel %vm7554_vm15, 4294967295, %v9987_v56  ;;  %vm9994_vm13 = vmmov %vm9993_vm9 }
  0x8d   : > { %5660 = vmatprep.mubr.msk.bf16.mxu0 %vm7492_vm1, %v7486_v0  ;;  %3571 = vmatprep.mubr.bf16.mxu1 %v7056_v28  ;;  %v2074_v28 = vadd.f32 %v7411_v9, %v1996_v1  ;;  %v6066_v0 = vunpack.c.l.bf16 %v6257_v24  ;;  %v2775_v1 = vpack.c.bf16 %v2769_v29, %v7451_v2  ;;  %v2432_v58 = vrot.slane %v7529_v4, 7  ;;  %9989 = vst [vmem:[#allocation69_spill] sm:$0xff] %v9988_v56  ;;  %v6518_v29 = vld [vmem:[%s9515_s1 + $0x140] sm:$0xff]  }
  0x8e   : > { %4110 = vmatpush1.bf16.msra.mxu1 %v6502_v44  ;;  %3846 = vmatprep.subr.bf16.mxu0 %v9902_v13  ;;  %v7541_v44 = vpack.c.bf16 %v2537_v17, %v2538_v60  ;;  %v7548_v19 = vpack.c.bf16 %v7525_v27, %v2144_v21  ;;  %v6507_v60 = vld [vmem:[%s9515_s1 + $0x1a8] sm:$0xff]   ;;  %v9990_v21 = vmov 0  ;;  %v408_v24 = vadd.s32 192, %v6614_v7 }
  0x8f   : > { %4111 = vmatprep.subr.bf16.mxu1 %v9902_v13  ;;  %3847 = vmatpush2.bf16.msra.mxu0 %v6515_v20  ;;  %v2433_v20 = vrot.slane %v7525_v27, 7  ;;  %v2146_v17 = vmax.f32 %v2074_v28, 0.0  ;;  %v1998_v37 = vmul.f32 %v7357_v63, %v6066_v0  ;;  %v9991_v21 = vsel %vm7562_vm12, 4294967295, %v9990_v21  ;;  %v7579_v28 = vld [vmem:[%s9515_s1 + $0x238] sm:$0xff]  }
  0x90   : > { %9985 = vst [vmem:[#allocation67_spill] sm:$0xff] %v7541_v44  ;;  %3848 = vmatprep.subr.bf16.mxu0 %v9902_v13  ;;  %9986 = vst [vmem:[#allocation68_spill] sm:$0xff] %v7548_v19  ;;  %v2767_v0 = vsel %vm9993_vm9, %v2634_v61, %v2635_v53  ;;  %v628_v56 = vand.u32 31, %v408_v24  ;;  %v9999_v24 = vmov 0 }
  0x91   : > { %9992 = vst [vmem:[#allocation70_spill] sm:$0xff] %v9991_v21  ;;  %v2535_v15 = vsel %vm9995_vm11, %v2432_v58, %v2433_v20  ;;  %vm9996_vm9 = vmmov %vm9995_vm11 }
  0x92   : > { %4112 = vmatpush1.bf16.msra.mxu1 %v6505_v43  ;;  %v2768_v43 = vsel %vm9994_vm13, %v2633_v51, %v2634_v61  ;;  %v1999_v61 = vmul.f32 %v7357_v63, %v6067_v18  ;;  %v7593_v51 = vsel %vm7562_vm12, %v2146_v17, 0.0  ;;  %v2637_v18 = vrot.slane %v7009_v46, 1  ;;  %vm7616_vm11 = vmpackc.low %vm9887_vm3, %vm7562_vm12 }
  0x93   : > { %4113 = vmatprep.subr.bf16.mxu1 %v9902_v13  ;;  %3849 = vmatpush2.bf16.msra.mxu0 %v6517_v12  ;;  %v2536_v12 = vsel %vm9996_vm9, %v6720_v48, %v2432_v58  ;;  %v2434_v39 = vrot.slane %v7593_v51, 7  ;;  %v10000_v24 = vsel %vm7616_vm11, 4294967295, %v9999_v24  ;;  %vm7624_vm13 = vcmp.ge.s32.totalorder %v628_v56, 1 }
  0x94   : > { %3347 = vmatmul.mubr.bf16.gmra.mxu0 %v7541_v44  ;;  %3572 = vmatmul.mubr.bf16.gmra.mxu1 %v2775_v1  ;;  %v2076_v1 = vadd.f32 %v7411_v9, %v1998_v37  ;;  %v7603_v58 = vpack.c.bf16 %v2535_v15, %v2536_v12  ;;  %v7610_v37 = vpack.c.bf16 %v9905_v3, %v2146_v17  ;;  %v10002_v17 = vmov 0  ;;  %v6258_v15 = vld [vmem:[%s6619_s6 + $0x70] sm:$0xff]  }
  0x95   : > { %5663 = vmatprep.mubr.msk.bf16.mxu0 %vm7554_vm15, %v7548_v19  ;;  %3579 = vmatprep.mubr.bf16.mxu1 %v7148_v50  ;;  %v6509_v50 = vld [vmem:[%s9515_s1 + $0x1a0] sm:$0xff]   ;;  %v7605_v19 = vpack.c.bf16 %v2767_v0, %v2768_v43  ;;  %10001 = vst [vmem:[#allocation73_spill] sm:$0xff] %v10000_v24  ;;  %v6512_v0 = vld [vmem:[%s9515_s1 + $0x198] sm:$0xff]   ;;  %v10003_v17 = vsel %vm7624_vm13, 4294967295, %v10002_v17  ;;  %v410_v43 = vadd.s32 208, %v6614_v7  ;;  %vm10005_vm9 = vcmp.lt.s32.totalorder %v6614_v7, 7 }
  0x96   : > { %4114 = vmatpush1.bf16.msra.mxu1 %v6507_v60  ;;  %3850 = vmatprep.subr.bf16.mxu0 %v9902_v13  ;;  %9997 = vst [vmem:[#allocation71_spill] sm:$0xff] %v7603_v58  ;;  %9998 = vst [vmem:[#allocation72_spill] sm:$0xff] %v7610_v37  ;;  %v2077_v60 = vadd.f32 %v7411_v9, %v1999_v61  ;;  %v2148_v46 = vmax.f32 %v2076_v1, 0.0  ;;  %vm10006_vm12 = vcmp.lt.s32.totalorder %v6614_v7, 1  ;;  %v6514_v24 = vld [vmem:[%s9515_s1 + $0x190] sm:$0xff]   ;;  %v6071_v41 = vunpack.c.h.bf16 %v6258_v15 }
  0x97   : > { %4115 = vmatprep.subr.bf16.mxu1 %v9902_v13  ;;  %3851 = vmatpush2.bf16.msra.mxu0 %v6518_v29  ;;  %v2000_v29 = vmul.f32 %v7357_v63, %v1922_v49  ;;  %10004 = vst [vmem:[#allocation74_spill] sm:$0xff] %v10003_v17  ;;  %v2533_v49 = vsel %vm10006_vm12, %v2434_v39, %v6720_v48  ;;  %vm10007_vm8 = vmmov %vm10006_vm12  ;;  %v6519_v17 = vld [vmem:[%s9515_s1 + $0x180] sm:$0xff]  }
  0x98   : > { %6339 = vmatprep.subr.bf16.mxu0 %v7579_v28  ;;  %v2534_v56 = vsel %vm10007_vm8, %v2433_v20, %v2434_v39  ;;  %vm10008_vm2 = vmmov %vm10005_vm9  ;;  %v7648_v61 = vmax.f32 %v2077_v60, 0.0  ;;  %v7652_v1 = vsel %vm7624_vm13, %v2148_v46, 0.0  ;;  %v2638_v60 = vrot.slane %v6994_v38, 1  ;;  %v6516_v38 = vld [vmem:[%s9515_s1 + $0x188] sm:$0xff]  }
  0x99   : > { %v2766_v12 = vsel %vm10008_vm2, %v2635_v53, %v7451_v2  ;;  %v2078_v21 = vadd.f32 %v7411_v9, %v2000_v29  ;;  %v2639_v53 = vrot.slane %v7132_v30, 1  ;;  %v7660_v20 = vpack.c.bf16 %v2533_v49, %v2534_v56  ;;  %vm7673_vm2 = vmpackc.low %vm9887_vm3, %vm7624_vm13  ;;  %v7687_v49 = vld [vmem:[%s6619_s6 + $0x78] ss:$16 sps:$4 sm:$0xff]  }
  0x9a   : > { %4116 = vmatpush1.bf16.msra.mxu1 %v6509_v50  ;;  %v2765_v50 = vsel %vm10005_vm9, %v7451_v2, %v2637_v18  ;;  %v2436_v29 = vrot.slane %v7652_v1, 7  ;;  %v2437_v6 = vrot.slane %v7648_v61, 7  ;;  %vm10017_vm12 = vmmov %vm10005_vm9  ;;  %vm10018_vm13 = vcmp.lt.s32.totalorder %v6614_v7, 1 }
  0x9b   : > { %4117 = vmatprep.subr.bf16.mxu1 %v9902_v13  ;;  %10009 = vst [vmem:[#allocation75_spill] sm:$0xff] %v7660_v20  ;;  %v7662_v39 = vpack.c.bf16 %v2765_v50, %v2766_v12  ;;  %v2150_v30 = vmax.f32 %v2078_v21, 0.0  ;;  %v2764_v21 = vsel %vm10005_vm9, %v2637_v18, %v2638_v60  ;;  %v2003_v56 = vmul.f32 %v7357_v63, %v6071_v41 }
  0x9c   : > { %3355 = vmatmul.mubr.bf16.gmra.mxu0 %v7603_v58  ;;  %3580 = vmatmul.mubr.bf16.gmra.mxu1 %v7605_v19 }
  0x9d   : > { %5666 = vmatprep.mubr.msk.bf16.mxu0 %vm7616_vm11, %v7610_v37  ;;  %3587 = vmatprep.mubr.bf16.mxu1 %v7242_v8  ;;  %v6070_v8 = vunpack.c.l.bf16 %v6258_v15  ;;  %v642_v37 = vand.u32 31, %v410_v43  ;;  %v10011_v43 = vmov 0  ;;  %v412_v15 = vadd.s32 224, %v6614_v7  ;;  %vm10019_vm11 = vmmov %vm10018_vm13 }
  0x9e   : > { %4118 = vmatpush1.bf16.msra.mxu1 %v6512_v0  ;;  %v7667_v0 = vpack.c.bf16 %v7648_v61, %v2148_v46  ;;  %v10012_v43 = vsel %vm7673_vm2, 4294967295, %v10011_v43  ;;  %v10014_v46 = vmov 0 }
  0x9f   : > { %4119 = vmatprep.subr.bf16.mxu1 %v9902_v13  ;;  %10013 = vst [vmem:[#allocation77_spill] sm:$0xff] %v10012_v43  ;;  %v2002_v50 = vmul.f32 %v7357_v63, %v6070_v8  ;;  %vm7681_vm8 = vcmp.le.s32.totalorder %v642_v37, 16  ;;  %v2763_v8 = vsel %vm10017_vm12, %v2638_v60, %v2639_v53  ;;  %v2531_v37 = vsel %vm10018_vm13, %v2436_v29, %v2437_v6  ;;  %vm10029_vm12 = vmmov %vm10005_vm9 }
  0xa0   : > { %10010 = vst [vmem:[#allocation76_spill] sm:$0xff] %v7667_v0  ;;  %v10015_v46 = vsel %vm7681_vm8, 4294967295, %v10014_v46  ;;  %v7708_v12 = vsel %vm7681_vm8, %v2150_v30, 0.0  ;;  %v1926_v60 = vunpack.c.l.bf16 %v7687_v49  ;;  %v7719_v43 = vpack.c.bf16 %v2763_v8, %v2764_v21  ;;  %v6521_v8 = vld [vmem:[%s9515_s1 + $0x1f8] sm:$0xff]  }
  0xa1   : > { %10016 = vst [vmem:[#allocation78_spill] sm:$0xff] %v10015_v46  ;;  %v2080_v18 = vadd.f32 %v7411_v9, %v2002_v50  ;;  %v7723_v50 = vpack.c.bf16 %v9905_v3, %v2150_v30  ;;  %v10026_v30 = vmov 0  ;;  %v414_v21 = vadd.s32 240, %v6614_v7 }
  0xa2   : > { %4120 = vmatpush1.bf16.msra.mxu1 %v6514_v24  ;;  %v2532_v24 = vsel %vm10019_vm11, %v6720_v48, %v2436_v29  ;;  %v2641_v29 = vrot.slane %v7212_v45, 1  ;;  %10021 = vst [vmem:[#allocation80_spill] sm:$0xff] %v7719_v43  ;;  %vm7729_vm11 = vmpackc.low %vm9887_vm3, %vm7681_vm8  ;;  %v2004_v45 = vmul.f32 %v7357_v63, %v1926_v60  ;;  %vm10030_vm9 = vcmp.lt.s32.totalorder %v6614_v7, 1 }
  0xa3   : > { %4121 = vmatprep.subr.bf16.mxu1 %v9902_v13  ;;  %v7717_v41 = vpack.c.bf16 %v2531_v37, %v2532_v24  ;;  %10022 = vst [vmem:[#allocation81_spill] sm:$0xff] %v7723_v50  ;;  %v2152_v35 = vmax.f32 %v2080_v18, 0.0  ;;  %v6259_v37 = vld [vmem:[%s6619_s6 + $0x80] sm:$0xff]   ;;  %vm10031_vm8 = vmmov %vm10030_vm9 }
  0xa4   : > { %3363 = vmatmul.mubr.bf16.gmra.mxu0 %v7660_v20  ;;  %3588 = vmatmul.mubr.bf16.gmra.mxu1 %v7662_v39  ;;  %v2082_v46 = vadd.f32 %v7411_v9, %v2004_v45  ;;  %v6075_v31 = vunpack.c.h.bf16 %v6259_v37 }
  0xa5   : > { %5669 = vmatprep.mubr.msk.bf16.mxu0 %vm7673_vm2, %v7667_v0  ;;  %3595 = vmatprep.mubr.bf16.mxu1 %v7329_v33  ;;  %v656_v33 = vand.u32 31, %v412_v15  ;;  %10020 = vst [vmem:[#allocation79_spill] sm:$0xff] %v7717_v41  ;;  %v2438_v0 = vrot.slane %v7708_v12, 7  ;;  %v10023_v15 = vmov 0  ;;  %vm10032_vm2 = vmmov %vm10029_vm12 }
  0xa6   : > { %4122 = vmatpush1.bf16.msra.mxu1 %v6516_v38  ;;  %v2081_v38 = vadd.f32 %v7411_v9, %v2003_v56  ;;  %v10024_v15 = vsel %vm7729_vm11, 4294967295, %v10023_v15  ;;  %v2762_v56 = vsel %vm10032_vm2, %v2639_v53, %v7451_v2 }
  0xa7   : > { %4123 = vmatprep.subr.bf16.mxu1 %v9902_v13  ;;  %10025 = vst [vmem:[#allocation82_spill] sm:$0xff] %v10024_v15  ;;  %vm7737_vm13 = vcmp.ge.s32.totalorder %v656_v33, 1  ;;  %v2529_v33 = vsel %vm10030_vm9, %v2438_v0, %v6720_v48  ;;  %v2530_v24 = vsel %vm10031_vm8, %v2437_v6, %v2438_v0  ;;  %v6522_v15 = vld [vmem:[%s9515_s1 + $0x1f0] sm:$0xff]   ;;  %v2643_v6 = vrot.slane %v7313_v32, 1  ;;  %vm10042_vm9 = vmmov %vm10029_vm12 }
  0xa8   : > { %v10027_v30 = vsel %vm7737_vm13, 4294967295, %v10026_v30  ;;  %v7761_v18 = vmax.f32 %v2081_v38, 0.0  ;;  %v7765_v60 = vsel %vm7737_vm13, %v2152_v35, 0.0  ;;  %v7773_v53 = vpack.c.bf16 %v2529_v33, %v2530_v24  ;;  %vm7786_vm2 = vmpackc.low %vm9887_vm3, %vm7737_vm13 }
  0xa9   : > { %10028 = vst [vmem:[#allocation83_spill] sm:$0xff] %v10027_v30  ;;  %v2642_v38 = vrot.slane %v7208_v5, 1  ;;  %v2154_v32 = vmax.f32 %v2082_v46, 0.0  ;;  %v10039_v5 = vmov 0  ;;  %vm10043_vm13 = vcmp.lt.s32.totalorder %v6614_v7, 1 }
  0xaa   : > { %4124 = vmatpush1.bf16.msra.mxu1 %v6519_v17  ;;  %v2761_v17 = vsel %vm10029_vm12, %v7451_v2, %v2641_v29  ;;  %10033 = vst [vmem:[#allocation84_spill] sm:$0xff] %v7773_v53  ;;  %v7780_v45 = vpack.c.bf16 %v7761_v18, %v2152_v35  ;;  %v416_v35 = vadd.s32 256, %v6614_v7  ;;  %v2007_v33 = vmul.f32 %v7357_v63, %v6075_v31 }
  0xab   : > { %4125 = vmatprep.subr.bf16.mxu1 %v9902_v13  ;;  %v7775_v0 = vpack.c.bf16 %v2761_v17, %v2762_v56  ;;  %v2760_v46 = vsel %vm10042_vm9, %v2641_v29, %v2642_v38  ;;  %v1930_v56 = vunpack.c.h.bf16 %v7687_v49  ;;  %v2645_v30 = vrot.slane %v7406_v36, 1 }
  0xac   : > { %3371 = vmatmul.mubr.bf16.gmra.mxu0 %v7717_v41  ;;  %3596 = vmatmul.mubr.bf16.gmra.mxu1 %v7719_v43  ;;  %v2440_v43 = vrot.slane %v7765_v60, 7  ;;  %10035 = vst [vmem:[#allocation86_spill] sm:$0xff] %v7780_v45  ;;  %v10048_v49 = vmov 0 }
  0xad   : > { %5672 = vmatprep.mubr.msk.bf16.mxu0 %vm7729_vm11, %v7723_v50  ;;  %3603 = vmatprep.mubr.bf16.mxu1 %v7415_v26  ;;  %v6074_v26 = vunpack.c.l.bf16 %v6259_v37  ;;  %v670_v50 = vand.u32 31, %v414_v21  ;;  %10034 = vst [vmem:[#allocation85_spill] sm:$0xff] %v7775_v0  ;;  %v10036_v21 = vmov 0  ;;  %v2759_v37 = vsel %vm10029_vm12, %v2642_v38, %v2643_v6  ;;  %vm10044_vm11 = vmmov %vm10043_vm13 }
  0xae   : > { %4126 = vmatpush2.bf16.msra.mxu1 %v6521_v8  ;;  %v2441_v8 = vrot.slane %v7761_v18, 7  ;;  %v10037_v21 = vsel %vm7786_vm2, 4294967295, %v10036_v21  ;;  %v684_v38 = vand.u32 31, %v416_v35  ;;  %v2008_v36 = vmul.f32 %v7357_v63, %v1930_v56  ;;  %vm10054_vm12 = vmmov %vm10042_vm9 }
  0xaf   : > { %4127 = vmatprep.subr.bf16.mxu1 %v9902_v13  ;;  %10038 = vst [vmem:[#allocation87_spill] sm:$0xff] %v10037_v21  ;;  %v2006_v17 = vmul.f32 %v7357_v63, %v6074_v26  ;;  %vm7791_vm8 = vcmp.le.s32.totalorder %v670_v50, 16  ;;  %v6524_v26 = vld [vmem:[%s9515_s1 + $0x1e8] sm:$0xff]   ;;  %v7830_v21 = vpack.c.bf16 %v9905_v3, %v2154_v32  ;;  %vm10055_vm9 = vcmp.lt.s32.totalorder %v6614_v7, 1 }
  0xb0   : > { %v10040_v5 = vsel %vm7791_vm8, 4294967295, %v10039_v5  ;;  %v2527_v50 = vsel %vm10043_vm13, %v2440_v43, %v2441_v8  ;;  %v7818_v29 = vsel %vm7791_vm8, %v2154_v32, 0.0  ;;  %vm7841_vm13 = vcmp.ge.s32.totalorder %v684_v38, 1  ;;  %v6260_v32 = vld [vmem:[%s6619_s6 + $0x90] sm:$0xff]  }
  0xb1   : > { %10041 = vst [vmem:[#allocation88_spill] sm:$0xff] %v10040_v5  ;;  %v2084_v24 = vadd.f32 %v7411_v9, %v2006_v17  ;;  %v2442_v31 = vrot.slane %v7818_v29, 7  ;;  %10047 = vst [vmem:[#allocation91_spill] sm:$0xff] %v7830_v21  ;;  %v2085_v17 = vadd.f32 %v7411_v9, %v2007_v33  ;;  %v2086_v38 = vadd.f32 %v7411_v9, %v2008_v36 }
  0xb2   : > { %4128 = vmatpush2.bf16.msra.mxu1 %v6522_v15  ;;  %v2528_v15 = vsel %vm10044_vm11, %v6720_v48, %v2440_v43  ;;  %v7826_v43 = vpack.c.bf16 %v2759_v37, %v2760_v46  ;;  %vm7836_vm11 = vmpackc.low %vm9887_vm3, %vm7791_vm8  ;;  %v10051_v37 = vmov 0  ;;  %v418_v46 = vadd.s32 272, %v6614_v7 }
  0xb3   : > { %4129 = vmatprep.subr.bf16.mxu1 %v9902_v13  ;;  %v10049_v49 = vsel %vm7836_vm11, 4294967295, %v10048_v49  ;;  %v2156_v35 = vmax.f32 %v2084_v24, 0.0  ;;  %v10052_v37 = vsel %vm7841_vm13, 4294967295, %v10051_v37  ;;  %vm10056_vm8 = vmmov %vm10055_vm9  ;;  %v7864_v24 = vmax.f32 %v2085_v17, 0.0 }
  0xb4   : > { %3379 = vmatmul.mubr.bf16.gmra.mxu0 %v7773_v53  ;;  %3604 = vmatmul.mubr.bf16.gmra.mxu1 %v7775_v0  ;;  %10046 = vst [vmem:[#allocation90_spill] sm:$0xff] %v7826_v43  ;;  %10050 = vst [vmem:[#allocation92_spill] sm:$0xff] %v10049_v49  ;;  %v6078_v5 = vunpack.c.l.bf16 %v6260_v32  ;;  %v2647_v49 = vrot.slane %v7469_v47, 1  ;;  %v10061_v36 = vmov 0  ;;  %v2158_v47 = vmax.f32 %v2086_v38, 0.0 }
  0xb5   : > { %5675 = vmatprep.mubr.msk.bf16.mxu0 %vm7786_vm2, %v7780_v45  ;;  %3611 = vmatprep.mubr.bf16.mxu1 %v7476_v34  ;;  %v7824_v34 = vpack.c.bf16 %v2527_v50, %v2528_v15  ;;  %10053 = vst [vmem:[#allocation93_spill] sm:$0xff] %v10052_v37  ;;  %v2525_v50 = vsel %vm10055_vm9, %v2442_v31, %v6720_v48  ;;  %vm10057_vm2 = vmmov %vm10054_vm12  ;;  %v7868_v56 = vsel %vm7841_vm13, %v2156_v35, 0.0  ;;  %v2445_v45 = vrot.slane %v7864_v24, 7 }
  0xb6   : > { %4130 = vmatpush2.bf16.msra.mxu1 %v6524_v26  ;;  %v2757_v26 = vsel %vm10054_vm12, %v7451_v2, %v2645_v30  ;;  %v2526_v15 = vsel %vm10056_vm8, %v2441_v8, %v2442_v31  ;;  %v2758_v33 = vsel %vm10057_vm2, %v2643_v6, %v7451_v2  ;;  %v2646_v31 = vrot.slane %v7398_v22, 1  ;;  %vm7885_vm2 = vmpackc.low %vm9887_vm3, %vm7841_vm13 }
  0xb7   : > { %4131 = vmatprep.subr.bf16.mxu1 %v9902_v13  ;;  %10045 = vst [vmem:[#allocation89_spill] sm:$0xff] %v7824_v34  ;;  %v7874_v8 = vpack.c.bf16 %v2757_v26, %v2758_v33  ;;  %v2444_v6 = vrot.slane %v7868_v56, 7  ;;  %v7879_v17 = vpack.c.bf16 %v7864_v24, %v2156_v35  ;;  %v10062_v36 = vsel %vm7885_vm2, 4294967295, %v10061_v36  ;;  %v7896_v26 = vld [vmem:[%s6619_s6 + $0x98] ss:$16 sps:$4 sm:$0xff]   ;;  %vm10067_vm9 = vmmov %vm10054_vm12 }
  0xb8   : > { %10063 = vst [vmem:[#allocation97_spill] sm:$0xff] %v10062_v36  ;;  %v10064_v22 = vmov 0  ;;  %v420_v35 = vadd.s32 288, %v6614_v7  ;;  %vm10068_vm13 = vcmp.lt.s32.totalorder %v6614_v7, 1  ;;  %v9726_v37 = vrot.slane %v6712_v42, 1 }
  0xb9   : > { %10059 = vst [vmem:[#allocation95_spill] sm:$0xff] %v7874_v8  ;;  %10060 = vst [vmem:[#allocation96_spill] sm:$0xff] %v7879_v17  ;;  %v2678_v36 = vrot.slane %v6652_v23, 1 }
  0xbb   : > { %v2724_v23 = vsel %vm10067_vm9, %v9726_v37, %v2678_v36 }
  0xbc   : > { %3387 = vmatmul.mubr.bf16.gmra.mxu0 %v7824_v34  ;;  %3612 = vmatmul.mubr.bf16.gmra.mxu1 %v7826_v43  ;;  %v6079_v43 = vunpack.c.h.bf16 %v6260_v32  ;;  %v2755_v32 = vsel %vm10054_vm12, %v2646_v31, %v2647_v49  ;;  %vm10069_vm12 = vmmov %vm10068_vm13 }
  0xbd   : > { %5678 = vmatprep.mubr.msk.bf16.mxu0 %vm7836_vm11, %v7830_v21  ;;  %3619 = vmatprep.mubr.bf16.mxu1 %v7541_v44  ;;  %v698_v44 = vand.u32 31, %v418_v46  ;;  %v7872_v21 = vpack.c.bf16 %v2525_v50, %v2526_v15  ;;  %v2010_v46 = vmul.f32 %v7357_v63, %v6078_v5  ;;  %v2756_v50 = vsel %vm10067_vm9, %v2645_v30, %v2646_v31 }
  0xbe   : > { %v2679_v5 = vrot.slane %v6770_v14, 1  ;;  %v2523_v15 = vsel %vm10068_vm13, %v2444_v6, %v2445_v45  ;;  %v2524_v33 = vsel %vm10069_vm12, %v6720_v48, %v2444_v6  ;;  %v2011_v30 = vmul.f32 %v7357_v63, %v6079_v43  ;;  %vm10073_vm13 = vmmov %vm10067_vm9 }
  0xbf   : > { %10058 = vst [vmem:[#allocation94_spill] sm:$0xff] %v7872_v21  ;;  %vm7890_vm8 = vcmp.le.s32.totalorder %v698_v44, 16  ;;  %v6525_v44 = vld [vmem:[%s9515_s1 + $0x1e0] sm:$0xff]   ;;  %v2088_v14 = vadd.f32 %v7411_v9, %v2010_v46  ;;  %v1934_v31 = vunpack.c.l.bf16 %v7896_v26  ;;  %v2649_v6 = vrot.slane %v7529_v4, 1 }
  0xc0   : > { %v10065_v22 = vsel %vm7890_vm8, 4294967295, %v10064_v22  ;;  %v7920_v38 = vsel %vm7890_vm8, %v2158_v47, 0.0  ;;  %4132 = vmatpush2.bf16.msra.mxu1 %v6525_v44  ;;  %v7928_v43 = vpack.c.bf16 %v2523_v15, %v2524_v33  ;;  %v2089_v44 = vadd.f32 %v7411_v9, %v2011_v30  ;;  %vm7946_vm12 = vmpackc.low %vm9887_vm3, %vm7890_vm8  ;;  %v6261_v30 = vld [vmem:[%s6619_s6 + $0xa0] sm:$0xff]  }
  0xc1   : > { %10066 = vst [vmem:[#allocation98_spill] sm:$0xff] %v10065_v22  ;;  %4133 = vmatprep.subr.bf16.mxu1 %v9902_v13  ;;  %v2446_v46 = vrot.slane %v7920_v38, 7  ;;  %v10074_v4 = vmov 0  ;;  %v10078_v15 = vmov 0  ;;  %v422_v33 = vadd.s32 304, %v6614_v7 }
  0xc2   : > { %10070 = vst [vmem:[#allocation99_spill] sm:$0xff] %v7928_v43  ;;  %v10075_v4 = vsel %vm7946_vm12, 4294967295, %v10074_v4  ;;  %vm10082_vm8 = vcmp.lt.s32.totalorder %v6614_v7, 1  ;;  %v6082_v37 = vunpack.c.l.bf16 %v6261_v30  ;;  %v2651_v22 = vrot.slane %v7593_v51, 1 }
  0xc3   : > { %10076 = vst [vmem:[#allocation102_spill] sm:$0xff] %v10075_v4  ;;  %vm10083_vm11 = vmmov %vm10082_vm8 }
  0xc4   : > { %3395 = vmatmul.mubr.bf16.gmra.mxu0 %v7872_v21  ;;  %3620 = vmatmul.mubr.bf16.gmra.mxu1 %v7874_v8  ;;  %v7933_v8 = vpack.c.bf16 %v9905_v3, %v2158_v47  ;;  %v2160_v47 = vmax.f32 %v2088_v14, 0.0  ;;  %v2754_v14 = vsel %vm10067_vm9, %v2647_v49, %v7451_v2 }
  0xc5   : > { %5681 = vmatprep.mubr.msk.bf16.mxu0 %vm7885_vm2, %v7879_v17  ;;  %3627 = vmatprep.mubr.bf16.mxu1 %v7603_v58  ;;  %v712_v58 = vand.u32 31, %v420_v35  ;;  %v7930_v17 = vpack.c.bf16 %v2755_v32, %v2756_v50  ;;  %v2723_v35 = vsel %vm10073_vm13, %v2678_v36, %v2679_v5  ;;  %v2012_v32 = vmul.f32 %v7357_v63, %v1934_v31  ;;  %vm10081_vm13 = vmmov %vm10067_vm9 }
  0xc6   : > { %10072 = vst [vmem:[#allocation101_spill] sm:$0xff] %v7933_v8  ;;  %v7951_v50 = vpack.c.bf16 %v2723_v35, %v2724_v23  ;;  %v2753_v36 = vsel %vm10081_vm13, %v7451_v2, %v2649_v6  ;;  %v2521_v31 = vsel %vm10082_vm8, %v2446_v46, %v6720_v48  ;;  %v2522_v35 = vsel %vm10083_vm11, %v2445_v45, %v2446_v46  ;;  %vm10087_vm11 = vmmov %vm10067_vm9 }
  0xc7   : > { %10071 = vst [vmem:[#allocation100_spill] sm:$0xff] %v7930_v17  ;;  %vm7953_vm2 = vcmp.ge.s32.totalorder %v712_v58, 1  ;;  %v2681_v58 = vrot.slane %v6846_v55, 1  ;;  %v7977_v23 = vmax.f32 %v2089_v44, 0.0  ;;  %v2090_v55 = vadd.f32 %v7411_v9, %v2012_v32  ;;  %vm10088_vm8 = vmmov %vm10067_vm9 }
  0xc8   : > { %10077 = vst [vmem:[#allocation103_spill] sm:$0xff] %v7951_v50  ;;  %v10079_v15 = vsel %vm7953_vm2, 4294967295, %v10078_v15  ;;  %v7981_v49 = vsel %vm7953_vm2, %v2160_v47, 0.0  ;;  %v7985_v4 = vpack.c.bf16 %v2753_v36, %v2754_v14  ;;  %v2650_v45 = vrot.slane %v7525_v27, 1  ;;  %vm8004_vm13 = vmpackc.low %vm9887_vm3, %vm7953_vm2 }
  0xc9   : > { %10080 = vst [vmem:[#allocation104_spill] sm:$0xff] %v10079_v15  ;;  %v7990_v50 = vpack.c.bf16 %v7977_v23, %v2160_v47  ;;  %v6083_v46 = vunpack.c.h.bf16 %v6261_v30  ;;  %v2448_v44 = vrot.slane %v7981_v49, 7  ;;  %v2449_v42 = vrot.slane %v7977_v23, 7 }
  0xca   : > { %10084 = vst [vmem:[#allocation105_spill] sm:$0xff] %v7985_v4  ;;  %v2721_v32 = vsel %vm10087_vm11, %v7451_v2, %v2681_v58  ;;  %v2722_v51 = vsel %vm10088_vm8, %v2679_v5, %v7451_v2  ;;  %v10089_v47 = vmov 0  ;;  %v2162_v27 = vmax.f32 %v2090_v55, 0.0  ;;  %vm10096_vm11 = vmmov %vm10088_vm8 }
  0xcb   : > { %10086 = vst [vmem:[#allocation107_spill] sm:$0xff] %v7990_v50  ;;  %v10090_v47 = vsel %vm8004_vm13, 4294967295, %v10089_v47  ;;  %v8009_v30 = vpack.c.bf16 %v2721_v32, %v2722_v51  ;;  %v10093_v36 = vmov 0  ;;  %v424_v14 = vadd.s32 320, %v6614_v7 }
  0xcc   : > { %3403 = vmatmul.mubr.bf16.gmra.mxu0 %v7928_v43  ;;  %3628 = vmatmul.mubr.bf16.gmra.mxu1 %v7930_v17  ;;  %10091 = vst [vmem:[#allocation108_spill] sm:$0xff] %v10090_v47  ;;  %v2751_v5 = vsel %vm10096_vm11, %v2650_v45, %v2651_v22  ;;  %vm10097_vm8 = vcmp.lt.s32.totalorder %v6614_v7, 1  ;;  %v1938_v51 = vunpack.c.h.bf16 %v7896_v26 }
  0xcd   : > { %5684 = vmatprep.mubr.msk.bf16.mxu0 %vm7946_vm12, %v7933_v8  ;;  %3635 = vmatprep.mubr.bf16.mxu1 %v7660_v20  ;;  %v726_v20 = vand.u32 31, %v422_v33  ;;  %v7987_v8 = vpack.c.bf16 %v2521_v31, %v2522_v35  ;;  %v2014_v33 = vmul.f32 %v7357_v63, %v6082_v37  ;;  %10092 = vst [vmem:[#allocation109_spill] sm:$0xff] %v8009_v30  ;;  %v2683_v35 = vrot.slane %v6950_v57, 1  ;;  %vm10098_vm2 = vmmov %vm10097_vm8  ;;  %v6527_v57 = vld [vmem:[%s9515_s1 + $0x1d8] sm:$0xff]  }
  0xce   : > { %v2015_v31 = vmul.f32 %v7357_v63, %v6083_v46  ;;  %v2520_v37 = vsel %vm10098_vm2, %v6720_v48, %v2448_v44  ;;  %vm10099_vm12 = vmmov %vm10096_vm11  ;;  %v740_v15 = vand.u32 31, %v424_v14  ;;  %4134 = vmatpush2.bf16.msra.mxu1 %v6527_v57 }
  0xcf   : > { %10085 = vst [vmem:[#allocation106_spill] sm:$0xff] %v7987_v8  ;;  %vm8011_vm9 = vcmp.le.s32.totalorder %v726_v20, 16  ;;  %v2519_v20 = vsel %vm10097_vm8, %v2448_v44, %v2449_v42  ;;  %v2752_v55 = vsel %vm10099_vm12, %v2649_v6, %v2650_v45  ;;  %v2092_v32 = vadd.f32 %v7411_v9, %v2014_v33  ;;  %4135 = vmatprep.subr.bf16.mxu1 %v9902_v13  ;;  %vm10103_vm2 = vmmov %vm10096_vm11 }
  0xd0   : > { %v10094_v36 = vsel %vm8011_vm9, 4294967295, %v10093_v36  ;;  %v8038_v46 = vsel %vm8011_vm9, %v2162_v27, 0.0  ;;  %v2653_v44 = vrot.slane %v7652_v1, 1  ;;  %v8044_v6 = vpack.c.bf16 %v2519_v20, %v2520_v37  ;;  %vm10104_vm12 = vmmov %vm10103_vm2  ;;  %v6262_v37 = vld [vmem:[%s6619_s6 + $0xb0] sm:$0xff]  }
  0xd1   : > { %10095 = vst [vmem:[#allocation110_spill] sm:$0xff] %v10094_v36  ;;  %v8046_v45 = vpack.c.bf16 %v2751_v5, %v2752_v55  ;;  %v2093_v47 = vadd.f32 %v7411_v9, %v2015_v31  ;;  %v8052_v33 = vpack.c.bf16 %v9905_v3, %v2162_v27  ;;  %vm8061_vm11 = vmpackc.low %vm9887_vm3, %vm8011_vm9  ;;  %v10105_v1 = vmov 0 }
  0xd2   : > { %10100 = vst [vmem:[#allocation111_spill] sm:$0xff] %v8044_v6  ;;  %v10106_v1 = vsel %vm8061_vm11, 4294967295, %v10105_v1  ;;  %v2164_v14 = vmax.f32 %v2092_v32, 0.0  ;;  %v2016_v5 = vmul.f32 %v7357_v63, %v1938_v51  ;;  %vm8068_vm8 = vcmp.ge.s32.totalorder %v740_v15, 1 }
  0xd3   : > { %10101 = vst [vmem:[#allocation112_spill] sm:$0xff] %v8046_v45  ;;  %10102 = vst [vmem:[#allocation113_spill] sm:$0xff] %v8052_v33  ;;  %v10109_v27 = vmov 0  ;;  %v426_v20 = vadd.s32 336, %v6614_v7  ;;  %v8082_v55 = vmax.f32 %v2093_v47, 0.0  ;;  %v2685_v15 = vrot.slane %v7023_v59, 1 }
  0xd4   : > { %3411 = vmatmul.mubr.bf16.gmra.mxu0 %v7987_v8  ;;  %3636 = vmatmul.mubr.bf16.gmra.mxu1 %v7985_v4  ;;  %10107 = vst [vmem:[#allocation114_spill] sm:$0xff] %v10106_v1  ;;  %v10110_v27 = vsel %vm8068_vm8, 4294967295, %v10109_v27  ;;  %vm10113_vm9 = vcmp.lt.s32.totalorder %v6614_v7, 1  ;;  %v2094_v47 = vadd.f32 %v7411_v9, %v2016_v5  ;;  %v6086_v59 = vunpack.c.l.bf16 %v6262_v37 }
  0xd5   : > { %5687 = vmatprep.mubr.msk.bf16.mxu0 %vm8004_vm13, %v7990_v50  ;;  %3643 = vmatprep.mubr.bf16.mxu1 %v7717_v41  ;;  %v2682_v41 = vrot.slane %v6842_v54, 1  ;;  %v2450_v50 = vrot.slane %v8038_v46, 7  ;;  %10111 = vst [vmem:[#allocation116_spill] sm:$0xff] %v10110_v27  ;;  %v2655_v51 = vrot.slane %v7708_v12, 1 }
  0xd7   : > { %v2719_v26 = vsel %vm10103_vm2, %v2682_v41, %v2683_v35  ;;  %v2720_v54 = vsel %vm10104_vm12, %v2681_v58, %v2682_v41  ;;  %v2749_v41 = vsel %vm10103_vm2, %v7451_v2, %v2653_v44  ;;  %vm10112_vm12 = vmmov %vm10103_vm2  ;;  %v2517_v57 = vsel %vm10113_vm9, %v2450_v50, %v6720_v48 }
  0xd8   : > { %v8066_v31 = vpack.c.bf16 %v2719_v26, %v2720_v54  ;;  %v2750_v58 = vsel %vm10112_vm12, %v2651_v22, %v7451_v2  ;;  %vm10114_vm2 = vmmov %vm10113_vm9  ;;  %v8096_v22 = vsel %vm8068_vm8, %v2164_v14, 0.0  ;;  %v754_v54 = vand.u32 31, %v426_v20 }
  0xd9   : > { %v2518_v32 = vsel %vm10114_vm2, %v2449_v42, %v2450_v50  ;;  %v8100_v26 = vpack.c.bf16 %v2749_v41, %v2750_v58  ;;  %v2453_v42 = vrot.slane %v8082_v55, 7  ;;  %v2654_v50 = vrot.slane %v7648_v61, 1  ;;  %vm10118_vm9 = vmmov %vm10112_vm12 }
  0xda   : > { %10108 = vst [vmem:[#allocation115_spill] sm:$0xff] %v8066_v31  ;;  %v8102_v36 = vpack.c.bf16 %v2517_v57, %v2518_v32  ;;  %v2452_v1 = vrot.slane %v8096_v22, 7  ;;  %v2717_v12 = vsel %vm10118_vm9, %v7451_v2, %v2685_v15  ;;  %vm10119_vm12 = vmmov %vm10118_vm9  ;;  %v2166_v20 = vmax.f32 %v2094_v47, 0.0  ;;  %v1870_v57 = vld [vmem:[%s6619_s6 + $0xb8] sm:$0xf] }
  0xdb   : > { %10115 = vst [vmem:[#allocation117_spill] sm:$0xff] %v8100_v26  ;;  %v2718_v5 = vsel %vm10119_vm12, %v2683_v35, %v7451_v2  ;;  %vm8119_vm2 = vmpackc.low %vm9887_vm3, %vm8068_vm8  ;;  %v2018_v61 = vmul.f32 %v7357_v63, %v6086_v59  ;;  %v428_v58 = vadd.s32 352, %v6614_v7  ;;  %v2747_v35 = vsel %vm10118_vm9, %v2654_v50, %v2655_v51 }
  0xdc   : > { %3419 = vmatmul.mubr.bf16.gmra.mxu0 %v8044_v6  ;;  %3644 = vmatmul.mubr.bf16.gmra.mxu1 %v8046_v45  ;;  %10116 = vst [vmem:[#allocation118_spill] sm:$0xff] %v8102_v36  ;;  %v8124_v41 = vpack.c.bf16 %v2717_v12, %v2718_v5  ;;  %vm10127_vm12 = vmmov %vm10118_vm9  ;;  %v2687_v47 = vrot.slane %v7142_v62, 1  ;;  %vm10128_vm8 = vcmp.lt.s32.totalorder %v6614_v7, 1  ;;  %v1942_v5 = vunpack.c.l.bf16 %v1870_v57 }
  0xdd   : > { %5690 = vmatprep.mubr.msk.bf16.mxu0 %vm8061_vm11, %v8052_v33  ;;  %3651 = vmatprep.mubr.bf16.mxu1 %v7773_v53  ;;  %v8105_v53 = vpack.c.bf16 %v8082_v55, %v2164_v14  ;;  %v6087_v33 = vunpack.c.h.bf16 %v6262_v37  ;;  %v10120_v14 = vmov 0  ;;  %vm8126_vm11 = vcmp.le.s32.totalorder %v754_v54, 16  ;;  %vm10129_vm13 = vmmov %vm10128_vm8 }
  0xde   : > { %v10121_v14 = vsel %vm8119_vm2, 4294967295, %v10120_v14  ;;  %10123 = vst [vmem:[#allocation121_spill] sm:$0xff] %v8124_v41  ;;  %v10124_v37 = vmov 0  ;;  %v2748_v32 = vsel %vm10127_vm12, %v2653_v44, %v2654_v50  ;;  %v2515_v59 = vsel %vm10128_vm8, %v2452_v1, %v2453_v42  ;;  %v6528_v44 = vld [vmem:[%s9515_s1 + $0x1d0] sm:$0xff]   ;;  %vm10133_vm8 = vmmov %vm10118_vm9 }
  0xdf   : > { %10117 = vst [vmem:[#allocation119_spill] sm:$0xff] %v8105_v53  ;;  %10122 = vst [vmem:[#allocation120_spill] sm:$0xff] %v10121_v14  ;;  %v10125_v37 = vsel %vm8126_vm11, 4294967295, %v10124_v37  ;;  %v2516_v54 = vsel %vm10129_vm13, %v6720_v48, %v2452_v1  ;;  %v2019_v12 = vmul.f32 %v7357_v63, %v6087_v33  ;;  %v8154_v62 = vsel %vm8126_vm11, %v2166_v20, 0.0  ;;  %4136 = vmatpush2.bf16.msra.mxu1 %v6528_v44 }
  0xe0   : > { %10126 = vst [vmem:[#allocation122_spill] sm:$0xff] %v10125_v37  ;;  %v2096_v50 = vadd.f32 %v7411_v9, %v2018_v61  ;;  %v768_v27 = vand.u32 31, %v428_v58  ;;  %v2657_v14 = vrot.slane %v7765_v60, 1  ;;  %v8159_v1 = vpack.c.bf16 %v2515_v59, %v2516_v54  ;;  %4137 = vmatprep.subr.bf16.mxu1 %v9902_v13  ;;  %vm10132_vm13 = vmmov %vm10118_vm9 }
  0xe1   : > { %v8161_v33 = vpack.c.bf16 %v2747_v35, %v2748_v32  ;;  %v2454_v41 = vrot.slane %v8154_v62, 7  ;;  %v2097_v61 = vadd.f32 %v7411_v9, %v2019_v12  ;;  %vm8176_vm9 = vmpackc.low %vm9887_vm3, %vm8126_vm11  ;;  %v10134_v60 = vmov 0 }
  0xe2   : > { %10130 = vst [vmem:[#allocation123_spill] sm:$0xff] %v8159_v1  ;;  %v10135_v60 = vsel %vm8176_vm9, 4294967295, %v10134_v60  ;;  %v2020_v57 = vmul.f32 %v7357_v63, %v1942_v5  ;;  %vm8183_vm12 = vcmp.ge.s32.totalorder %v768_v27, 1  ;;  %v10137_v32 = vmov 0 }
  0xe3   : > { %10131 = vst [vmem:[#allocation124_spill] sm:$0xff] %v8161_v33  ;;  %v10138_v32 = vsel %vm8183_vm12, 4294967295, %v10137_v32  ;;  %v430_v59 = vadd.s32 368, %v6614_v7  ;;  %v8206_v54 = vmax.f32 %v2097_v61, 0.0 }
  0xe4   : > { %3427 = vmatmul.mubr.bf16.gmra.mxu0 %v8102_v36  ;;  %3652 = vmatmul.mubr.bf16.gmra.mxu1 %v8100_v26  ;;  %10139 = vst [vmem:[#allocation126_spill] sm:$0xff] %v10138_v32  ;;  %v2098_v44 = vadd.f32 %v7411_v9, %v2020_v57 }
  0xe5   : > { %5693 = vmatprep.mubr.msk.bf16.mxu0 %vm8119_vm2, %v8105_v53  ;;  %3659 = vmatprep.mubr.bf16.mxu1 %v7824_v34  ;;  %v2686_v34 = vrot.slane %v7019_v52, 1  ;;  %v8164_v53 = vpack.c.bf16 %v9905_v3, %v2166_v20  ;;  %v2168_v20 = vmax.f32 %v2096_v50, 0.0  ;;  %v2659_v50 = vrot.slane %v7818_v29, 1 }
  0xe6   : > { %v782_v5 = vand.u32 31, %v430_v59  ;;  %v2457_v61 = vrot.slane %v8206_v54, 7  ;;  %v10150_v59 = vmov 0 }
  0xe7   : > { %v2715_v58 = vsel %vm10132_vm13, %v2686_v34, %v2687_v47  ;;  %v2716_v52 = vsel %vm10133_vm8, %v2685_v15, %v2686_v34  ;;  %v2689_v34 = vrot.slane %v7239_v25, 1  ;;  %vm10140_vm13 = vmmov %vm10133_vm8  ;;  %vm10141_vm8 = vcmp.lt.s32.totalorder %v6614_v7, 1 }
  0xe8   : > { %v8181_v35 = vpack.c.bf16 %v2715_v58, %v2716_v52  ;;  %v2745_v15 = vsel %vm10140_vm13, %v7451_v2, %v2657_v14  ;;  %v2513_v63 = vsel %vm10141_vm8, %v2454_v41, %v6720_v48  ;;  %vm10142_vm11 = vmmov %vm10141_vm8  ;;  %v8210_v12 = vsel %vm8183_vm12, %v2168_v20, 0.0 }
  0xe9   : > { %v2514_v25 = vsel %vm10142_vm11, %v2453_v42, %v2454_v41  ;;  %vm10143_vm2 = vmmov %vm10140_vm13  ;;  %v8219_v42 = vpack.c.bf16 %v8206_v54, %v2168_v20  ;;  %v2456_v41 = vrot.slane %v8210_v12, 7  ;;  %vm8239_vm8 = vcmp.le.s32.totalorder %v782_v5, 16 }
  0xea   : > { %10136 = vst [vmem:[#allocation125_spill] sm:$0xff] %v8181_v35  ;;  %v2746_v27 = vsel %vm10143_vm2, %v2655_v51, %v7451_v2  ;;  %v8214_v58 = vpack.c.bf16 %v2513_v63, %v2514_v25  ;;  %v2658_v51 = vrot.slane %v7761_v18, 1  ;;  %vm10146_vm11 = vmmov %vm10143_vm2  ;;  %v2714_v29 = vsel %vm10143_vm2, %v2687_v47, %v7451_v2 }
  0xeb   : > { %v8216_v52 = vpack.c.bf16 %v2745_v15, %v2746_v27  ;;  %v2713_v9 = vsel %vm10146_vm11, %v7451_v2, %v2689_v34  ;;  %vm8233_vm13 = vmpackc.low %vm9887_vm3, %vm8183_vm12  ;;  %v2170_v18 = vmax.f32 %v2098_v44, 0.0  ;;  %v10151_v59 = vsel %vm8239_vm8, 4294967295, %v10150_v59  ;;  %v6530_v44 = vld [vmem:[%s9515_s1 + $0x1c8] sm:$0xff]  }
  0xec   : > { %3435 = vmatmul.mubr.bf16.gmra.mxu0 %v8159_v1  ;;  %3660 = vmatmul.mubr.bf16.gmra.mxu1 %v8161_v33  ;;  %10144 = vst [vmem:[#allocation127_spill] sm:$0xff] %v8214_v58  ;;  %v8237_v57 = vpack.c.bf16 %v2713_v9, %v2714_v29  ;;  %10152 = vst [vmem:[#allocation130_spill] sm:$0xff] %v10151_v59  ;;  %v2690_v9 = vrot.slane %v7230_v40, 1  ;;  %v2661_v29 = vrot.slane %v7868_v56, 1  ;;  %v10162_v56 = vmov 0 }
  0xed   : > { %5696 = vmatprep.mubr.msk.bf16.mxu0 %vm8176_vm9, %v8164_v53  ;;  %3667 = vmatprep.mubr.bf16.mxu1 %v7872_v21  ;;  %10145 = vst [vmem:[#allocation128_spill] sm:$0xff] %v8216_v52  ;;  %vm10153_vm11 = vmmov %vm10143_vm2  ;;  %vm10154_vm2 = vcmp.lt.s32.totalorder %v6614_v7, 1  ;;  %v8264_v5 = vsel %vm8239_vm8, %v2170_v18, 0.0  ;;  %v2669_v59 = vrot.slane %v8096_v22, 1  ;;  %v10228_v21 = vld [vmem:[#allocation68_spill] sm:$0xff] }
  0xee   : > { %10149 = vst [vmem:[#allocation129_spill] sm:$0xff] %v8237_v57  ;;  %v2743_v47 = vsel %vm10153_vm11, %v2658_v51, %v2659_v50  ;;  %v2511_v63 = vsel %vm10154_vm2, %v2456_v41, %v2457_v61  ;;  %vm10155_vm12 = vmmov %vm10154_vm2  ;;  %4138 = vmatpush2.bf16.msra.mxu1 %v6530_v44 }
  0xef   : > { %v2512_v25 = vsel %vm10155_vm12, %v6720_v48, %v2456_v41  ;;  %vm10156_vm9 = vmmov %vm10153_vm11  ;;  %4139 = vmatprep.subr.bf16.mxu1 %v9902_v13  ;;  %v10160_v41 = vrot.slane %v7322_v16, 1 }
  0xf0   : > { %v2744_v27 = vsel %vm10156_vm9, %v2657_v14, %v2658_v51  ;;  %v8268_v15 = vpack.c.bf16 %v2511_v63, %v2512_v25  ;;  %v2458_v14 = vrot.slane %v8264_v5, 7  ;;  %v8275_v51 = vpack.c.bf16 %v9905_v3, %v2170_v18  ;;  %vm10161_vm12 = vmmov %vm10156_vm9 }
  0xf1   : > { %v8270_v32 = vpack.c.bf16 %v2743_v47, %v2744_v27  ;;  %v2711_v44 = vsel %vm10156_vm9, %v2690_v9, %v10160_v41  ;;  %v2712_v40 = vsel %vm10161_vm12, %v2689_v34, %v2690_v9  ;;  %vm8286_vm11 = vmpackc.low %vm9887_vm3, %vm8239_vm8  ;;  %v2663_v9 = vrot.slane %v7920_v38, 1  ;;  %v6531_v38 = vld [vmem:[%s9515_s1 + $0x1c0] sm:$0xff]  }
  0xf2   : > { %10157 = vst [vmem:[#allocation131_spill] sm:$0xff] %v8268_v15  ;;  %10159 = vst [vmem:[#allocation133_spill] sm:$0xff] %v8275_v51  ;;  %v10163_v56 = vsel %vm8286_vm11, 4294967295, %v10162_v56  ;;  %v8290_v13 = vpack.c.bf16 %v2711_v44, %v2712_v40  ;;  %v2662_v41 = vrot.slane %v7864_v24, 1  ;;  %4140 = vmatpush2.bf16.msra.mxu1 %v6531_v38  ;;  %v6523_v44 = vld [vmem:[%s9515_s1 + $0x230] sm:$0xff]   ;;  %vm10263_vm3 = vcmp.lt.s32.totalorder %v6614_v7, 1 }
  0xf3   : > { %10158 = vst [vmem:[#allocation132_spill] sm:$0xff] %v8270_v32  ;;  %10164 = vst [vmem:[#allocation134_spill] sm:$0xff] %v10163_v56  ;;  %v10237_v56 = vld [vmem:[#allocation34_spill] sm:$0xff] }
  0xf4   : > { %3443 = vmatmul.mubr.bf16.gmra.mxu0 %v8214_v58  ;;  %3668 = vmatmul.mubr.bf16.gmra.mxu1 %v8216_v52  ;;  %10165 = vst [vmem:[#allocation135_spill] sm:$0xff] %v8290_v13  ;;  %vm10166_vm2 = vmmov %vm10156_vm9  ;;  %vm10167_vm9 = vcmp.lt.s32.totalorder %v6614_v7, 1 }
  0xf5   : > { %5699 = vmatprep.mubr.msk.bf16.mxu0 %vm8233_vm13, %v8219_v42  ;;  %3675 = vmatprep.mubr.bf16.mxu1 %v7928_v43  ;;  %v2741_v18 = vsel %vm10166_vm2, %v7451_v2, %v2661_v29  ;;  %v2509_v34 = vsel %vm10167_vm9, %v2458_v14, %v6720_v48  ;;  %vm10168_vm12 = vmmov %vm10167_vm9 }
  0xf6   : > { %v2510_v47 = vsel %vm10168_vm12, %v2457_v61, %v2458_v14  ;;  %vm10169_vm8 = vmmov %vm10166_vm2  ;;  %v2739_v61 = vsel %vm10166_vm2, %v2662_v41, %v2663_v9  ;;  %v2665_v14 = vrot.slane %v7981_v49, 1 }
  0xf7   : > { %v2742_v63 = vsel %vm10169_vm8, %v2659_v50, %v7451_v2  ;;  %v8309_v25 = vpack.c.bf16 %v2509_v34, %v2510_v47  ;;  %vm10172_vm8 = vmmov %vm10166_vm2 }
  0xf8   : > { %v8311_v27 = vpack.c.bf16 %v2741_v18, %v2742_v63  ;;  %v2740_v50 = vsel %vm10172_vm8, %v2661_v29, %v2662_v41  ;;  %vm10175_vm9 = vmmov %vm10166_vm2  ;;  %v2667_v63 = vrot.slane %v8038_v46, 1  ;;  %v2666_v41 = vrot.slane %v7977_v23, 1  ;;  %v10182_v23 = vld [vmem:[#allocation80_spill] sm:$0xff] }
  0xf9   : > { %10170 = vst [vmem:[#allocation136_spill] sm:$0xff] %v8309_v25  ;;  %v8326_v24 = vpack.c.bf16 %v2739_v61, %v2740_v50  ;;  %v2737_v49 = vsel %vm10175_vm9, %v7451_v2, %v2665_v14  ;;  %vm10176_vm12 = vmmov %vm10166_vm2 }
  0xfa   : > { %10171 = vst [vmem:[#allocation137_spill] sm:$0xff] %v8311_v27  ;;  %v2738_v29 = vsel %vm10176_vm12, %v2663_v9, %v7451_v2  ;;  %vm10189_vm8 = vmmov %vm10166_vm2 }
  0xfb   : > { %10173 = vst [vmem:[#allocation138_spill] sm:$0xff] %v8326_v24  ;;  %v8356_v47 = vpack.c.bf16 %v2737_v49, %v2738_v29  ;;  %v10180_v49 = vld [vmem:[#allocation21_spill] sm:$0xff]  ;;  %vm10196_vm9 = vmmov %vm10166_vm2 }
  0xfc   : > { %3451 = vmatmul.mubr.bf16.gmra.mxu0 %v8268_v15  ;;  %3676 = vmatmul.mubr.bf16.gmra.mxu1 %v8270_v32  ;;  %vm10197_vm12 = vmmov %vm10166_vm2 }
  0xfd   : > { %5702 = vmatprep.mubr.msk.bf16.mxu0 %vm8286_vm11, %v8275_v51  ;;  %3683 = vmatprep.mubr.bf16.mxu1 %v7987_v8  ;;  %10178 = vst [vmem:[#allocation141_spill] sm:$0xff] %v8356_v47  ;;  %v10216_v8 = vld [vmem:[#allocation16_spill] sm:$0xff] }
 0x104   : > { %3459 = vmatmul.mubr.bf16.gmra.mxu0 %v8309_v25  ;;  %3684 = vmatmul.mubr.bf16.gmra.mxu1 %v8311_v27 }
 0x105   : > { %3691 = vmatprep.mubr.bf16.mxu1 %v8044_v6  ;;  %3852 = vmatprep.mubr.bf16.mxu0 %v7605_v19 }
 0x10c   : > { %v8332_v19 = vpop.f32.mrf.mxu0  ;;  %v8334_v40 = vpop.f32.mrf.mxu1  ;;  %3692 = vmatmul.mubr.bf16.gmra.mxu1 %v8326_v24  ;;  %5729 = vmatmul.mubr.msk.bf16.vlgmr.msra.gmra.mxu0 %vm6880_vm10, %v6885_v11  ;;  %vm10183_vm10 = vmmov %vm10166_vm2 }
 0x10d   : > { %10174 = vst [vmem:[#allocation139_spill] sm:$0xff] %v8334_v40  ;;  %6340 = vmatpush3.bf16.msra.mxu0 %v7579_v28  ;;  %3699 = vmatprep.mubr.bf16.mxu1 %v8102_v36  ;;  %v2735_v46 = vsel %vm10183_vm10, %v2666_v41, %v2667_v63  ;;  %vm10203_vm10 = vmmov %vm10166_vm2 }
 0x10e   : > { %v3278_v18 = vpop.f32.mrf.mxu0  ;;  %v3470_v34 = vpop.f32.mrf.mxu1  ;;  %3860 = vmatprep.mubr.bf16.mxu0 %v7662_v39  ;;  %6341 = vmatprep.subr.bf16.mxu0 %v6523_v44  ;;  %v6529_v39 = vld [vmem:[%s9515_s1 + $0x220] sm:$0xff]  }
 0x110   : > { %v8352_v11 = vpop.f32.mrf.mxu0  ;;  %v8354_v28 = vpop.f32.mrf.mxu1 }
 0x111   : > { %10177 = vst [vmem:[#allocation140_spill] sm:$0xff] %v8354_v28  ;;  %6342 = vmatpush3.bf16.msra.mxu0 %v6523_v44  ;;  %v2736_v44 = vsel %vm10166_vm2, %v2665_v14, %v2666_v41 }
 0x112   : > { %v3281_v9 = vpop.f32.mrf.mxu0  ;;  %v3473_v61 = vpop.f32.mrf.mxu1  ;;  %6343 = vmatprep.subr.bf16.mxu0 %v6526_v10  ;;  %v8380_v29 = vpack.c.bf16 %v2735_v46, %v2736_v44 }
 0x113   : > { %v6532_v9 = vld [vmem:[%s9515_s1 + $0x218] sm:$0xff]  }
 0x114   : > { %v8363_v50 = vpop.f32.mrf.mxu0  ;;  %v8365_v38 = vpop.f32.mrf.mxu1  ;;  %3700 = vmatmul.mubr.bf16.gmra.mxu1 %v8356_v47  ;;  %5732 = vmatmul.mubr.msk.bf16.gmra.mxu0 %vm6987_vm14, %v10180_v49  ;;  %10184 = vst [vmem:[#allocation21_spill] sm:$0xff] %v8380_v29  ;;  %vm10188_vm14 = vmmov %vm10166_vm2 }
 0x115   : > { %10179 = vst [vmem:[#allocation142_spill] sm:$0xff] %v8365_v38  ;;  %3707 = vmatprep.mubr.bf16.mxu1 %v8159_v1  ;;  %3868 = vmatprep.mubr.bf16.mxu0 %v10182_v23  ;;  %v2733_v22 = vsel %vm10188_vm14, %v7451_v2, %v2669_v59  ;;  %vm10210_vm14 = vmmov %vm10166_vm2 }
 0x116   : > { %v3286_v18 = vpop.f32.mrf.mxu0  ;;  %v3478_v34 = vpop.f32.mrf.mxu1  ;;  %6344 = vmatpush3.bf16.msra.mxu0 %v6526_v10  ;;  %v10186_v10 = vld [vmem:[#allocation28_spill] sm:$0xff] }
 0x117   : > { %6345 = vmatprep.subr.bf16.mxu0 %v6529_v39  ;;  %v2671_v34 = vrot.slane %v8154_v62, 1 }
 0x118   : > { %v3287_v61 = vpop.f32.mrf.mxu0  ;;  %v3479_v49 = vpop.f32.mrf.mxu1 }
 0x119   : > { %v2670_v61 = vrot.slane %v8082_v55, 1 }
 0x11a   : > { %v3289_v37 = vpop.f32.mrf.mxu0  ;;  %v3481_v38 = vpop.f32.mrf.mxu1  ;;  %6346 = vmatpush3.bf16.msra.mxu0 %v6529_v39 }
 0x11b   : > { %6347 = vmatprep.subr.bf16.mxu0 %v6532_v9  ;;  %v2734_v37 = vsel %vm10189_vm8, %v2667_v63, %v7451_v2  ;;  %v10193_v63 = vld [vmem:[#allocation35_spill] sm:$0xff]  ;;  %v2731_v62 = vsel %vm10196_vm9, %v2670_v61, %v2671_v34  ;;  %v2732_v55 = vsel %vm10197_vm12, %v2669_v59, %v2670_v61  ;;  %vm10211_vm8 = vmmov %vm10166_vm2 }
 0x11c   : > { %v8383_v28 = vpop.f32.mrf.mxu0  ;;  %v8385_v14 = vpop.f32.mrf.mxu1  ;;  %3708 = vmatmul.mubr.bf16.gmra.mxu1 %v8380_v29  ;;  %5735 = vmatmul.mubr.msk.bf16.gmra.mxu0 %vm7080_vm6, %v10186_v10  ;;  %v8403_v18 = vpack.c.bf16 %v2733_v22, %v2734_v37  ;;  %v10195_v22 = vld [vmem:[#allocation90_spill] sm:$0xff]  ;;  %v10202_v59 = vld [vmem:[#allocation95_spill] sm:$0xff]  ;;  %vm10219_vm9 = vmmov %vm10166_vm2 }
 0x11d   : > { %10185 = vst [vmem:[#allocation23_spill] sm:$0xff] %v8385_v14  ;;  %3715 = vmatprep.mubr.bf16.mxu1 %v8214_v58  ;;  %3876 = vmatprep.mubr.bf16.mxu0 %v7775_v0  ;;  %vm10220_vm12 = vmmov %vm10166_vm2 }
 0x11e   : > { %v3294_v39 = vpop.f32.mrf.mxu0  ;;  %v3486_v38 = vpop.f32.mrf.mxu1  ;;  %6348 = vmatpush3.bf16.msra.mxu0 %v6532_v9  ;;  %10191 = vst [vmem:[#allocation29_spill] sm:$0xff] %v8403_v18 }
 0x120   : > { %v8399_v46 = vpop.f32.mrf.mxu0  ;;  %v8401_v44 = vpop.f32.mrf.mxu1 }
 0x121   : > { %10190 = vst [vmem:[#allocation28_spill] sm:$0xff] %v8401_v44 }
 0x122   : > { %v3297_v49 = vpop.f32.mrf.mxu0  ;;  %v3489_v14 = vpop.f32.mrf.mxu1 }
 0x123   : > { %v8421_v49 = vpack.c.bf16 %v2731_v62, %v2732_v55 }
 0x124   : > { %v8407_v40 = vpop.f32.mrf.mxu0  ;;  %v8409_v58 = vpop.f32.mrf.mxu1  ;;  %3716 = vmatmul.mubr.bf16.gmra.mxu1 %v8403_v18  ;;  %5738 = vmatmul.mubr.msk.bf16.gmra.mxu0 %vm7176_vm4, %v10193_v63 }
 0x125   : > { %10192 = vst [vmem:[#allocation143_spill] sm:$0xff] %v8409_v58  ;;  %3723 = vmatprep.mubr.bf16.mxu1 %v8268_v15  ;;  %3884 = vmatprep.mubr.bf16.mxu0 %v10195_v22  ;;  %10198 = vst [vmem:[#allocation35_spill] sm:$0xff] %v8421_v49  ;;  %v2673_v58 = vrot.slane %v8210_v12, 1  ;;  %v10200_v22 = vld [vmem:[#allocation43_spill] sm:$0xff] }
 0x126   : > { %v3302_v14 = vpop.f32.mrf.mxu0  ;;  %v3494_v37 = vpop.f32.mrf.mxu1 }
 0x127   : > { %v2729_v12 = vsel %vm10203_vm10, %v7451_v2, %v2673_v58 }
 0x128   : > { %v3303_v39 = vpop.f32.mrf.mxu0  ;;  %v3495_v38 = vpop.f32.mrf.mxu1 }
 0x129   : > { %v2675_v39 = vrot.slane %v8264_v5, 1  ;;  %v2674_v38 = vrot.slane %v8206_v54, 1 }
 0x12a   : > { %v3305_v44 = vpop.f32.mrf.mxu0  ;;  %v3497_v0 = vpop.f32.mrf.mxu1 }
 0x12b   : > { %v2730_v0 = vsel %vm10166_vm2, %v2671_v34, %v7451_v2  ;;  %v6533_v44 = vld [vmem:[%s9515_s1 + $0x210] sm:$0xff]   ;;  %v2727_v5 = vsel %vm10210_vm14, %v2674_v38, %v2675_v39  ;;  %v2728_v54 = vsel %vm10211_vm8, %v2673_v58, %v2674_v38  ;;  %v10217_v58 = vld [vmem:[#allocation6_spill] sm:$0xff] }
 0x12c   : > { %v8424_v1 = vpop.f32.mrf.mxu0  ;;  %v8426_v15 = vpop.f32.mrf.mxu1  ;;  %3724 = vmatmul.mubr.bf16.gmra.mxu1 %v8421_v49  ;;  %5741 = vmatmul.mubr.msk.bf16.gmra.mxu0 %vm7262_vm5, %v10200_v22  ;;  %v8447_v37 = vpack.c.bf16 %v2729_v12, %v2730_v0  ;;  %v10218_v38 = vrot.slane %v10217_v58, 1 }
 0x12d   : > { %10199 = vst [vmem:[#allocation37_spill] sm:$0xff] %v8426_v15  ;;  %3731 = vmatprep.mubr.bf16.mxu1 %v8309_v25  ;;  %3892 = vmatprep.mubr.bf16.mxu0 %v10202_v59 }
 0x12e   : > { %v3310_v61 = vpop.f32.mrf.mxu0  ;;  %v3502_v62 = vpop.f32.mrf.mxu1  ;;  %6349 = vmatprep.subr.bf16.mxu0 %v6533_v44  ;;  %10205 = vst [vmem:[#allocation44_spill] sm:$0xff] %v8447_v37 }
 0x12f   : > { %6350 = vmatpush3.bf16.msra.mxu0 %v6533_v44  ;;  %v10207_v61 = vld [vmem:[#allocation51_spill] sm:$0xff] }
 0x130   : > { %v8443_v55 = vpop.f32.mrf.mxu0  ;;  %v8445_v14 = vpop.f32.mrf.mxu1 }
 0x131   : > { %10204 = vst [vmem:[#allocation43_spill] sm:$0xff] %v8445_v14  ;;  %v10209_v14 = vld [vmem:[#allocation10_spill] sm:$0xff] }
 0x132   : > { %v3313_v15 = vpop.f32.mrf.mxu0  ;;  %v3505_v34 = vpop.f32.mrf.mxu1 }
 0x133   : > { %v8465_v34 = vpack.c.bf16 %v2727_v5, %v2728_v54 }
 0x134   : > { %v8451_v25 = vpop.f32.mrf.mxu0  ;;  %v8453_v59 = vpop.f32.mrf.mxu1  ;;  %3732 = vmatmul.mubr.bf16.gmra.mxu1 %v8447_v37  ;;  %5744 = vmatmul.mubr.msk.bf16.gmra.mxu0 %vm7347_vm0, %v10207_v61 }
 0x135   : > { %10206 = vst [vmem:[#allocation144_spill] sm:$0xff] %v8453_v59  ;;  %3739 = vmatprep.mubr.bf16.mxu1 %v10209_v14  ;;  %3900 = vmatprep.mubr.bf16.mxu0 %v7930_v17  ;;  %10212 = vst [vmem:[#allocation51_spill] sm:$0xff] %v8465_v34  ;;  %v10214_v14 = vld [vmem:[#allocation58_spill] sm:$0xff]  ;;  %v10309_v17 = vld [vmem:[#allocation103_spill] sm:$0xff] }
 0x136   : > { %v3318_v15 = vpop.f32.mrf.mxu0  ;;  %v3510_v12 = vpop.f32.mrf.mxu1 }
 0x138   : > { %v3319_v0 = vpop.f32.mrf.mxu0  ;;  %v3511_v44 = vpop.f32.mrf.mxu1 }
 0x13a   : > { %v3321_v59 = vpop.f32.mrf.mxu0  ;;  %v3513_v36 = vpop.f32.mrf.mxu1 }
 0x13b   : > { %v2725_v36 = vsel %vm10219_vm9, %v7451_v2, %v10218_v38  ;;  %v2726_v59 = vsel %vm10220_vm12, %v2675_v39, %v7451_v2  ;;  %v10224_v38 = vld [vmem:[#allocation64_spill] sm:$0xff] }
 0x13c   : > { %v8467_v3 = vpop.f32.mrf.mxu0  ;;  %v8469_v6 = vpop.f32.mrf.mxu1  ;;  %3740 = vmatmul.mubr.bf16.gmra.mxu1 %v8465_v34  ;;  %5747 = vmatmul.mubr.msk.bf16.gmra.mxu0 %vm7432_vm7, %v10214_v14  ;;  %v8489_v0 = vpack.c.bf16 %v2725_v36, %v2726_v59  ;;  %v10226_v39 = vld [vmem:[#allocation20_spill] sm:$0xff] }
 0x13d   : > { %10213 = vst [vmem:[#allocation52_spill] sm:$0xff] %v8469_v6  ;;  %3747 = vmatprep.mubr.bf16.mxu1 %v10216_v8  ;;  %3908 = vmatprep.mubr.bf16.mxu0 %v7985_v4  ;;  %v10245_v4 = vld [vmem:[#allocation121_spill] sm:$0xff] }
 0x13e   : > { %v3326_v5 = vpop.f32.mrf.mxu0  ;;  %v3518_v54 = vpop.f32.mrf.mxu1  ;;  %10222 = vst [vmem:[#allocation59_spill] sm:$0xff] %v8489_v0 }
 0x140   : > { %v8485_v15 = vpop.f32.mrf.mxu0  ;;  %v8487_v12 = vpop.f32.mrf.mxu1 }
 0x141   : > { %10221 = vst [vmem:[#allocation58_spill] sm:$0xff] %v8487_v12 }
 0x142   : > { %v3329_v44 = vpop.f32.mrf.mxu0  ;;  %v3521_v6 = vpop.f32.mrf.mxu1 }
 0x144   : > { %v8491_v8 = vpop.f32.mrf.mxu0  ;;  %v8493_v58 = vpop.f32.mrf.mxu1  ;;  %3748 = vmatmul.mubr.bf16.gmra.mxu1 %v8489_v0  ;;  %5750 = vmatmul.mubr.msk.bf16.gmra.mxu0 %vm7492_vm1, %v10224_v38 }
 0x145   : > { %10223 = vst [vmem:[#allocation6_spill] sm:$0xff] %v8493_v58  ;;  %3755 = vmatprep.mubr.bf16.mxu1 %v10226_v39  ;;  %3916 = vmatprep.mubr.bf16.mxu0 %v8046_v45  ;;  %v10227_v58 = vld [vmem:[#allocation103_spill] sm:$0xff] }
 0x146   : > { %v3334_v5 = vpop.f32.mrf.mxu0  ;;  %v3526_v54 = vpop.f32.mrf.mxu1  ;;  %v10231_v39 = vld [vmem:[#allocation27_spill] sm:$0xff] }
 0x147   : > { %v6534_v5 = vld [vmem:[%s9515_s1 + $0x208] sm:$0xff]  }
 0x148   : > { %v3335_v36 = vpop.f32.mrf.mxu0  ;;  %v3527_v59 = vpop.f32.mrf.mxu1  ;;  %6351 = vmatprep.subr.bf16.mxu0 %v6534_v5 }
 0x149   : > { %6352 = vmatpush3.bf16.msra.mxu0 %v6534_v5 }
 0x14a   : > { %v3337_v44 = vpop.f32.mrf.mxu0  ;;  %v3529_v6 = vpop.f32.mrf.mxu1 }
 0x14c   : > { %v8501_v12 = vpop.f32.mrf.mxu0  ;;  %v3565_v43 = vpop.f32.mrf.mxu1  ;;  %3756 = vmatmul.mubr.bf16.gmra.mxu1 %v10227_v58  ;;  %5753 = vmatmul.mubr.msk.bf16.gmra.mxu0 %vm7554_vm15, %v10228_v21 }
 0x14d   : > { %v8508_v51 = vadd.f32 %v3565_v43, %v8332_v19  ;;  %3763 = vmatprep.mubr.bf16.mxu1 %v10231_v39  ;;  %3924 = vmatprep.mubr.bf16.mxu0 %v8100_v26  ;;  %v10233_v26 = vld [vmem:[#allocation72_spill] sm:$0xff] }
 0x14e   : > { %v3342_v54 = vpop.f32.mrf.mxu0  ;;  %v3567_v36 = vpop.f32.mrf.mxu1 }
 0x14f   : > { %10230 = vst [vmem:[#allocation64_spill] sm:$0xff] %v8508_v51  ;;  %v10234_v51 = vld [vmem:[#allocation73_spill] sm:$0xff]  ;;  %v6267_v54 = vld [vmem:[%s6619_s6 + $0x100] sm:$0xff]  }
 0x150   : > { %v8515_v59 = vpop.f32.mrf.mxu0  ;;  %v3568_v44 = vpop.f32.mrf.mxu1  ;;  %vm10235_vm10 = vnez %v10234_v51  ;;  %v6107_v21 = vunpack.c.h.bf16 %v6267_v54  ;;  %v6538_v51 = vld [vmem:[%s9516_s2] ss:$0 sm:$0xff] }
 0x151   : > { %v8518_v6 = vadd.f32 %v3568_v44, %v8352_v11  ;;  %v6106_v44 = vunpack.c.l.bf16 %v6267_v54 }
 0x152   : > { %v3345_v43 = vpop.f32.mrf.mxu0  ;;  %v3570_v19 = vpop.f32.mrf.mxu1 }
 0x153   : > { %10232 = vst [vmem:[#allocation145_spill] sm:$0xff] %v8518_v6 }
 0x154   : > { %v8520_v39 = vpop.f32.mrf.mxu0  ;;  %v3573_v45 = vpop.f32.mrf.mxu1  ;;  %3764 = vmatmul.mubr.bf16.gmra.mxu1 %v8009_v30  ;;  %5756 = vmatmul.mubr.msk.bf16.gmra.mxu0 %vm10235_vm10, %v10233_v26  ;;  %v2038_v26 = vmul.f32 %v6538_v51, %v6106_v44 }
 0x155   : > { %v8528_v36 = vadd.f32 %v3573_v45, %v8363_v50  ;;  %3771 = vmatprep.mubr.bf16.mxu1 %v10237_v56  ;;  %3932 = vmatprep.mubr.bf16.mxu0 %v8161_v33  ;;  %v10238_v56 = vld [vmem:[#allocation76_spill] sm:$0xff]  ;;  %v10239_v33 = vld [vmem:[#allocation77_spill] sm:$0xff] }
 0x156   : > { %v3350_v11 = vpop.f32.mrf.mxu0  ;;  %v3575_v5 = vpop.f32.mrf.mxu1  ;;  %vm10240_vm2 = vnez %v10239_v33 }
 0x157   : > { %10236 = vst [vmem:[#allocation146_spill] sm:$0xff] %v8528_v36  ;;  %v448_v11 = vadd.s32 512, %v6614_v7  ;;  %v1890_v5 = vld [vmem:[%s6619_s6 + $0x108] sm:$0xf] }
 0x158   : > { %v3351_v43 = vpop.f32.mrf.mxu0  ;;  %v3576_v19 = vpop.f32.mrf.mxu1  ;;  %v1962_v33 = vunpack.c.l.bf16 %v1890_v5  ;;  %v10247_v5 = vld [vmem:[#allocation82_spill] sm:$0xff] }
 0x159   : > { %v2039_v43 = vmul.f32 %v6538_v51, %v6107_v21  ;;  %v6539_v19 = vld [vmem:[%s9517_s3] ss:$0 sm:$0xff]  ;;  %v908_v58 = vand.u32 31, %v448_v11  ;;  %vm10248_vm14 = vnez %v10247_v5  ;;  %v10249_v11 = vmov 0 }
 0x15a   : > { %v3353_v6 = vpop.f32.mrf.mxu0  ;;  %v3578_v30 = vpop.f32.mrf.mxu1  ;;  %v8551_v36 = vadd.f32 %v6539_v19, %v2038_v26  ;;  %v2040_v21 = vmul.f32 %v6538_v51, %v1962_v33  ;;  %v10246_v26 = vld [vmem:[#allocation81_spill] sm:$0xff] }
 0x15b   : > { %v10242_v6 = vld [vmem:[#allocation42_spill] sm:$0xff]  ;;  %vm8565_vm8 = vcmp.ge.s32.totalorder %v908_v58, 1 }
 0x15c   : > { %v8535_v45 = vpop.f32.mrf.mxu0  ;;  %v3581_v50 = vpop.f32.mrf.mxu1  ;;  %3772 = vmatmul.mubr.bf16.gmra.mxu1 %v8066_v31  ;;  %5759 = vmatmul.mubr.msk.bf16.gmra.mxu0 %vm10240_vm2, %v10238_v56  ;;  %10243 = vst [vmem:[#allocation148_spill] sm:$0xff] %v8551_v36  ;;  %v10250_v11 = vsel %vm8565_vm8, 4294967295, %v10249_v11 }
 0x15d   : > { %v8544_v30 = vadd.f32 %v3581_v50, %v8383_v28  ;;  %3779 = vmatprep.mubr.bf16.mxu1 %v10242_v6  ;;  %3940 = vmatprep.mubr.bf16.mxu0 %v8216_v52  ;;  %v2117_v52 = vadd.f32 %v6539_v19, %v2039_v43  ;;  %10251 = vst [vmem:[#allocation81_spill] sm:$0xff] %v10250_v11  ;;  %v10256_v11 = vld [vmem:[#allocation87_spill] sm:$0xff] }
 0x15e   : > { %v3358_v54 = vpop.f32.mrf.mxu0  ;;  %v3583_v44 = vpop.f32.mrf.mxu1  ;;  %vm10257_vm9 = vnez %v10256_v11 }
 0x15f   : > { %10241 = vst [vmem:[#allocation147_spill] sm:$0xff] %v8544_v30  ;;  %v9799_v54 = vmax.f32 %v8551_v36, 0.0  ;;  %v8575_v43 = vmax.f32 %v2117_v52, 0.0 }
 0x160   : > { %v8553_v56 = vpop.f32.mrf.mxu0  ;;  %v3584_v31 = vpop.f32.mrf.mxu1 }
 0x161   : > { %v8556_v28 = vadd.f32 %v3584_v31, %v8399_v46  ;;  %v450_v31 = vadd.s32 528, %v6614_v7  ;;  %v8581_v58 = vsel %vm8565_vm8, %v9799_v54, 0.0  ;;  %v10255_v54 = vld [vmem:[#allocation86_spill] sm:$0xff]  ;;  %vm10264_vm8 = vmmov %vm10263_vm3 }
 0x162   : > { %v3361_v50 = vpop.f32.mrf.mxu0  ;;  %v3586_v6 = vpop.f32.mrf.mxu1 }
 0x163   : > { %10244 = vst [vmem:[#allocation149_spill] sm:$0xff] %v8556_v28  ;;  %v10253_v6 = vld [vmem:[#allocation50_spill] sm:$0xff]  ;;  %v8583_v50 = vadd.f32 %v6539_v19, %v2040_v21  ;;  %v10258_v19 = vmov 0  ;;  %v10262_v21 = vld [vmem:[#allocation57_spill] sm:$0xff] }
 0x164   : > { %v8559_v44 = vpop.f32.mrf.mxu0  ;;  %v3589_v30 = vpop.f32.mrf.mxu1  ;;  %3780 = vmatmul.mubr.bf16.gmra.mxu1 %v10245_v4  ;;  %5762 = vmatmul.mubr.msk.bf16.gmra.mxu0 %vm10248_vm14, %v10246_v26 }
 0x165   : > { %v8571_v46 = vadd.f32 %v3589_v30, %v8407_v40  ;;  %3787 = vmatprep.mubr.bf16.mxu1 %v10253_v6  ;;  %3948 = vmatprep.mubr.bf16.mxu0 %v8270_v32  ;;  %10254 = vst [vmem:[#allocation151_spill] sm:$0xff] %v8583_v50  ;;  %v922_v40 = vand.u32 31, %v450_v31  ;;  %v2476_v6 = vrot.slane %v8581_v58, 7  ;;  %v9806_v52 = vmax.f32 %v8583_v50, 0.0 }
 0x166   : > { %v3366_v33 = vpop.f32.mrf.mxu0  ;;  %v3591_v51 = vpop.f32.mrf.mxu1 }
 0x167   : > { %10252 = vst [vmem:[#allocation150_spill] sm:$0xff] %v8571_v46  ;;  %v2477_v33 = vrot.slane %v8575_v43, 7  ;;  %vm8594_vm12 = vcmp.le.s32.totalorder %v922_v40, 16  ;;  %v2492_v40 = vsel %vm10264_vm8, %v6720_v48, %v2476_v6 }
 0x168   : > { %v3367_v28 = vpop.f32.mrf.mxu0  ;;  %v3592_v5 = vpop.f32.mrf.mxu1  ;;  %v10259_v19 = vsel %vm8594_vm12, 4294967295, %v10258_v19 }
 0x169   : > { %10260 = vst [vmem:[#allocation86_spill] sm:$0xff] %v10259_v19  ;;  %v6535_v5 = vld [vmem:[%s9515_s1 + $0x200] sm:$0xff]   ;;  %v10269_v19 = vld [vmem:[#allocation92_spill] sm:$0xff] }
 0x16a   : > { %v3369_v30 = vpop.f32.mrf.mxu0  ;;  %v3594_v46 = vpop.f32.mrf.mxu1  ;;  %6353 = vmatprep.subr.bf16.mxu0 %v6535_v5 }
 0x16b   : > { %v2491_v30 = vsel %vm10263_vm3, %v2476_v6, %v2477_v33  ;;  %6354 = vmatpush3.bf16.msra.mxu0 %v6535_v5  ;;  %vm10270_vm3 = vnez %v10269_v19 }
 0x16c   : > { %v8588_v51 = vpop.f32.mrf.mxu0  ;;  %v3597_v32 = vpop.f32.mrf.mxu1  ;;  %3788 = vmatmul.mubr.bf16.gmra.mxu1 %v8181_v35  ;;  %5765 = vmatmul.mubr.msk.bf16.gmra.mxu0 %vm10257_vm9, %v10255_v54 }
 0x16d   : > { %v8599_v28 = vadd.f32 %v3597_v32, %v8424_v1  ;;  %3795 = vmatprep.mubr.bf16.mxu1 %v10262_v21  ;;  %3956 = vmatprep.mubr.bf16.mxu0 %v8311_v27  ;;  %v8615_v1 = vsel %vm8594_vm12, %v9806_v52, 0.0  ;;  %v10268_v52 = vld [vmem:[#allocation91_spill] sm:$0xff]  ;;  %vm10271_vm12 = vmmov %vm10264_vm8 }
 0x16e   : > { %v3374_v31 = vpop.f32.mrf.mxu0  ;;  %v3599_v46 = vpop.f32.mrf.mxu1  ;;  %10265 = vst [vmem:[#allocation152_spill] sm:$0xff] %v8615_v1  ;;  %v2478_v6 = vrot.slane %v8615_v1, 7 }
 0x16f   : > { %10261 = vst [vmem:[#allocation87_spill] sm:$0xff] %v8599_v28  ;;  %v8622_v46 = vpack.c.bf16 %v2491_v30, %v2492_v40 }
 0x170   : > { %v8617_v32 = vpop.f32.mrf.mxu0  ;;  %v3600_v21 = vpop.f32.mrf.mxu1 }
 0x171   : > { %v8620_v31 = vadd.f32 %v3600_v21, %v8443_v55  ;;  %10267 = vst [vmem:[#allocation154_spill] sm:$0xff] %v8622_v46  ;;  %v2490_v21 = vsel %vm10271_vm12, %v2477_v33, %v2478_v6  ;;  %vm10277_vm12 = vcmp.lt.s32.totalorder %v6614_v7, 7 }
 0x172   : > { %v3377_v27 = vpop.f32.mrf.mxu0  ;;  %v3602_v36 = vpop.f32.mrf.mxu1 }
 0x173   : > { %10266 = vst [vmem:[#allocation153_spill] sm:$0xff] %v8620_v31  ;;  %v2489_v36 = vsel %vm10264_vm8, %v2478_v6, %v6720_v48  ;;  %v9814_v31 = vrot.slane %v8581_v58, 1  ;;  %v10278_v6 = vrot.slane %v7322_v16, 1  ;;  %vm10279_vm8 = vmmov %vm10277_vm12  ;;  %v10282_v16 = vld [vmem:[#allocation101_spill] sm:$0xff] }
 0x174   : > { %v8625_v28 = vpop.f32.mrf.mxu0  ;;  %v3605_v50 = vpop.f32.mrf.mxu1  ;;  %3796 = vmatmul.mubr.bf16.gmra.mxu1 %v8237_v57  ;;  %5768 = vmatmul.mubr.msk.bf16.gmra.mxu0 %vm10270_vm3, %v10268_v52  ;;  %v8642_v1 = vpack.c.bf16 %v2489_v36, %v2490_v21 }
 0x175   : > { %v8632_v5 = vadd.f32 %v3605_v50, %v8451_v25  ;;  %3803 = vmatprep.mubr.bf16.mxu1 %v8622_v46  ;;  %3964 = vmatprep.mubr.bf16.mxu0 %v8326_v24  ;;  %v2709_v33 = vsel %vm10277_vm12, %v7451_v2, %v9814_v31  ;;  %v2710_v36 = vsel %vm10279_vm8, %v10278_v6, %v7451_v2  ;;  %v10286_v2 = vld [vmem:[#allocation108_spill] sm:$0xff] }
 0x176   : > { %v3382_v27 = vpop.f32.mrf.mxu0  ;;  %v3607_v55 = vpop.f32.mrf.mxu1  ;;  %10272 = vst [vmem:[#allocation91_spill] sm:$0xff] %v8642_v1  ;;  %vm10287_vm8 = vnez %v10286_v2 }
 0x177   : > { %v10273_v27 = vld [vmem:[#allocation96_spill] sm:$0xff]  ;;  %v10274_v55 = vld [vmem:[#allocation97_spill] sm:$0xff] }
 0x178   : > { %v3383_v30 = vpop.f32.mrf.mxu0  ;;  %v3608_v40 = vpop.f32.mrf.mxu1  ;;  %vm10275_vm3 = vnez %v10274_v55  ;;  %v10360_v55 = vld [vmem:[#allocation87_spill] sm:$0xff] }
 0x179   : > { %v8667_v40 = vpack.c.bf16 %v2709_v33, %v2710_v36 }
 0x17a   : > { %v3385_v25 = vpop.f32.mrf.mxu0  ;;  %v3610_v50 = vpop.f32.mrf.mxu1 }
 0x17b   : > { %10280 = vst [vmem:[#allocation96_spill] sm:$0xff] %v8667_v40 }
 0x17c   : > { %v8644_v46 = vpop.f32.mrf.mxu0  ;;  %v3613_v24 = vpop.f32.mrf.mxu1  ;;  %3804 = vmatmul.mubr.bf16.gmra.mxu1 %v8290_v13  ;;  %5771 = vmatmul.mubr.msk.bf16.gmra.mxu0 %vm10275_vm3, %v10273_v27 }
 0x17d   : > { %v8651_v48 = vadd.f32 %v3613_v24, %v8467_v3  ;;  %3811 = vmatprep.mubr.bf16.mxu1 %v8642_v1  ;;  %3972 = vmatprep.mubr.bf16.mxu0 %v8356_v47 }
 0x17e   : > { %v3390_v21 = vpop.f32.mrf.mxu0  ;;  %v3615_v30 = vpop.f32.mrf.mxu1 }
 0x17f   : > { %10276 = vst [vmem:[#allocation92_spill] sm:$0xff] %v8651_v48  ;;  %v10283_v48 = vld [vmem:[#allocation102_spill] sm:$0xff] }
 0x180   : > { %v8665_v3 = vpop.f32.mrf.mxu0  ;;  %v3616_v24 = vpop.f32.mrf.mxu1  ;;  %vm10284_vm12 = vnez %v10283_v48 }
 0x181   : > { %v8670_v25 = vadd.f32 %v3616_v24, %v8485_v15 }
 0x182   : > { %v3393_v50 = vpop.f32.mrf.mxu0  ;;  %v3618_v1 = vpop.f32.mrf.mxu1 }
 0x183   : > { %10281 = vst [vmem:[#allocation97_spill] sm:$0xff] %v8670_v25  ;;  %v10285_v25 = vld [vmem:[#allocation107_spill] sm:$0xff] }
 0x184   : > { %v8672_v47 = vpop.f32.mrf.mxu0  ;;  %v3621_v31 = vpop.f32.mrf.mxu1  ;;  %3812 = vmatmul.mubr.bf16.gmra.mxu1 %v8667_v40  ;;  %5774 = vmatmul.mubr.msk.bf16.gmra.mxu0 %vm10284_vm12, %v10282_v16 }
 0x185   : > { %v8679_v6 = vadd.f32 %v3621_v31, %v8491_v8  ;;  %3980 = vmatprep.mubr.bf16.mxu0 %v8380_v29  ;;  %5825 = vmatprep.mubr.msk.bf16.mxu1 %vm7080_vm6, %v10186_v10  ;;  %v10288_v8 = vld [vmem:[#allocation33_spill] sm:$0xff] }
 0x186   : > { %v3398_v15 = vpop.f32.mrf.mxu0  ;;  %v3623_v1 = vpop.f32.mrf.mxu1 }
 0x188   : > { %v3399_v33 = vpop.f32.mrf.mxu0  ;;  %v3624_v36 = vpop.f32.mrf.mxu1 }
 0x18a   : > { %v3401_v21 = vpop.f32.mrf.mxu0  ;;  %v3626_v30 = vpop.f32.mrf.mxu1 }
 0x18c   : > { %v8685_v24 = vpop.f32.mrf.mxu0  ;;  %v3629_v50 = vpop.f32.mrf.mxu1  ;;  %5777 = vmatmul.mubr.msk.bf16.gmra.mxu0 %vm10287_vm8, %v10285_v25  ;;  %4142 = vmatmul.mubr.bf16.vlgmr.msra.gmra.mxu1 %v10288_v8  ;;  %v10291_v8 = vld [vmem:[#allocation114_spill] sm:$0xff] }
 0x18d   : > { %v8692_v31 = vadd.f32 %v3629_v50, %v8501_v12  ;;  %3988 = vmatprep.mubr.bf16.mxu0 %v8403_v18  ;;  %5828 = vmatprep.mubr.msk.bf16.mxu1 %vm7176_vm4, %v10193_v63  ;;  %v10290_v50 = vld [vmem:[#allocation113_spill] sm:$0xff]  ;;  %vm10292_vm6 = vnez %v10291_v8 }
 0x18e   : > { %v3406_v10 = vpop.f32.mrf.mxu0  ;;  %v3631_v41 = vpop.f32.mrf.mxu1  ;;  %v10293_v18 = vld [vmem:[#allocation41_spill] sm:$0xff] }
 0x190   : > { %v8698_v15 = vpop.f32.mrf.mxu0  ;;  %v3632_v1 = vpop.f32.mrf.mxu1 }
 0x191   : > { %v8701_v33 = vadd.f32 %v3632_v1, %v8515_v59 }
 0x192   : > { %v3409_v36 = vpop.f32.mrf.mxu0  ;;  %v3634_v21 = vpop.f32.mrf.mxu1 }
 0x193   : > { %10289 = vst [vmem:[#allocation101_spill] sm:$0xff] %v8701_v33  ;;  %v10294_v33 = vld [vmem:[#allocation119_spill] sm:$0xff] }
 0x194   : > { %v8703_v30 = vpop.f32.mrf.mxu0  ;;  %v3637_v12 = vpop.f32.mrf.mxu1  ;;  %5780 = vmatmul.mubr.msk.bf16.gmra.mxu0 %vm10292_vm6, %v10290_v50  ;;  %4150 = vmatmul.mubr.bf16.gmra.mxu1 %v10293_v18  ;;  %v10295_v18 = vld [vmem:[#allocation120_spill] sm:$0xff] }
 0x195   : > { %v8710_v63 = vadd.f32 %v3637_v12, %v8520_v39  ;;  %3996 = vmatprep.mubr.bf16.mxu0 %v8421_v49  ;;  %5831 = vmatprep.mubr.msk.bf16.mxu1 %vm7262_vm5, %v10200_v22  ;;  %vm10296_vm4 = vnez %v10295_v18  ;;  %v10297_v39 = vld [vmem:[#allocation49_spill] sm:$0xff]  ;;  %vm10298_vm5 = vnez %v10135_v60  ;;  %v10397_v60 = vld [vmem:[#allocation100_spill] sm:$0xff] }
 0x196   : > { %v3414_v9 = vpop.f32.mrf.mxu0  ;;  %v3639_v59 = vpop.f32.mrf.mxu1 }
 0x198   : > { %v3415_v10 = vpop.f32.mrf.mxu0  ;;  %v3640_v41 = vpop.f32.mrf.mxu1 }
 0x19a   : > { %v3417_v1 = vpop.f32.mrf.mxu0  ;;  %v3642_v36 = vpop.f32.mrf.mxu1 }
 0x19c   : > { %v8716_v21 = vpop.f32.mrf.mxu0  ;;  %v3645_v29 = vpop.f32.mrf.mxu1  ;;  %5783 = vmatmul.mubr.msk.bf16.gmra.mxu0 %vm10296_vm4, %v10294_v33  ;;  %4158 = vmatmul.mubr.bf16.gmra.mxu1 %v10297_v39 }
 0x19d   : > { %v8723_v12 = vadd.f32 %v3645_v29, %v8535_v45  ;;  %4004 = vmatprep.mubr.bf16.mxu0 %v8447_v37  ;;  %5834 = vmatprep.mubr.msk.bf16.mxu1 %vm7347_vm0, %v10207_v61  ;;  %v10299_v45 = vld [vmem:[#allocation56_spill] sm:$0xff] }
 0x19e   : > { %v3422_v23 = vpop.f32.mrf.mxu0  ;;  %v3647_v22 = vpop.f32.mrf.mxu1 }
 0x1a0   : > { %v8729_v9 = vpop.f32.mrf.mxu0  ;;  %v3648_v59 = vpop.f32.mrf.mxu1 }
 0x1a1   : > { %v8732_v10 = vadd.f32 %v3648_v59, %v8553_v56 }
 0x1a2   : > { %v3425_v41 = vpop.f32.mrf.mxu0  ;;  %v3650_v1 = vpop.f32.mrf.mxu1 }
 0x1a4   : > { %v8734_v36 = vpop.f32.mrf.mxu0  ;;  %v3653_v29 = vpop.f32.mrf.mxu1  ;;  %5786 = vmatmul.mubr.msk.bf16.gmra.mxu0 %vm10298_vm5, %v8164_v53  ;;  %4166 = vmatmul.mubr.bf16.gmra.mxu1 %v10299_v45 }
 0x1a5   : > { %v8741_v61 = vadd.f32 %v3653_v29, %v8559_v44  ;;  %4012 = vmatprep.mubr.bf16.mxu0 %v8465_v34  ;;  %5837 = vmatprep.mubr.msk.bf16.mxu1 %vm7432_vm7, %v10214_v14  ;;  %v10301_v44 = vld [vmem:[#allocation62_spill] sm:$0xff] }
 0x1a6   : > { %v3430_v56 = vpop.f32.mrf.mxu0  ;;  %v3655_v62 = vpop.f32.mrf.mxu1 }
 0x1a7   : > { %10300 = vst [vmem:[#allocation102_spill] sm:$0xff] %v8741_v61  ;;  %v10329_v61 = vld [vmem:[#allocation17_spill] sm:$0xff] }
 0x1a8   : > { %v3431_v39 = vpop.f32.mrf.mxu0  ;;  %v3656_v23 = vpop.f32.mrf.mxu1 }
 0x1aa   : > { %v3433_v22 = vpop.f32.mrf.mxu0  ;;  %v3658_v59 = vpop.f32.mrf.mxu1 }
 0x1ac   : > { %v8747_v41 = vpop.f32.mrf.mxu0  ;;  %v3661_v1 = vpop.f32.mrf.mxu1  ;;  %5789 = vmatmul.mubr.msk.bf16.gmra.mxu0 %vm8233_vm13, %v8219_v42  ;;  %4174 = vmatmul.mubr.bf16.gmra.mxu1 %v10301_v44 }
 0x1ad   : > { %v8754_v29 = vadd.f32 %v3661_v1, %v8588_v51  ;;  %4020 = vmatprep.mubr.bf16.mxu0 %v8489_v0  ;;  %5840 = vmatprep.mubr.msk.bf16.mxu1 %vm7492_vm1, %v10224_v38  ;;  %v10305_v1 = vld [vmem:[#allocation133_spill] sm:$0xff]  ;;  %v10307_v0 = vld [vmem:[#allocation67_spill] sm:$0xff]  ;;  %vm10330_vm1 = vnez %v10329_v61 }
 0x1ae   : > { %v3438_v14 = vpop.f32.mrf.mxu0  ;;  %v3663_v45 = vpop.f32.mrf.mxu1  ;;  %v10427_v61 = vld [vmem:[#allocation21_spill] sm:$0xff] }
 0x1af   : > { %10302 = vst [vmem:[#allocation107_spill] sm:$0xff] %v8754_v29  ;;  %v10310_v14 = vld [vmem:[#allocation68_spill] sm:$0xff]  ;;  %v10312_v29 = vld [vmem:[#allocation5_spill] sm:$0xff] }
 0x1b0   : > { %v8760_v56 = vpop.f32.mrf.mxu0  ;;  %v3664_v62 = vpop.f32.mrf.mxu1  ;;  %v10317_v45 = vld [vmem:[#allocation109_spill] sm:$0xff] }
 0x1b1   : > { %v8763_v39 = vadd.f32 %v3664_v62, %v8617_v32 }
 0x1b2   : > { %v3441_v23 = vpop.f32.mrf.mxu0  ;;  %v3666_v22 = vpop.f32.mrf.mxu1 }
 0x1b3   : > { %10304 = vst [vmem:[#allocation108_spill] sm:$0xff] %v8763_v39 }
 0x1b4   : > { %v8765_v59 = vpop.f32.mrf.mxu0  ;;  %v3669_v51 = vpop.f32.mrf.mxu1  ;;  %5792 = vmatmul.mubr.msk.bf16.gmra.mxu0 %vm8286_vm11, %v10305_v1  ;;  %4182 = vmatmul.mubr.bf16.gmra.mxu1 %v10307_v0  ;;  %v10313_v0 = vld [vmem:[#allocation4_spill] sm:$0xff] }
 0x1b5   : > { %v8772_v38 = vadd.f32 %v3669_v51, %v8625_v28  ;;  %4028 = vmatprep.mubr.bf16.mxu0 %v10309_v17  ;;  %5843 = vmatprep.mubr.msk.bf16.mxu1 %vm7554_vm15, %v10310_v14  ;;  %vm10314_vm0 = vnez %v10313_v0  ;;  %v10315_v28 = vld [vmem:[#allocation71_spill] sm:$0xff]  ;;  %v10318_v14 = vld [vmem:[#allocation72_spill] sm:$0xff] }
 0x1b6   : > { %v3446_v32 = vpop.f32.mrf.mxu0  ;;  %v3671_v62 = vpop.f32.mrf.mxu1 }
 0x1b7   : > { %10308 = vst [vmem:[#allocation33_spill] sm:$0xff] %v8772_v38  ;;  %v10325_v32 = vld [vmem:[#allocation115_spill] sm:$0xff] }
 0x1b8   : > { %v3447_v23 = vpop.f32.mrf.mxu0  ;;  %v3672_v22 = vpop.f32.mrf.mxu1 }
 0x1ba   : > { %v3449_v34 = vpop.f32.mrf.mxu0  ;;  %v3674_v37 = vpop.f32.mrf.mxu1 }
 0x1bc   : > { %v8778_v49 = vpop.f32.mrf.mxu0  ;;  %v3677_v39 = vpop.f32.mrf.mxu1  ;;  %5795 = vmatmul.mubr.msk.bf16.gmra.mxu0 %vm10314_vm0, %v10312_v29  ;;  %4190 = vmatmul.mubr.bf16.gmra.mxu1 %v10315_v28 }
 0x1bd   : > { %v8785_v51 = vadd.f32 %v3677_v39, %v8644_v46  ;;  %4036 = vmatprep.mubr.bf16.mxu0 %v10317_v45  ;;  %5846 = vmatprep.mubr.msk.bf16.mxu1 %vm10235_vm10, %v10318_v14  ;;  %v10321_v39 = vld [vmem:[#allocation13_spill] sm:$0xff]  ;;  %v10324_v45 = vld [vmem:[#allocation75_spill] sm:$0xff] }
 0x1be   : > { %v3454_v34 = vpop.f32.mrf.mxu0  ;;  %v3679_v37 = vpop.f32.mrf.mxu1 }
 0x1bf   : > { %10316 = vst [vmem:[#allocation113_spill] sm:$0xff] %v8785_v51  ;;  %v10322_v51 = vld [vmem:[#allocation14_spill] sm:$0xff]  ;;  %v10326_v34 = vld [vmem:[#allocation76_spill] sm:$0xff] }
 0x1c0   : > { %v8791_v62 = vpop.f32.mrf.mxu0  ;;  %v3680_v23 = vpop.f32.mrf.mxu1  ;;  %vm10323_vm7 = vnez %v10322_v51 }
 0x1c1   : > { %v8794_v22 = vadd.f32 %v3680_v23, %v8665_v3 }
 0x1c2   : > { %v3457_v17 = vpop.f32.mrf.mxu0  ;;  %v3682_v38 = vpop.f32.mrf.mxu1 }
 0x1c3   : > { %10320 = vst [vmem:[#allocation114_spill] sm:$0xff] %v8794_v22 }
 0x1c4   : > { %v8796_v28 = vpop.f32.mrf.mxu0  ;;  %v3685_v46 = vpop.f32.mrf.mxu1  ;;  %5798 = vmatmul.mubr.msk.bf16.gmra.mxu0 %vm10323_vm7, %v10321_v39  ;;  %4198 = vmatmul.mubr.bf16.gmra.mxu1 %v10324_v45  ;;  %v10328_v39 = vld [vmem:[#allocation18_spill] sm:$0xff] }
 0x1c5   : > { %v8803_v14 = vadd.f32 %v3685_v46, %v8672_v47  ;;  %4044 = vmatprep.mubr.bf16.mxu0 %v10325_v32  ;;  %5849 = vmatprep.mubr.msk.bf16.mxu1 %vm10240_vm2, %v10326_v34  ;;  %v10331_v47 = vld [vmem:[#allocation79_spill] sm:$0xff]  ;;  %v10332_v46 = vld [vmem:[#allocation64_spill] sm:$0xff]  ;;  %vm10347_vm2 = vnez %v10269_v19  ;;  %v10352_v19 = vld [vmem:[#allocation94_spill] sm:$0xff] }
 0x1c6   : > { %v3462_v3 = vpop.f32.mrf.mxu0  ;;  %v3687_v38 = vpop.f32.mrf.mxu1  ;;  %v10337_v32 = vld [vmem:[#allocation24_spill] sm:$0xff] }
 0x1c7   : > { %v10340_v34 = vld [vmem:[#allocation84_spill] sm:$0xff] }
 0x1c8   : > { %v3463_v17 = vpop.f32.mrf.mxu0  ;;  %v3688_v23 = vpop.f32.mrf.mxu1 }
 0x1c9   : > { %v10335_v23 = vld [vmem:[#allocation145_spill] sm:$0xff] }
 0x1ca   : > { %v3465_v22 = vpop.f32.mrf.mxu0  ;;  %v3690_v0 = vpop.f32.mrf.mxu1 }
 0x1cc   : > { %v3693_v29 = vpop.f32.mrf.mxu1  ;;  %v3854_v51 = vpop.f32.mrf.mxu0  ;;  %5801 = vmatmul.mubr.msk.bf16.gmra.mxu0 %vm10330_vm1, %v10328_v39  ;;  %4206 = vmatmul.mubr.bf16.gmra.mxu1 %v10331_v47 }
 0x1cd   : > { %v8814_v45 = vadd.f32 %v3693_v29, %v8685_v24  ;;  %v8817_v37 = vadd.f32 %v3854_v51, %v10332_v46  ;;  %4052 = vmatprep.mubr.bf16.mxu0 %v10245_v4  ;;  %5852 = vmatprep.mubr.msk.bf16.mxu1 %vm10248_vm14, %v10246_v26  ;;  %v10338_v4 = vld [vmem:[#allocation25_spill] sm:$0xff] }
 0x1ce   : > { %v3695_v0 = vpop.f32.mrf.mxu1  ;;  %v3856_v22 = vpop.f32.mrf.mxu0  ;;  %vm10339_vm15 = vnez %v10338_v4 }
 0x1cf   : > { %v10341_v0 = vld [vmem:[#allocation146_spill] sm:$0xff] }
 0x1d0   : > { %v3696_v3 = vpop.f32.mrf.mxu1  ;;  %v3857_v38 = vpop.f32.mrf.mxu0 }
 0x1d1   : > { %v8824_v17 = vadd.f32 %v3696_v3, %v8698_v15  ;;  %v8827_v47 = vadd.f32 %v3857_v38, %v10335_v23 }
 0x1d2   : > { %v3698_v24 = vpop.f32.mrf.mxu1  ;;  %v3859_v29 = vpop.f32.mrf.mxu0 }
 0x1d3   : > { %10334 = vst [vmem:[#allocation41_spill] sm:$0xff] %v8824_v17  ;;  %10336 = vst [vmem:[#allocation119_spill] sm:$0xff] %v8827_v47  ;;  %v10342_v17 = vld [vmem:[#allocation30_spill] sm:$0xff] }
 0x1d4   : > { %v3701_v51 = vpop.f32.mrf.mxu1  ;;  %v3862_v46 = vpop.f32.mrf.mxu0  ;;  %5804 = vmatmul.mubr.msk.bf16.gmra.mxu0 %vm10339_vm15, %v10337_v32  ;;  %4214 = vmatmul.mubr.bf16.gmra.mxu1 %v10340_v34 }
 0x1d5   : > { %v8834_v26 = vadd.f32 %v3701_v51, %v8703_v30  ;;  %v8837_v22 = vadd.f32 %v3862_v46, %v10341_v0  ;;  %4060 = vmatprep.mubr.bf16.mxu0 %v8181_v35  ;;  %5855 = vmatprep.mubr.msk.bf16.mxu1 %vm10257_vm9, %v10255_v54  ;;  %v10343_v30 = vld [vmem:[#allocation31_spill] sm:$0xff]  ;;  %v10345_v51 = vld [vmem:[#allocation89_spill] sm:$0xff]  ;;  %v10355_v35 = vld [vmem:[#allocation152_spill] sm:$0xff] }
 0x1d6   : > { %v3703_v15 = vpop.f32.mrf.mxu1  ;;  %v3864_v3 = vpop.f32.mrf.mxu0  ;;  %vm10344_vm10 = vnez %v10343_v30  ;;  %v10346_v0 = vld [vmem:[#allocation147_spill] sm:$0xff] }
 0x1d8   : > { %v3704_v38 = vpop.f32.mrf.mxu1  ;;  %v3865_v23 = vpop.f32.mrf.mxu0 }
 0x1da   : > { %v3706_v24 = vpop.f32.mrf.mxu1  ;;  %v3867_v29 = vpop.f32.mrf.mxu0 }
 0x1db   : > { %v10348_v24 = vld [vmem:[#allocation149_spill] sm:$0xff] }
 0x1dc   : > { %v3709_v47 = vpop.f32.mrf.mxu1  ;;  %v3870_v34 = vpop.f32.mrf.mxu0  ;;  %5807 = vmatmul.mubr.msk.bf16.gmra.mxu0 %vm10344_vm10, %v10342_v17  ;;  %4222 = vmatmul.mubr.bf16.gmra.mxu1 %v10345_v51 }
 0x1dd   : > { %v8848_v46 = vadd.f32 %v3709_v47, %v8716_v21  ;;  %v8851_v11 = vadd.f32 %v3870_v34, %v10346_v0  ;;  %4068 = vmatprep.mubr.bf16.mxu0 %v8237_v57  ;;  %5858 = vmatprep.mubr.msk.bf16.mxu1 %vm10347_vm2, %v10268_v52  ;;  %v10349_v0 = vld [vmem:[#allocation38_spill] sm:$0xff]  ;;  %v10350_v57 = vld [vmem:[#allocation39_spill] sm:$0xff] }
 0x1de   : > { %v3711_v54 = vpop.f32.mrf.mxu1  ;;  %v3872_v15 = vpop.f32.mrf.mxu0  ;;  %vm10351_vm14 = vnez %v10350_v57  ;;  %v10439_v57 = vld [vmem:[#allocation59_spill] sm:$0xff] }
 0x1df   : > { %v10354_v54 = vld [vmem:[#allocation150_spill] sm:$0xff] }
 0x1e0   : > { %v3712_v3 = vpop.f32.mrf.mxu1  ;;  %v3873_v38 = vpop.f32.mrf.mxu0 }
 0x1e1   : > { %v8858_v23 = vadd.f32 %v3712_v3, %v8729_v9  ;;  %v8861_v29 = vadd.f32 %v3873_v38, %v10348_v24 }
 0x1e2   : > { %v3714_v21 = vpop.f32.mrf.mxu1  ;;  %v3875_v47 = vpop.f32.mrf.mxu0 }
 0x1e4   : > { %v3717_v34 = vpop.f32.mrf.mxu1  ;;  %v3878_v51 = vpop.f32.mrf.mxu0  ;;  %5810 = vmatmul.mubr.msk.bf16.gmra.mxu0 %vm10351_vm14, %v10349_v0  ;;  %4230 = vmatmul.mubr.bf16.gmra.mxu1 %v10352_v19  ;;  %v2694_v19 = vrot.slane %v8575_v43, 1 }
 0x1e5   : > { %v8868_v52 = vadd.f32 %v3717_v34, %v8734_v36  ;;  %v8871_v15 = vadd.f32 %v3878_v51, %v10354_v54  ;;  %4076 = vmatprep.mubr.bf16.mxu0 %v8290_v13  ;;  %5861 = vmatprep.mubr.msk.bf16.mxu1 %vm10275_vm3, %v10273_v27  ;;  %v2695_v36 = vrot.slane %v10355_v35, 1  ;;  %v10356_v51 = vld [vmem:[#allocation45_spill] sm:$0xff]  ;;  %v10357_v54 = vld [vmem:[#allocation47_spill] sm:$0xff]  ;;  %vm10362_vm3 = vcmp.lt.s32.totalorder %v6614_v7, 7 }
 0x1e6   : > { %v3719_v9 = vpop.f32.mrf.mxu1  ;;  %v3880_v3 = vpop.f32.mrf.mxu0  ;;  %vm10358_vm9 = vnez %v10357_v54  ;;  %v10359_v13 = vld [vmem:[#allocation99_spill] sm:$0xff]  ;;  %vm10364_vm2 = vmmov %vm10362_vm3 }
 0x1e7   : > { %10353 = vst [vmem:[#allocation120_spill] sm:$0xff] %v8868_v52 }
 0x1e8   : > { %v3720_v38 = vpop.f32.mrf.mxu1  ;;  %v3881_v24 = vpop.f32.mrf.mxu0 }
 0x1e9   : > { %v2707_v38 = vsel %vm10362_vm3, %v2694_v19, %v2695_v36  ;;  %v10363_v24 = vrot.slane %v8581_v58, 1  ;;  %v10369_v58 = vld [vmem:[#allocation106_spill] sm:$0xff]  ;;  %vm10371_vm3 = vmmov %vm10364_vm2 }
 0x1ea   : > { %v3722_v21 = vpop.f32.mrf.mxu1  ;;  %v3883_v47 = vpop.f32.mrf.mxu0 }
 0x1eb   : > { %v10365_v47 = vld [vmem:[#allocation153_spill] sm:$0xff] }
 0x1ec   : > { %v3725_v34 = vpop.f32.mrf.mxu1  ;;  %v3886_v52 = vpop.f32.mrf.mxu0  ;;  %5813 = vmatmul.mubr.msk.bf16.gmra.mxu0 %vm10358_vm9, %v10356_v51  ;;  %4238 = vmatmul.mubr.bf16.gmra.mxu1 %v10359_v13  ;;  %v2708_v13 = vsel %vm10364_vm2, %v10363_v24, %v2694_v19 }
 0x1ed   : > { %v8884_v27 = vadd.f32 %v3725_v34, %v8747_v41  ;;  %v8887_v9 = vadd.f32 %v3886_v52, %v10360_v55  ;;  %4084 = vmatprep.mubr.bf16.mxu0 %v8667_v40  ;;  %5864 = vmatprep.mubr.msk.bf16.mxu1 %vm10284_vm12, %v10282_v16  ;;  %v8905_v48 = vpack.c.bf16 %v2707_v38, %v2708_v13  ;;  %v10366_v40 = vld [vmem:[#allocation53_spill] sm:$0xff] }
 0x1ee   : > { %v3727_v35 = vpop.f32.mrf.mxu1  ;;  %v3888_v3 = vpop.f32.mrf.mxu0  ;;  %v10370_v13 = vld [vmem:[#allocation61_spill] sm:$0xff] }
 0x1ef   : > { %10361 = vst [vmem:[#allocation49_spill] sm:$0xff] %v8887_v9  ;;  %v10367_v9 = vld [vmem:[#allocation54_spill] sm:$0xff] }
 0x1f0   : > { %v3728_v41 = vpop.f32.mrf.mxu1  ;;  %v3889_v21 = vpop.f32.mrf.mxu0  ;;  %vm10368_vm12 = vnez %v10367_v9 }
 0x1f1   : > { %v8900_v52 = vadd.f32 %v3728_v41, %v8760_v56  ;;  %v8903_v34 = vadd.f32 %v3889_v21, %v10365_v47  ;;  %v2706_v41 = vsel %vm10371_vm3, %v2695_v36, %v10370_v13 }
 0x1f2   : > { %v3730_v16 = vpop.f32.mrf.mxu1  ;;  %v3891_v55 = vpop.f32.mrf.mxu0  ;;  %v8937_v2 = vpack.c.bf16 %v10370_v13, %v2706_v41 }
 0x1f3   : > { %v10372_v16 = vld [vmem:[#allocation148_spill] sm:$0xff] }
 0x1f4   : > { %v3733_v35 = vpop.f32.mrf.mxu1  ;;  %v3894_v3 = vpop.f32.mrf.mxu0  ;;  %5816 = vmatmul.mubr.msk.bf16.gmra.mxu0 %vm10368_vm12, %v10366_v40  ;;  %4246 = vmatmul.mubr.bf16.gmra.mxu1 %v10369_v58  ;;  %vm10376_vm12 = vmmov 1  }
 0x1f5   : > { %v8912_v19 = vadd.f32 %v3733_v35, %v8765_v59  ;;  %v8915_v56 = vadd.f32 %v3894_v3, %v8632_v5  ;;  %4092 = vmatprep.mubr.bf16.mxu0 %v8905_v48  ;;  %5867 = vmatprep.mubr.msk.bf16.mxu1 %vm10287_vm8, %v10285_v25  ;;  %v10373_v59 = vmax.f32 %v10372_v16, 0.0  ;;  %v10374_v5 = vld [vmem:[#allocation81_spill] sm:$0xff] }
 0x1f6   : > { %v3735_v38 = vpop.f32.mrf.mxu1  ;;  %v3896_v24 = vpop.f32.mrf.mxu0  ;;  %vm10375_vm2 = vnez %v10374_v5 }
 0x1f7   : > { %v8927_v55 = vpack.c.bf16 %v8575_v43, %v10373_v59  ;;  %vm8932_vm9 = vmpackc.low %vm10376_vm12, %vm10375_vm2  ;;  %v10379_v43 = vld [vmem:[#allocation111_spill] sm:$0xff]  ;;  %v10380_v24 = vld [vmem:[#allocation92_spill] sm:$0xff] }
 0x1f8   : > { %v3736_v21 = vpop.f32.mrf.mxu1  ;;  %v3897_v47 = vpop.f32.mrf.mxu0  ;;  %v10381_v59 = vld [vmem:[#allocation151_spill] sm:$0xff] }
 0x1f9   : > { %v10382_v5 = vmax.f32 %v10381_v59, 0.0  ;;  %v10390_v59 = vld [vmem:[#allocation80_spill] sm:$0xff] }
 0x1fa   : > { %v3738_v25 = vpop.f32.mrf.mxu1  ;;  %v3899_v3 = vpop.f32.mrf.mxu0 }
 0x1fb   : > { %v10383_v25 = vmov 0.0  }
 0x1fc   : > { %v3741_v36 = vpop.f32.mrf.mxu1  ;;  %v3902_v58 = vpop.f32.mrf.mxu0  ;;  %5819 = vmatmul.mubr.msk.bf16.gmra.mxu0 %vm8932_vm9, %v8927_v55  ;;  %4254 = vmatmul.mubr.bf16.gmra.mxu1 %v10379_v43  ;;  %v8956_v3 = vpack.c.bf16 %v10383_v25, %v10382_v5  ;;  %v10385_v43 = vld [vmem:[#allocation86_spill] sm:$0xff] }
 0x1fd   : > { %v8944_v38 = vadd.f32 %v3741_v36, %v8778_v49  ;;  %v8947_v21 = vadd.f32 %v3902_v58, %v10380_v24  ;;  %4100 = vmatprep.mubr.bf16.mxu0 %v8937_v2  ;;  %5870 = vmatprep.mubr.msk.bf16.mxu1 %vm10292_vm6, %v10290_v50  ;;  %v10384_v36 = vld [vmem:[#allocation97_spill] sm:$0xff]  ;;  %vm10386_vm8 = vnez %v10385_v43  ;;  %v10455_v50 = vld [vmem:[#allocation96_spill] sm:$0xff] }
 0x1fe   : > { %v3743_v13 = vpop.f32.mrf.mxu1  ;;  %v3904_v41 = vpop.f32.mrf.mxu0  ;;  %vm8967_vm3 = vmpackc.low %vm10376_vm12, %vm10386_vm8 }
 0x200   : > { %v3744_v47 = vpop.f32.mrf.mxu1  ;;  %v3905_v16 = vpop.f32.mrf.mxu0 }
 0x201   : > { %v8959_v49 = vadd.f32 %v3744_v47, %v8791_v62  ;;  %v8962_v58 = vadd.f32 %v3905_v16, %v10384_v36  ;;  %v10389_v62 = vld [vmem:[#allocation118_spill] sm:$0xff] }
 0x202   : > { %v3746_v8 = vpop.f32.mrf.mxu1  ;;  %v3907_v24 = vpop.f32.mrf.mxu0 }
 0x204   : > { %v3749_v13 = vpop.f32.mrf.mxu1  ;;  %v3910_v41 = vpop.f32.mrf.mxu0  ;;  %5822 = vmatmul.mubr.msk.bf16.gmra.mxu0 %vm8967_vm3, %v8956_v3  ;;  %4262 = vmatmul.mubr.bf16.gmra.mxu1 %v10389_v62 }
 0x205   : > { %v8976_v47 = vadd.f32 %v3749_v13, %v8796_v28  ;;  %v8979_v16 = vadd.f32 %v3910_v41, %v8679_v6  ;;  %5873 = vmatprep.mubr.msk.bf16.mxu1 %vm10296_vm4, %v10294_v33  ;;  %6355 = vmatprep.mubr.bf16.mxu0 %v10390_v59  ;;  %v10391_v28 = vld [vmem:[#allocation123_spill] sm:$0xff]  ;;  %v10392_v13 = vld [vmem:[#allocation85_spill] sm:$0xff]  ;;  %v10393_v33 = vld [vmem:[#allocation90_spill] sm:$0xff] }
 0x206   : > { %v3751_v5 = vpop.f32.mrf.mxu1  ;;  %v3912_v36 = vpop.f32.mrf.mxu0 }
 0x207   : > { %v10394_v5 = vld [vmem:[#allocation101_spill] sm:$0xff] }
 0x208   : > { %v3752_v43 = vpop.f32.mrf.mxu1  ;;  %v3913_v8 = vpop.f32.mrf.mxu0 }
 0x20a   : > { %v3754_v24 = vpop.f32.mrf.mxu1  ;;  %v3915_v25 = vpop.f32.mrf.mxu0 }
 0x20c   : > { %v8985_v7 = vpop.f32.mrf.mxu1  ;;  %v3918_v62 = vpop.f32.mrf.mxu0  ;;  %4270 = vmatmul.mubr.bf16.gmra.mxu1 %v10391_v28  ;;  %6356 = vmatmul.mubr.bf16.vlgmr.msra.gmra.mxu0 %v10392_v13  ;;  %v10396_v28 = vld [vmem:[#allocation95_spill] sm:$0xff] }
 0x20d   : > { %v8990_v6 = vadd.f32 %v3918_v62, %v8692_v31  ;;  %5876 = vmatprep.mubr.msk.bf16.mxu1 %vm10298_vm5, %v8164_v53  ;;  %6359 = vmatprep.mubr.bf16.mxu0 %v10393_v33  ;;  %v10395_v62 = vld [vmem:[#allocation127_spill] sm:$0xff] }
 0x20e   : > { %v3759_v18 = vpop.f32.mrf.mxu1  ;;  %v3920_v41 = vpop.f32.mrf.mxu0 }
 0x210   : > { %v8996_v59 = vpop.f32.mrf.mxu1  ;;  %v3921_v25 = vpop.f32.mrf.mxu0 }
 0x211   : > { %v8999_v36 = vadd.f32 %v3921_v25, %v10394_v5 }
 0x212   : > { %v3762_v43 = vpop.f32.mrf.mxu1  ;;  %v3923_v8 = vpop.f32.mrf.mxu0 }
 0x214   : > { %v9001_v24 = vpop.f32.mrf.mxu1  ;;  %v3926_v31 = vpop.f32.mrf.mxu0  ;;  %4278 = vmatmul.mubr.bf16.gmra.mxu1 %v10395_v62  ;;  %6360 = vmatmul.mubr.bf16.gmra.mxu0 %v10396_v28  ;;  %v10398_v62 = vld [vmem:[#allocation131_spill] sm:$0xff]  ;;  %v10399_v28 = vld [vmem:[#allocation105_spill] sm:$0xff] }
 0x215   : > { %v9006_v53 = vadd.f32 %v3926_v31, %v8710_v63  ;;  %5879 = vmatprep.mubr.msk.bf16.mxu1 %vm8233_vm13, %v8219_v42  ;;  %6363 = vmatprep.mubr.bf16.mxu0 %v10397_v60  ;;  %v10400_v42 = vld [vmem:[#allocation112_spill] sm:$0xff]  ;;  %vm10440_vm13 = vnez %v10357_v54 }
 0x216   : > { %v3767_v13 = vpop.f32.mrf.mxu1  ;;  %v3928_v33 = vpop.f32.mrf.mxu0 }
 0x218   : > { %v3768_v18 = vpop.f32.mrf.mxu1  ;;  %v3929_v41 = vpop.f32.mrf.mxu0 }
 0x21a   : > { %v3770_v25 = vpop.f32.mrf.mxu1  ;;  %v3931_v5 = vpop.f32.mrf.mxu0 }
 0x21b   : > { %v10403_v5 = vld [vmem:[#allocation136_spill] sm:$0xff] }
 0x21c   : > { %v9012_v43 = vpop.f32.mrf.mxu1  ;;  %v3934_v8 = vpop.f32.mrf.mxu0  ;;  %4286 = vmatmul.mubr.bf16.gmra.mxu1 %v10398_v62  ;;  %6364 = vmatmul.mubr.bf16.gmra.mxu0 %v10399_v28  ;;  %v10406_v62 = vld [vmem:[#allocation5_spill] sm:$0xff] }
 0x21d   : > { %v9017_v63 = vadd.f32 %v3934_v8, %v8723_v12  ;;  %5882 = vmatprep.mubr.msk.bf16.mxu1 %vm8286_vm11, %v10305_v1  ;;  %6367 = vmatprep.mubr.bf16.mxu0 %v10400_v42  ;;  %v10404_v8 = vld [vmem:[#allocation117_spill] sm:$0xff]  ;;  %v10405_v1 = vld [vmem:[#allocation102_spill] sm:$0xff]  ;;  %v10408_v42 = vld [vmem:[#allocation124_spill] sm:$0xff]  ;;  %vm10444_vm11 = vnez %v10367_v9 }
 0x21e   : > { %v3775_v20 = vpop.f32.mrf.mxu1  ;;  %v3936_v31 = vpop.f32.mrf.mxu0  ;;  %v10414_v28 = vld [vmem:[#allocation13_spill] sm:$0xff] }
 0x21f   : > { %v10447_v9 = vld [vmem:[#allocation121_spill] sm:$0xff] }
 0x220   : > { %v9023_v60 = vpop.f32.mrf.mxu1  ;;  %v3937_v13 = vpop.f32.mrf.mxu0 }
 0x221   : > { %v9026_v33 = vadd.f32 %v3937_v13, %v8732_v10 }
 0x222   : > { %v3778_v18 = vpop.f32.mrf.mxu1  ;;  %v3939_v41 = vpop.f32.mrf.mxu0 }
 0x223   : > { %10401 = vst [vmem:[#allocation56_spill] sm:$0xff] %v9026_v33  ;;  %v10410_v33 = vld [vmem:[#allocation10_spill] sm:$0xff] }
 0x224   : > { %v9028_v25 = vpop.f32.mrf.mxu1  ;;  %v3942_v12 = vpop.f32.mrf.mxu0  ;;  %4294 = vmatmul.mubr.bf16.gmra.mxu1 %v10403_v5  ;;  %6368 = vmatmul.mubr.bf16.gmra.mxu0 %v10404_v8  ;;  %v10411_v8 = vld [vmem:[#allocation128_spill] sm:$0xff] }
 0x225   : > { %10402 = vst [vmem:[#allocation62_spill] sm:$0xff] %v9028_v25  ;;  %v9033_v44 = vadd.f32 %v3942_v12, %v10405_v1  ;;  %5885 = vmatprep.mubr.msk.bf16.mxu1 %vm10314_vm0, %v10406_v62  ;;  %6371 = vmatprep.mubr.bf16.mxu0 %v10408_v42  ;;  %v10412_v12 = vld [vmem:[#allocation107_spill] sm:$0xff]  ;;  %v10416_v42 = vld [vmem:[#allocation132_spill] sm:$0xff] }
 0x226   : > { %v3783_v10 = vpop.f32.mrf.mxu1  ;;  %v3944_v20 = vpop.f32.mrf.mxu0 }
 0x228   : > { %v3784_v31 = vpop.f32.mrf.mxu1  ;;  %v3945_v13 = vpop.f32.mrf.mxu0 }
 0x22a   : > { %v3786_v18 = vpop.f32.mrf.mxu1  ;;  %v3947_v41 = vpop.f32.mrf.mxu0 }
 0x22b   : > { %v10417_v18 = vld [vmem:[#allocation108_spill] sm:$0xff] }
 0x22c   : > { %v9039_v25 = vpop.f32.mrf.mxu1  ;;  %v3950_v5 = vpop.f32.mrf.mxu0  ;;  %4302 = vmatmul.mubr.bf16.gmra.mxu1 %v10410_v33  ;;  %6372 = vmatmul.mubr.bf16.gmra.mxu0 %v10411_v8 }
 0x22d   : > { %10409 = vst [vmem:[#allocation65_spill] sm:$0xff] %v9039_v25  ;;  %v9044_v1 = vadd.f32 %v3950_v5, %v10412_v12  ;;  %5888 = vmatprep.mubr.msk.bf16.mxu1 %vm10323_vm7, %v10414_v28  ;;  %6375 = vmatprep.mubr.bf16.mxu0 %v10416_v42  ;;  %v10420_v12 = vld [vmem:[#allocation16_spill] sm:$0xff]  ;;  %v10422_v28 = vld [vmem:[#allocation33_spill] sm:$0xff]  ;;  %v10423_v42 = vld [vmem:[#allocation138_spill] sm:$0xff] }
 0x22e   : > { %v3791_v10 = vpop.f32.mrf.mxu1  ;;  %v3952_v20 = vpop.f32.mrf.mxu0 }
 0x22f   : > { %10413 = vst [vmem:[#allocation133_spill] sm:$0xff] %v9044_v1  ;;  %v10421_v1 = vld [vmem:[#allocation137_spill] sm:$0xff] }
 0x230   : > { %v9050_v31 = vpop.f32.mrf.mxu1  ;;  %v3953_v13 = vpop.f32.mrf.mxu0 }
 0x231   : > { %v9053_v41 = vadd.f32 %v3953_v13, %v10417_v18 }
 0x232   : > { %v3794_v33 = vpop.f32.mrf.mxu1  ;;  %v3955_v25 = vpop.f32.mrf.mxu0 }
 0x233   : > { %10418 = vst [vmem:[#allocation134_spill] sm:$0xff] %v9053_v41  ;;  %v10424_v41 = vld [vmem:[#allocation20_spill] sm:$0xff] }
 0x234   : > { %v9055_v8 = vpop.f32.mrf.mxu1  ;;  %v3958_v5 = vpop.f32.mrf.mxu0  ;;  %4310 = vmatmul.mubr.bf16.gmra.mxu1 %v10420_v12  ;;  %6376 = vmatmul.mubr.bf16.gmra.mxu0 %v10421_v1  ;;  %v10425_v1 = vld [vmem:[#allocation141_spill] sm:$0xff] }
 0x235   : > { %10419 = vst [vmem:[#allocation67_spill] sm:$0xff] %v9055_v8  ;;  %v9060_v62 = vadd.f32 %v3958_v5, %v10422_v28  ;;  %5891 = vmatprep.mubr.msk.bf16.mxu1 %vm10330_vm1, %v10328_v39  ;;  %6379 = vmatprep.mubr.bf16.mxu0 %v10423_v42  ;;  %v10426_v5 = vld [vmem:[#allocation113_spill] sm:$0xff] }
 0x236   : > { %v3799_v10 = vpop.f32.mrf.mxu1  ;;  %v3960_v20 = vpop.f32.mrf.mxu0 }
 0x238   : > { %v3800_v13 = vpop.f32.mrf.mxu1  ;;  %v3961_v25 = vpop.f32.mrf.mxu0 }
 0x239   : > { %v10428_v13 = vld [vmem:[#allocation114_spill] sm:$0xff] }
 0x23a   : > { %v3802_v18 = vpop.f32.mrf.mxu1  ;;  %v3963_v33 = vpop.f32.mrf.mxu0 }
 0x23c   : > { %v9066_v8 = vpop.f32.mrf.mxu1  ;;  %v3966_v12 = vpop.f32.mrf.mxu0  ;;  %4318 = vmatmul.mubr.bf16.gmra.mxu1 %v10424_v41  ;;  %6380 = vmatmul.mubr.bf16.gmra.mxu0 %v10425_v1  ;;  %v10430_v1 = vld [vmem:[#allocation27_spill] sm:$0xff] }
 0x23d   : > { %v9071_v28 = vadd.f32 %v3966_v12, %v10426_v5  ;;  %5894 = vmatprep.mubr.msk.bf16.mxu1 %vm10339_vm15, %v10337_v32  ;;  %6383 = vmatprep.mubr.bf16.mxu0 %v10427_v61  ;;  %v10431_v5 = vld [vmem:[#allocation29_spill] sm:$0xff]  ;;  %v10432_v32 = vld [vmem:[#allocation35_spill] sm:$0xff] }
 0x23e   : > { %v3807_v39 = vpop.f32.mrf.mxu1  ;;  %v3968_v42 = vpop.f32.mrf.mxu0 }
 0x240   : > { %v9077_v10 = vpop.f32.mrf.mxu1  ;;  %v3969_v20 = vpop.f32.mrf.mxu0 }
 0x241   : > { %v9080_v25 = vadd.f32 %v3969_v20, %v10428_v13 }
 0x242   : > { %v3810_v41 = vpop.f32.mrf.mxu1  ;;  %v3971_v18 = vpop.f32.mrf.mxu0 }
 0x244   : > { %v9082_v33 = vpop.f32.mrf.mxu1  ;;  %v3974_v12 = vpop.f32.mrf.mxu0  ;;  %4326 = vmatmul.mubr.bf16.gmra.mxu1 %v10430_v1  ;;  %6384 = vmatmul.mubr.bf16.gmra.mxu0 %v10431_v5  ;;  %v10433_v1 = vld [vmem:[#allocation34_spill] sm:$0xff]  ;;  %v10434_v5 = vld [vmem:[#allocation44_spill] sm:$0xff] }
 0x245   : > { %10429 = vst [vmem:[#allocation68_spill] sm:$0xff] %v9082_v33  ;;  %v9087_v4 = vadd.f32 %v3974_v12, %v8803_v14  ;;  %5897 = vmatprep.mubr.msk.bf16.mxu1 %vm10344_vm10, %v10342_v17  ;;  %6387 = vmatprep.mubr.bf16.mxu0 %v10432_v32  ;;  %v10435_v17 = vld [vmem:[#allocation51_spill] sm:$0xff] }
 0x246   : > { %v3815_v61 = vpop.f32.mrf.mxu1  ;;  %v3976_v39 = vpop.f32.mrf.mxu0 }
 0x248   : > { %v3816_v42 = vpop.f32.mrf.mxu1  ;;  %v3977_v20 = vpop.f32.mrf.mxu0 }
 0x249   : > { %v10436_v42 = vld [vmem:[#allocation41_spill] sm:$0xff] }
 0x24a   : > { %v3818_v13 = vpop.f32.mrf.mxu1  ;;  %v3979_v41 = vpop.f32.mrf.mxu0 }
 0x24b   : > { %v10437_v13 = vld [vmem:[#allocation119_spill] sm:$0xff] }
 0x24c   : > { %v3982_v18 = vpop.f32.mrf.mxu0  ;;  %v4143_v33 = vpop.f32.mrf.mxu1  ;;  %4334 = vmatmul.mubr.bf16.gmra.mxu1 %v10433_v1  ;;  %6388 = vmatmul.mubr.bf16.gmra.mxu0 %v10434_v5  ;;  %v10438_v1 = vld [vmem:[#allocation42_spill] sm:$0xff] }
 0x24d   : > { %v9096_v14 = vadd.f32 %v3982_v18, %v8814_v45  ;;  %v9099_v30 = vadd.f32 %v4143_v33, %v8817_v37  ;;  %5900 = vmatprep.mubr.msk.bf16.mxu1 %vm10351_vm14, %v10349_v0  ;;  %6391 = vmatprep.mubr.bf16.mxu0 %v10435_v17  ;;  %v10441_v17 = vld [vmem:[#allocation103_spill] sm:$0xff] }
 0x24e   : > { %v3984_v12 = vpop.f32.mrf.mxu0  ;;  %v4145_v32 = vpop.f32.mrf.mxu1 }
 0x250   : > { %v3985_v61 = vpop.f32.mrf.mxu0  ;;  %v4146_v39 = vpop.f32.mrf.mxu1 }
 0x251   : > { %v9106_v20 = vadd.f32 %v3985_v61, %v10436_v42  ;;  %v9109_v41 = vadd.f32 %v4146_v39, %v10437_v13 }
 0x252   : > { %v3987_v45 = vpop.f32.mrf.mxu0  ;;  %v4148_v18 = vpop.f32.mrf.mxu1 }
 0x254   : > { %v3990_v37 = vpop.f32.mrf.mxu0  ;;  %v4151_v33 = vpop.f32.mrf.mxu1  ;;  %4342 = vmatmul.mubr.bf16.gmra.mxu1 %v10438_v1  ;;  %6392 = vmatmul.mubr.bf16.gmra.mxu0 %v10439_v57  ;;  %v10442_v1 = vld [vmem:[#allocation50_spill] sm:$0xff] }
 0x255   : > { %v9114_v0 = vadd.f32 %v3990_v37, %v8834_v26  ;;  %v9117_v5 = vadd.f32 %v4151_v33, %v8837_v22  ;;  %5903 = vmatprep.mubr.msk.bf16.mxu1 %vm10440_vm13, %v10356_v51  ;;  %6395 = vmatprep.mubr.bf16.mxu0 %v10441_v17  ;;  %v10443_v26 = vld [vmem:[#allocation109_spill] sm:$0xff]  ;;  %v10445_v51 = vld [vmem:[#allocation115_spill] sm:$0xff] }
 0x256   : > { %v3992_v12 = vpop.f32.mrf.mxu0  ;;  %v4153_v32 = vpop.f32.mrf.mxu1 }
 0x258   : > { %v3993_v61 = vpop.f32.mrf.mxu0  ;;  %v4154_v39 = vpop.f32.mrf.mxu1 }
 0x25a   : > { %v3995_v42 = vpop.f32.mrf.mxu0  ;;  %v4156_v13 = vpop.f32.mrf.mxu1 }
 0x25b   : > { %v10446_v42 = vld [vmem:[#allocation57_spill] sm:$0xff] }
 0x25c   : > { %v3998_v45 = vpop.f32.mrf.mxu0  ;;  %v4159_v18 = vpop.f32.mrf.mxu1  ;;  %4350 = vmatmul.mubr.bf16.gmra.mxu1 %v10442_v1  ;;  %6396 = vmatmul.mubr.bf16.gmra.mxu0 %v10443_v26 }
 0x25d   : > { %v9126_v22 = vadd.f32 %v3998_v45, %v8848_v46  ;;  %v9129_v54 = vadd.f32 %v4159_v18, %v8851_v11  ;;  %5906 = vmatprep.mubr.msk.bf16.mxu1 %vm10444_vm11, %v10366_v40  ;;  %6399 = vmatprep.mubr.bf16.mxu0 %v10445_v51  ;;  %v10448_v40 = vld [vmem:[#allocation120_spill] sm:$0xff] }
 0x25e   : > { %v4000_v37 = vpop.f32.mrf.mxu0  ;;  %v4161_v33 = vpop.f32.mrf.mxu1 }
 0x260   : > { %v4001_v57 = vpop.f32.mrf.mxu0  ;;  %v4162_v17 = vpop.f32.mrf.mxu1 }
 0x261   : > { %v9136_v12 = vadd.f32 %v4001_v57, %v8858_v23  ;;  %v9139_v32 = vadd.f32 %v4162_v17, %v8861_v29  ;;  %v10449_v23 = vld [vmem:[#allocation125_spill] sm:$0xff]  ;;  %v10450_v17 = vld [vmem:[#allocation154_spill] sm:$0xff] }
 0x262   : > { %v4003_v46 = vpop.f32.mrf.mxu0  ;;  %v4164_v61 = vpop.f32.mrf.mxu1 }
 0x263   : > { %v10451_v46 = vld [vmem:[#allocation129_spill] sm:$0xff] }
 0x264   : > { %v4006_v11 = vpop.f32.mrf.mxu0  ;;  %v4167_v39 = vpop.f32.mrf.mxu1  ;;  %4358 = vmatmul.mubr.bf16.gmra.mxu1 %v10446_v42  ;;  %6400 = vmatmul.mubr.bf16.gmra.mxu0 %v10447_v9  ;;  %v10452_v61 = vld [vmem:[#allocation49_spill] sm:$0xff] }
 0x265   : > { %v9144_v13 = vadd.f32 %v4006_v11, %v10448_v40  ;;  %v9147_v45 = vadd.f32 %v4167_v39, %v8871_v15  ;;  %5909 = vmatprep.mubr.msk.bf16.mxu1 %vm8932_vm9, %v8927_v55  ;;  %6403 = vmatprep.mubr.bf16.mxu0 %v10449_v23  ;;  %v10453_v55 = vld [vmem:[#allocation135_spill] sm:$0xff] }
 0x266   : > { %v4008_v29 = vpop.f32.mrf.mxu0  ;;  %v4169_v18 = vpop.f32.mrf.mxu1 }
 0x268   : > { %v4009_v1 = vpop.f32.mrf.mxu0  ;;  %v4170_v26 = vpop.f32.mrf.mxu1 }
 0x269   : > { %v10454_v26 = vld [vmem:[#allocation91_spill] sm:$0xff] }
 0x26a   : > { %v4011_v51 = vpop.f32.mrf.mxu0  ;;  %v4172_v37 = vpop.f32.mrf.mxu1 }
 0x26b   : > { %v10456_v37 = vmov 0.0|0.0  }
 0x26c   : > { %v4014_v33 = vpop.f32.mrf.mxu0  ;;  %v4175_v57 = vpop.f32.mrf.mxu1  ;;  %4366 = vmatmul.mubr.bf16.gmra.mxu1 %v10450_v17  ;;  %6404 = vmatmul.mubr.bf16.gmra.mxu0 %v10451_v46 }
 0x26d   : > { %v9156_v15 = vadd.f32 %v4014_v33, %v8884_v27  ;;  %v9159_v35 = vadd.f32 %v4175_v57, %v10452_v61  ;;  %5912 = vmatprep.mubr.msk.bf16.mxu1 %vm8967_vm3, %v8956_v3  ;;  %6407 = vmatprep.mubr.bf16.mxu0 %v10453_v55 }
 0x26e   : > { %v4016_v11 = vpop.f32.mrf.mxu0  ;;  %v4177_v39 = vpop.f32.mrf.mxu1 }
 0x26f   : > { %v10457_v11 = vld [vmem:[#allocation9_spill] sm:$0xff] }
 0x270   : > { %v4017_v42 = vpop.f32.mrf.mxu0  ;;  %v4178_v9 = vpop.f32.mrf.mxu1 }
 0x271   : > { %v9166_v40 = vadd.f32 %v4017_v42, %v8900_v52  ;;  %v9169_v23 = vadd.f32 %v4178_v9, %v8903_v34 }
 0x272   : > { %v4019_v27 = vpop.f32.mrf.mxu0  ;;  %v4180_v29 = vpop.f32.mrf.mxu1 }
 0x274   : > { %v4022_v18 = vpop.f32.mrf.mxu0  ;;  %v4183_v1 = vpop.f32.mrf.mxu1  ;;  %4374 = vmatmul.mubr.bf16.gmra.mxu1 %v10454_v26  ;;  %6408 = vmatmul.mubr.bf16.gmra.mxu0 %v10455_v50 }
 0x275   : > { %v9174_v3 = vadd.f32 %v4022_v18, %v8912_v19  ;;  %v9177_v51 = vadd.f32 %v4183_v1, %v8915_v56  ;;  %4381 = vmatprep.mubr.bf16.mxu1 %v10456_v37  ;;  %6411 = vmatprep.mubr.bf16.mxu0 %v8905_v48  ;;  %v10458_v48 = vld [vmem:[#allocation63_spill] sm:$0xff] }
 0x276   : > { %v4024_v52 = vpop.f32.mrf.mxu0  ;;  %v4185_v34 = vpop.f32.mrf.mxu1 }
 0x278   : > { %v4025_v33 = vpop.f32.mrf.mxu0  ;;  %v4186_v57 = vpop.f32.mrf.mxu1 }
 0x279   : > { %v10459_v57 = vld [vmem:[#allocation139_spill] sm:$0xff] }
 0x27a   : > { %v4027_v17 = vpop.f32.mrf.mxu0  ;;  %v4188_v46 = vpop.f32.mrf.mxu1 }
 0x27b   : > { %v3758_v17 = vadd.f32 %v8985_v7, %v10459_v57 }
 0x27c   : > { %v4030_v61 = vpop.f32.mrf.mxu0  ;;  %v4191_v55 = vpop.f32.mrf.mxu1  ;;  %4382 = vmatmul.mubr.bf16.gmra.mxu1 %v10457_v11  ;;  %6412 = vmatmul.mubr.bf16.gmra.mxu0 %v8937_v2 }
 0x27d   : > { %v9184_v19 = vadd.f32 %v4030_v61, %v8944_v38  ;;  %v9187_v56 = vadd.f32 %v4191_v55, %v8947_v21  ;;  %4389 = vmatprep.mubr.bf16.mxu1 %v10456_v37  ;;  %6415 = vmatprep.mubr.bf16.mxu0 %v10458_v48 }
 0x27e   : > { %v4032_v39 = vpop.f32.mrf.mxu0  ;;  %v4193_v42 = vpop.f32.mrf.mxu1 }
 0x280   : > { %v4033_v9 = vpop.f32.mrf.mxu0  ;;  %v4194_v27 = vpop.f32.mrf.mxu1 }
 0x281   : > { %v9192_v29 = vadd.f32 %v4033_v9, %v8959_v49  ;;  %v9195_v18 = vadd.f32 %v4194_v27, %v8962_v58 }
 0x282   : > { %v4035_v2 = vpop.f32.mrf.mxu0  ;;  %v4196_v38 = vpop.f32.mrf.mxu1 }
 0x284   : > { %v4038_v1 = vpop.f32.mrf.mxu0  ;;  %v4199_v26 = vpop.f32.mrf.mxu1  ;;  %4390 = vmatmul.mubr.bf16.gmra.mxu1 %v10457_v11  ;;  %6416 = vmatmul.mubr.bf16.gmra.mxu0 %v10458_v48 }
 0x285   : > { %v9200_v21 = vadd.f32 %v4038_v1, %v8976_v47  ;;  %v9203_v50 = vadd.f32 %v4199_v26, %v8979_v16  ;;  %v10460_v16 = vld [vmem:[#allocation140_spill] sm:$0xff]  ;;  %v10461_v1 = vld [vmem:[#allocation142_spill] sm:$0xff] }
 0x286   : > { %v4040_v37 = vpop.f32.mrf.mxu0  ;;  %v4201_v49 = vpop.f32.mrf.mxu1  ;;  %v3761_v39 = vadd.f32 %v8996_v59, %v10460_v16  ;;  %v3766_v26 = vadd.f32 %v9001_v24, %v10461_v1  ;;  %v10464_v1 = vld [vmem:[#allocation56_spill] sm:$0xff] }
 0x288   : > { %v4041_v52 = vpop.f32.mrf.mxu0  ;;  %v4202_v34 = vpop.f32.mrf.mxu1 }
 0x28a   : > { %v4043_v58 = vpop.f32.mrf.mxu0  ;;  %v4204_v33 = vpop.f32.mrf.mxu1 }
 0x28c   : > { %v4046_v46 = vpop.f32.mrf.mxu0  ;;  %v4207_v61 = vpop.f32.mrf.mxu1 }
 0x28d   : > { %v9207_v55 = vadd.f32 %v4046_v46, %v3758_v17  ;;  %v9210_v11 = vadd.f32 %v4207_v61, %v8990_v6 }
 0x28e   : > { %v4048_v47 = vpop.f32.mrf.mxu0  ;;  %v4209_v48 = vpop.f32.mrf.mxu1 }
 0x290   : > { %v4049_v42 = vpop.f32.mrf.mxu0  ;;  %v4210_v9 = vpop.f32.mrf.mxu1 }
 0x291   : > { %v9214_v27 = vadd.f32 %v4049_v42, %v3761_v39  ;;  %v9217_v2 = vadd.f32 %v4210_v9, %v8999_v36  ;;  %v10462_v36 = vld [vmem:[#allocation23_spill] sm:$0xff] }
 0x292   : > { %v4051_v7 = vpop.f32.mrf.mxu0  ;;  %v4212_v38 = vpop.f32.mrf.mxu1  ;;  %v3774_v46 = vadd.f32 %v9012_v43, %v10462_v36 }
 0x294   : > { %v4054_v37 = vpop.f32.mrf.mxu0  ;;  %v4215_v6 = vpop.f32.mrf.mxu1 }
 0x295   : > { %v9221_v49 = vadd.f32 %v4054_v37, %v3766_v26  ;;  %v9224_v52 = vadd.f32 %v4215_v6, %v9006_v53  ;;  %v10463_v53 = vld [vmem:[#allocation28_spill] sm:$0xff]  ;;  %v10465_v6 = vld [vmem:[#allocation143_spill] sm:$0xff] }
 0x296   : > { %v4056_v59 = vpop.f32.mrf.mxu0  ;;  %v4217_v34 = vpop.f32.mrf.mxu1  ;;  %v3777_v42 = vadd.f32 %v9023_v60, %v10463_v53 }
 0x297   : > { %v10466_v59 = vld [vmem:[#allocation62_spill] sm:$0xff] }
 0x298   : > { %v4057_v58 = vpop.f32.mrf.mxu0  ;;  %v4218_v33 = vpop.f32.mrf.mxu1  ;;  %v3782_v34 = vadd.f32 %v10466_v59, %v10465_v6 }
 0x29a   : > { %v4059_v57 = vpop.f32.mrf.mxu0  ;;  %v4220_v17 = vpop.f32.mrf.mxu1 }
 0x29c   : > { %v4062_v61 = vpop.f32.mrf.mxu0  ;;  %v4223_v47 = vpop.f32.mrf.mxu1 }
 0x29d   : > { %v9228_v48 = vadd.f32 %v4062_v61, %v3774_v46  ;;  %v9231_v24 = vadd.f32 %v4223_v47, %v9017_v63 }
 0x29e   : > { %v4064_v16 = vpop.f32.mrf.mxu0  ;;  %v4225_v39 = vpop.f32.mrf.mxu1 }
 0x29f   : > { %v10467_v16 = vld [vmem:[#allocation37_spill] sm:$0xff] }
 0x2a0   : > { %v4065_v9 = vpop.f32.mrf.mxu0  ;;  %v4226_v7 = vpop.f32.mrf.mxu1  ;;  %v10468_v39 = vld [vmem:[#allocation65_spill] sm:$0xff] }
 0x2a1   : > { %v9235_v38 = vadd.f32 %v4065_v9, %v3777_v42  ;;  %v9238_v26 = vadd.f32 %v4226_v7, %v10464_v1  ;;  %v3790_v53 = vadd.f32 %v10468_v39, %v10467_v16  ;;  %v10470_v1 = vld [vmem:[#allocation133_spill] sm:$0xff] }
 0x2a2   : > { %v4067_v43 = vpop.f32.mrf.mxu0  ;;  %v4228_v37 = vpop.f32.mrf.mxu1 }
 0x2a4   : > { %v4070_v58 = vpop.f32.mrf.mxu0  ;;  %v4231_v63 = vpop.f32.mrf.mxu1 }
 0x2a5   : > { %v9242_v33 = vadd.f32 %v4070_v58, %v3782_v34  ;;  %v9245_v57 = vadd.f32 %v4231_v63, %v9033_v44  ;;  %v10471_v44 = vld [vmem:[#allocation43_spill] sm:$0xff] }
 0x2a6   : > { %v4072_v60 = vpop.f32.mrf.mxu0  ;;  %v4233_v17 = vpop.f32.mrf.mxu1  ;;  %v3793_v59 = vadd.f32 %v9050_v31, %v10471_v44 }
 0x2a7   : > { %v10473_v60 = vld [vmem:[#allocation134_spill] sm:$0xff] }
 0x2a8   : > { %v4073_v36 = vpop.f32.mrf.mxu0  ;;  %v4234_v46 = vpop.f32.mrf.mxu1 }
 0x2aa   : > { %v4075_v61 = vpop.f32.mrf.mxu0  ;;  %v4236_v47 = vpop.f32.mrf.mxu1 }
 0x2ab   : > { %v10474_v61 = vld [vmem:[#allocation144_spill] sm:$0xff]  ;;  %v10475_v47 = vld [vmem:[#allocation67_spill] sm:$0xff] }
 0x2ac   : > { %v4078_v42 = vpop.f32.mrf.mxu0  ;;  %v4239_v9 = vpop.f32.mrf.mxu1  ;;  %v3798_v16 = vadd.f32 %v10475_v47, %v10474_v61 }
 0x2ad   : > { %v9249_v7 = vadd.f32 %v4078_v42, %v3790_v53  ;;  %v9252_v43 = vadd.f32 %v4239_v9, %v10470_v1 }
 0x2ae   : > { %v4080_v37 = vpop.f32.mrf.mxu0  ;;  %v4241_v6 = vpop.f32.mrf.mxu1 }
 0x2af   : > { %10469 = vst [vmem:[#allocation69_spill] sm:$0xff] %v9249_v7 }
 0x2b0   : > { %v4081_v34 = vpop.f32.mrf.mxu0  ;;  %v4242_v58 = vpop.f32.mrf.mxu1 }
 0x2b1   : > { %v9256_v63 = vadd.f32 %v4081_v34, %v3793_v59  ;;  %v9259_v17 = vadd.f32 %v4242_v58, %v10473_v60  ;;  %v10476_v34 = vld [vmem:[#allocation52_spill] sm:$0xff] }
 0x2b2   : > { %v4083_v36 = vpop.f32.mrf.mxu0  ;;  %v4244_v46 = vpop.f32.mrf.mxu1  ;;  %v3806_v58 = vadd.f32 %v9066_v8, %v10476_v34 }
 0x2b3   : > { %10472 = vst [vmem:[#allocation71_spill] sm:$0xff] %v9256_v63 }
 0x2b4   : > { %v4086_v39 = vpop.f32.mrf.mxu0  ;;  %v4247_v53 = vpop.f32.mrf.mxu1 }
 0x2b5   : > { %v9263_v42 = vadd.f32 %v4086_v39, %v3798_v16  ;;  %v9266_v9 = vadd.f32 %v4247_v53, %v9060_v62  ;;  %v10478_v62 = vld [vmem:[#allocation58_spill] sm:$0xff] }
 0x2b6   : > { %v4088_v31 = vpop.f32.mrf.mxu0  ;;  %v4249_v1 = vpop.f32.mrf.mxu1  ;;  %v3809_v39 = vadd.f32 %v9077_v10, %v10478_v62 }
 0x2b8   : > { %v4089_v37 = vpop.f32.mrf.mxu0  ;;  %v4250_v6 = vpop.f32.mrf.mxu1 }
 0x2ba   : > { %v4091_v44 = vpop.f32.mrf.mxu0  ;;  %v4252_v59 = vpop.f32.mrf.mxu1 }
 0x2bb   : > { %v10480_v44 = vld [vmem:[#allocation6_spill] sm:$0xff]  ;;  %v10481_v59 = vld [vmem:[#allocation68_spill] sm:$0xff] }
 0x2bc   : > { %v4094_v60 = vpop.f32.mrf.mxu0  ;;  %v4255_v36 = vpop.f32.mrf.mxu1  ;;  %v3814_v34 = vadd.f32 %v10481_v59, %v10480_v44 }
 0x2bd   : > { %v9270_v46 = vadd.f32 %v4094_v60, %v3806_v58  ;;  %v9273_v61 = vadd.f32 %v4255_v36, %v9071_v28  ;;  %v10482_v60 = vld [vmem:[#allocation2_spill] sm:$0xff] }
 0x2be   : > { %v4096_v47 = vpop.f32.mrf.mxu0  ;;  %v4257_v16 = vpop.f32.mrf.mxu1  ;;  %v386_v36 = vadd.s32 16, %v10482_v60  ;;  %v460_v59 = vand.u32 31, %v10482_v60 }
 0x2bf   : > { %10477 = vst [vmem:[#allocation72_spill] sm:$0xff] %v9270_v46 }
 0x2c0   : > { %v4097_v53 = vpop.f32.mrf.mxu0  ;;  %v4258_v31 = vpop.f32.mrf.mxu1  ;;  %vm1320_vm4 = vcmp.ge.s32.totalorder %v460_v59, 1 }
 0x2c1   : > { %v9277_v1 = vadd.f32 %v4097_v53, %v3809_v39  ;;  %v9280_v37 = vadd.f32 %v4258_v31, %v9080_v25  ;;  %v474_v53 = vand.u32 31, %v386_v36 }
 0x2c2   : > { %v4099_v8 = vpop.f32.mrf.mxu0  ;;  %v4260_v6 = vpop.f32.mrf.mxu1 }
 0x2c3   : > { %10479 = vst [vmem:[#allocation73_spill] sm:$0xff] %v9277_v1  ;;  %vm1394_vm6 = vcmp.le.s32.totalorder %v474_v53, 16 }
 0x2c4   : > { %v4102_v28 = vpop.f32.mrf.mxu0  ;;  %v9284_v58 = vpop.f32.mrf.mxu1 }
 0x2c5   : > { %v9287_v47 = vadd.f32 %v4102_v28, %v3814_v34 }
 0x2c6   : > { %v4104_v10 = vpop.f32.mrf.mxu0  ;;  %v4265_v16 = vpop.f32.mrf.mxu1 }
 0x2c7   : > { %10483 = vst [vmem:[#allocation75_spill] sm:$0xff] %v9287_v47  ;;  %v10484_v10 = vmov 0.0  }
 0x2c8   : > { %v4105_v62 = vpop.f32.mrf.mxu0  ;;  %v4266_v39 = vpop.f32.mrf.mxu1 }
 0x2ca   : > { %v4107_v25 = vpop.f32.mrf.mxu0  ;;  %v4268_v31 = vpop.f32.mrf.mxu1 }
 0x2cc   : > { %v4271_v1 = vpop.f32.mrf.mxu1  ;;  %v6357_v8 = vpop.f32.mrf.mxu0 }
 0x2cd   : > { %v9291_v6 = vadd.f32 %v4271_v1, %v9096_v14  ;;  %v4441_v44 = vadd.f32 %v6357_v8, %v9117_v5 }
 0x2ce   : > { %v4273_v34 = vpop.f32.mrf.mxu1  ;;  %v4432_v28 = vpop.f32.mrf.mxu0 }
 0x2cf   : > { %v4817_v36 = vsel %vm1394_vm6, %v4441_v44, 0.0  ;;  %v4433_v62 = vadd.f32 %v4432_v28, %v9099_v30 }
 0x2d0   : > { %v4880_v16 = vpack.c.bf16 %v10484_v10, %v4817_v36  ;;  %v4274_v39 = vpop.f32.mrf.mxu1  ;;  %v6358_v14 = vpop.f32.mrf.mxu0 }
 0x2d1   : > { %v9303_v5 = vadd.f32 %v4274_v39, %v9106_v20  ;;  %v4815_v25 = vsel %vm1320_vm4, %v4433_v62, 0.0  ;;  %v10485_v39 = vld [vmem:[#allocation12_spill] sm:$0xff] }
 0x2d2   : > { %6268 = vst [vmem:[%s9298_s27 + $0x8] sm:$0xff] %v4880_v16   ;;  %v4276_v1 = vpop.f32.mrf.mxu1  ;;  %v4435_v60 = vpop.f32.mrf.mxu0  ;;  %v5201_v36 = vunpack.c.l.bf16 %v4880_v16  ;;  %vm10486_vm5 = vnez %v10485_v39  ;;  %v10487_v39 = vld [vmem:[#allocation8_spill] sm:$0xff] }
 0x2d3   : > { %v4436_v53 = vadd.f32 %v4435_v60, %v9109_v41  ;;  %vm10488_vm0 = vnez %v10487_v39 }
 0x2d4   : > { %v9307_v31 = vpop.f32.mrf.mxu1  ;;  %v6361_v8 = vpop.f32.mrf.mxu0  ;;  %v5334_v16 = vmul.f32 %v5201_v36, %v5201_v36 }
 0x2d5   : > { %v4879_v44 = vpack.c.bf16 %v4436_v53, %v4815_v25  ;;  %v4457_v30 = vadd.f32 %v6361_v8, %v9147_v45 }
 0x2d6   : > { %v4281_v34 = vpop.f32.mrf.mxu1  ;;  %v4448_v28 = vpop.f32.mrf.mxu0 }
 0x2d7   : > { %6112 = vst [vmem:[%s9298_s27] sm:$0xff] %v4879_v44   ;;  %v5199_v59 = vunpack.c.l.bf16 %v4879_v44  ;;  %v5200_v20 = vunpack.c.h.bf16 %v4879_v44  ;;  %v4821_v14 = vsel %vm10486_vm5, %v4457_v30, 0.0  ;;  %v4449_v41 = vadd.f32 %v4448_v28, %v9129_v54 }
 0x2d8   : > { %v4882_v1 = vpack.c.bf16 %v10484_v10, %v4821_v14  ;;  %v4282_v62 = vpop.f32.mrf.mxu1  ;;  %v6362_v60 = vpop.f32.mrf.mxu0 }
 0x2d9   : > { %v5263_v47 = vadd.f32 %v5200_v20, %v5199_v59  ;;  %v5332_v53 = vmul.f32 %v5199_v59, %v5199_v59  ;;  %v5333_v25 = vmul.f32 %v5200_v20, %v5200_v20  ;;  %v4819_v30 = vsel %vm10488_vm0, %v4449_v41, 0.0 }
 0x2da   : > { %6270 = vst [vmem:[%s9298_s27 + $0x18] sm:$0xff] %v4882_v1   ;;  %v4284_v45 = vpop.f32.mrf.mxu1  ;;  %v4451_v8 = vpop.f32.mrf.mxu0 }
 0x2db   : > { %v5396_v34 = vadd.f32 %v5333_v25, %v5332_v53  ;;  %v4452_v44 = vadd.f32 %v4451_v8, %v9139_v32  ;;  %v5264_v46 = vadd.f32 %v5263_v47, %v5201_v36  ;;  %v10489_v53 = vld [vmem:[#allocation26_spill] sm:$0xff]  ;;  %v5205_v8 = vunpack.c.l.bf16 %v4882_v1 }
 0x2dc   : > { %v9319_v14 = vpop.f32.mrf.mxu1  ;;  %v6365_v54 = vpop.f32.mrf.mxu0  ;;  %vm10490_vm7 = vnez %v10489_v53 }
 0x2dd   : > { %v4881_v28 = vpack.c.bf16 %v4452_v44, %v4819_v30  ;;  %v5397_v62 = vadd.f32 %v5396_v34, %v5334_v16  ;;  %v4473_v59 = vadd.f32 %v6365_v54, %v9177_v51 }
 0x2de   : > { %v4289_v20 = vpop.f32.mrf.mxu1  ;;  %v4464_v60 = vpop.f32.mrf.mxu0 }
 0x2df   : > { %6269 = vst [vmem:[%s9298_s27 + $0x10] sm:$0xff] %v4881_v28   ;;  %v5203_v45 = vunpack.c.l.bf16 %v4881_v28  ;;  %v5204_v63 = vunpack.c.h.bf16 %v4881_v28  ;;  %v4825_v32 = vsel %vm10490_vm7, %v4473_v59, 0.0  ;;  %v4465_v36 = vadd.f32 %v4464_v60, %v9159_v35  ;;  %v10491_v59 = vld [vmem:[#allocation19_spill] sm:$0xff] }
 0x2e0   : > { %v4884_v47 = vpack.c.bf16 %v10484_v10, %v4825_v32  ;;  %v9327_v41 = vpop.f32.mrf.mxu1  ;;  %v6366_v25 = vpop.f32.mrf.mxu0  ;;  %vm10492_vm1 = vnez %v10491_v59  ;;  %v5338_v60 = vmul.f32 %v5205_v8, %v5205_v8 }
 0x2e1   : > { %v5266_v44 = vadd.f32 %v5264_v46, %v5203_v45  ;;  %v5336_v16 = vmul.f32 %v5203_v45, %v5203_v45  ;;  %v5337_v30 = vmul.f32 %v5204_v63, %v5204_v63  ;;  %v4823_v20 = vsel %vm10492_vm1, %v4465_v36, 0.0 }
 0x2e2   : > { %6272 = vst [vmem:[%s9298_s27 + $0x28] sm:$0xff] %v4884_v47   ;;  %v4292_v51 = vpop.f32.mrf.mxu1  ;;  %v4467_v34 = vpop.f32.mrf.mxu0  ;;  %v5209_v7 = vunpack.c.l.bf16 %v4884_v47 }
 0x2e3   : > { %v5267_v39 = vadd.f32 %v5266_v44, %v5204_v63  ;;  %v5399_v54 = vadd.f32 %v5397_v62, %v5336_v16  ;;  %v4468_v28 = vadd.f32 %v4467_v34, %v9169_v23  ;;  %v10493_v23 = vld [vmem:[#allocation46_spill] sm:$0xff] }
 0x2e4   : > { %v9333_v53 = vpop.f32.mrf.mxu1  ;;  %v6369_v35 = vpop.f32.mrf.mxu0  ;;  %vm10494_vm15 = vnez %v10493_v23  ;;  %v5342_v47 = vmul.f32 %v5209_v7, %v5209_v7 }
 0x2e5   : > { %v5400_v32 = vadd.f32 %v5399_v54, %v5337_v30  ;;  %v4883_v1 = vpack.c.bf16 %v4468_v28, %v4823_v20  ;;  %v5268_v46 = vadd.f32 %v5267_v39, %v5205_v8  ;;  %v4489_v45 = vadd.f32 %v6369_v35, %v9203_v50 }
 0x2e6   : > { %v4297_v25 = vpop.f32.mrf.mxu1  ;;  %v4480_v51 = vpop.f32.mrf.mxu0 }
 0x2e7   : > { %6271 = vst [vmem:[%s9298_s27 + $0x20] sm:$0xff] %v4883_v1   ;;  %v5207_v44 = vunpack.c.l.bf16 %v4883_v1  ;;  %v5208_v63 = vunpack.c.h.bf16 %v4883_v1  ;;  %v5401_v62 = vadd.f32 %v5400_v32, %v5338_v60  ;;  %v4829_v16 = vsel %vm10494_vm15, %v4489_v45, 0.0  ;;  %v10495_v32 = vld [vmem:[#allocation36_spill] sm:$0xff] }
 0x2e8   : > { %v4481_v36 = vadd.f32 %v4480_v51, %v9187_v56  ;;  %v4298_v34 = vpop.f32.mrf.mxu1  ;;  %v6370_v59 = vpop.f32.mrf.mxu0  ;;  %v4886_v8 = vpack.c.bf16 %v10484_v10, %v4829_v16  ;;  %vm10496_vm10 = vnez %v10495_v32 }
 0x2e9   : > { %v5270_v30 = vadd.f32 %v5268_v46, %v5207_v44  ;;  %v5340_v54 = vmul.f32 %v5207_v44, %v5207_v44  ;;  %v5341_v20 = vmul.f32 %v5208_v63, %v5208_v63 }
 0x2ea   : > { %v4300_v50 = vpop.f32.mrf.mxu1  ;;  %v4483_v39 = vpop.f32.mrf.mxu0  ;;  %6274 = vst [vmem:[%s9298_s27 + $0x38] sm:$0xff] %v4886_v8   ;;  %v4827_v1 = vsel %vm10496_vm10, %v4481_v36, 0.0 }
 0x2eb   : > { %v5271_v28 = vadd.f32 %v5270_v30, %v5208_v63  ;;  %v5403_v35 = vadd.f32 %v5401_v62, %v5340_v54  ;;  %v4484_v60 = vadd.f32 %v4483_v39, %v9195_v18  ;;  %v10497_v18 = vld [vmem:[#allocation60_spill] sm:$0xff]  ;;  %v5213_v50 = vunpack.c.l.bf16 %v4886_v8 }
 0x2ec   : > { %v9345_v56 = vpop.f32.mrf.mxu1  ;;  %v6373_v45 = vpop.f32.mrf.mxu0  ;;  %vm10498_vm14 = vnez %v10497_v18 }
 0x2ed   : > { %v5404_v46 = vadd.f32 %v5403_v35, %v5341_v20  ;;  %v4885_v25 = vpack.c.bf16 %v4484_v60, %v4827_v1  ;;  %v5272_v51 = vadd.f32 %v5271_v28, %v5209_v7  ;;  %v4505_v44 = vadd.f32 %v6373_v45, %v9224_v52  ;;  %v10499_v45 = vld [vmem:[#allocation55_spill] sm:$0xff] }
 0x2ee   : > { %v4305_v23 = vpop.f32.mrf.mxu1  ;;  %v4496_v16 = vpop.f32.mrf.mxu0  ;;  %vm10500_vm9 = vnez %v10499_v45  ;;  %v5346_v8 = vmul.f32 %v5213_v50, %v5213_v50 }
 0x2ef   : > { %6273 = vst [vmem:[%s9298_s27 + $0x30] sm:$0xff] %v4885_v25   ;;  %v5211_v63 = vunpack.c.l.bf16 %v4885_v25  ;;  %v5212_v62 = vunpack.c.h.bf16 %v4885_v25  ;;  %v5405_v34 = vadd.f32 %v5404_v46, %v5342_v47  ;;  %v4833_v59 = vsel %vm10498_vm14, %v4505_v44, 0.0 }
 0x2f0   : > { %v4497_v36 = vadd.f32 %v4496_v16, %v9210_v11  ;;  %v9352_v30 = vpop.f32.mrf.mxu1  ;;  %v6374_v54 = vpop.f32.mrf.mxu0  ;;  %v4888_v52 = vpack.c.bf16 %v10484_v10, %v4833_v59 }
 0x2f1   : > { %v5274_v39 = vadd.f32 %v5272_v51, %v5211_v63  ;;  %v5344_v7 = vmul.f32 %v5211_v63, %v5211_v63  ;;  %v5345_v60 = vmul.f32 %v5212_v62, %v5212_v62 }
 0x2f2   : > { %v4308_v28 = vpop.f32.mrf.mxu1  ;;  %v4499_v20 = vpop.f32.mrf.mxu0  ;;  %6276 = vst [vmem:[%s9298_s27 + $0x48] sm:$0xff] %v4888_v52   ;;  %v4831_v11 = vsel %vm10500_vm9, %v4497_v36, 0.0 }
 0x2f3   : > { %v5275_v35 = vadd.f32 %v5274_v39, %v5212_v62  ;;  %v5407_v32 = vadd.f32 %v5405_v34, %v5344_v7  ;;  %v4500_v1 = vadd.f32 %v4499_v20, %v9217_v2  ;;  %v10501_v2 = vld [vmem:[#allocation70_spill] sm:$0xff]  ;;  %v5217_v7 = vunpack.c.l.bf16 %v4888_v52 }
 0x2f4   : > { %v9359_v47 = vpop.f32.mrf.mxu1  ;;  %v6377_v46 = vpop.f32.mrf.mxu0  ;;  %vm10502_vm12 = vnez %v10501_v2 }
 0x2f5   : > { %v5408_v25 = vadd.f32 %v5407_v32, %v5345_v60  ;;  %v4887_v51 = vpack.c.bf16 %v4500_v1, %v4831_v11  ;;  %v5276_v44 = vadd.f32 %v5275_v35, %v5213_v50  ;;  %v4521_v23 = vadd.f32 %v6377_v46, %v9245_v57  ;;  %v10503_v11 = vld [vmem:[#allocation66_spill] sm:$0xff] }
 0x2f6   : > { %v4313_v16 = vpop.f32.mrf.mxu1  ;;  %v4512_v63 = vpop.f32.mrf.mxu0  ;;  %vm10504_vm2 = vnez %v10503_v11  ;;  %v5350_v52 = vmul.f32 %v5217_v7, %v5217_v7 }
 0x2f7   : > { %6275 = vst [vmem:[%s9298_s27 + $0x40] sm:$0xff] %v4887_v51   ;;  %v5215_v62 = vunpack.c.l.bf16 %v4887_v51  ;;  %v5216_v34 = vunpack.c.h.bf16 %v4887_v51  ;;  %v5409_v18 = vadd.f32 %v5408_v25, %v5346_v8  ;;  %v4837_v59 = vsel %vm10502_vm12, %v4521_v23, 0.0 }
 0x2f8   : > { %v4513_v36 = vadd.f32 %v4512_v63, %v9231_v24  ;;  %v4314_v54 = vpop.f32.mrf.mxu1  ;;  %v6378_v39 = vpop.f32.mrf.mxu0  ;;  %v4890_v50 = vpack.c.bf16 %v10484_v10, %v4837_v59 }
 0x2f9   : > { %v5278_v28 = vadd.f32 %v5276_v44, %v5215_v62  ;;  %v5348_v20 = vmul.f32 %v5215_v62, %v5215_v62  ;;  %v5349_v32 = vmul.f32 %v5216_v34, %v5216_v34 }
 0x2fa   : > { %v4316_v57 = vpop.f32.mrf.mxu1  ;;  %v4515_v35 = vpop.f32.mrf.mxu0  ;;  %6278 = vst [vmem:[%s9298_s27 + $0x58] sm:$0xff] %v4890_v50   ;;  %v4835_v46 = vsel %vm10504_vm2, %v4513_v36, 0.0  ;;  %v5221_v39 = vunpack.c.l.bf16 %v4890_v50 }
 0x2fb   : > { %v5279_v60 = vadd.f32 %v5278_v28, %v5216_v34  ;;  %v5411_v1 = vadd.f32 %v5409_v18, %v5348_v20  ;;  %v4516_v45 = vadd.f32 %v4515_v35, %v9238_v26  ;;  %v10505_v26 = vld [vmem:[#allocation78_spill] sm:$0xff] }
 0x2fc   : > { %v9371_v24 = vpop.f32.mrf.mxu1  ;;  %v6381_v8 = vpop.f32.mrf.mxu0  ;;  %vm10506_vm8 = vnez %v10505_v26 }
 0x2fd   : > { %v5412_v25 = vadd.f32 %v5411_v1, %v5349_v32  ;;  %v4889_v51 = vpack.c.bf16 %v4516_v45, %v4835_v46  ;;  %v5280_v44 = vadd.f32 %v5279_v60, %v5217_v7  ;;  %v4537_v23 = vadd.f32 %v6381_v8, %v9266_v9  ;;  %v10507_v45 = vld [vmem:[#allocation74_spill] sm:$0xff] }
 0x2fe   : > { %v4321_v16 = vpop.f32.mrf.mxu1  ;;  %v4528_v63 = vpop.f32.mrf.mxu0  ;;  %vm10508_vm3 = vnez %v10507_v45  ;;  %v5354_v8 = vmul.f32 %v5221_v39, %v5221_v39 }
 0x2ff   : > { %6277 = vst [vmem:[%s9298_s27 + $0x50] sm:$0xff] %v4889_v51   ;;  %v5219_v62 = vunpack.c.l.bf16 %v4889_v51  ;;  %v5220_v34 = vunpack.c.h.bf16 %v4889_v51  ;;  %v5413_v18 = vadd.f32 %v5412_v25, %v5350_v52  ;;  %v4841_v2 = vsel %vm10506_vm8, %v4537_v23, 0.0 }
 0x300   : > { %v4529_v59 = vadd.f32 %v4528_v63, %v9252_v43  ;;  %v9378_v36 = vpop.f32.mrf.mxu1  ;;  %v6382_v54 = vpop.f32.mrf.mxu0  ;;  %v4892_v9 = vpack.c.bf16 %v10484_v10, %v4841_v2  ;;  %v4264_v43 = vadd.f32 %v9284_v58, %v9087_v4 }
 0x301   : > { %v5282_v28 = vadd.f32 %v5280_v44, %v5219_v62  ;;  %v5352_v7 = vmul.f32 %v5219_v62, %v5219_v62  ;;  %v5353_v60 = vmul.f32 %v5220_v34, %v5220_v34 }
 0x302   : > { %v4324_v20 = vpop.f32.mrf.mxu1  ;;  %v4531_v57 = vpop.f32.mrf.mxu0  ;;  %6280 = vst [vmem:[%s9298_s27 + $0x68] sm:$0xff] %v4892_v9   ;;  %v4839_v11 = vsel %vm10508_vm3, %v4529_v59, 0.0  ;;  %v5225_v2 = vunpack.c.l.bf16 %v4892_v9 }
 0x303   : > { %v5283_v35 = vadd.f32 %v5282_v28, %v5220_v34  ;;  %v5415_v32 = vadd.f32 %v5413_v18, %v5352_v7  ;;  %v4532_v1 = vadd.f32 %v4531_v57, %v9259_v17  ;;  %v10509_v34 = vld [vmem:[#allocation88_spill] sm:$0xff] }
 0x304   : > { %v9387_v50 = vpop.f32.mrf.mxu1  ;;  %v6385_v46 = vpop.f32.mrf.mxu0  ;;  %vm10510_vm13 = vnez %v10509_v34  ;;  %v5358_v45 = vmul.f32 %v5225_v2, %v5225_v2 }
 0x305   : > { %v5416_v52 = vadd.f32 %v5415_v32, %v5353_v60  ;;  %v4891_v25 = vpack.c.bf16 %v4532_v1, %v4839_v11  ;;  %v5284_v51 = vadd.f32 %v5283_v35, %v5221_v39  ;;  %v4553_v44 = vadd.f32 %v6385_v46, %v4264_v43 }
 0x306   : > { %v4329_v23 = vpop.f32.mrf.mxu1  ;;  %v4544_v16 = vpop.f32.mrf.mxu0  ;;  %v4280_v32 = vadd.f32 %v9307_v31, %v9114_v0 }
 0x307   : > { %6279 = vst [vmem:[%s9298_s27 + $0x60] sm:$0xff] %v4891_v25   ;;  %v5223_v63 = vunpack.c.l.bf16 %v4891_v25  ;;  %v5224_v17 = vunpack.c.h.bf16 %v4891_v25  ;;  %v5417_v62 = vadd.f32 %v5416_v52, %v5354_v8  ;;  %v4845_v4 = vsel %vm10510_vm13, %v4553_v44, 0.0 }
 0x308   : > { %v4545_v58 = vadd.f32 %v4544_v16, %v9273_v61  ;;  %v4330_v18 = vpop.f32.mrf.mxu1  ;;  %v6386_v26 = vpop.f32.mrf.mxu0  ;;  %v4894_v39 = vpack.c.bf16 %v10484_v10, %v4845_v4  ;;  %v10511_v61 = vld [vmem:[#allocation83_spill] sm:$0xff]  ;;  %v10513_v16 = vld [vmem:[#allocation98_spill] sm:$0xff] }
 0x309   : > { %v5286_v59 = vadd.f32 %v5284_v51, %v5223_v63  ;;  %v5356_v54 = vmul.f32 %v5223_v63, %v5223_v63  ;;  %v5357_v57 = vmul.f32 %v5224_v17, %v5224_v17  ;;  %vm10512_vm11 = vnez %v10511_v61 }
 0x30a   : > { %v4332_v28 = vpop.f32.mrf.mxu1  ;;  %v4547_v7 = vpop.f32.mrf.mxu0  ;;  %6282 = vst [vmem:[%s9298_s27 + $0x78] sm:$0xff] %v4894_v39   ;;  %v4843_v1 = vsel %vm10512_vm11, %v4545_v58, 0.0  ;;  %vm10514_vm6 = vnez %v10513_v16 }
 0x30b   : > { %v5287_v20 = vadd.f32 %v5286_v59, %v5224_v17  ;;  %v5419_v35 = vadd.f32 %v5417_v62, %v5356_v54  ;;  %v4548_v60 = vadd.f32 %v4547_v7, %v9280_v37  ;;  %v5229_v62 = vunpack.c.l.bf16 %v4894_v39  ;;  %v10515_v7 = vld [vmem:[#allocation93_spill] sm:$0xff] }
 0x30c   : > { %v9400_v9 = vpop.f32.mrf.mxu1  ;;  %v6389_v43 = vpop.f32.mrf.mxu0  ;;  %vm10516_vm4 = vnez %v10515_v7 }
 0x30d   : > { %v5420_v11 = vadd.f32 %v5419_v35, %v5357_v57  ;;  %v4893_v46 = vpack.c.bf16 %v4548_v60, %v4843_v1  ;;  %v5288_v8 = vadd.f32 %v5287_v20, %v5225_v2  ;;  %v4569_v52 = vadd.f32 %v6389_v43, %v4280_v32 }
 0x30e   : > { %v4337_v25 = vpop.f32.mrf.mxu1  ;;  %v4560_v51 = vpop.f32.mrf.mxu0  ;;  %v5362_v35 = vmul.f32 %v5229_v62, %v5229_v62  ;;  %v4288_v1 = vadd.f32 %v9319_v14, %v9126_v22 }
 0x30f   : > { %6281 = vst [vmem:[%s9298_s27 + $0x70] sm:$0xff] %v4893_v46   ;;  %v5227_v44 = vunpack.c.l.bf16 %v4893_v46  ;;  %v5228_v37 = vunpack.c.h.bf16 %v4893_v46  ;;  %v5421_v23 = vadd.f32 %v5420_v11, %v5358_v45  ;;  %v4849_v0 = vsel %vm10514_vm6, %v4569_v52, 0.0 }
 0x310   : > { %v4561_v31 = vadd.f32 %v4560_v51, %v9291_v6  ;;  %v9406_v63 = vpop.f32.mrf.mxu1  ;;  %v6390_v17 = vpop.f32.mrf.mxu0  ;;  %v4896_v58 = vpack.c.bf16 %v10484_v10, %v4849_v0  ;;  %v4296_v6 = vadd.f32 %v9333_v53, %v9144_v13  ;;  %v4291_v53 = vadd.f32 %v9327_v41, %v9136_v12  ;;  %v10519_v41 = vld [vmem:[#allocation104_spill] sm:$0xff] }
 0x311   : > { %v5290_v34 = vadd.f32 %v5288_v8, %v5227_v44  ;;  %v5360_v4 = vmul.f32 %v5227_v44, %v5227_v44  ;;  %v5361_v59 = vmul.f32 %v5228_v37, %v5228_v37  ;;  %v10517_v8 = vld [vmem:[#allocation110_spill] sm:$0xff]  ;;  %v4312_v12 = vadd.f32 %v9359_v47, %v9174_v3 }
 0x312   : > { %v4340_v18 = vpop.f32.mrf.mxu1  ;;  %v4563_v26 = vpop.f32.mrf.mxu0  ;;  %6284 = vst [vmem:[%s9298_s27 + $0x88] sm:$0xff] %v4896_v58   ;;  %v4847_v20 = vsel %vm10516_vm4, %v4561_v31, 0.0  ;;  %vm10518_vm5 = vnez %v10517_v8  ;;  %vm10520_vm0 = vnez %v10519_v41  ;;  %v4307_v47 = vadd.f32 %v9352_v30, %v9166_v40 }
 0x313   : > { %v5291_v2 = vadd.f32 %v5290_v34, %v5228_v37  ;;  %v5423_v54 = vadd.f32 %v5421_v23, %v5360_v4  ;;  %v4564_v28 = vadd.f32 %v4563_v26, %v9303_v5  ;;  %v5233_v37 = vunpack.c.l.bf16 %v4896_v58 }
 0x314   : > { %v9415_v39 = vpop.f32.mrf.mxu1  ;;  %v6393_v57 = vpop.f32.mrf.mxu0  ;;  %v4328_v30 = vadd.f32 %v9387_v50, %v9200_v21  ;;  %v4323_v50 = vadd.f32 %v9378_v36, %v9192_v29  ;;  %v10527_v36 = vld [vmem:[#allocation126_spill] sm:$0xff]  ;;  %vm5465_vm6 = vcmask 1040384  }
 0x315   : > { %v5424_v60 = vadd.f32 %v5423_v54, %v5361_v59  ;;  %v4895_v32 = vpack.c.bf16 %v4564_v28, %v4847_v20  ;;  %v5292_v61 = vadd.f32 %v5291_v2, %v5229_v62  ;;  %v4585_v43 = vadd.f32 %v6393_v57, %v4296_v6 }
 0x316   : > { %v4345_v45 = vpop.f32.mrf.mxu1  ;;  %v4576_v11 = vpop.f32.mrf.mxu0  ;;  %v5366_v26 = vmul.f32 %v5233_v37, %v5233_v37  ;;  %v4304_v28 = vadd.f32 %v9345_v56, %v9156_v15  ;;  %v4344_v29 = vadd.f32 %v9415_v39, %v9221_v49  ;;  %vm10528_vm10 = vnez %v10527_v36 }
 0x317   : > { %6283 = vst [vmem:[%s9298_s27 + $0x80] sm:$0xff] %v4895_v32   ;;  %v5231_v5 = vunpack.c.l.bf16 %v4895_v32  ;;  %v5232_v46 = vunpack.c.h.bf16 %v4895_v32  ;;  %v5425_v13 = vadd.f32 %v5424_v60, %v5362_v35  ;;  %v4853_v52 = vsel %vm10518_vm5, %v4585_v43, 0.0  ;;  %v10521_v60 = vld [vmem:[#allocation122_spill] sm:$0xff] }
 0x318   : > { %v4577_v25 = vadd.f32 %v4576_v11, %v4288_v1  ;;  %v4346_v51 = vpop.f32.mrf.mxu1  ;;  %v6394_v44 = vpop.f32.mrf.mxu0  ;;  %v4898_v14 = vpack.c.bf16 %v10484_v10, %v4853_v52  ;;  %vm10522_vm7 = vnez %v10521_v60  ;;  %v10523_v52 = vld [vmem:[#allocation116_spill] sm:$0xff]  ;;  %v4339_v39 = vadd.f32 %v9406_v63, %v9214_v27  ;;  %v10531_v63 = vld [vmem:[#allocation3_spill] sm:$0xff] }
 0x319   : > { %v5294_v23 = vadd.f32 %v5292_v61, %v5231_v5  ;;  %v5364_v22 = vmul.f32 %v5231_v5, %v5231_v5  ;;  %v5365_v17 = vmul.f32 %v5232_v46, %v5232_v46  ;;  %vm10524_vm1 = vnez %v10523_v52 }
 0x31a   : > { %v4348_v16 = vpop.f32.mrf.mxu1  ;;  %v4579_v0 = vpop.f32.mrf.mxu0  ;;  %6286 = vst [vmem:[%s9298_s27 + $0x98] sm:$0xff] %v4898_v14   ;;  %v4851_v4 = vsel %vm10520_vm0, %v4577_v25, 0.0  ;;  %v5237_v45 = vunpack.c.l.bf16 %v4898_v14  ;;  %vm10532_vm9 = vnez %v10531_v63 }
 0x31b   : > { %v5295_v31 = vadd.f32 %v5294_v23, %v5232_v46  ;;  %v5427_v62 = vadd.f32 %v5425_v13, %v5364_v22  ;;  %v4580_v34 = vadd.f32 %v4579_v0, %v4291_v53  ;;  %v4320_v16 = vadd.f32 %v9371_v24, %v9184_v19 }
 0x31c   : > { %v9430_v18 = vpop.f32.mrf.mxu1  ;;  %v6397_v58 = vpop.f32.mrf.mxu0 }
 0x31d   : > { %v5428_v2 = vadd.f32 %v5427_v62, %v5365_v17  ;;  %v4897_v59 = vpack.c.bf16 %v4580_v34, %v4851_v4  ;;  %v5296_v54 = vadd.f32 %v5295_v31, %v5233_v37  ;;  %v4601_v6 = vadd.f32 %v6397_v58, %v4312_v12  ;;  %v10525_v12 = vld [vmem:[#allocation130_spill] sm:$0xff] }
 0x31e   : > { %v4353_v7 = vpop.f32.mrf.mxu1  ;;  %v4592_v20 = vpop.f32.mrf.mxu0  ;;  %v5370_v37 = vmul.f32 %v5237_v45, %v5237_v45  ;;  %vm10526_vm15 = vnez %v10525_v12  ;;  %v4352_v12 = vadd.f32 %v9430_v18, %v9228_v48 }
 0x31f   : > { %6285 = vst [vmem:[%s9298_s27 + $0x90] sm:$0xff] %v4897_v59   ;;  %v5235_v57 = vunpack.c.l.bf16 %v4897_v59  ;;  %v5236_v35 = vunpack.c.h.bf16 %v4897_v59  ;;  %v5429_v3 = vadd.f32 %v5428_v2, %v5366_v26  ;;  %v4857_v32 = vsel %vm10522_vm7, %v4601_v6, 0.0 }
 0x320   : > { %v4593_v61 = vadd.f32 %v4592_v20, %v4304_v28  ;;  %v9439_v1 = vpop.f32.mrf.mxu1  ;;  %v6398_v43 = vpop.f32.mrf.mxu0  ;;  %v4900_v11 = vpack.c.bf16 %v10484_v10, %v4857_v32 }
 0x321   : > { %v5298_v15 = vadd.f32 %v5296_v54, %v5235_v57  ;;  %v5368_v56 = vmul.f32 %v5235_v57, %v5235_v57  ;;  %v5369_v53 = vmul.f32 %v5236_v35, %v5236_v35 }
 0x322   : > { %v4356_v5 = vpop.f32.mrf.mxu1  ;;  %v4595_v46 = vpop.f32.mrf.mxu0  ;;  %6288 = vst [vmem:[%s9298_s27 + $0xa8] sm:$0xff] %v4900_v11   ;;  %v4855_v25 = vsel %vm10524_vm1, %v4593_v61, 0.0  ;;  %v5241_v2 = vunpack.c.l.bf16 %v4900_v11 }
 0x323   : > { %v5299_v13 = vadd.f32 %v5298_v15, %v5236_v35  ;;  %v5431_v8 = vadd.f32 %v5429_v3, %v5368_v56  ;;  %v4596_v40 = vadd.f32 %v4595_v46, %v4307_v47 }
 0x324   : > { %v4359_v51 = vpop.f32.mrf.mxu1  ;;  %v6401_v44 = vpop.f32.mrf.mxu0  ;;  %v5374_v60 = vmul.f32 %v5241_v2, %v5241_v2 }
 0x325   : > { %v5432_v23 = vadd.f32 %v5431_v8, %v5369_v53  ;;  %v4899_v22 = vpack.c.bf16 %v4596_v40, %v4855_v25  ;;  %v5300_v14 = vadd.f32 %v5299_v13, %v5237_v45  ;;  %v4617_v0 = vadd.f32 %v6401_v44, %v4328_v30  ;;  %v10529_v13 = vld [vmem:[#allocation7_spill] sm:$0xff] }
 0x326   : > { %v4361_v31 = vpop.f32.mrf.mxu1  ;;  %v4608_v17 = vpop.f32.mrf.mxu0  ;;  %v4336_v45 = vadd.f32 %v9400_v9, %v9207_v55  ;;  %vm10530_vm14 = vnez %v10529_v13  ;;  %v4360_v27 = vadd.f32 %v4359_v51, %v9242_v33  ;;  %v4355_v51 = vadd.f32 %v9439_v1, %v9235_v38  ;;  %v10535_v1 = vld [vmem:[#allocation11_spill] sm:$0xff] }
 0x327   : > { %6287 = vst [vmem:[%s9298_s27 + $0xa0] sm:$0xff] %v4899_v22   ;;  %v5239_v62 = vunpack.c.l.bf16 %v4899_v22  ;;  %v5240_v34 = vunpack.c.h.bf16 %v4899_v22  ;;  %v5433_v21 = vadd.f32 %v5432_v23, %v5370_v37  ;;  %v4861_v41 = vsel %vm10526_vm15, %v4617_v0, 0.0 }
 0x328   : > { %v4609_v4 = vadd.f32 %v4608_v17, %v4320_v16  ;;  %v4362_v58 = vpop.f32.mrf.mxu1  ;;  %v6402_v26 = vpop.f32.mrf.mxu0  ;;  %v4902_v24 = vpack.c.bf16 %v10484_v10, %v4861_v41  ;;  %vm10536_vm2 = vnez %v10535_v1 }
 0x329   : > { %v5302_v59 = vadd.f32 %v5300_v14, %v5239_v62  ;;  %v5372_v19 = vmul.f32 %v5239_v62, %v5239_v62  ;;  %v5373_v7 = vmul.f32 %v5240_v34, %v5240_v34 }
 0x32a   : > { %v4364_v54 = vpop.f32.mrf.mxu1  ;;  %v4611_v28 = vpop.f32.mrf.mxu0  ;;  %6290 = vst [vmem:[%s9298_s27 + $0xb8] sm:$0xff] %v4902_v24   ;;  %v4859_v35 = vsel %vm10528_vm10, %v4609_v4, 0.0  ;;  %v5245_v52 = vunpack.c.l.bf16 %v4902_v24 }
 0x32b   : > { %v5303_v6 = vadd.f32 %v5302_v59, %v5240_v34  ;;  %v5435_v20 = vadd.f32 %v5433_v21, %v5372_v19  ;;  %v4612_v57 = vadd.f32 %v4611_v28, %v4323_v50  ;;  %v10533_v59 = vld [vmem:[#allocation15_spill] sm:$0xff] }
 0x32c   : > { %v9460_v3 = vpop.f32.mrf.mxu1  ;;  %v6405_v47 = vpop.f32.mrf.mxu0  ;;  %v5378_v62 = vmul.f32 %v5245_v52, %v5245_v52  ;;  %vm10534_vm12 = vnez %v10533_v59 }
 0x32d   : > { %v5436_v32 = vadd.f32 %v5435_v20, %v5373_v7  ;;  %v4901_v61 = vpack.c.bf16 %v4612_v57, %v4859_v35  ;;  %v5304_v43 = vadd.f32 %v5303_v6, %v5241_v2  ;;  %v4633_v15 = vadd.f32 %v6405_v47, %v4344_v29 }
 0x32e   : > { %v4369_v56 = vpop.f32.mrf.mxu1  ;;  %v4624_v11 = vpop.f32.mrf.mxu0 }
 0x32f   : > { %6289 = vst [vmem:[%s9298_s27 + $0xb0] sm:$0xff] %v4901_v61   ;;  %v5243_v5 = vunpack.c.l.bf16 %v4901_v61  ;;  %v5244_v46 = vunpack.c.h.bf16 %v4901_v61  ;;  %v5437_v49 = vadd.f32 %v5436_v32, %v5374_v60  ;;  %v4865_v53 = vsel %vm10530_vm14, %v4633_v15, 0.0 }
 0x330   : > { %v4625_v8 = vadd.f32 %v4624_v11, %v4336_v45  ;;  %v4370_v40 = vpop.f32.mrf.mxu1  ;;  %v6406_v30 = vpop.f32.mrf.mxu0  ;;  %v4904_v9 = vpack.c.bf16 %v10484_v10, %v4865_v53  ;;  %v10537_v11 = vld [vmem:[#allocation69_spill] sm:$0xff] }
 0x331   : > { %v5306_v25 = vadd.f32 %v5304_v43, %v5243_v5  ;;  %v5376_v55 = vmul.f32 %v5243_v5, %v5243_v5  ;;  %v5377_v22 = vmul.f32 %v5244_v46, %v5244_v46  ;;  %v4368_v5 = vadd.f32 %v9460_v3, %v10537_v11 }
 0x332   : > { %v4372_v44 = vpop.f32.mrf.mxu1  ;;  %v4627_v37 = vpop.f32.mrf.mxu0  ;;  %6292 = vst [vmem:[%s9298_s27 + $0xc8] sm:$0xff] %v4904_v9   ;;  %v4863_v0 = vsel %vm10532_vm9, %v4625_v8, 0.0  ;;  %v5249_v6 = vunpack.c.l.bf16 %v4904_v9  ;;  %v10538_v8 = vld [vmem:[#allocation71_spill] sm:$0xff] }
 0x333   : > { %v5307_v23 = vadd.f32 %v5306_v25, %v5244_v46  ;;  %v5439_v14 = vadd.f32 %v5437_v49, %v5376_v55  ;;  %v4628_v16 = vadd.f32 %v4627_v37, %v4339_v39  ;;  %v4371_v30 = vadd.f32 %v4370_v40, %v10538_v8  ;;  %v10541_v40 = vld [vmem:[#allocation22_spill] sm:$0xff] }
 0x334   : > { %v4375_v31 = vpop.f32.mrf.mxu1  ;;  %v6409_v17 = vpop.f32.mrf.mxu0  ;;  %v5382_v43 = vmul.f32 %v5249_v6, %v5249_v6  ;;  %vm10542_vm3 = vnez %v10541_v40 }
 0x335   : > { %v5440_v34 = vadd.f32 %v5439_v14, %v5377_v22  ;;  %v4903_v21 = vpack.c.bf16 %v4628_v16, %v4863_v0  ;;  %v5308_v50 = vadd.f32 %v5307_v23, %v5245_v52  ;;  %v4649_v41 = vadd.f32 %v6409_v17, %v4360_v27  ;;  %v10539_v52 = vld [vmem:[#allocation32_spill] sm:$0xff] }
 0x336   : > { %v4377_v4 = vpop.f32.mrf.mxu1  ;;  %v4640_v58 = vpop.f32.mrf.mxu0  ;;  %v4376_v38 = vadd.f32 %v4375_v31, %v9263_v42  ;;  %vm10540_vm8 = vnez %v10539_v52 }
 0x337   : > { %6291 = vst [vmem:[%s9298_s27 + $0xc0] sm:$0xff] %v4903_v21   ;;  %v5247_v26 = vunpack.c.l.bf16 %v4903_v21  ;;  %v5248_v2 = vunpack.c.h.bf16 %v4903_v21  ;;  %v5441_v33 = vadd.f32 %v5440_v34, %v5378_v62  ;;  %v4869_v19 = vsel %vm10534_vm12, %v4649_v41, 0.0  ;;  %v10543_v4 = vld [vmem:[#allocation72_spill] sm:$0xff] }
 0x338   : > { %v4641_v24 = vadd.f32 %v4640_v58, %v4352_v12  ;;  %v4378_v54 = vpop.f32.mrf.mxu1  ;;  %v6410_v28 = vpop.f32.mrf.mxu0  ;;  %v4906_v18 = vpack.c.bf16 %v10484_v10, %v4869_v19 }
 0x339   : > { %v5310_v7 = vadd.f32 %v5308_v50, %v5247_v26  ;;  %v5380_v48 = vmul.f32 %v5247_v26, %v5247_v26  ;;  %v5381_v36 = vmul.f32 %v5248_v2, %v5248_v2  ;;  %v10544_v26 = vld [vmem:[#allocation75_spill] sm:$0xff] }
 0x33a   : > { %v4380_v20 = vpop.f32.mrf.mxu1  ;;  %v4643_v57 = vpop.f32.mrf.mxu0  ;;  %6294 = vst [vmem:[%s9298_s27 + $0xd8] sm:$0xff] %v4906_v18   ;;  %v4867_v60 = vsel %vm10536_vm2, %v4641_v24, 0.0  ;;  %v5253_v37 = vunpack.c.l.bf16 %v4906_v18  ;;  %v10545_v18 = vld [vmem:[#allocation73_spill] sm:$0xff] }
 0x33b   : > { %v5311_v29 = vadd.f32 %v5310_v7, %v5248_v2  ;;  %v5443_v35 = vadd.f32 %v5441_v33, %v5380_v48  ;;  %v4644_v47 = vadd.f32 %v4643_v57, %v4355_v51 }
 0x33c   : > { %v4383_v32 = vpop.f32.mrf.mxu1  ;;  %v6413_v61 = vpop.f32.mrf.mxu0  ;;  %v5386_v21 = vmul.f32 %v5253_v37, %v5253_v37 }
 0x33d   : > { %v5444_v45 = vadd.f32 %v5443_v35, %v5381_v36  ;;  %v4905_v15 = vpack.c.bf16 %v4644_v47, %v4867_v60  ;;  %v5312_v56 = vadd.f32 %v5311_v29, %v5249_v6  ;;  %v4665_v46 = vadd.f32 %v6413_v61, %v4376_v38  ;;  %v10546_v35 = vld [vmem:[#allocation48_spill] sm:$0xff] }
 0x33e   : > { %v4385_v49 = vpop.f32.mrf.mxu1  ;;  %v4656_v39 = vpop.f32.mrf.mxu0  ;;  %v4384_v58 = vadd.f32 %v4383_v32, %v10543_v4  ;;  %vm10547_vm13 = vnez %v10546_v35 }
 0x33f   : > { %6293 = vst [vmem:[%s9298_s27 + $0xd0] sm:$0xff] %v4905_v15   ;;  %v5251_v13 = vunpack.c.l.bf16 %v4905_v15  ;;  %v5252_v53 = vunpack.c.h.bf16 %v4905_v15  ;;  %v5445_v42 = vadd.f32 %v5444_v45, %v5382_v43  ;;  %v4873_v25 = vsel %vm10540_vm8, %v4665_v46, 0.0  ;;  %v10548_v45 = vld [vmem:[#allocation40_spill] sm:$0xff] }
 0x340   : > { %v4657_v55 = vadd.f32 %v4656_v39, %v4368_v5  ;;  %v4386_v9 = vpop.f32.mrf.mxu1  ;;  %v6414_v44 = vpop.f32.mrf.mxu0  ;;  %v4908_v3 = vpack.c.bf16 %v10484_v10, %v4873_v25  ;;  %vm10549_vm11 = vnez %v10548_v45 }
 0x341   : > { %v5314_v23 = vadd.f32 %v5312_v56, %v5251_v13  ;;  %v5384_v22 = vmul.f32 %v5251_v13, %v5251_v13  ;;  %v5385_v63 = vmul.f32 %v5252_v53, %v5252_v53  ;;  %v4387_v20 = vadd.f32 %v4386_v9, %v10545_v18 }
 0x342   : > { %v4388_v14 = vpop.f32.mrf.mxu1  ;;  %v4659_v16 = vpop.f32.mrf.mxu0  ;;  %6296 = vst [vmem:[%s9298_s27 + $0xe8] sm:$0xff] %v4908_v3   ;;  %v4871_v17 = vsel %vm10542_vm3, %v4657_v55, 0.0  ;;  %v5257_v48 = vunpack.c.l.bf16 %v4908_v3 }
 0x343   : > { %v5315_v27 = vadd.f32 %v5314_v23, %v5252_v53  ;;  %v5447_v0 = vadd.f32 %v5445_v42, %v5384_v22  ;;  %v4660_v31 = vadd.f32 %v4659_v16, %v4371_v30 }
 0x344   : > { %v4391_v62 = vpop.f32.mrf.mxu1  ;;  %v6417_v34 = vpop.f32.mrf.mxu0  ;;  %v5390_v56 = vmul.f32 %v5257_v48, %v5257_v48 }
 0x345   : > { %v5448_v50 = vadd.f32 %v5447_v0, %v5385_v63  ;;  %v4907_v12 = vpack.c.bf16 %v4660_v31, %v4871_v17  ;;  %v5316_v41 = vadd.f32 %v5315_v27, %v5253_v37  ;;  %v4392_v2 = vadd.f32 %v4391_v62, %v10544_v26 }
 0x346   : > { %v4672_v33 = vpop.f32.mrf.mxu0  ;;  %v4393_v51 = vpop.f32.mrf.mxu1 }
 0x347   : > { %6295 = vst [vmem:[%s9298_s27 + $0xe0] sm:$0xff] %v4907_v12   ;;  %v5255_v59 = vunpack.c.l.bf16 %v4907_v12  ;;  %v5256_v19 = vunpack.c.h.bf16 %v4907_v12  ;;  %v5449_v24 = vadd.f32 %v5448_v50, %v5386_v21  ;;  %v4681_v54 = vadd.f32 %v6417_v34, %v4392_v2 }
 0x348   : > { %v4673_v28 = vadd.f32 %v4672_v33, %v4384_v58  ;;  %v6418_v6 = vpop.f32.mrf.mxu0  ;;  %v4394_v7 = vpop.f32.mrf.mxu1 }
 0x349   : > { %v5318_v57 = vadd.f32 %v5316_v41, %v5255_v59  ;;  %v5388_v29 = vmul.f32 %v5255_v59, %v5255_v59  ;;  %v5389_v36 = vmul.f32 %v5256_v19, %v5256_v19  ;;  %v4877_v47 = vsel %vm10547_vm13, %v4681_v54, 0.0 }
 0x34a   : > { %v4675_v38 = vpop.f32.mrf.mxu0  ;;  %v4396_v1 = vpop.f32.mrf.mxu1  ;;  %v4910_v61 = vpack.c.bf16 %v10484_v10, %v4877_v47  ;;  %v4875_v15 = vsel %vm10549_vm11, %v4673_v28, 0.0 }
 0x34b   : > { %v5319_v60 = vadd.f32 %v5318_v57, %v5256_v19  ;;  %v5451_v32 = vadd.f32 %v5449_v24, %v5388_v29  ;;  %v4676_v43 = vadd.f32 %v4675_v38, %v4387_v20 }
 0x34c   : > { %6298 = vst [vmem:[%s9298_s27 + $0xf8] sm:$0xff] %v4910_v61   ;;  %v5261_v53 = vunpack.c.l.bf16 %v4910_v61 }
 0x34d   : > { %v5452_v11 = vadd.f32 %v5451_v32, %v5389_v36  ;;  %v4909_v5 = vpack.c.bf16 %v4676_v43, %v4875_v15  ;;  %v5320_v46 = vadd.f32 %v5319_v60, %v5257_v48 }
 0x34e   : > { %v5394_v25 = vmul.f32 %v5261_v53, %v5261_v53 }
 0x34f   : > { %6297 = vst [vmem:[%s9298_s27 + $0xf0] sm:$0xff] %v4909_v5   ;;  %v5259_v49 = vunpack.c.l.bf16 %v4909_v5  ;;  %v5260_v39 = vunpack.c.h.bf16 %v4909_v5  ;;  %v5453_v13 = vadd.f32 %v5452_v11, %v5390_v56 }
 0x351   : > { %v5322_v42 = vadd.f32 %v5320_v46, %v5259_v49  ;;  %v5392_v8 = vmul.f32 %v5259_v49, %v5259_v49  ;;  %v5393_v52 = vmul.f32 %v5260_v39, %v5260_v39 }
 0x353   : > { %v5323_v30 = vadd.f32 %v5322_v42, %v5260_v39  ;;  %v5455_v10 = vadd.f32 %v5453_v13, %v5392_v8 }
 0x355   : > { %v5324_v55 = vadd.f32 %v5323_v30, %v5261_v53  ;;  %v5456_v9 = vadd.f32 %v5455_v10, %v5393_v52 }
 0x357   : > { %v5326_v44 = vrot.slane %v5324_v55, 4  ;;  %v5457_v37 = vadd.f32 %v5456_v9, %v5394_v25 }
 0x359   : > { %v5327_v23 = vadd.f32 %v5326_v44, %v5324_v55  ;;  %v5459_v22 = vrot.slane %v5457_v37, 4 }
 0x35b   : > { %v5328_v3 = vrot.slane %v5327_v23, 2  ;;  %v5460_v14 = vadd.f32 %v5459_v22, %v5457_v37 }
 0x35d   : > { %v5329_v16 = vadd.f32 %v5328_v3, %v5327_v23  ;;  %v5461_v27 = vrot.slane %v5460_v14, 2 }
 0x35f   : > { %v5330_v63 = vrot.slane %v5329_v16, 1  ;;  %v5462_v0 = vadd.f32 %v5461_v27, %v5460_v14 }
 0x361   : > { %v5463_v31 = vrot.slane %v5462_v0, 1  ;;  %v5331_v40 = vadd.f32 %v5330_v63, %v5329_v16 }
 0x363   : > { %v5464_v17 = vadd.f32 %v5463_v31, %v5462_v0 }
 0x365   : > { %v5466_v62 = vsel %vm5465_vm6, %v5331_v40, %v5464_v17 }
 0x366   : > { %5467 = vst [vmem:[%s235_s7] sm:$0x3] %v5466_v62 }
 0x367 PF: > { %s16_s18 = sadd.s32 1, %s6546_s18  }
 0x368   : > { %p13_p4 = scmp.ge.s32.totalorder %s16_s18, 4  }
 0x36a   :  { %15 = sbr.rel (!%p13_p4) target bundleno = 1 (0x1), region = 78 }

</bundles_post_ra>
